<compile_context>
chip_gen: v7x
topology: tpu7x:2x2x1
jax: 0.10.0
libtpu: 0.0.40
codegen_flags: <defaults>
</compile_context>

<pallas_src>
import functools

import jax
import jax.numpy as jnp
from jax.experimental import pallas as pl
from jax.experimental.pallas import tpu as pltpu

# Explicit headroom for the fc-head weight block (4.7 MB bf16, no tiling).
_VMEM_LIMIT_BYTES = 32 * 1024 * 1024


def _round_up(n, m):
    return ((n + m - 1) // m) * m


def _vmem_spec():
    # Whole-array-in-VMEM operand (no grid): Pallas DMAs the full array in/out.
    return pl.BlockSpec(memory_space=pltpu.MemorySpace.VMEM)


# ----------------------------------------------------------------------------
# Kernel 1: fused matmul + bias + ReLU (used for all three conv layers).
#   x: (M, K) bf16   w: (K, N) bf16   b: (1, N) f32   out: (M, N) bf16
# Single invocation, f32 MXU accumulation, bf16 store.
# ----------------------------------------------------------------------------
def _matmul_bias_relu_kernel(x_ref, w_ref, b_ref, o_ref):
    y = jnp.dot(x_ref[...], w_ref[...], preferred_element_type=jnp.float32)
    y = jnp.maximum(y + b_ref[...], 0.0)
    o_ref[...] = y.astype(o_ref.dtype)


def conv_matmul_bias_relu(x, w, b):
    M, K = x.shape
    K2, N = w.shape
    assert K == K2, (K, K2)
    return pl.pallas_call(
        _matmul_bias_relu_kernel,
        out_shape=jax.ShapeDtypeStruct((M, N), jnp.bfloat16),
        in_specs=[_vmem_spec()] * 3,
        out_specs=_vmem_spec(),
        compiler_params=pltpu.CompilerParams(vmem_limit_bytes=_VMEM_LIMIT_BYTES),
    )(x, w, b.reshape(1, N))


# ----------------------------------------------------------------------------
# Kernel 2: fused fc head: out = relu(x @ w1 + b1) @ w2 + b2, one launch.
#   x: (Mp, 9216) bf16   w1: (9216, 256) bf16   w2: (256, 128) bf16 (padded)
# The full fc1 weight is one VMEM block (kt=1): no accumulator, no grid steps.
# ----------------------------------------------------------------------------
def _fc_head_kernel(x_ref, w1_ref, b1_ref, w2_ref, b2_ref, o_ref):
    h = jnp.dot(x_ref[...], w1_ref[...], preferred_element_type=jnp.float32)
    h = jnp.maximum(h + b1_ref[...], 0.0).astype(w2_ref.dtype)
    y = jnp.dot(h, w2_ref[...], preferred_element_type=jnp.float32)
    o_ref[...] = y + b2_ref[...]


def fc_head(feat, w1, b1, w2, b2):
    M, K = feat.shape
    assert K == w1.shape[0], (K, w1.shape)
    Np = w2.shape[1]
    # Pad the tiny batch dim once (bf16 sublane packing = 16 rows); this is the
    # only pad in the whole forward and costs ~0.3 MB of writes.
    Mp = max(16, _round_up(M, 16))
    if Mp != M:
        feat = jnp.pad(feat, ((0, Mp - M), (0, 0)))
    out = pl.pallas_call(
        _fc_head_kernel,
        out_shape=jax.ShapeDtypeStruct((Mp, Np), jnp.float32),
        in_specs=[_vmem_spec()] * 5,
        out_specs=_vmem_spec(),
        compiler_params=pltpu.CompilerParams(vmem_limit_bytes=_VMEM_LIMIT_BYTES),
    )(feat, w1, b1.reshape(1, -1), w2, b2.reshape(1, -1))
    return out[:M]


# ----------------------------------------------------------------------------
# Glue: im2col patch extraction (plain JAX reshuffle, no heavy compute).
# TODO(synk): fold into the kernels via manual strided DMA to kill the extra
# HBM round trip of the patch matrix.
# ----------------------------------------------------------------------------
def im2col_nhwc(x, ksize, stride):
    B, H, W, C = x.shape
    OH = (H - ksize) // stride + 1
    OW = (W - ksize) // stride + 1
    patches = []
    for kh in range(ksize):
        for kw in range(ksize):
            patches.append(
                x[:, kh:kh + stride * OH:stride, kw:kw + stride * OW:stride, :]
            )
    cols = jnp.stack(patches, axis=3)  # (B, OH, OW, k*k, C): (kh, kw, c) order
    return cols.reshape(B * OH * OW, ksize * ksize * C), OH, OW


# ----------------------------------------------------------------------------
# Parameters: PyTorch-layout init (for the reference) + one-time re-layout.
# ----------------------------------------------------------------------------
def init_params(key, in_channels, action_space):
    keys = jax.random.split(key, 10)

    def uniform(k, shape, fan_in):
        bound = 1.0 / jnp.sqrt(jnp.float32(fan_in))
        return jax.random.uniform(k, shape, jnp.float32, -bound, bound)

    p = {}
    # conv weights stored as (Cout, Cin, KH, KW), like torch
    p["conv1_w"] = uniform(keys[0], (32, in_channels, 8, 8), in_channels * 64)
    p["conv1_b"] = uniform(keys[1], (32,), in_channels * 64)
    p["conv2_w"] = uniform(keys[2], (64, 32, 4, 4), 32 * 16)
    p["conv2_b"] = uniform(keys[3], (64,), 32 * 16)
    p["conv3_w"] = uniform(keys[4], (64, 64, 3, 3), 64 * 9)
    p["conv3_b"] = uniform(keys[5], (64,), 64 * 9)
    # fc weights stored as (out, in), like torch
    p["fc1_w"] = uniform(keys[6], (256, 12 * 12 * 64), 12 * 12 * 64)
    p["fc1_b"] = uniform(keys[7], (256,), 12 * 12 * 64)
    p["fc2_w"] = uniform(keys[8], (action_space, 256), 256)
    p["fc2_b"] = uniform(keys[9], (action_space,), 256)
    return p


def prepare_params(p):
    """One-time weight re-layout + bf16 cast (done at init, never per call):
      conv: (Cout,Cin,KH,KW) -> (KH*KW*Cin, Cout)           [im2col row order]
      fc1:  (256, C*H*W) with (c,h,w) columns -> (H*W*C, 256) so the NHWC
            flatten needs no per-call activation transpose
      fc2:  (A, 256) -> (256, 128) with zero-padded action columns
    """
    q = {}
    for name in ("conv1", "conv2", "conv3"):
        w = p[name + "_w"]
        cout, cin, kh, kw = w.shape
        q[name + "_w"] = (
            jnp.transpose(w, (2, 3, 1, 0))
            .reshape(kh * kw * cin, cout)
            .astype(jnp.bfloat16)
        )
        q[name + "_b"] = p[name + "_b"].astype(jnp.float32)

    w1 = p["fc1_w"].reshape(256, 64, 12, 12)                      # (out,c,h,w)
    w1 = jnp.transpose(w1, (2, 3, 1, 0)).reshape(12 * 12 * 64, 256)
    q["fc1_w"] = w1.astype(jnp.bfloat16)
    q["fc1_b"] = p["fc1_b"].astype(jnp.float32)

    A = p["fc2_w"].shape[0]
    Ap = _round_up(A, 128)
    w2 = jnp.transpose(p["fc2_w"], (1, 0)).astype(jnp.bfloat16)   # (256, A)
    q["fc2_w"] = jnp.pad(w2, ((0, 0), (0, Ap - A)))               # (256, 128)
    q["fc2_b"] = jnp.pad(p["fc2_b"].astype(jnp.float32), (0, Ap - A))
    return q


# ----------------------------------------------------------------------------
# Forward pass: 4 Pallas launches (conv1, conv2, conv3, fc head), bf16 flow.
# ----------------------------------------------------------------------------
def dqn_forward(params, x_nchw, *, num_actions):
    x = jnp.transpose(x_nchw, (0, 2, 3, 1)).astype(jnp.bfloat16)  # NCHW->NHWC
    B = x.shape[0]

    for name, k, s in (("conv1", 8, 4), ("conv2", 4, 2), ("conv3", 3, 1)):
        w = params[name + "_w"]            # (KH*KW*Cin, Cout), bf16
        cols, OH, OW = im2col_nhwc(x, k, s)
        y = conv_matmul_bias_relu(cols, w, params[name + "_b"])   # bf16 out
        x = y.reshape(B, OH, OW, w.shape[1])

    # torch's x.view(B,-1) flattens NCHW as (c,h,w); fc1_w was pre-permuted to
    # (h,w,c) row order, so the NHWC activation flattens directly.
    feat = x.reshape(B, -1)
    out = fc_head(feat, params["fc1_w"], params["fc1_b"],
                  params["fc2_w"], params["fc2_b"])
    return out[:, :num_actions]


# ----------------------------------------------------------------------------
# Pure-JAX f32 reference (for correctness check only), torch-layout params.
# ----------------------------------------------------------------------------
def reference_forward(params, x):
    def conv(x, w, b, s):
        y = jax.lax.conv_general_dilated(
            x, w, (s, s), "VALID",
            dimension_numbers=("NCHW", "OIHW", "NCHW"),
        )
        return jax.nn.relu(y + b[None, :, None, None])

    x = conv(x, params["conv1_w"], params["conv1_b"], 4)
    x = conv(x, params["conv2_w"], params["conv2_b"], 2)
    x = conv(x, params["conv3_w"], params["conv3_b"], 1)
    feat = x.reshape(x.shape[0], -1)
    h = jax.nn.relu(feat @ params["fc1_w"].T + params["fc1_b"])
    return h @ params["fc2_w"].T + params["fc2_b"]


if __name__ == "__main__":
    key = jax.random.PRNGKey(0)
    k_param, k_x = jax.random.split(key)

    in_channels = 4
    action_space = 6
    batch = 2
    # fc1 expects 12*12*64 features, which fixes the spatial input to 124x124.
    x = jax.random.normal(k_x, (batch, in_channels, 124, 124), jnp.float32)

    torch_params = init_params(k_param, in_channels, action_space)
    params = prepare_params(torch_params)   # one-time re-layout + bf16 cast

    fwd = jax.jit(functools.partial(dqn_forward, num_actions=action_space))
    out = jax.block_until_ready(fwd(params, x))
    assert out.shape == (batch, action_space), out.shape

    ref = jax.block_until_ready(reference_forward(torch_params, x))
    # bf16 MXU inputs with f32 accumulation: compare at bf16-level tolerance.
    assert jnp.allclose(out, ref, rtol=2e-2, atol=2e-2), (
        float(jnp.max(jnp.abs(out - ref)))
    )

    print("KERNEL_OK")
</pallas_src>

<mosaic_0001>
module attributes {stable_mosaic.version = 11 : i64} {
  func.func @_matmul_bias_relu_kernel(%arg0: memref<1800x256xbf16, #tpu.memory_space<vmem>>, %arg1: memref<256x32xbf16, #tpu.memory_space<vmem>>, %arg2: memref<1x32xf32, #tpu.memory_space<vmem>>, %arg3: memref<1800x32xbf16, #tpu.memory_space<vmem>>) attributes {dimension_semantics = [], scalar_prefetch = 0 : i64, scratch_operands = 0 : i64, tpu.core_type = #tpu.core_type<tc>} {
    %c0 = arith.constant 0 : index
    %c0_0 = arith.constant 0 : index
    %0 = vector.load %arg0[%c0, %c0_0] : memref<1800x256xbf16, #tpu.memory_space<vmem>>, vector<1800x256xbf16>
    %c0_1 = arith.constant 0 : index
    %c0_2 = arith.constant 0 : index
    %1 = vector.load %arg1[%c0_1, %c0_2] : memref<256x32xbf16, #tpu.memory_space<vmem>>, vector<256x32xbf16>
    %cst = arith.constant dense<0.000000e+00> : vector<1800x32xf32>
    %2 = tpu.matmul %0, %1, %cst {dimension_numbers = #tpu.dot_dimension_numbers<[1], [0], [0], [1], [0, 0, 1, 1], [], []>} : vector<1800x256xbf16>, vector<256x32xbf16>, vector<1800x32xf32> -> vector<1800x32xf32>
    %c0_3 = arith.constant 0 : index
    %c0_4 = arith.constant 0 : index
    %3 = vector.load %arg2[%c0_3, %c0_4] : memref<1x32xf32, #tpu.memory_space<vmem>>, vector<1x32xf32>
    %4 = vector.broadcast %3 : vector<1x32xf32> to vector<1800x32xf32>
    %5 = arith.addf %2, %4 : vector<1800x32xf32>
    %cst_5 = arith.constant 0.000000e+00 : f32
    %6 = vector.broadcast %cst_5 : f32 to vector<1800x32xf32>
    %7 = arith.maximumf %5, %6 : vector<1800x32xf32>
    %8 = arith.truncf %7 : vector<1800x32xf32> to vector<1800x32xbf16>
    %c0_6 = arith.constant 0 : index
    %c0_7 = arith.constant 0 : index
    %9 = vector.load %arg3[%c0_6, %c0_7] : memref<1800x32xbf16, #tpu.memory_space<vmem>>, vector<1800x32xbf16>
    tpu.vector_store %arg3[%c0_6, %c0_7], %8 {strides = array<i32>} : memref<1800x32xbf16, #tpu.memory_space<vmem>>, vector<1800x32xbf16>,
    return
  }
}

module attributes {stable_mosaic.version = 11 : i64} {
  func.func @_matmul_bias_relu_kernel(%arg0: memref<392x512xbf16, #tpu.memory_space<vmem>>, %arg1: memref<512x64xbf16, #tpu.memory_space<vmem>>, %arg2: memref<1x64xf32, #tpu.memory_space<vmem>>, %arg3: memref<392x64xbf16, #tpu.memory_space<vmem>>) attributes {dimension_semantics = [], scalar_prefetch = 0 : i64, scratch_operands = 0 : i64, tpu.core_type = #tpu.core_type<tc>} {
    %c0 = arith.constant 0 : index
    %c0_0 = arith.constant 0 : index
    %0 = vector.load %arg0[%c0, %c0_0] : memref<392x512xbf16, #tpu.memory_space<vmem>>, vector<392x512xbf16>
    %c0_1 = arith.constant 0 : index
    %c0_2 = arith.constant 0 : index
    %1 = vector.load %arg1[%c0_1, %c0_2] : memref<512x64xbf16, #tpu.memory_space<vmem>>, vector<512x64xbf16>
    %cst = arith.constant dense<0.000000e+00> : vector<392x64xf32>
    %2 = tpu.matmul %0, %1, %cst {dimension_numbers = #tpu.dot_dimension_numbers<[1], [0], [0], [1], [0, 0, 1, 1], [], []>} : vector<392x512xbf16>, vector<512x64xbf16>, vector<392x64xf32> -> vector<392x64xf32>
    %c0_3 = arith.constant 0 : index
    %c0_4 = arith.constant 0 : index
    %3 = vector.load %arg2[%c0_3, %c0_4] : memref<1x64xf32, #tpu.memory_space<vmem>>, vector<1x64xf32>
    %4 = vector.broadcast %3 : vector<1x64xf32> to vector<392x64xf32>
    %5 = arith.addf %2, %4 : vector<392x64xf32>
    %cst_5 = arith.constant 0.000000e+00 : f32
    %6 = vector.broadcast %cst_5 : f32 to vector<392x64xf32>
    %7 = arith.maximumf %5, %6 : vector<392x64xf32>
    %8 = arith.truncf %7 : vector<392x64xf32> to vector<392x64xbf16>
    %c0_6 = arith.constant 0 : index
    %c0_7 = arith.constant 0 : index
    %9 = vector.load %arg3[%c0_6, %c0_7] : memref<392x64xbf16, #tpu.memory_space<vmem>>, vector<392x64xbf16>
    tpu.vector_store %arg3[%c0_6, %c0_7], %8 {strides = array<i32>} : memref<392x64xbf16, #tpu.memory_space<vmem>>, vector<392x64xbf16>,
    return
  }
}

module attributes {stable_mosaic.version = 11 : i64} {
  func.func @_matmul_bias_relu_kernel(%arg0: memref<288x576xbf16, #tpu.memory_space<vmem>>, %arg1: memref<576x64xbf16, #tpu.memory_space<vmem>>, %arg2: memref<1x64xf32, #tpu.memory_space<vmem>>, %arg3: memref<288x64xbf16, #tpu.memory_space<vmem>>) attributes {dimension_semantics = [], scalar_prefetch = 0 : i64, scratch_operands = 0 : i64, tpu.core_type = #tpu.core_type<tc>} {
    %c0 = arith.constant 0 : index
    %c0_0 = arith.constant 0 : index
    %0 = vector.load %arg0[%c0, %c0_0] : memref<288x576xbf16, #tpu.memory_space<vmem>>, vector<288x576xbf16>
    %c0_1 = arith.constant 0 : index
    %c0_2 = arith.constant 0 : index
    %1 = vector.load %arg1[%c0_1, %c0_2] : memref<576x64xbf16, #tpu.memory_space<vmem>>, vector<576x64xbf16>
    %cst = arith.constant dense<0.000000e+00> : vector<288x64xf32>
    %2 = tpu.matmul %0, %1, %cst {dimension_numbers = #tpu.dot_dimension_numbers<[1], [0], [0], [1], [0, 0, 1, 1], [], []>} : vector<288x576xbf16>, vector<576x64xbf16>, vector<288x64xf32> -> vector<288x64xf32>
    %c0_3 = arith.constant 0 : index
    %c0_4 = arith.constant 0 : index
    %3 = vector.load %arg2[%c0_3, %c0_4] : memref<1x64xf32, #tpu.memory_space<vmem>>, vector<1x64xf32>
    %4 = vector.broadcast %3 : vector<1x64xf32> to vector<288x64xf32>
    %5 = arith.addf %2, %4 : vector<288x64xf32>
    %cst_5 = arith.constant 0.000000e+00 : f32
    %6 = vector.broadcast %cst_5 : f32 to vector<288x64xf32>
    %7 = arith.maximumf %5, %6 : vector<288x64xf32>
    %8 = arith.truncf %7 : vector<288x64xf32> to vector<288x64xbf16>
    %c0_6 = arith.constant 0 : index
    %c0_7 = arith.constant 0 : index
    %9 = vector.load %arg3[%c0_6, %c0_7] : memref<288x64xbf16, #tpu.memory_space<vmem>>, vector<288x64xbf16>
    tpu.vector_store %arg3[%c0_6, %c0_7], %8 {strides = array<i32>} : memref<288x64xbf16, #tpu.memory_space<vmem>>, vector<288x64xbf16>,
    return
  }
}

module attributes {stable_mosaic.version = 11 : i64} {
  func.func @_fc_head_kernel(%arg0: memref<16x9216xbf16, #tpu.memory_space<vmem>>, %arg1: memref<9216x256xbf16, #tpu.memory_space<vmem>>, %arg2: memref<1x256xf32, #tpu.memory_space<vmem>>, %arg3: memref<256x128xbf16, #tpu.memory_space<vmem>>, %arg4: memref<1x128xf32, #tpu.memory_space<vmem>>, %arg5: memref<16x128xf32, #tpu.memory_space<vmem>>) attributes {dimension_semantics = [], scalar_prefetch = 0 : i64, scratch_operands = 0 : i64, tpu.core_type = #tpu.core_type<tc>} {
    %c0 = arith.constant 0 : index
    %c0_0 = arith.constant 0 : index
    %0 = vector.load %arg0[%c0, %c0_0] : memref<16x9216xbf16, #tpu.memory_space<vmem>>, vector<16x9216xbf16>
    %c0_1 = arith.constant 0 : index
    %c0_2 = arith.constant 0 : index
    %1 = vector.load %arg1[%c0_1, %c0_2] : memref<9216x256xbf16, #tpu.memory_space<vmem>>, vector<9216x256xbf16>
    %cst = arith.constant dense<0.000000e+00> : vector<16x256xf32>
    %2 = tpu.matmul %0, %1, %cst {dimension_numbers = #tpu.dot_dimension_numbers<[1], [0], [0], [1], [0, 0, 1, 1], [], []>} : vector<16x9216xbf16>, vector<9216x256xbf16>, vector<16x256xf32> -> vector<16x256xf32>
    %c0_3 = arith.constant 0 : index
    %c0_4 = arith.constant 0 : index
    %3 = vector.load %arg2[%c0_3, %c0_4] : memref<1x256xf32, #tpu.memory_space<vmem>>, vector<1x256xf32>
    %4 = vector.broadcast %3 : vector<1x256xf32> to vector<16x256xf32>
    %5 = arith.addf %2, %4 : vector<16x256xf32>
    %cst_5 = arith.constant 0.000000e+00 : f32
    %6 = vector.broadcast %cst_5 : f32 to vector<16x256xf32>
    %7 = arith.maximumf %5, %6 : vector<16x256xf32>
    %8 = arith.truncf %7 : vector<16x256xf32> to vector<16x256xbf16>
    %c0_6 = arith.constant 0 : index
    %c0_7 = arith.constant 0 : index
    %9 = vector.load %arg3[%c0_6, %c0_7] : memref<256x128xbf16, #tpu.memory_space<vmem>>, vector<256x128xbf16>
    %cst_8 = arith.constant dense<0.000000e+00> : vector<16x128xf32>
    %10 = tpu.matmul %8, %9, %cst_8 {dimension_numbers = #tpu.dot_dimension_numbers<[1], [0], [0], [1], [0, 0, 1, 1], [], []>} : vector<16x256xbf16>, vector<256x128xbf16>, vector<16x128xf32> -> vector<16x128xf32>
    %c0_9 = arith.constant 0 : index
    %c0_10 = arith.constant 0 : index
    %11 = vector.load %arg4[%c0_9, %c0_10] : memref<1x128xf32, #tpu.memory_space<vmem>>, vector<1x128xf32>
    %12 = vector.broadcast %11 : vector<1x128xf32> to vector<16x128xf32>
    %13 = arith.addf %10, %12 : vector<16x128xf32>
    %c0_11 = arith.constant 0 : index
    %c0_12 = arith.constant 0 : index
    %14 = vector.load %arg5[%c0_11, %c0_12] : memref<16x128xf32, #tpu.memory_space<vmem>>, vector<16x128xf32>
    tpu.vector_store %arg5[%c0_11, %c0_12], %13 {strides = array<i32>} : memref<16x128xf32, #tpu.memory_space<vmem>>, vector<16x128xf32>,
    return
  }
}

</mosaic_0001>

<bundles_post_ra>
// kernel: dqn_forward.4
= control target key start
LH: loop header
LB: loop body
LE: loop exit
PB: predicated region body
PF: predicated region fallthrough
CT: control target
= control target key end

     0   :  { %v4877_v0 = vmov 0   ;;  %vm3564_vm0 = vcmask 257024   ;;  %s6789_s1 = inlined_call_operand.vmem [shape: bf16[256,32], index: 1, kind: input, shape index: {}]   ;;  %s6790_s0 = inlined_call_operand.vmem [shape: bf16[1800,256], index: 0, kind: input, shape index: {}]   ;;  %s6791_s2 = inlined_call_operand.vmem [shape: f32[1,32], index: 2, kind: input, shape index: {}]   ;;  %s6792_s3 = inlined_call_operand.vmem [shape: bf16[1800,32], index: 3, kind: output, shape index: {}]  }
   0x1   :  { %1502 = vmatprep.subr.bf16.mxu0 %v4877_v0  ;;  %v4520_v1 = vld [vmem:[%s6789_s1] sm:$0xff]   ;;  %4487 = vmatprep.subr.bf16.mxu1 %v4877_v0  ;;  %v4521_v2 = vld [vmem:[%s6789_s1 + $0x8] sm:$0xff]   ;;  %v4522_v3 = vld [vmem:[%s6789_s1 + $0x10] sm:$0xff]  }
   0x2   :  { %1503 = vmatpush1.bf16.msra.mxu0 %v4520_v1  ;;  %4503 = vmatpush1.bf16.msra.mxu1 %v4520_v1  ;;  %v4523_v4 = vld [vmem:[%s6789_s1 + $0x18] sm:$0xff]   ;;  %v4524_v5 = vld [vmem:[%s6789_s1 + $0x20] sm:$0xff]   ;;  %v4525_v7 = vld [vmem:[%s6789_s1 + $0x28] sm:$0xff]  }
   0x3   :  { %1504 = vmatprep.subr.bf16.mxu0 %v4877_v0  ;;  %4488 = vmatprep.subr.bf16.mxu1 %v4877_v0  ;;  %v4538_v6 = vld [vmem:[%s6790_s0 + $0x4] ss:$8 sps:$4 sm:$0xff]   ;;  %v4541_v8 = vld [vmem:[%s6790_s0 + $0x394] ss:$8 sps:$4 sm:$0xff]   ;;  %v4536_v19 = vld [vmem:[%s6790_s0] ss:$8 sps:$4 sm:$0xff]  }
   0x4   :  { %1534 = vmatprep.mubr.bf16.mxu0 %v4538_v6  ;;  %1990 = vmatprep.mubr.bf16.mxu1 %v4541_v8  ;;  %v4526_v9 = vld [vmem:[%s6789_s1 + $0x30] sm:$0xff]   ;;  %v4527_v10 = vld [vmem:[%s6789_s1 + $0x38] sm:$0xff]   ;;  %v4528_v11 = vld [vmem:[%s6789_s1 + $0x40] sm:$0xff]  }
   0x5   :  { %v4529_v12 = vld [vmem:[%s6789_s1 + $0x48] sm:$0xff]   ;;  %v4530_v13 = vld [vmem:[%s6789_s1 + $0x50] sm:$0xff]   ;;  %v4531_v14 = vld [vmem:[%s6789_s1 + $0x58] sm:$0xff]  }
   0x6   :  { %1505 = vmatpush1.bf16.msra.mxu0 %v4521_v2  ;;  %4504 = vmatpush1.bf16.msra.mxu1 %v4521_v2  ;;  %v4532_v15 = vld [vmem:[%s6789_s1 + $0x60] sm:$0xff]   ;;  %v4533_v16 = vld [vmem:[%s6789_s1 + $0x68] sm:$0xff]   ;;  %v4534_v17 = vld [vmem:[%s6789_s1 + $0x70] sm:$0xff]  }
   0x7   :  { %1506 = vmatprep.subr.bf16.mxu0 %v4877_v0  ;;  %4489 = vmatprep.subr.bf16.mxu1 %v4877_v0  ;;  %v4535_v18 = vld [vmem:[%s6789_s1 + $0x78] sm:$0xff]   ;;  %v4545_v22 = vld [vmem:[%s6790_s0 + $0x3a4] ss:$8 sps:$4 sm:$0xff]   ;;  %v4549_v24 = vld [vmem:[%s6790_s0 + $0x3a0] ss:$8 sps:$4 sm:$0xff]  }
   0x8   :  { %v4539_v20 = vld [vmem:[%s6790_s0 + $0x390] ss:$8 sps:$4 sm:$0xff]   ;;  %v4542_v21 = vld [vmem:[%s6790_s0 + $0x14] ss:$8 sps:$4 sm:$0xff]   ;;  %v4547_v25 = vld [vmem:[%s6790_s0 + $0x24] ss:$8 sps:$4 sm:$0xff]  }
   0x9   :  { %v4544_v23 = vld [vmem:[%s6790_s0 + $0x10] ss:$8 sps:$4 sm:$0xff]   ;;  %v4551_v26 = vld [vmem:[%s6790_s0 + $0x3b4] ss:$8 sps:$4 sm:$0xff]   ;;  %v4550_v27 = vld [vmem:[%s6790_s0 + $0x20] ss:$8 sps:$4 sm:$0xff]  }
   0xa   :  { %1507 = vmatpush1.bf16.msra.mxu0 %v4522_v3  ;;  %4505 = vmatpush1.bf16.msra.mxu1 %v4522_v3  ;;  %v4555_v28 = vld [vmem:[%s6790_s0 + $0x3b0] ss:$8 sps:$4 sm:$0xff]   ;;  %v4553_v29 = vld [vmem:[%s6790_s0 + $0x34] ss:$8 sps:$4 sm:$0xff]   ;;  %v4557_v30 = vld [vmem:[%s6790_s0 + $0x3c4] ss:$8 sps:$4 sm:$0xff]  }
   0xb   :  { %1508 = vmatprep.subr.bf16.mxu0 %v4877_v0  ;;  %4490 = vmatprep.subr.bf16.mxu1 %v4877_v0  ;;  %v4556_v31 = vld [vmem:[%s6790_s0 + $0x30] ss:$8 sps:$4 sm:$0xff]   ;;  %v4561_v32 = vld [vmem:[%s6790_s0 + $0x3c0] ss:$8 sps:$4 sm:$0xff]   ;;  %v4559_v33 = vld [vmem:[%s6790_s0 + $0x44] ss:$8 sps:$4 sm:$0xff]  }
   0xc   :  { %v4563_v34 = vld [vmem:[%s6790_s0 + $0x3d4] ss:$8 sps:$4 sm:$0xff]   ;;  %v4562_v35 = vld [vmem:[%s6790_s0 + $0x40] ss:$8 sps:$4 sm:$0xff]   ;;  %v4567_v36 = vld [vmem:[%s6790_s0 + $0x3d0] ss:$8 sps:$4 sm:$0xff]  }
   0xd   :  { %v4565_v37 = vld [vmem:[%s6790_s0 + $0x54] ss:$8 sps:$4 sm:$0xff]   ;;  %v4569_v38 = vld [vmem:[%s6790_s0 + $0x3e4] ss:$8 sps:$4 sm:$0xff]   ;;  %v4568_v39 = vld [vmem:[%s6790_s0 + $0x50] ss:$8 sps:$4 sm:$0xff]  }
   0xe   :  { %1509 = vmatpush1.bf16.msra.mxu0 %v4523_v4  ;;  %4506 = vmatpush1.bf16.msra.mxu1 %v4523_v4  ;;  %v4573_v40 = vld [vmem:[%s6790_s0 + $0x3e0] ss:$8 sps:$4 sm:$0xff]   ;;  %v4571_v41 = vld [vmem:[%s6790_s0 + $0x64] ss:$8 sps:$4 sm:$0xff]   ;;  %v4575_v42 = vld [vmem:[%s6790_s0 + $0x3f4] ss:$8 sps:$4 sm:$0xff]  }
   0xf   :  { %1510 = vmatprep.subr.bf16.mxu0 %v4877_v0  ;;  %4491 = vmatprep.subr.bf16.mxu1 %v4877_v0  ;;  %v4574_v43 = vld [vmem:[%s6790_s0 + $0x60] ss:$8 sps:$4 sm:$0xff]   ;;  %v4579_v44 = vld [vmem:[%s6790_s0 + $0x3f0] ss:$8 sps:$4 sm:$0xff]   ;;  %v4577_v45 = vld [vmem:[%s6790_s0 + $0x74] ss:$8 sps:$4 sm:$0xff]  }
  0x10   :  { %v4581_v46 = vld [vmem:[%s6790_s0 + $0x404] ss:$8 sps:$4 sm:$0xff]   ;;  %v4580_v47 = vld [vmem:[%s6790_s0 + $0x70] ss:$8 sps:$4 sm:$0xff]   ;;  %v4585_v48 = vld [vmem:[%s6790_s0 + $0x400] ss:$8 sps:$4 sm:$0xff]  }
  0x11   :  { %v4583_v49 = vld [vmem:[%s6790_s0 + $0x84] ss:$8 sps:$4 sm:$0xff]   ;;  %v4587_v50 = vld [vmem:[%s6790_s0 + $0x414] ss:$8 sps:$4 sm:$0xff]   ;;  %v4586_v51 = vld [vmem:[%s6790_s0 + $0x80] ss:$8 sps:$4 sm:$0xff]  }
  0x12   :  { %1511 = vmatpush1.bf16.msra.mxu0 %v4524_v5  ;;  %4507 = vmatpush1.bf16.msra.mxu1 %v4524_v5  ;;  %v4591_v52 = vld [vmem:[%s6790_s0 + $0x410] ss:$8 sps:$4 sm:$0xff]   ;;  %v4589_v53 = vld [vmem:[%s6790_s0 + $0x94] ss:$8 sps:$4 sm:$0xff]   ;;  %v4593_v54 = vld [vmem:[%s6790_s0 + $0x424] ss:$8 sps:$4 sm:$0xff]  }
  0x13   :  { %1512 = vmatprep.subr.bf16.mxu0 %v4877_v0  ;;  %4492 = vmatprep.subr.bf16.mxu1 %v4877_v0  ;;  %v4592_v55 = vld [vmem:[%s6790_s0 + $0x90] ss:$8 sps:$4 sm:$0xff]   ;;  %v4597_v56 = vld [vmem:[%s6790_s0 + $0x420] ss:$8 sps:$4 sm:$0xff]   ;;  %v4595_v57 = vld [vmem:[%s6790_s0 + $0xa4] ss:$8 sps:$4 sm:$0xff]  }
  0x14   :  { %v4599_v58 = vld [vmem:[%s6790_s0 + $0x434] ss:$8 sps:$4 sm:$0xff]   ;;  %v4598_v59 = vld [vmem:[%s6790_s0 + $0xa0] ss:$8 sps:$4 sm:$0xff]   ;;  %v4603_v60 = vld [vmem:[%s6790_s0 + $0x430] ss:$8 sps:$4 sm:$0xff]  }
  0x15   :  { %v4601_v61 = vld [vmem:[%s6790_s0 + $0xb4] ss:$8 sps:$4 sm:$0xff]   ;;  %v4605_v62 = vld [vmem:[%s6790_s0 + $0x444] ss:$8 sps:$4 sm:$0xff]   ;;  %v4604_v63 = vld [vmem:[%s6790_s0 + $0xb0] ss:$8 sps:$4 sm:$0xff]  }
  0x16   :  { %1513 = vmatpush1.bf16.msra.mxu0 %v4525_v7  ;;  %4508 = vmatpush1.bf16.msra.mxu1 %v4525_v7  ;;  %v4607_v1 = vld [vmem:[%s6790_s0 + $0xc4] ss:$8 sps:$4 sm:$0xff]   ;;  %v4611_v2 = vld [vmem:[%s6790_s0 + $0x454] ss:$8 sps:$4 sm:$0xff]   ;;  %v4610_v3 = vld [vmem:[%s6790_s0 + $0xc0] ss:$8 sps:$4 sm:$0xff]  }
  0x17   :  { %1514 = vmatprep.subr.bf16.mxu0 %v4877_v0  ;;  %4493 = vmatprep.subr.bf16.mxu1 %v4877_v0  ;;  %v4615_v4 = vld [vmem:[%s6790_s0 + $0x450] ss:$8 sps:$4 sm:$0xff]   ;;  %v4613_v5 = vld [vmem:[%s6790_s0 + $0xd4] ss:$8 sps:$4 sm:$0xff]   ;;  %v4617_v6 = vld [vmem:[%s6790_s0 + $0x464] ss:$8 sps:$4 sm:$0xff]  }
  0x18   :  { %v4616_v7 = vld [vmem:[%s6790_s0 + $0xd0] ss:$8 sps:$4 sm:$0xff]   ;;  %v4621_v8 = vld [vmem:[%s6790_s0 + $0x460] ss:$8 sps:$4 sm:$0xff]  }
  0x1a   :  { %1515 = vmatpush1.bf16.msra.mxu0 %v4526_v9  ;;  %4509 = vmatpush1.bf16.msra.mxu1 %v4526_v9  ;;  %v4619_v9 = vld [vmem:[%s6790_s0 + $0xe4] ss:$8 sps:$4 sm:$0xff]  }
  0x1b   :  { %1516 = vmatprep.subr.bf16.mxu0 %v4877_v0  ;;  %4494 = vmatprep.subr.bf16.mxu1 %v4877_v0 }
  0x1e   :  { %1517 = vmatpush1.bf16.msra.mxu0 %v4527_v10  ;;  %4510 = vmatpush1.bf16.msra.mxu1 %v4527_v10  ;;  %v4623_v10 = vld [vmem:[%s6790_s0 + $0x474] ss:$8 sps:$4 sm:$0xff]  }
  0x1f   :  { %1518 = vmatprep.subr.bf16.mxu0 %v4877_v0  ;;  %4495 = vmatprep.subr.bf16.mxu1 %v4877_v0 }
  0x22   :  { %1519 = vmatpush1.bf16.msra.mxu0 %v4528_v11  ;;  %4511 = vmatpush1.bf16.msra.mxu1 %v4528_v11  ;;  %v4622_v11 = vld [vmem:[%s6790_s0 + $0xe0] ss:$8 sps:$4 sm:$0xff]  }
  0x23   :  { %1520 = vmatprep.subr.bf16.mxu0 %v4877_v0  ;;  %4496 = vmatprep.subr.bf16.mxu1 %v4877_v0 }
  0x26   :  { %1521 = vmatpush1.bf16.msra.mxu0 %v4529_v12  ;;  %4512 = vmatpush1.bf16.msra.mxu1 %v4529_v12  ;;  %v4627_v12 = vld [vmem:[%s6790_s0 + $0x470] ss:$8 sps:$4 sm:$0xff]  }
  0x27   :  { %1522 = vmatprep.subr.bf16.mxu0 %v4877_v0  ;;  %4497 = vmatprep.subr.bf16.mxu1 %v4877_v0 }
  0x2a   :  { %1523 = vmatpush1.bf16.msra.mxu0 %v4530_v13  ;;  %4513 = vmatpush1.bf16.msra.mxu1 %v4530_v13  ;;  %v4625_v13 = vld [vmem:[%s6790_s0 + $0xf4] ss:$8 sps:$4 sm:$0xff]  }
  0x2b   :  { %1524 = vmatprep.subr.bf16.mxu0 %v4877_v0  ;;  %4498 = vmatprep.subr.bf16.mxu1 %v4877_v0 }
  0x2e   :  { %1525 = vmatpush1.bf16.msra.mxu0 %v4531_v14  ;;  %4514 = vmatpush1.bf16.msra.mxu1 %v4531_v14  ;;  %v4629_v14 = vld [vmem:[%s6790_s0 + $0x484] ss:$8 sps:$4 sm:$0xff]  }
  0x2f   :  { %1526 = vmatprep.subr.bf16.mxu0 %v4877_v0  ;;  %4499 = vmatprep.subr.bf16.mxu1 %v4877_v0 }
  0x32   :  { %1527 = vmatpush1.bf16.msra.mxu0 %v4532_v15  ;;  %4515 = vmatpush1.bf16.msra.mxu1 %v4532_v15  ;;  %v4628_v15 = vld [vmem:[%s6790_s0 + $0xf0] ss:$8 sps:$4 sm:$0xff]  }
  0x33   :  { %1528 = vmatprep.subr.bf16.mxu0 %v4877_v0  ;;  %4500 = vmatprep.subr.bf16.mxu1 %v4877_v0 }
  0x36   :  { %1529 = vmatpush1.bf16.msra.mxu0 %v4533_v16  ;;  %4516 = vmatpush1.bf16.msra.mxu1 %v4533_v16  ;;  %v4633_v16 = vld [vmem:[%s6790_s0 + $0x480] ss:$8 sps:$4 sm:$0xff]  }
  0x37   :  { %1530 = vmatprep.subr.bf16.mxu0 %v4877_v0  ;;  %4501 = vmatprep.subr.bf16.mxu1 %v4877_v0 }
  0x3a   :  { %1531 = vmatpush1.bf16.msra.mxu0 %v4534_v17  ;;  %4517 = vmatpush1.bf16.msra.mxu1 %v4534_v17  ;;  %v4631_v17 = vld [vmem:[%s6790_s0 + $0x104] ss:$8 sps:$4 sm:$0xff]  }
  0x3b   :  { %1532 = vmatprep.subr.bf16.mxu0 %v4877_v0  ;;  %4502 = vmatprep.subr.bf16.mxu1 %v4877_v0  ;;  %v4609_v0 = vld [vmem:[%s6790_s0 + $0x440] ss:$8 sps:$4 sm:$0xff]  }
  0x3e   :  { %1533 = vmatpush1.bf16.msra.mxu0 %v4535_v18  ;;  %4518 = vmatpush1.bf16.msra.mxu1 %v4535_v18  ;;  %v4635_v18 = vld [vmem:[%s6790_s0 + $0x494] ss:$8 sps:$4 sm:$0xff]  }
  0x41   :  { %1535 = vmatmul.mubr.bf16.vlgmr.msra.gmra.mrb[0].mxu0 %v4536_v19  ;;  %1991 = vmatmul.mubr.bf16.vlgmr.msra.gmra.mrb[0].mxu1 %v4539_v20  ;;  %v4634_v19 = vld [vmem:[%s6790_s0 + $0x100] ss:$8 sps:$4 sm:$0xff]   ;;  %v4639_v20 = vld [vmem:[%s6790_s0 + $0x490] ss:$8 sps:$4 sm:$0xff]  }
  0x42   :  { %1542 = vmatprep.mubr.bf16.mxu0 %v4542_v21  ;;  %1998 = vmatprep.mubr.bf16.mxu1 %v4545_v22  ;;  %v4637_v21 = vld [vmem:[%s6790_s0 + $0x114] ss:$8 sps:$4 sm:$0xff]   ;;  %v4641_v22 = vld [vmem:[%s6790_s0 + $0x4a4] ss:$8 sps:$4 sm:$0xff]  }
  0x49   :  { %1543 = vmatmul.mubr.bf16.gmra.mrb[4].mxu0 %v4544_v23  ;;  %1999 = vmatmul.mubr.bf16.gmra.mrb[4].mxu1 %v4549_v24  ;;  %v4640_v23 = vld [vmem:[%s6790_s0 + $0x110] ss:$8 sps:$4 sm:$0xff]   ;;  %v4645_v24 = vld [vmem:[%s6790_s0 + $0x4a0] ss:$8 sps:$4 sm:$0xff]  }
  0x4a   :  { %1550 = vmatprep.mubr.bf16.mxu0 %v4547_v25  ;;  %2006 = vmatprep.mubr.bf16.mxu1 %v4551_v26  ;;  %v4643_v25 = vld [vmem:[%s6790_s0 + $0x124] ss:$8 sps:$4 sm:$0xff]   ;;  %v4647_v26 = vld [vmem:[%s6790_s0 + $0x4b4] ss:$8 sps:$4 sm:$0xff]  }
  0x51   :  { %1551 = vmatmul.mubr.bf16.gmra.mrb[8].mxu0 %v4550_v27  ;;  %2007 = vmatmul.mubr.bf16.gmra.mrb[8].mxu1 %v4555_v28  ;;  %v4646_v27 = vld [vmem:[%s6790_s0 + $0x120] ss:$8 sps:$4 sm:$0xff]   ;;  %v4651_v28 = vld [vmem:[%s6790_s0 + $0x4b0] ss:$8 sps:$4 sm:$0xff]  }
  0x52   :  { %1558 = vmatprep.mubr.bf16.mxu0 %v4553_v29  ;;  %2014 = vmatprep.mubr.bf16.mxu1 %v4557_v30  ;;  %v4649_v29 = vld [vmem:[%s6790_s0 + $0x134] ss:$8 sps:$4 sm:$0xff]   ;;  %v4653_v30 = vld [vmem:[%s6790_s0 + $0x4c4] ss:$8 sps:$4 sm:$0xff]  }
  0x59   :  { %1559 = vmatmul.mubr.bf16.gmra.mrb[12].mxu0 %v4556_v31  ;;  %2015 = vmatmul.mubr.bf16.gmra.mrb[12].mxu1 %v4561_v32  ;;  %v4652_v31 = vld [vmem:[%s6790_s0 + $0x130] ss:$8 sps:$4 sm:$0xff]   ;;  %v4657_v32 = vld [vmem:[%s6790_s0 + $0x4c0] ss:$8 sps:$4 sm:$0xff]  }
  0x5a   :  { %1566 = vmatprep.mubr.bf16.mxu0 %v4559_v33  ;;  %2022 = vmatprep.mubr.bf16.mxu1 %v4563_v34  ;;  %v4655_v33 = vld [vmem:[%s6790_s0 + $0x144] ss:$8 sps:$4 sm:$0xff]   ;;  %v4659_v34 = vld [vmem:[%s6790_s0 + $0x4d4] ss:$8 sps:$4 sm:$0xff]  }
  0x61   :  { %1567 = vmatmul.mubr.bf16.gmra.mrb[16].mxu0 %v4562_v35  ;;  %2023 = vmatmul.mubr.bf16.gmra.mrb[16].mxu1 %v4567_v36  ;;  %v4658_v35 = vld [vmem:[%s6790_s0 + $0x140] ss:$8 sps:$4 sm:$0xff]   ;;  %v4663_v36 = vld [vmem:[%s6790_s0 + $0x4d0] ss:$8 sps:$4 sm:$0xff]  }
  0x62   :  { %1574 = vmatprep.mubr.bf16.mxu0 %v4565_v37  ;;  %2030 = vmatprep.mubr.bf16.mxu1 %v4569_v38  ;;  %v4661_v37 = vld [vmem:[%s6790_s0 + $0x154] ss:$8 sps:$4 sm:$0xff]   ;;  %v4665_v38 = vld [vmem:[%s6790_s0 + $0x4e4] ss:$8 sps:$4 sm:$0xff]  }
  0x69   :  { %1575 = vmatmul.mubr.bf16.gmra.mrb[20].mxu0 %v4568_v39  ;;  %2031 = vmatmul.mubr.bf16.gmra.mrb[20].mxu1 %v4573_v40  ;;  %v4664_v39 = vld [vmem:[%s6790_s0 + $0x150] ss:$8 sps:$4 sm:$0xff]   ;;  %v4669_v40 = vld [vmem:[%s6790_s0 + $0x4e0] ss:$8 sps:$4 sm:$0xff]  }
  0x6a   :  { %1582 = vmatprep.mubr.bf16.mxu0 %v4571_v41  ;;  %2038 = vmatprep.mubr.bf16.mxu1 %v4575_v42  ;;  %v4667_v41 = vld [vmem:[%s6790_s0 + $0x164] ss:$8 sps:$4 sm:$0xff]   ;;  %v4671_v42 = vld [vmem:[%s6790_s0 + $0x4f4] ss:$8 sps:$4 sm:$0xff]  }
  0x71   :  { %1583 = vmatmul.mubr.bf16.gmra.mrb[24].mxu0 %v4574_v43  ;;  %2039 = vmatmul.mubr.bf16.gmra.mrb[24].mxu1 %v4579_v44  ;;  %v4670_v43 = vld [vmem:[%s6790_s0 + $0x160] ss:$8 sps:$4 sm:$0xff]   ;;  %v4675_v44 = vld [vmem:[%s6790_s0 + $0x4f0] ss:$8 sps:$4 sm:$0xff]  }
  0x72   :  { %1590 = vmatprep.mubr.bf16.mxu0 %v4577_v45  ;;  %2046 = vmatprep.mubr.bf16.mxu1 %v4581_v46  ;;  %v4673_v45 = vld [vmem:[%s6790_s0 + $0x174] ss:$8 sps:$4 sm:$0xff]   ;;  %v4677_v46 = vld [vmem:[%s6790_s0 + $0x504] ss:$8 sps:$4 sm:$0xff]  }
  0x79   :  { %1591 = vmatmul.mubr.bf16.gmra.mrb[28].mxu0 %v4580_v47  ;;  %2047 = vmatmul.mubr.bf16.gmra.mrb[28].mxu1 %v4585_v48  ;;  %v4676_v47 = vld [vmem:[%s6790_s0 + $0x170] ss:$8 sps:$4 sm:$0xff]   ;;  %v4681_v48 = vld [vmem:[%s6790_s0 + $0x500] ss:$8 sps:$4 sm:$0xff]  }
  0x7a   :  { %1598 = vmatprep.mubr.bf16.mxu0 %v4583_v49  ;;  %2054 = vmatprep.mubr.bf16.mxu1 %v4587_v50  ;;  %v4679_v49 = vld [vmem:[%s6790_s0 + $0x184] ss:$8 sps:$4 sm:$0xff]   ;;  %v4683_v50 = vld [vmem:[%s6790_s0 + $0x514] ss:$8 sps:$4 sm:$0xff]  }
  0x81   :  { %1599 = vmatmul.mubr.bf16.gmra.mrb[32].mxu0 %v4586_v51  ;;  %2055 = vmatmul.mubr.bf16.gmra.mrb[32].mxu1 %v4591_v52  ;;  %v4682_v51 = vld [vmem:[%s6790_s0 + $0x180] ss:$8 sps:$4 sm:$0xff]   ;;  %v4687_v52 = vld [vmem:[%s6790_s0 + $0x510] ss:$8 sps:$4 sm:$0xff]  }
  0x82   :  { %1606 = vmatprep.mubr.bf16.mxu0 %v4589_v53  ;;  %2062 = vmatprep.mubr.bf16.mxu1 %v4593_v54  ;;  %v4685_v53 = vld [vmem:[%s6790_s0 + $0x194] ss:$8 sps:$4 sm:$0xff]   ;;  %v4689_v54 = vld [vmem:[%s6790_s0 + $0x524] ss:$8 sps:$4 sm:$0xff]  }
  0x89   :  { %1607 = vmatmul.mubr.bf16.gmra.mrb[36].mxu0 %v4592_v55  ;;  %2063 = vmatmul.mubr.bf16.gmra.mrb[36].mxu1 %v4597_v56  ;;  %v4688_v55 = vld [vmem:[%s6790_s0 + $0x190] ss:$8 sps:$4 sm:$0xff]   ;;  %v4693_v56 = vld [vmem:[%s6790_s0 + $0x520] ss:$8 sps:$4 sm:$0xff]  }
  0x8a   :  { %1614 = vmatprep.mubr.bf16.mxu0 %v4595_v57  ;;  %2070 = vmatprep.mubr.bf16.mxu1 %v4599_v58  ;;  %v4691_v57 = vld [vmem:[%s6790_s0 + $0x1a4] ss:$8 sps:$4 sm:$0xff]   ;;  %v4695_v58 = vld [vmem:[%s6790_s0 + $0x534] ss:$8 sps:$4 sm:$0xff]  }
  0x91   :  { %1615 = vmatmul.mubr.bf16.gmra.mrb[40].mxu0 %v4598_v59  ;;  %2071 = vmatmul.mubr.bf16.gmra.mrb[40].mxu1 %v4603_v60  ;;  %v4694_v59 = vld [vmem:[%s6790_s0 + $0x1a0] ss:$8 sps:$4 sm:$0xff]   ;;  %v4699_v60 = vld [vmem:[%s6790_s0 + $0x530] ss:$8 sps:$4 sm:$0xff]  }
  0x92   :  { %1622 = vmatprep.mubr.bf16.mxu0 %v4601_v61  ;;  %2078 = vmatprep.mubr.bf16.mxu1 %v4605_v62  ;;  %v4697_v61 = vld [vmem:[%s6790_s0 + $0x1b4] ss:$8 sps:$4 sm:$0xff]   ;;  %v4701_v62 = vld [vmem:[%s6790_s0 + $0x544] ss:$8 sps:$4 sm:$0xff]  }
  0x99   :  { %1623 = vmatmul.mubr.bf16.gmra.mrb[44].mxu0 %v4604_v63  ;;  %2079 = vmatmul.mubr.bf16.gmra.mrb[44].mxu1 %v4609_v0  ;;  %v5311_v63 = vld [vmem:[%s6791_s2] ss:$0 sm:$0xff] }
  0x9a   :  { %1630 = vmatprep.mubr.bf16.mxu0 %v4607_v1  ;;  %2086 = vmatprep.mubr.bf16.mxu1 %v4611_v2 }
  0xa1   :  { %1631 = vmatmul.mubr.bf16.gmra.mrb[48].mxu0 %v4610_v3  ;;  %2087 = vmatmul.mubr.bf16.gmra.mrb[48].mxu1 %v4615_v4  ;;  %v4700_v4 = vld [vmem:[%s6790_s0 + $0x1b0] ss:$8 sps:$4 sm:$0xff]  }
  0xa2   :  { %1638 = vmatprep.mubr.bf16.mxu0 %v4613_v5  ;;  %2094 = vmatprep.mubr.bf16.mxu1 %v4617_v6 }
  0xa9   :  { %1639 = vmatmul.mubr.bf16.gmra.mrb[52].mxu0 %v4616_v7  ;;  %2095 = vmatmul.mubr.bf16.gmra.mrb[52].mxu1 %v4621_v8  ;;  %v4705_v7 = vld [vmem:[%s6790_s0 + $0x540] ss:$8 sps:$4 sm:$0xff]  }
  0xaa   :  { %1646 = vmatprep.mubr.bf16.mxu0 %v4619_v9  ;;  %2102 = vmatprep.mubr.bf16.mxu1 %v4623_v10  ;;  %v4703_v10 = vld [vmem:[%s6790_s0 + $0x1c4] ss:$8 sps:$4 sm:$0xff]  }
  0xb1   :  { %1647 = vmatmul.mubr.bf16.gmra.mrb[56].mxu0 %v4622_v11  ;;  %2103 = vmatmul.mubr.bf16.gmra.mrb[56].mxu1 %v4627_v12  ;;  %v4707_v11 = vld [vmem:[%s6790_s0 + $0x554] ss:$8 sps:$4 sm:$0xff]  }
  0xb2   :  { %1654 = vmatprep.mubr.bf16.mxu0 %v4625_v13  ;;  %2110 = vmatprep.mubr.bf16.mxu1 %v4629_v14 }
  0xb9   :  { %1655 = vmatmul.mubr.bf16.gmra.mrb[60].mxu0 %v4628_v15  ;;  %2111 = vmatmul.mubr.bf16.gmra.mrb[60].mxu1 %v4633_v16 }
  0xba   :  { %1662 = vmatprep.mubr.bf16.mxu0 %v4631_v17  ;;  %2118 = vmatprep.mubr.bf16.mxu1 %v4635_v18 }
  0xc1   :  { %1663 = vmatmul.mubr.bf16.gmra.mrb[64].mxu0 %v4634_v19  ;;  %2119 = vmatmul.mubr.bf16.gmra.mrb[64].mxu1 %v4639_v20 }
  0xc2   :  { %1670 = vmatprep.mubr.bf16.mxu0 %v4637_v21  ;;  %2126 = vmatprep.mubr.bf16.mxu1 %v4641_v22 }
  0xc9   :  { %1671 = vmatmul.mubr.bf16.gmra.mrb[68].mxu0 %v4640_v23  ;;  %2127 = vmatmul.mubr.bf16.gmra.mrb[68].mxu1 %v4645_v24 }
  0xca   :  { %1678 = vmatprep.mubr.bf16.mxu0 %v4643_v25  ;;  %2134 = vmatprep.mubr.bf16.mxu1 %v4647_v26 }
  0xd1   :  { %1679 = vmatmul.mubr.bf16.gmra.mrb[72].mxu0 %v4646_v27  ;;  %2135 = vmatmul.mubr.bf16.gmra.mrb[72].mxu1 %v4651_v28  ;;  %v4706_v28 = vld [vmem:[%s6790_s0 + $0x1c0] ss:$8 sps:$4 sm:$0xff]  }
  0xd2   :  { %1686 = vmatprep.mubr.bf16.mxu0 %v4649_v29  ;;  %2142 = vmatprep.mubr.bf16.mxu1 %v4653_v30 }
  0xd9   :  { %1687 = vmatmul.mubr.bf16.gmra.mrb[76].mxu0 %v4652_v31  ;;  %2143 = vmatmul.mubr.bf16.gmra.mrb[76].mxu1 %v4657_v32  ;;  %v4711_v31 = vld [vmem:[%s6790_s0 + $0x550] ss:$8 sps:$4 sm:$0xff]  }
  0xda   :  { %1694 = vmatprep.mubr.bf16.mxu0 %v4655_v33  ;;  %2150 = vmatprep.mubr.bf16.mxu1 %v4659_v34  ;;  %v4709_v34 = vld [vmem:[%s6790_s0 + $0x1d4] ss:$8 sps:$4 sm:$0xff]  }
  0xe1   :  { %1695 = vmatmul.mubr.bf16.gmra.mrb[80].mxu0 %v4658_v35  ;;  %2151 = vmatmul.mubr.bf16.gmra.mrb[80].mxu1 %v4663_v36  ;;  %v4713_v35 = vld [vmem:[%s6790_s0 + $0x564] ss:$8 sps:$4 sm:$0xff]  }
  0xe2   :  { %1702 = vmatprep.mubr.bf16.mxu0 %v4661_v37  ;;  %2158 = vmatprep.mubr.bf16.mxu1 %v4665_v38 }
  0xe9   :  { %1703 = vmatmul.mubr.bf16.gmra.mrb[84].mxu0 %v4664_v39  ;;  %2159 = vmatmul.mubr.bf16.gmra.mrb[84].mxu1 %v4669_v40 }
  0xea   :  { %1710 = vmatprep.mubr.bf16.mxu0 %v4667_v41  ;;  %2166 = vmatprep.mubr.bf16.mxu1 %v4671_v42 }
  0xf1   :  { %1711 = vmatmul.mubr.bf16.gmra.mrb[88].mxu0 %v4670_v43  ;;  %2167 = vmatmul.mubr.bf16.gmra.mrb[88].mxu1 %v4675_v44 }
  0xf2   :  { %1718 = vmatprep.mubr.bf16.mxu0 %v4673_v45  ;;  %2174 = vmatprep.mubr.bf16.mxu1 %v4677_v46 }
  0xf9   :  { %1719 = vmatmul.mubr.bf16.gmra.mrb[92].mxu0 %v4676_v47  ;;  %2175 = vmatmul.mubr.bf16.gmra.mrb[92].mxu1 %v4681_v48 }
  0xfa   :  { %1726 = vmatprep.mubr.bf16.mxu0 %v4679_v49  ;;  %2182 = vmatprep.mubr.bf16.mxu1 %v4683_v50 }
 0x101   :  { %1727 = vmatmul.mubr.bf16.gmra.mrb[96].mxu0 %v4682_v51  ;;  %2183 = vmatmul.mubr.bf16.gmra.mrb[96].mxu1 %v4687_v52  ;;  %v4712_v52 = vld [vmem:[%s6790_s0 + $0x1d0] ss:$8 sps:$4 sm:$0xff]  }
 0x102   :  { %1734 = vmatprep.mubr.bf16.mxu0 %v4685_v53  ;;  %2190 = vmatprep.mubr.bf16.mxu1 %v4689_v54 }
 0x109   :  { %1735 = vmatmul.mubr.bf16.gmra.mrb[100].mxu0 %v4688_v55  ;;  %2191 = vmatmul.mubr.bf16.gmra.mrb[100].mxu1 %v4693_v56  ;;  %v4717_v55 = vld [vmem:[%s6790_s0 + $0x560] ss:$8 sps:$4 sm:$0xff]  }
 0x10a   :  { %1742 = vmatprep.mubr.bf16.mxu0 %v4691_v57  ;;  %2198 = vmatprep.mubr.bf16.mxu1 %v4695_v58  ;;  %v4715_v58 = vld [vmem:[%s6790_s0 + $0x1e4] ss:$8 sps:$4 sm:$0xff]  }
 0x111   :  { %1743 = vmatmul.mubr.bf16.gmra.mrb[104].mxu0 %v4694_v59  ;;  %2199 = vmatmul.mubr.bf16.gmra.mrb[104].mxu1 %v4699_v60  ;;  %v4719_v59 = vld [vmem:[%s6790_s0 + $0x574] ss:$8 sps:$4 sm:$0xff]  }
 0x112   :  { %1750 = vmatprep.mubr.bf16.mxu0 %v4697_v61  ;;  %2206 = vmatprep.mubr.bf16.mxu1 %v4701_v62 }
 0x114   :  { %v1536_v0 = vpop.f32.mrb[0].mxu0  ;;  %v1992_v1 = vpop.f32.mrb[0].mxu1 }
 0x115   :  { %v1537_v2 = vadd.f32 %v5311_v63, %v1536_v0  ;;  %v1538_v3 = vpop.f32.mrb[1].mxu0  ;;  %v1993_v5 = vadd.f32 %v5311_v63, %v1992_v1  ;;  %v1994_v6 = vpop.f32.mrb[1].mxu1 }
 0x116   :  { %v1539_v8 = vpop.f32.mrb[2].mxu0  ;;  %v1995_v9 = vpop.f32.mrb[2].mxu1 }
 0x117   :  { %v2438_v12 = vmax.f32 %v1537_v2, 0.0  ;;  %v1540_v13 = vadd.f32 %v5311_v63, %v1539_v8  ;;  %v1541_v14 = vpop.f32.mrb[3].mxu0  ;;  %v2552_v15 = vmax.f32 %v1993_v5, 0.0  ;;  %v1996_v16 = vadd.f32 %v5311_v63, %v1995_v9  ;;  %v1997_v17 = vpop.f32.mrb[3].mxu1 }
 0x119   :  { %v4262_v18 = vpack.c.bf16 %v2438_v12, %v2438_v12  ;;  %v2439_v19 = vmax.f32 %v1540_v13, 0.0  ;;  %1751 = vmatmul.mubr.bf16.gmra.mrb[108].mxu0 %v4700_v4  ;;  %v4376_v20 = vpack.c.bf16 %v2552_v15, %v2552_v15  ;;  %v2553_v21 = vmax.f32 %v1996_v16, 0.0  ;;  %2207 = vmatmul.mubr.bf16.gmra.mrb[108].mxu1 %v4705_v7  ;;  %v4718_v13 = vld [vmem:[%s6790_s0 + $0x1e0] ss:$8 sps:$4 sm:$0xff]   ;;  %v4723_v16 = vld [vmem:[%s6790_s0 + $0x570] ss:$8 sps:$4 sm:$0xff]  }
 0x11a   :  { %1758 = vmatprep.mubr.bf16.mxu0 %v4703_v10  ;;  %2214 = vmatprep.mubr.bf16.mxu1 %v4707_v11 }
 0x11b   :  { %3565 = vst.msk [vmem:[%s6792_s3] sm:$0xf] %vm3564_vm0, %v4262_v18  ;;  %v4263_v22 = vpack.c.bf16 %v2439_v19, %v2439_v19  ;;  %3679 = vst.msk [vmem:[%s6792_s3 + $0x1c8] sm:$0xf] %vm3564_vm0, %v4376_v20  ;;  %v4377_v23 = vpack.c.bf16 %v2553_v21, %v2553_v21  ;;  %v4721_v19 = vld [vmem:[%s6790_s0 + $0x1f4] ss:$8 sps:$4 sm:$0xff]  }
 0x11c   :  { %v1544_v24 = vpop.f32.mrb[4].mxu0  ;;  %v2000_v25 = vpop.f32.mrb[4].mxu1  ;;  %v4725_v20 = vld [vmem:[%s6790_s0 + $0x584] ss:$8 sps:$4 sm:$0xff]  }
 0x11d   :  { %3566 = vst.msk [vmem:[%s6792_s3 + $0x4] sm:$0xf] %vm3564_vm0, %v4263_v22  ;;  %v1545_v26 = vadd.f32 %v5311_v63, %v1544_v24  ;;  %v1546_v27 = vpop.f32.mrb[5].mxu0  ;;  %3680 = vst.msk [vmem:[%s6792_s3 + $0x1cc] sm:$0xf] %vm3564_vm0, %v4377_v23  ;;  %v2001_v29 = vadd.f32 %v5311_v63, %v2000_v25  ;;  %v2002_v30 = vpop.f32.mrb[5].mxu1 }
 0x11e   :  { %v1547_v32 = vpop.f32.mrb[6].mxu0  ;;  %v2003_v33 = vpop.f32.mrb[6].mxu1 }
 0x11f   :  { %v2440_v36 = vmax.f32 %v1545_v26, 0.0  ;;  %v1548_v37 = vadd.f32 %v5311_v63, %v1547_v32  ;;  %v1549_v38 = vpop.f32.mrb[7].mxu0  ;;  %v2554_v39 = vmax.f32 %v2001_v29, 0.0  ;;  %v2004_v40 = vadd.f32 %v5311_v63, %v2003_v33  ;;  %v2005_v41 = vpop.f32.mrb[7].mxu1 }
 0x121   :  { %v4264_v42 = vpack.c.bf16 %v2440_v36, %v2440_v36  ;;  %v2441_v43 = vmax.f32 %v1548_v37, 0.0  ;;  %1759 = vmatmul.mubr.bf16.gmra.mrb[112].mxu0 %v4706_v28  ;;  %v4378_v44 = vpack.c.bf16 %v2554_v39, %v2554_v39  ;;  %v2555_v45 = vmax.f32 %v2004_v40, 0.0  ;;  %2215 = vmatmul.mubr.bf16.gmra.mrb[112].mxu1 %v4711_v31  ;;  %v4724_v37 = vld [vmem:[%s6790_s0 + $0x1f0] ss:$8 sps:$4 sm:$0xff]   ;;  %v4729_v40 = vld [vmem:[%s6790_s0 + $0x580] ss:$8 sps:$4 sm:$0xff]  }
 0x122   :  { %1766 = vmatprep.mubr.bf16.mxu0 %v4709_v34  ;;  %2222 = vmatprep.mubr.bf16.mxu1 %v4713_v35 }
 0x123   :  { %3567 = vst.msk [vmem:[%s6792_s3 + $0x8] sm:$0xf] %vm3564_vm0, %v4264_v42  ;;  %v4265_v46 = vpack.c.bf16 %v2441_v43, %v2441_v43  ;;  %3681 = vst.msk [vmem:[%s6792_s3 + $0x1d0] sm:$0xf] %vm3564_vm0, %v4378_v44  ;;  %v4379_v47 = vpack.c.bf16 %v2555_v45, %v2555_v45  ;;  %v4727_v43 = vld [vmem:[%s6790_s0 + $0x204] ss:$8 sps:$4 sm:$0xff]  }
 0x124   :  { %v1552_v48 = vpop.f32.mrb[8].mxu0  ;;  %v2008_v49 = vpop.f32.mrb[8].mxu1  ;;  %v4731_v44 = vld [vmem:[%s6790_s0 + $0x594] ss:$8 sps:$4 sm:$0xff]  }
 0x125   :  { %3568 = vst.msk [vmem:[%s6792_s3 + $0xc] sm:$0xf] %vm3564_vm0, %v4265_v46  ;;  %v1553_v50 = vadd.f32 %v5311_v63, %v1552_v48  ;;  %v1554_v51 = vpop.f32.mrb[9].mxu0  ;;  %3682 = vst.msk [vmem:[%s6792_s3 + $0x1d4] sm:$0xf] %vm3564_vm0, %v4379_v47  ;;  %v2009_v53 = vadd.f32 %v5311_v63, %v2008_v49  ;;  %v2010_v54 = vpop.f32.mrb[9].mxu1 }
 0x126   :  { %v1555_v56 = vpop.f32.mrb[10].mxu0  ;;  %v2011_v57 = vpop.f32.mrb[10].mxu1 }
 0x127   :  { %v2442_v60 = vmax.f32 %v1553_v50, 0.0  ;;  %v1556_v61 = vadd.f32 %v5311_v63, %v1555_v56  ;;  %v1557_v62 = vpop.f32.mrb[11].mxu0  ;;  %v2556_v0 = vmax.f32 %v2009_v53, 0.0  ;;  %v2012_v1 = vadd.f32 %v5311_v63, %v2011_v57  ;;  %v2013_v2 = vpop.f32.mrb[11].mxu1 }
 0x129   :  { %v4266_v3 = vpack.c.bf16 %v2442_v60, %v2442_v60  ;;  %v2443_v4 = vmax.f32 %v1556_v61, 0.0  ;;  %1767 = vmatmul.mubr.bf16.gmra.mrb[116].mxu0 %v4712_v52  ;;  %v4380_v5 = vpack.c.bf16 %v2556_v0, %v2556_v0  ;;  %v2557_v6 = vmax.f32 %v2012_v1, 0.0  ;;  %2223 = vmatmul.mubr.bf16.gmra.mrb[116].mxu1 %v4717_v55  ;;  %v4730_v61 = vld [vmem:[%s6790_s0 + $0x200] ss:$8 sps:$4 sm:$0xff]   ;;  %v4735_v1 = vld [vmem:[%s6790_s0 + $0x590] ss:$8 sps:$4 sm:$0xff]  }
 0x12a   :  { %1774 = vmatprep.mubr.bf16.mxu0 %v4715_v58  ;;  %2230 = vmatprep.mubr.bf16.mxu1 %v4719_v59 }
 0x12b   :  { %3569 = vst.msk [vmem:[%s6792_s3 + $0x10] sm:$0xf] %vm3564_vm0, %v4266_v3  ;;  %v4267_v7 = vpack.c.bf16 %v2443_v4, %v2443_v4  ;;  %3683 = vst.msk [vmem:[%s6792_s3 + $0x1d8] sm:$0xf] %vm3564_vm0, %v4380_v5  ;;  %v4381_v8 = vpack.c.bf16 %v2557_v6, %v2557_v6  ;;  %v4733_v4 = vld [vmem:[%s6790_s0 + $0x214] ss:$8 sps:$4 sm:$0xff]  }
 0x12c   :  { %v1560_v9 = vpop.f32.mrb[12].mxu0  ;;  %v2016_v10 = vpop.f32.mrb[12].mxu1  ;;  %v4737_v5 = vld [vmem:[%s6790_s0 + $0x5a4] ss:$8 sps:$4 sm:$0xff]  }
 0x12d   :  { %3570 = vst.msk [vmem:[%s6792_s3 + $0x14] sm:$0xf] %vm3564_vm0, %v4267_v7  ;;  %v1561_v11 = vadd.f32 %v5311_v63, %v1560_v9  ;;  %v1562_v12 = vpop.f32.mrb[13].mxu0  ;;  %3684 = vst.msk [vmem:[%s6792_s3 + $0x1dc] sm:$0xf] %vm3564_vm0, %v4381_v8  ;;  %v2017_v14 = vadd.f32 %v5311_v63, %v2016_v10  ;;  %v2018_v15 = vpop.f32.mrb[13].mxu1 }
 0x12e   :  { %v1563_v17 = vpop.f32.mrb[14].mxu0  ;;  %v2019_v18 = vpop.f32.mrb[14].mxu1 }
 0x12f   :  { %v2444_v21 = vmax.f32 %v1561_v11, 0.0  ;;  %v1564_v22 = vadd.f32 %v5311_v63, %v1563_v17  ;;  %v1565_v23 = vpop.f32.mrb[15].mxu0  ;;  %v2558_v24 = vmax.f32 %v2017_v14, 0.0  ;;  %v2020_v25 = vadd.f32 %v5311_v63, %v2019_v18  ;;  %v2021_v26 = vpop.f32.mrb[15].mxu1 }
 0x131   :  { %v4268_v27 = vpack.c.bf16 %v2444_v21, %v2444_v21  ;;  %v2445_v28 = vmax.f32 %v1564_v22, 0.0  ;;  %1775 = vmatmul.mubr.bf16.gmra.mrb[120].mxu0 %v4718_v13  ;;  %v4382_v29 = vpack.c.bf16 %v2558_v24, %v2558_v24  ;;  %v2559_v30 = vmax.f32 %v2020_v25, 0.0  ;;  %2231 = vmatmul.mubr.bf16.gmra.mrb[120].mxu1 %v4723_v16  ;;  %v4736_v22 = vld [vmem:[%s6790_s0 + $0x210] ss:$8 sps:$4 sm:$0xff]   ;;  %v4741_v25 = vld [vmem:[%s6790_s0 + $0x5a0] ss:$8 sps:$4 sm:$0xff]  }
 0x132   :  { %1782 = vmatprep.mubr.bf16.mxu0 %v4721_v19  ;;  %2238 = vmatprep.mubr.bf16.mxu1 %v4725_v20 }
 0x133   :  { %3571 = vst.msk [vmem:[%s6792_s3 + $0x18] sm:$0xf] %vm3564_vm0, %v4268_v27  ;;  %v4269_v31 = vpack.c.bf16 %v2445_v28, %v2445_v28  ;;  %3685 = vst.msk [vmem:[%s6792_s3 + $0x1e0] sm:$0xf] %vm3564_vm0, %v4382_v29  ;;  %v4383_v32 = vpack.c.bf16 %v2559_v30, %v2559_v30  ;;  %v4739_v28 = vld [vmem:[%s6790_s0 + $0x224] ss:$8 sps:$4 sm:$0xff]  }
 0x134   :  { %v1568_v33 = vpop.f32.mrb[16].mxu0  ;;  %v2024_v34 = vpop.f32.mrb[16].mxu1  ;;  %v4743_v29 = vld [vmem:[%s6790_s0 + $0x5b4] ss:$8 sps:$4 sm:$0xff]  }
 0x135   :  { %3572 = vst.msk [vmem:[%s6792_s3 + $0x1c] sm:$0xf] %vm3564_vm0, %v4269_v31  ;;  %v1569_v35 = vadd.f32 %v5311_v63, %v1568_v33  ;;  %v1570_v36 = vpop.f32.mrb[17].mxu0  ;;  %3686 = vst.msk [vmem:[%s6792_s3 + $0x1e4] sm:$0xf] %vm3564_vm0, %v4383_v32  ;;  %v2025_v38 = vadd.f32 %v5311_v63, %v2024_v34  ;;  %v2026_v39 = vpop.f32.mrb[17].mxu1 }
 0x136   :  { %v1571_v41 = vpop.f32.mrb[18].mxu0  ;;  %v2027_v42 = vpop.f32.mrb[18].mxu1 }
 0x137   :  { %v2446_v45 = vmax.f32 %v1569_v35, 0.0  ;;  %v1572_v46 = vadd.f32 %v5311_v63, %v1571_v41  ;;  %v1573_v47 = vpop.f32.mrb[19].mxu0  ;;  %v2560_v48 = vmax.f32 %v2025_v38, 0.0  ;;  %v2028_v49 = vadd.f32 %v5311_v63, %v2027_v42  ;;  %v2029_v50 = vpop.f32.mrb[19].mxu1 }
 0x139   :  { %v4270_v51 = vpack.c.bf16 %v2446_v45, %v2446_v45  ;;  %v2447_v52 = vmax.f32 %v1572_v46, 0.0  ;;  %1783 = vmatmul.mubr.bf16.gmra.mrb[124].mxu0 %v4724_v37  ;;  %v4384_v53 = vpack.c.bf16 %v2560_v48, %v2560_v48  ;;  %v2561_v54 = vmax.f32 %v2028_v49, 0.0  ;;  %2239 = vmatmul.mubr.bf16.gmra.mrb[124].mxu1 %v4729_v40  ;;  %v4742_v46 = vld [vmem:[%s6790_s0 + $0x220] ss:$8 sps:$4 sm:$0xff]   ;;  %v4747_v49 = vld [vmem:[%s6790_s0 + $0x5b0] ss:$8 sps:$4 sm:$0xff]  }
 0x13a   :  { %1790 = vmatprep.mubr.bf16.mxu0 %v4727_v43  ;;  %2246 = vmatprep.mubr.bf16.mxu1 %v4731_v44 }
 0x13b   :  { %3573 = vst.msk [vmem:[%s6792_s3 + $0x20] sm:$0xf] %vm3564_vm0, %v4270_v51  ;;  %v4271_v55 = vpack.c.bf16 %v2447_v52, %v2447_v52  ;;  %3687 = vst.msk [vmem:[%s6792_s3 + $0x1e8] sm:$0xf] %vm3564_vm0, %v4384_v53  ;;  %v4385_v56 = vpack.c.bf16 %v2561_v54, %v2561_v54  ;;  %v4745_v52 = vld [vmem:[%s6790_s0 + $0x234] ss:$8 sps:$4 sm:$0xff]  }
 0x13c   :  { %v1576_v57 = vpop.f32.mrb[20].mxu0  ;;  %v2032_v58 = vpop.f32.mrb[20].mxu1  ;;  %v4749_v53 = vld [vmem:[%s6790_s0 + $0x5c4] ss:$8 sps:$4 sm:$0xff]  }
 0x13d   :  { %3574 = vst.msk [vmem:[%s6792_s3 + $0x24] sm:$0xf] %vm3564_vm0, %v4271_v55  ;;  %v1577_v59 = vadd.f32 %v5311_v63, %v1576_v57  ;;  %v1578_v60 = vpop.f32.mrb[21].mxu0  ;;  %3688 = vst.msk [vmem:[%s6792_s3 + $0x1ec] sm:$0xf] %vm3564_vm0, %v4385_v56  ;;  %v2033_v62 = vadd.f32 %v5311_v63, %v2032_v58  ;;  %v2034_v0 = vpop.f32.mrb[21].mxu1 }
 0x13e   :  { %v1579_v2 = vpop.f32.mrb[22].mxu0  ;;  %v2035_v3 = vpop.f32.mrb[22].mxu1 }
 0x13f   :  { %v2448_v6 = vmax.f32 %v1577_v59, 0.0  ;;  %v1580_v7 = vadd.f32 %v5311_v63, %v1579_v2  ;;  %v1581_v8 = vpop.f32.mrb[23].mxu0  ;;  %v2562_v9 = vmax.f32 %v2033_v62, 0.0  ;;  %v2036_v10 = vadd.f32 %v5311_v63, %v2035_v3  ;;  %v2037_v11 = vpop.f32.mrb[23].mxu1 }
 0x141   :  { %v4272_v12 = vpack.c.bf16 %v2448_v6, %v2448_v6  ;;  %v2449_v13 = vmax.f32 %v1580_v7, 0.0  ;;  %1791 = vmatmul.mubr.bf16.gmra.mrb[128].mxu0 %v4730_v61  ;;  %v4386_v14 = vpack.c.bf16 %v2562_v9, %v2562_v9  ;;  %v2563_v15 = vmax.f32 %v2036_v10, 0.0  ;;  %2247 = vmatmul.mubr.bf16.gmra.mrb[128].mxu1 %v4735_v1  ;;  %v4748_v7 = vld [vmem:[%s6790_s0 + $0x230] ss:$8 sps:$4 sm:$0xff]   ;;  %v4753_v10 = vld [vmem:[%s6790_s0 + $0x5c0] ss:$8 sps:$4 sm:$0xff]  }
 0x142   :  { %1798 = vmatprep.mubr.bf16.mxu0 %v4733_v4  ;;  %2254 = vmatprep.mubr.bf16.mxu1 %v4737_v5 }
 0x143   :  { %3575 = vst.msk [vmem:[%s6792_s3 + $0x28] sm:$0xf] %vm3564_vm0, %v4272_v12  ;;  %v4273_v16 = vpack.c.bf16 %v2449_v13, %v2449_v13  ;;  %3689 = vst.msk [vmem:[%s6792_s3 + $0x1f0] sm:$0xf] %vm3564_vm0, %v4386_v14  ;;  %v4387_v17 = vpack.c.bf16 %v2563_v15, %v2563_v15  ;;  %v4751_v13 = vld [vmem:[%s6790_s0 + $0x244] ss:$8 sps:$4 sm:$0xff]  }
 0x144   :  { %v1584_v18 = vpop.f32.mrb[24].mxu0  ;;  %v2040_v19 = vpop.f32.mrb[24].mxu1  ;;  %v4755_v14 = vld [vmem:[%s6790_s0 + $0x5d4] ss:$8 sps:$4 sm:$0xff]  }
 0x145   :  { %3576 = vst.msk [vmem:[%s6792_s3 + $0x2c] sm:$0xf] %vm3564_vm0, %v4273_v16  ;;  %v1585_v20 = vadd.f32 %v5311_v63, %v1584_v18  ;;  %v1586_v21 = vpop.f32.mrb[25].mxu0  ;;  %3690 = vst.msk [vmem:[%s6792_s3 + $0x1f4] sm:$0xf] %vm3564_vm0, %v4387_v17  ;;  %v2041_v23 = vadd.f32 %v5311_v63, %v2040_v19  ;;  %v2042_v24 = vpop.f32.mrb[25].mxu1 }
 0x146   :  { %v1587_v26 = vpop.f32.mrb[26].mxu0  ;;  %v2043_v27 = vpop.f32.mrb[26].mxu1 }
 0x147   :  { %v2450_v30 = vmax.f32 %v1585_v20, 0.0  ;;  %v1588_v31 = vadd.f32 %v5311_v63, %v1587_v26  ;;  %v1589_v32 = vpop.f32.mrb[27].mxu0  ;;  %v2564_v33 = vmax.f32 %v2041_v23, 0.0  ;;  %v2044_v34 = vadd.f32 %v5311_v63, %v2043_v27  ;;  %v2045_v35 = vpop.f32.mrb[27].mxu1 }
 0x149   :  { %v4274_v36 = vpack.c.bf16 %v2450_v30, %v2450_v30  ;;  %v2451_v37 = vmax.f32 %v1588_v31, 0.0  ;;  %1799 = vmatmul.mubr.bf16.gmra.mrb[132].mxu0 %v4736_v22  ;;  %v4388_v38 = vpack.c.bf16 %v2564_v33, %v2564_v33  ;;  %v2565_v39 = vmax.f32 %v2044_v34, 0.0  ;;  %2255 = vmatmul.mubr.bf16.gmra.mrb[132].mxu1 %v4741_v25  ;;  %v4754_v31 = vld [vmem:[%s6790_s0 + $0x240] ss:$8 sps:$4 sm:$0xff]   ;;  %v4759_v34 = vld [vmem:[%s6790_s0 + $0x5d0] ss:$8 sps:$4 sm:$0xff]  }
 0x14a   :  { %1806 = vmatprep.mubr.bf16.mxu0 %v4739_v28  ;;  %2262 = vmatprep.mubr.bf16.mxu1 %v4743_v29 }
 0x14b   :  { %3577 = vst.msk [vmem:[%s6792_s3 + $0x30] sm:$0xf] %vm3564_vm0, %v4274_v36  ;;  %v4275_v40 = vpack.c.bf16 %v2451_v37, %v2451_v37  ;;  %3691 = vst.msk [vmem:[%s6792_s3 + $0x1f8] sm:$0xf] %vm3564_vm0, %v4388_v38  ;;  %v4389_v41 = vpack.c.bf16 %v2565_v39, %v2565_v39  ;;  %v4757_v37 = vld [vmem:[%s6790_s0 + $0x254] ss:$8 sps:$4 sm:$0xff]  }
 0x14c   :  { %v1592_v42 = vpop.f32.mrb[28].mxu0  ;;  %v2048_v43 = vpop.f32.mrb[28].mxu1  ;;  %v4761_v38 = vld [vmem:[%s6790_s0 + $0x5e4] ss:$8 sps:$4 sm:$0xff]  }
 0x14d   :  { %3578 = vst.msk [vmem:[%s6792_s3 + $0x34] sm:$0xf] %vm3564_vm0, %v4275_v40  ;;  %v1593_v44 = vadd.f32 %v5311_v63, %v1592_v42  ;;  %v1594_v45 = vpop.f32.mrb[29].mxu0  ;;  %3692 = vst.msk [vmem:[%s6792_s3 + $0x1fc] sm:$0xf] %vm3564_vm0, %v4389_v41  ;;  %v2049_v47 = vadd.f32 %v5311_v63, %v2048_v43  ;;  %v2050_v48 = vpop.f32.mrb[29].mxu1 }
 0x14e   :  { %v1595_v50 = vpop.f32.mrb[30].mxu0  ;;  %v2051_v51 = vpop.f32.mrb[30].mxu1 }
 0x14f   :  { %v2452_v54 = vmax.f32 %v1593_v44, 0.0  ;;  %v1596_v55 = vadd.f32 %v5311_v63, %v1595_v50  ;;  %v1597_v56 = vpop.f32.mrb[31].mxu0  ;;  %v2566_v57 = vmax.f32 %v2049_v47, 0.0  ;;  %v2052_v58 = vadd.f32 %v5311_v63, %v2051_v51  ;;  %v2053_v59 = vpop.f32.mrb[31].mxu1 }
 0x151   :  { %v4276_v60 = vpack.c.bf16 %v2452_v54, %v2452_v54  ;;  %v2453_v61 = vmax.f32 %v1596_v55, 0.0  ;;  %1807 = vmatmul.mubr.bf16.gmra.mrb[136].mxu0 %v4742_v46  ;;  %v4390_v62 = vpack.c.bf16 %v2566_v57, %v2566_v57  ;;  %v2567_v0 = vmax.f32 %v2052_v58, 0.0  ;;  %2263 = vmatmul.mubr.bf16.gmra.mrb[136].mxu1 %v4747_v49  ;;  %v4760_v55 = vld [vmem:[%s6790_s0 + $0x250] ss:$8 sps:$4 sm:$0xff]   ;;  %v4765_v58 = vld [vmem:[%s6790_s0 + $0x5e0] ss:$8 sps:$4 sm:$0xff]  }
 0x152   :  { %1814 = vmatprep.mubr.bf16.mxu0 %v4745_v52  ;;  %2270 = vmatprep.mubr.bf16.mxu1 %v4749_v53 }
 0x153   :  { %3579 = vst.msk [vmem:[%s6792_s3 + $0x38] sm:$0xf] %vm3564_vm0, %v4276_v60  ;;  %v4277_v1 = vpack.c.bf16 %v2453_v61, %v2453_v61  ;;  %3693 = vst.msk [vmem:[%s6792_s3 + $0x200] sm:$0xf] %vm3564_vm0, %v4390_v62  ;;  %v4391_v2 = vpack.c.bf16 %v2567_v0, %v2567_v0  ;;  %v4763_v61 = vld [vmem:[%s6790_s0 + $0x264] ss:$8 sps:$4 sm:$0xff]  }
 0x154   :  { %v1600_v3 = vpop.f32.mrb[32].mxu0  ;;  %v2056_v4 = vpop.f32.mrb[32].mxu1  ;;  %v4767_v62 = vld [vmem:[%s6790_s0 + $0x5f4] ss:$8 sps:$4 sm:$0xff]  }
 0x155   :  { %3580 = vst.msk [vmem:[%s6792_s3 + $0x3c] sm:$0xf] %vm3564_vm0, %v4277_v1  ;;  %v1601_v5 = vadd.f32 %v5311_v63, %v1600_v3  ;;  %v1602_v6 = vpop.f32.mrb[33].mxu0  ;;  %3694 = vst.msk [vmem:[%s6792_s3 + $0x204] sm:$0xf] %vm3564_vm0, %v4391_v2  ;;  %v2057_v8 = vadd.f32 %v5311_v63, %v2056_v4  ;;  %v2058_v9 = vpop.f32.mrb[33].mxu1 }
 0x156   :  { %v1603_v11 = vpop.f32.mrb[34].mxu0  ;;  %v2059_v12 = vpop.f32.mrb[34].mxu1 }
 0x157   :  { %v2454_v15 = vmax.f32 %v1601_v5, 0.0  ;;  %v1604_v16 = vadd.f32 %v5311_v63, %v1603_v11  ;;  %v1605_v17 = vpop.f32.mrb[35].mxu0  ;;  %v2568_v18 = vmax.f32 %v2057_v8, 0.0  ;;  %v2060_v19 = vadd.f32 %v5311_v63, %v2059_v12  ;;  %v2061_v20 = vpop.f32.mrb[35].mxu1 }
 0x159   :  { %v4278_v21 = vpack.c.bf16 %v2454_v15, %v2454_v15  ;;  %v2455_v22 = vmax.f32 %v1604_v16, 0.0  ;;  %1815 = vmatmul.mubr.bf16.gmra.mrb[140].mxu0 %v4748_v7  ;;  %v4392_v23 = vpack.c.bf16 %v2568_v18, %v2568_v18  ;;  %v2569_v24 = vmax.f32 %v2060_v19, 0.0  ;;  %2271 = vmatmul.mubr.bf16.gmra.mrb[140].mxu1 %v4753_v10  ;;  %v4766_v16 = vld [vmem:[%s6790_s0 + $0x260] ss:$8 sps:$4 sm:$0xff]   ;;  %v4771_v19 = vld [vmem:[%s6790_s0 + $0x5f0] ss:$8 sps:$4 sm:$0xff]  }
 0x15a   :  { %1822 = vmatprep.mubr.bf16.mxu0 %v4751_v13  ;;  %2278 = vmatprep.mubr.bf16.mxu1 %v4755_v14 }
 0x15b   :  { %3581 = vst.msk [vmem:[%s6792_s3 + $0x40] sm:$0xf] %vm3564_vm0, %v4278_v21  ;;  %v4279_v25 = vpack.c.bf16 %v2455_v22, %v2455_v22  ;;  %3695 = vst.msk [vmem:[%s6792_s3 + $0x208] sm:$0xf] %vm3564_vm0, %v4392_v23  ;;  %v4393_v26 = vpack.c.bf16 %v2569_v24, %v2569_v24  ;;  %v4769_v22 = vld [vmem:[%s6790_s0 + $0x274] ss:$8 sps:$4 sm:$0xff]  }
 0x15c   :  { %v1608_v27 = vpop.f32.mrb[36].mxu0  ;;  %v2064_v28 = vpop.f32.mrb[36].mxu1  ;;  %v4773_v23 = vld [vmem:[%s6790_s0 + $0x604] ss:$8 sps:$4 sm:$0xff]  }
 0x15d   :  { %3582 = vst.msk [vmem:[%s6792_s3 + $0x44] sm:$0xf] %vm3564_vm0, %v4279_v25  ;;  %v1609_v29 = vadd.f32 %v5311_v63, %v1608_v27  ;;  %v1610_v30 = vpop.f32.mrb[37].mxu0  ;;  %3696 = vst.msk [vmem:[%s6792_s3 + $0x20c] sm:$0xf] %vm3564_vm0, %v4393_v26  ;;  %v2065_v32 = vadd.f32 %v5311_v63, %v2064_v28  ;;  %v2066_v33 = vpop.f32.mrb[37].mxu1 }
 0x15e   :  { %v1611_v35 = vpop.f32.mrb[38].mxu0  ;;  %v2067_v36 = vpop.f32.mrb[38].mxu1 }
 0x15f   :  { %v2456_v39 = vmax.f32 %v1609_v29, 0.0  ;;  %v1612_v40 = vadd.f32 %v5311_v63, %v1611_v35  ;;  %v1613_v41 = vpop.f32.mrb[39].mxu0  ;;  %v2570_v42 = vmax.f32 %v2065_v32, 0.0  ;;  %v2068_v43 = vadd.f32 %v5311_v63, %v2067_v36  ;;  %v2069_v44 = vpop.f32.mrb[39].mxu1 }
 0x161   :  { %v4280_v45 = vpack.c.bf16 %v2456_v39, %v2456_v39  ;;  %v2457_v46 = vmax.f32 %v1612_v40, 0.0  ;;  %1823 = vmatmul.mubr.bf16.gmra.mrb[144].mxu0 %v4754_v31  ;;  %v4394_v47 = vpack.c.bf16 %v2570_v42, %v2570_v42  ;;  %v2571_v48 = vmax.f32 %v2068_v43, 0.0  ;;  %2279 = vmatmul.mubr.bf16.gmra.mrb[144].mxu1 %v4759_v34  ;;  %v4772_v40 = vld [vmem:[%s6790_s0 + $0x270] ss:$8 sps:$4 sm:$0xff]   ;;  %v4777_v43 = vld [vmem:[%s6790_s0 + $0x600] ss:$8 sps:$4 sm:$0xff]  }
 0x162   :  { %1830 = vmatprep.mubr.bf16.mxu0 %v4757_v37  ;;  %2286 = vmatprep.mubr.bf16.mxu1 %v4761_v38 }
 0x163   :  { %3583 = vst.msk [vmem:[%s6792_s3 + $0x48] sm:$0xf] %vm3564_vm0, %v4280_v45  ;;  %v4281_v49 = vpack.c.bf16 %v2457_v46, %v2457_v46  ;;  %3697 = vst.msk [vmem:[%s6792_s3 + $0x210] sm:$0xf] %vm3564_vm0, %v4394_v47  ;;  %v4395_v50 = vpack.c.bf16 %v2571_v48, %v2571_v48  ;;  %v4775_v46 = vld [vmem:[%s6790_s0 + $0x284] ss:$8 sps:$4 sm:$0xff]  }
 0x164   :  { %v1616_v51 = vpop.f32.mrb[40].mxu0  ;;  %v2072_v52 = vpop.f32.mrb[40].mxu1  ;;  %v4779_v47 = vld [vmem:[%s6790_s0 + $0x614] ss:$8 sps:$4 sm:$0xff]  }
 0x165   :  { %3584 = vst.msk [vmem:[%s6792_s3 + $0x4c] sm:$0xf] %vm3564_vm0, %v4281_v49  ;;  %v1617_v53 = vadd.f32 %v5311_v63, %v1616_v51  ;;  %v1618_v54 = vpop.f32.mrb[41].mxu0  ;;  %3698 = vst.msk [vmem:[%s6792_s3 + $0x214] sm:$0xf] %vm3564_vm0, %v4395_v50  ;;  %v2073_v56 = vadd.f32 %v5311_v63, %v2072_v52  ;;  %v2074_v57 = vpop.f32.mrb[41].mxu1 }
 0x166   :  { %v1619_v59 = vpop.f32.mrb[42].mxu0  ;;  %v2075_v60 = vpop.f32.mrb[42].mxu1 }
 0x167   :  { %v2458_v0 = vmax.f32 %v1617_v53, 0.0  ;;  %v1620_v1 = vadd.f32 %v5311_v63, %v1619_v59  ;;  %v1621_v2 = vpop.f32.mrb[43].mxu0  ;;  %v2572_v3 = vmax.f32 %v2073_v56, 0.0  ;;  %v2076_v4 = vadd.f32 %v5311_v63, %v2075_v60  ;;  %v2077_v5 = vpop.f32.mrb[43].mxu1 }
 0x169   :  { %v4282_v6 = vpack.c.bf16 %v2458_v0, %v2458_v0  ;;  %v2459_v7 = vmax.f32 %v1620_v1, 0.0  ;;  %1831 = vmatmul.mubr.bf16.gmra.mrb[148].mxu0 %v4760_v55  ;;  %v4396_v8 = vpack.c.bf16 %v2572_v3, %v2572_v3  ;;  %v2573_v9 = vmax.f32 %v2076_v4, 0.0  ;;  %2287 = vmatmul.mubr.bf16.gmra.mrb[148].mxu1 %v4765_v58  ;;  %v4778_v1 = vld [vmem:[%s6790_s0 + $0x280] ss:$8 sps:$4 sm:$0xff]   ;;  %v4783_v4 = vld [vmem:[%s6790_s0 + $0x610] ss:$8 sps:$4 sm:$0xff]  }
 0x16a   :  { %1838 = vmatprep.mubr.bf16.mxu0 %v4763_v61  ;;  %2294 = vmatprep.mubr.bf16.mxu1 %v4767_v62 }
 0x16b   :  { %3585 = vst.msk [vmem:[%s6792_s3 + $0x50] sm:$0xf] %vm3564_vm0, %v4282_v6  ;;  %v4283_v10 = vpack.c.bf16 %v2459_v7, %v2459_v7  ;;  %3699 = vst.msk [vmem:[%s6792_s3 + $0x218] sm:$0xf] %vm3564_vm0, %v4396_v8  ;;  %v4397_v11 = vpack.c.bf16 %v2573_v9, %v2573_v9  ;;  %v4781_v7 = vld [vmem:[%s6790_s0 + $0x294] ss:$8 sps:$4 sm:$0xff]  }
 0x16c   :  { %v1624_v12 = vpop.f32.mrb[44].mxu0  ;;  %v2080_v13 = vpop.f32.mrb[44].mxu1  ;;  %v4785_v8 = vld [vmem:[%s6790_s0 + $0x624] ss:$8 sps:$4 sm:$0xff]  }
 0x16d   :  { %3586 = vst.msk [vmem:[%s6792_s3 + $0x54] sm:$0xf] %vm3564_vm0, %v4283_v10  ;;  %v1625_v14 = vadd.f32 %v5311_v63, %v1624_v12  ;;  %v1626_v15 = vpop.f32.mrb[45].mxu0  ;;  %3700 = vst.msk [vmem:[%s6792_s3 + $0x21c] sm:$0xf] %vm3564_vm0, %v4397_v11  ;;  %v2081_v17 = vadd.f32 %v5311_v63, %v2080_v13  ;;  %v2082_v18 = vpop.f32.mrb[45].mxu1 }
 0x16e   :  { %v1627_v20 = vpop.f32.mrb[46].mxu0  ;;  %v2083_v21 = vpop.f32.mrb[46].mxu1 }
 0x16f   :  { %v2460_v24 = vmax.f32 %v1625_v14, 0.0  ;;  %v1628_v25 = vadd.f32 %v5311_v63, %v1627_v20  ;;  %v1629_v26 = vpop.f32.mrb[47].mxu0  ;;  %v2574_v27 = vmax.f32 %v2081_v17, 0.0  ;;  %v2084_v28 = vadd.f32 %v5311_v63, %v2083_v21  ;;  %v2085_v29 = vpop.f32.mrb[47].mxu1 }
 0x171   :  { %v4284_v30 = vpack.c.bf16 %v2460_v24, %v2460_v24  ;;  %v2461_v31 = vmax.f32 %v1628_v25, 0.0  ;;  %1839 = vmatmul.mubr.bf16.gmra.mrb[152].mxu0 %v4766_v16  ;;  %v4398_v32 = vpack.c.bf16 %v2574_v27, %v2574_v27  ;;  %v2575_v33 = vmax.f32 %v2084_v28, 0.0  ;;  %2295 = vmatmul.mubr.bf16.gmra.mrb[152].mxu1 %v4771_v19  ;;  %v4784_v25 = vld [vmem:[%s6790_s0 + $0x290] ss:$8 sps:$4 sm:$0xff]   ;;  %v4789_v28 = vld [vmem:[%s6790_s0 + $0x620] ss:$8 sps:$4 sm:$0xff]  }
 0x172   :  { %1846 = vmatprep.mubr.bf16.mxu0 %v4769_v22  ;;  %2302 = vmatprep.mubr.bf16.mxu1 %v4773_v23 }
 0x173   :  { %3587 = vst.msk [vmem:[%s6792_s3 + $0x58] sm:$0xf] %vm3564_vm0, %v4284_v30  ;;  %v4285_v34 = vpack.c.bf16 %v2461_v31, %v2461_v31  ;;  %3701 = vst.msk [vmem:[%s6792_s3 + $0x220] sm:$0xf] %vm3564_vm0, %v4398_v32  ;;  %v4399_v35 = vpack.c.bf16 %v2575_v33, %v2575_v33  ;;  %v4787_v31 = vld [vmem:[%s6790_s0 + $0x2a4] ss:$8 sps:$4 sm:$0xff]  }
 0x174   :  { %v1632_v36 = vpop.f32.mrb[48].mxu0  ;;  %v2088_v37 = vpop.f32.mrb[48].mxu1  ;;  %v4791_v32 = vld [vmem:[%s6790_s0 + $0x634] ss:$8 sps:$4 sm:$0xff]  }
 0x175   :  { %3588 = vst.msk [vmem:[%s6792_s3 + $0x5c] sm:$0xf] %vm3564_vm0, %v4285_v34  ;;  %v1633_v38 = vadd.f32 %v5311_v63, %v1632_v36  ;;  %v1634_v39 = vpop.f32.mrb[49].mxu0  ;;  %3702 = vst.msk [vmem:[%s6792_s3 + $0x224] sm:$0xf] %vm3564_vm0, %v4399_v35  ;;  %v2089_v41 = vadd.f32 %v5311_v63, %v2088_v37  ;;  %v2090_v42 = vpop.f32.mrb[49].mxu1 }
 0x176   :  { %v1635_v44 = vpop.f32.mrb[50].mxu0  ;;  %v2091_v45 = vpop.f32.mrb[50].mxu1 }
 0x177   :  { %v2462_v48 = vmax.f32 %v1633_v38, 0.0  ;;  %v1636_v49 = vadd.f32 %v5311_v63, %v1635_v44  ;;  %v1637_v50 = vpop.f32.mrb[51].mxu0  ;;  %v2576_v51 = vmax.f32 %v2089_v41, 0.0  ;;  %v2092_v52 = vadd.f32 %v5311_v63, %v2091_v45  ;;  %v2093_v53 = vpop.f32.mrb[51].mxu1 }
 0x179   :  { %v4286_v54 = vpack.c.bf16 %v2462_v48, %v2462_v48  ;;  %v2463_v55 = vmax.f32 %v1636_v49, 0.0  ;;  %1847 = vmatmul.mubr.bf16.gmra.mrb[156].mxu0 %v4772_v40  ;;  %v4400_v56 = vpack.c.bf16 %v2576_v51, %v2576_v51  ;;  %v2577_v57 = vmax.f32 %v2092_v52, 0.0  ;;  %2303 = vmatmul.mubr.bf16.gmra.mrb[156].mxu1 %v4777_v43  ;;  %v4790_v49 = vld [vmem:[%s6790_s0 + $0x2a0] ss:$8 sps:$4 sm:$0xff]   ;;  %v4795_v52 = vld [vmem:[%s6790_s0 + $0x630] ss:$8 sps:$4 sm:$0xff]  }
 0x17a   :  { %1854 = vmatprep.mubr.bf16.mxu0 %v4775_v46  ;;  %2310 = vmatprep.mubr.bf16.mxu1 %v4779_v47 }
 0x17b   :  { %3589 = vst.msk [vmem:[%s6792_s3 + $0x60] sm:$0xf] %vm3564_vm0, %v4286_v54  ;;  %v4287_v58 = vpack.c.bf16 %v2463_v55, %v2463_v55  ;;  %3703 = vst.msk [vmem:[%s6792_s3 + $0x228] sm:$0xf] %vm3564_vm0, %v4400_v56  ;;  %v4401_v59 = vpack.c.bf16 %v2577_v57, %v2577_v57  ;;  %v4793_v55 = vld [vmem:[%s6790_s0 + $0x2b4] ss:$8 sps:$4 sm:$0xff]  }
 0x17c   :  { %v1640_v60 = vpop.f32.mrb[52].mxu0  ;;  %v2096_v61 = vpop.f32.mrb[52].mxu1  ;;  %v4797_v56 = vld [vmem:[%s6790_s0 + $0x644] ss:$8 sps:$4 sm:$0xff]  }
 0x17d   :  { %3590 = vst.msk [vmem:[%s6792_s3 + $0x64] sm:$0xf] %vm3564_vm0, %v4287_v58  ;;  %v1641_v62 = vadd.f32 %v5311_v63, %v1640_v60  ;;  %v1642_v0 = vpop.f32.mrb[53].mxu0  ;;  %3704 = vst.msk [vmem:[%s6792_s3 + $0x22c] sm:$0xf] %vm3564_vm0, %v4401_v59  ;;  %v2097_v2 = vadd.f32 %v5311_v63, %v2096_v61  ;;  %v2098_v3 = vpop.f32.mrb[53].mxu1 }
 0x17e   :  { %v1643_v5 = vpop.f32.mrb[54].mxu0  ;;  %v2099_v6 = vpop.f32.mrb[54].mxu1 }
 0x17f   :  { %v2464_v9 = vmax.f32 %v1641_v62, 0.0  ;;  %v1644_v10 = vadd.f32 %v5311_v63, %v1643_v5  ;;  %v1645_v11 = vpop.f32.mrb[55].mxu0  ;;  %v2578_v12 = vmax.f32 %v2097_v2, 0.0  ;;  %v2100_v13 = vadd.f32 %v5311_v63, %v2099_v6  ;;  %v2101_v14 = vpop.f32.mrb[55].mxu1 }
 0x181   :  { %v4288_v15 = vpack.c.bf16 %v2464_v9, %v2464_v9  ;;  %v2465_v16 = vmax.f32 %v1644_v10, 0.0  ;;  %1855 = vmatmul.mubr.bf16.gmra.mrb[160].mxu0 %v4778_v1  ;;  %v4402_v17 = vpack.c.bf16 %v2578_v12, %v2578_v12  ;;  %v2579_v18 = vmax.f32 %v2100_v13, 0.0  ;;  %2311 = vmatmul.mubr.bf16.gmra.mrb[160].mxu1 %v4783_v4  ;;  %v4796_v10 = vld [vmem:[%s6790_s0 + $0x2b0] ss:$8 sps:$4 sm:$0xff]   ;;  %v4801_v13 = vld [vmem:[%s6790_s0 + $0x640] ss:$8 sps:$4 sm:$0xff]  }
 0x182   :  { %1862 = vmatprep.mubr.bf16.mxu0 %v4781_v7  ;;  %2318 = vmatprep.mubr.bf16.mxu1 %v4785_v8  ;;  %v5824_v7 = vld [vmem:[%s6791_s2] ss:$0 sm:$0xff] }
 0x183   :  { %3591 = vst.msk [vmem:[%s6792_s3 + $0x68] sm:$0xf] %vm3564_vm0, %v4288_v15  ;;  %v4289_v19 = vpack.c.bf16 %v2465_v16, %v2465_v16  ;;  %3705 = vst.msk [vmem:[%s6792_s3 + $0x230] sm:$0xf] %vm3564_vm0, %v4402_v17  ;;  %v4403_v20 = vpack.c.bf16 %v2579_v18, %v2579_v18  ;;  %v4799_v16 = vld [vmem:[%s6790_s0 + $0x2c4] ss:$8 sps:$4 sm:$0xff]  }
 0x184   :  { %v1648_v21 = vpop.f32.mrb[56].mxu0  ;;  %v2104_v22 = vpop.f32.mrb[56].mxu1  ;;  %v4803_v17 = vld [vmem:[%s6790_s0 + $0x654] ss:$8 sps:$4 sm:$0xff]  }
 0x185   :  { %3592 = vst.msk [vmem:[%s6792_s3 + $0x6c] sm:$0xf] %vm3564_vm0, %v4289_v19  ;;  %v1649_v23 = vadd.f32 %v5311_v63, %v1648_v21  ;;  %v1650_v24 = vpop.f32.mrb[57].mxu0  ;;  %3706 = vst.msk [vmem:[%s6792_s3 + $0x234] sm:$0xf] %vm3564_vm0, %v4403_v20  ;;  %v2105_v26 = vadd.f32 %v5311_v63, %v2104_v22  ;;  %v2106_v27 = vpop.f32.mrb[57].mxu1 }
 0x186   :  { %v1651_v29 = vpop.f32.mrb[58].mxu0  ;;  %v2107_v30 = vpop.f32.mrb[58].mxu1 }
 0x187   :  { %v2466_v33 = vmax.f32 %v1649_v23, 0.0  ;;  %v1652_v34 = vadd.f32 %v5311_v63, %v1651_v29  ;;  %v1653_v35 = vpop.f32.mrb[59].mxu0  ;;  %v2580_v36 = vmax.f32 %v2105_v26, 0.0  ;;  %v2108_v37 = vadd.f32 %v5311_v63, %v2107_v30  ;;  %v2109_v38 = vpop.f32.mrb[59].mxu1 }
 0x189   :  { %v4290_v39 = vpack.c.bf16 %v2466_v33, %v2466_v33  ;;  %v2467_v40 = vmax.f32 %v1652_v34, 0.0  ;;  %1863 = vmatmul.mubr.bf16.gmra.mrb[164].mxu0 %v4784_v25  ;;  %v4404_v41 = vpack.c.bf16 %v2580_v36, %v2580_v36  ;;  %v2581_v42 = vmax.f32 %v2108_v37, 0.0  ;;  %2319 = vmatmul.mubr.bf16.gmra.mrb[164].mxu1 %v4789_v28  ;;  %v4802_v34 = vld [vmem:[%s6790_s0 + $0x2c0] ss:$8 sps:$4 sm:$0xff]   ;;  %v4807_v37 = vld [vmem:[%s6790_s0 + $0x650] ss:$8 sps:$4 sm:$0xff]  }
 0x18a   :  { %1870 = vmatprep.mubr.bf16.mxu0 %v4787_v31  ;;  %2326 = vmatprep.mubr.bf16.mxu1 %v4791_v32 }
 0x18b   :  { %3593 = vst.msk [vmem:[%s6792_s3 + $0x70] sm:$0xf] %vm3564_vm0, %v4290_v39  ;;  %v4291_v43 = vpack.c.bf16 %v2467_v40, %v2467_v40  ;;  %3707 = vst.msk [vmem:[%s6792_s3 + $0x238] sm:$0xf] %vm3564_vm0, %v4404_v41  ;;  %v4405_v44 = vpack.c.bf16 %v2581_v42, %v2581_v42  ;;  %v4805_v40 = vld [vmem:[%s6790_s0 + $0x2d4] ss:$8 sps:$4 sm:$0xff]  }
 0x18c   :  { %v1656_v45 = vpop.f32.mrb[60].mxu0  ;;  %v2112_v46 = vpop.f32.mrb[60].mxu1  ;;  %v4809_v41 = vld [vmem:[%s6790_s0 + $0x664] ss:$8 sps:$4 sm:$0xff]  }
 0x18d   :  { %3594 = vst.msk [vmem:[%s6792_s3 + $0x74] sm:$0xf] %vm3564_vm0, %v4291_v43  ;;  %v1657_v47 = vadd.f32 %v5311_v63, %v1656_v45  ;;  %v1658_v48 = vpop.f32.mrb[61].mxu0  ;;  %3708 = vst.msk [vmem:[%s6792_s3 + $0x23c] sm:$0xf] %vm3564_vm0, %v4405_v44  ;;  %v2113_v50 = vadd.f32 %v5311_v63, %v2112_v46  ;;  %v2114_v51 = vpop.f32.mrb[61].mxu1 }
 0x18e   :  { %v1659_v53 = vpop.f32.mrb[62].mxu0  ;;  %v2115_v54 = vpop.f32.mrb[62].mxu1 }
 0x18f   :  { %v2468_v57 = vmax.f32 %v1657_v47, 0.0  ;;  %v1660_v58 = vadd.f32 %v5311_v63, %v1659_v53  ;;  %v1661_v59 = vpop.f32.mrb[63].mxu0  ;;  %v2582_v60 = vmax.f32 %v2113_v50, 0.0  ;;  %v2116_v61 = vadd.f32 %v5311_v63, %v2115_v54  ;;  %v2117_v62 = vpop.f32.mrb[63].mxu1 }
 0x191   :  { %v4292_v0 = vpack.c.bf16 %v2468_v57, %v2468_v57  ;;  %v2469_v1 = vmax.f32 %v1660_v58, 0.0  ;;  %1871 = vmatmul.mubr.bf16.gmra.mrb[168].mxu0 %v4790_v49  ;;  %v4406_v2 = vpack.c.bf16 %v2582_v60, %v2582_v60  ;;  %v2583_v3 = vmax.f32 %v2116_v61, 0.0  ;;  %2327 = vmatmul.mubr.bf16.gmra.mrb[168].mxu1 %v4795_v52  ;;  %v4808_v58 = vld [vmem:[%s6790_s0 + $0x2d0] ss:$8 sps:$4 sm:$0xff]   ;;  %v4813_v61 = vld [vmem:[%s6790_s0 + $0x660] ss:$8 sps:$4 sm:$0xff]  }
 0x192   :  { %1878 = vmatprep.mubr.bf16.mxu0 %v4793_v55  ;;  %2334 = vmatprep.mubr.bf16.mxu1 %v4797_v56 }
 0x193   :  { %3595 = vst.msk [vmem:[%s6792_s3 + $0x78] sm:$0xf] %vm3564_vm0, %v4292_v0  ;;  %v4293_v4 = vpack.c.bf16 %v2469_v1, %v2469_v1  ;;  %3709 = vst.msk [vmem:[%s6792_s3 + $0x240] sm:$0xf] %vm3564_vm0, %v4406_v2  ;;  %v4407_v63 = vpack.c.bf16 %v2583_v3, %v2583_v3  ;;  %v4811_v1 = vld [vmem:[%s6790_s0 + $0x2e4] ss:$8 sps:$4 sm:$0xff]  }
 0x194   :  { %v1664_v5 = vpop.f32.mrb[64].mxu0  ;;  %v2120_v6 = vpop.f32.mrb[64].mxu1  ;;  %v4815_v2 = vld [vmem:[%s6790_s0 + $0x674] ss:$8 sps:$4 sm:$0xff]  }
 0x195   :  { %3596 = vst.msk [vmem:[%s6792_s3 + $0x7c] sm:$0xf] %vm3564_vm0, %v4293_v4  ;;  %v1665_v8 = vadd.f32 %v5824_v7, %v1664_v5  ;;  %v1666_v9 = vpop.f32.mrb[65].mxu0  ;;  %3710 = vst.msk [vmem:[%s6792_s3 + $0x244] sm:$0xf] %vm3564_vm0, %v4407_v63  ;;  %v2121_v11 = vadd.f32 %v5824_v7, %v2120_v6  ;;  %v2122_v12 = vpop.f32.mrb[65].mxu1 }
 0x196   :  { %v1667_v14 = vpop.f32.mrb[66].mxu0  ;;  %v2123_v15 = vpop.f32.mrb[66].mxu1 }
 0x197   :  { %v2470_v18 = vmax.f32 %v1665_v8, 0.0  ;;  %v1668_v19 = vadd.f32 %v5824_v7, %v1667_v14  ;;  %v1669_v20 = vpop.f32.mrb[67].mxu0  ;;  %v2584_v21 = vmax.f32 %v2121_v11, 0.0  ;;  %v2124_v22 = vadd.f32 %v5824_v7, %v2123_v15  ;;  %v2125_v23 = vpop.f32.mrb[67].mxu1 }
 0x199   :  { %v4294_v24 = vpack.c.bf16 %v2470_v18, %v2470_v18  ;;  %v2471_v25 = vmax.f32 %v1668_v19, 0.0  ;;  %1879 = vmatmul.mubr.bf16.gmra.mrb[172].mxu0 %v4796_v10  ;;  %v4408_v26 = vpack.c.bf16 %v2584_v21, %v2584_v21  ;;  %v2585_v27 = vmax.f32 %v2124_v22, 0.0  ;;  %2335 = vmatmul.mubr.bf16.gmra.mrb[172].mxu1 %v4801_v13  ;;  %v4814_v19 = vld [vmem:[%s6790_s0 + $0x2e0] ss:$8 sps:$4 sm:$0xff]   ;;  %v4819_v22 = vld [vmem:[%s6790_s0 + $0x670] ss:$8 sps:$4 sm:$0xff]  }
 0x19a   :  { %1886 = vmatprep.mubr.bf16.mxu0 %v4799_v16  ;;  %2342 = vmatprep.mubr.bf16.mxu1 %v4803_v17 }
 0x19b   :  { %3597 = vst.msk [vmem:[%s6792_s3 + $0x80] sm:$0xf] %vm3564_vm0, %v4294_v24  ;;  %v4295_v28 = vpack.c.bf16 %v2471_v25, %v2471_v25  ;;  %3711 = vst.msk [vmem:[%s6792_s3 + $0x248] sm:$0xf] %vm3564_vm0, %v4408_v26  ;;  %v4409_v29 = vpack.c.bf16 %v2585_v27, %v2585_v27  ;;  %v4817_v25 = vld [vmem:[%s6790_s0 + $0x2f4] ss:$8 sps:$4 sm:$0xff]  }
 0x19c   :  { %v1672_v30 = vpop.f32.mrb[68].mxu0  ;;  %v2128_v31 = vpop.f32.mrb[68].mxu1  ;;  %v4821_v26 = vld [vmem:[%s6790_s0 + $0x684] ss:$8 sps:$4 sm:$0xff]  }
 0x19d   :  { %3598 = vst.msk [vmem:[%s6792_s3 + $0x84] sm:$0xf] %vm3564_vm0, %v4295_v28  ;;  %v1673_v32 = vadd.f32 %v5824_v7, %v1672_v30  ;;  %v1674_v33 = vpop.f32.mrb[69].mxu0  ;;  %3712 = vst.msk [vmem:[%s6792_s3 + $0x24c] sm:$0xf] %vm3564_vm0, %v4409_v29  ;;  %v2129_v35 = vadd.f32 %v5824_v7, %v2128_v31  ;;  %v2130_v36 = vpop.f32.mrb[69].mxu1 }
 0x19e   :  { %v1675_v38 = vpop.f32.mrb[70].mxu0  ;;  %v2131_v39 = vpop.f32.mrb[70].mxu1 }
 0x19f   :  { %v2472_v42 = vmax.f32 %v1673_v32, 0.0  ;;  %v1676_v43 = vadd.f32 %v5824_v7, %v1675_v38  ;;  %v1677_v44 = vpop.f32.mrb[71].mxu0  ;;  %v2586_v45 = vmax.f32 %v2129_v35, 0.0  ;;  %v2132_v46 = vadd.f32 %v5824_v7, %v2131_v39  ;;  %v2133_v47 = vpop.f32.mrb[71].mxu1 }
 0x1a1   :  { %v4296_v48 = vpack.c.bf16 %v2472_v42, %v2472_v42  ;;  %v2473_v49 = vmax.f32 %v1676_v43, 0.0  ;;  %1887 = vmatmul.mubr.bf16.gmra.mrb[176].mxu0 %v4802_v34  ;;  %v4410_v50 = vpack.c.bf16 %v2586_v45, %v2586_v45  ;;  %v2587_v51 = vmax.f32 %v2132_v46, 0.0  ;;  %2343 = vmatmul.mubr.bf16.gmra.mrb[176].mxu1 %v4807_v37  ;;  %v4820_v43 = vld [vmem:[%s6790_s0 + $0x2f0] ss:$8 sps:$4 sm:$0xff]   ;;  %v4825_v46 = vld [vmem:[%s6790_s0 + $0x680] ss:$8 sps:$4 sm:$0xff]  }
 0x1a2   :  { %1894 = vmatprep.mubr.bf16.mxu0 %v4805_v40  ;;  %2350 = vmatprep.mubr.bf16.mxu1 %v4809_v41 }
 0x1a3   :  { %3599 = vst.msk [vmem:[%s6792_s3 + $0x88] sm:$0xf] %vm3564_vm0, %v4296_v48  ;;  %v4297_v52 = vpack.c.bf16 %v2473_v49, %v2473_v49  ;;  %3713 = vst.msk [vmem:[%s6792_s3 + $0x250] sm:$0xf] %vm3564_vm0, %v4410_v50  ;;  %v4411_v53 = vpack.c.bf16 %v2587_v51, %v2587_v51  ;;  %v4823_v49 = vld [vmem:[%s6790_s0 + $0x304] ss:$8 sps:$4 sm:$0xff]  }
 0x1a4   :  { %v1680_v54 = vpop.f32.mrb[72].mxu0  ;;  %v2136_v55 = vpop.f32.mrb[72].mxu1  ;;  %v4827_v50 = vld [vmem:[%s6790_s0 + $0x694] ss:$8 sps:$4 sm:$0xff]  }
 0x1a5   :  { %3600 = vst.msk [vmem:[%s6792_s3 + $0x8c] sm:$0xf] %vm3564_vm0, %v4297_v52  ;;  %v1681_v56 = vadd.f32 %v5824_v7, %v1680_v54  ;;  %v1682_v57 = vpop.f32.mrb[73].mxu0  ;;  %3714 = vst.msk [vmem:[%s6792_s3 + $0x254] sm:$0xf] %vm3564_vm0, %v4411_v53  ;;  %v2137_v59 = vadd.f32 %v5824_v7, %v2136_v55  ;;  %v2138_v60 = vpop.f32.mrb[73].mxu1 }
 0x1a6   :  { %v1683_v62 = vpop.f32.mrb[74].mxu0  ;;  %v2139_v0 = vpop.f32.mrb[74].mxu1 }
 0x1a7   :  { %v2474_v3 = vmax.f32 %v1681_v56, 0.0  ;;  %v1684_v4 = vadd.f32 %v5824_v7, %v1683_v62  ;;  %v1685_v63 = vpop.f32.mrb[75].mxu0  ;;  %v2588_v5 = vmax.f32 %v2137_v59, 0.0  ;;  %v2140_v6 = vadd.f32 %v5824_v7, %v2139_v0  ;;  %v2141_v8 = vpop.f32.mrb[75].mxu1 }
 0x1a9   :  { %v4298_v9 = vpack.c.bf16 %v2474_v3, %v2474_v3  ;;  %v2475_v10 = vmax.f32 %v1684_v4, 0.0  ;;  %1895 = vmatmul.mubr.bf16.gmra.mrb[180].mxu0 %v4808_v58  ;;  %v4412_v11 = vpack.c.bf16 %v2588_v5, %v2588_v5  ;;  %v2589_v12 = vmax.f32 %v2140_v6, 0.0  ;;  %2351 = vmatmul.mubr.bf16.gmra.mrb[180].mxu1 %v4813_v61  ;;  %v4826_v4 = vld [vmem:[%s6790_s0 + $0x300] ss:$8 sps:$4 sm:$0xff]   ;;  %v4831_v6 = vld [vmem:[%s6790_s0 + $0x690] ss:$8 sps:$4 sm:$0xff]  }
 0x1aa   :  { %1902 = vmatprep.mubr.bf16.mxu0 %v4811_v1  ;;  %2358 = vmatprep.mubr.bf16.mxu1 %v4815_v2 }
 0x1ab   :  { %3601 = vst.msk [vmem:[%s6792_s3 + $0x90] sm:$0xf] %vm3564_vm0, %v4298_v9  ;;  %v4299_v13 = vpack.c.bf16 %v2475_v10, %v2475_v10  ;;  %3715 = vst.msk [vmem:[%s6792_s3 + $0x258] sm:$0xf] %vm3564_vm0, %v4412_v11  ;;  %v4413_v14 = vpack.c.bf16 %v2589_v12, %v2589_v12  ;;  %v4829_v10 = vld [vmem:[%s6790_s0 + $0x314] ss:$8 sps:$4 sm:$0xff]  }
 0x1ac   :  { %v1688_v15 = vpop.f32.mrb[76].mxu0  ;;  %v2144_v16 = vpop.f32.mrb[76].mxu1  ;;  %v4833_v11 = vld [vmem:[%s6790_s0 + $0x6a4] ss:$8 sps:$4 sm:$0xff]  }
 0x1ad   :  { %3602 = vst.msk [vmem:[%s6792_s3 + $0x94] sm:$0xf] %vm3564_vm0, %v4299_v13  ;;  %v1689_v17 = vadd.f32 %v5824_v7, %v1688_v15  ;;  %v1690_v18 = vpop.f32.mrb[77].mxu0  ;;  %3716 = vst.msk [vmem:[%s6792_s3 + $0x25c] sm:$0xf] %vm3564_vm0, %v4413_v14  ;;  %v2145_v20 = vadd.f32 %v5824_v7, %v2144_v16  ;;  %v2146_v21 = vpop.f32.mrb[77].mxu1 }
 0x1ae   :  { %v1691_v23 = vpop.f32.mrb[78].mxu0  ;;  %v2147_v24 = vpop.f32.mrb[78].mxu1 }
 0x1af   :  { %v2476_v27 = vmax.f32 %v1689_v17, 0.0  ;;  %v1692_v28 = vadd.f32 %v5824_v7, %v1691_v23  ;;  %v1693_v29 = vpop.f32.mrb[79].mxu0  ;;  %v2590_v30 = vmax.f32 %v2145_v20, 0.0  ;;  %v2148_v31 = vadd.f32 %v5824_v7, %v2147_v24  ;;  %v2149_v32 = vpop.f32.mrb[79].mxu1 }
 0x1b1   :  { %v4300_v33 = vpack.c.bf16 %v2476_v27, %v2476_v27  ;;  %v2477_v34 = vmax.f32 %v1692_v28, 0.0  ;;  %1903 = vmatmul.mubr.bf16.gmra.mrb[184].mxu0 %v4814_v19  ;;  %v4414_v35 = vpack.c.bf16 %v2590_v30, %v2590_v30  ;;  %v2591_v36 = vmax.f32 %v2148_v31, 0.0  ;;  %2359 = vmatmul.mubr.bf16.gmra.mrb[184].mxu1 %v4819_v22  ;;  %v4832_v28 = vld [vmem:[%s6790_s0 + $0x310] ss:$8 sps:$4 sm:$0xff]   ;;  %v4837_v31 = vld [vmem:[%s6790_s0 + $0x6a0] ss:$8 sps:$4 sm:$0xff]  }
 0x1b2   :  { %1910 = vmatprep.mubr.bf16.mxu0 %v4817_v25  ;;  %2366 = vmatprep.mubr.bf16.mxu1 %v4821_v26 }
 0x1b3   :  { %3603 = vst.msk [vmem:[%s6792_s3 + $0x98] sm:$0xf] %vm3564_vm0, %v4300_v33  ;;  %v4301_v37 = vpack.c.bf16 %v2477_v34, %v2477_v34  ;;  %3717 = vst.msk [vmem:[%s6792_s3 + $0x260] sm:$0xf] %vm3564_vm0, %v4414_v35  ;;  %v4415_v38 = vpack.c.bf16 %v2591_v36, %v2591_v36  ;;  %v4835_v34 = vld [vmem:[%s6790_s0 + $0x324] ss:$8 sps:$4 sm:$0xff]  }
 0x1b4   :  { %v1696_v39 = vpop.f32.mrb[80].mxu0  ;;  %v2152_v40 = vpop.f32.mrb[80].mxu1  ;;  %v4839_v35 = vld [vmem:[%s6790_s0 + $0x6b4] ss:$8 sps:$4 sm:$0xff]  }
 0x1b5   :  { %3604 = vst.msk [vmem:[%s6792_s3 + $0x9c] sm:$0xf] %vm3564_vm0, %v4301_v37  ;;  %v1697_v41 = vadd.f32 %v5824_v7, %v1696_v39  ;;  %v1698_v42 = vpop.f32.mrb[81].mxu0  ;;  %3718 = vst.msk [vmem:[%s6792_s3 + $0x264] sm:$0xf] %vm3564_vm0, %v4415_v38  ;;  %v2153_v44 = vadd.f32 %v5824_v7, %v2152_v40  ;;  %v2154_v45 = vpop.f32.mrb[81].mxu1 }
 0x1b6   :  { %v1699_v47 = vpop.f32.mrb[82].mxu0  ;;  %v2155_v48 = vpop.f32.mrb[82].mxu1 }
 0x1b7   :  { %v2478_v51 = vmax.f32 %v1697_v41, 0.0  ;;  %v1700_v52 = vadd.f32 %v5824_v7, %v1699_v47  ;;  %v1701_v53 = vpop.f32.mrb[83].mxu0  ;;  %v2592_v54 = vmax.f32 %v2153_v44, 0.0  ;;  %v2156_v55 = vadd.f32 %v5824_v7, %v2155_v48  ;;  %v2157_v56 = vpop.f32.mrb[83].mxu1 }
 0x1b9   :  { %v4302_v57 = vpack.c.bf16 %v2478_v51, %v2478_v51  ;;  %v2479_v58 = vmax.f32 %v1700_v52, 0.0  ;;  %1911 = vmatmul.mubr.bf16.gmra.mrb[188].mxu0 %v4820_v43  ;;  %v4416_v59 = vpack.c.bf16 %v2592_v54, %v2592_v54  ;;  %v2593_v60 = vmax.f32 %v2156_v55, 0.0  ;;  %2367 = vmatmul.mubr.bf16.gmra.mrb[188].mxu1 %v4825_v46  ;;  %v4838_v52 = vld [vmem:[%s6790_s0 + $0x320] ss:$8 sps:$4 sm:$0xff]   ;;  %v4843_v55 = vld [vmem:[%s6790_s0 + $0x6b0] ss:$8 sps:$4 sm:$0xff]  }
 0x1ba   :  { %1918 = vmatprep.mubr.bf16.mxu0 %v4823_v49  ;;  %2374 = vmatprep.mubr.bf16.mxu1 %v4827_v50 }
 0x1bb   :  { %3605 = vst.msk [vmem:[%s6792_s3 + $0xa0] sm:$0xf] %vm3564_vm0, %v4302_v57  ;;  %v4303_v61 = vpack.c.bf16 %v2479_v58, %v2479_v58  ;;  %3719 = vst.msk [vmem:[%s6792_s3 + $0x268] sm:$0xf] %vm3564_vm0, %v4416_v59  ;;  %v4417_v62 = vpack.c.bf16 %v2593_v60, %v2593_v60  ;;  %v4841_v58 = vld [vmem:[%s6790_s0 + $0x334] ss:$8 sps:$4 sm:$0xff]  }
 0x1bc   :  { %v1704_v0 = vpop.f32.mrb[84].mxu0  ;;  %v2160_v1 = vpop.f32.mrb[84].mxu1  ;;  %v4845_v59 = vld [vmem:[%s6790_s0 + $0x6c4] ss:$8 sps:$4 sm:$0xff]  }
 0x1bd   :  { %3606 = vst.msk [vmem:[%s6792_s3 + $0xa4] sm:$0xf] %vm3564_vm0, %v4303_v61  ;;  %v1705_v2 = vadd.f32 %v5824_v7, %v1704_v0  ;;  %v1706_v3 = vpop.f32.mrb[85].mxu0  ;;  %3720 = vst.msk [vmem:[%s6792_s3 + $0x26c] sm:$0xf] %vm3564_vm0, %v4417_v62  ;;  %v2161_v63 = vadd.f32 %v5824_v7, %v2160_v1  ;;  %v2162_v5 = vpop.f32.mrb[85].mxu1 }
 0x1be   :  { %v1707_v8 = vpop.f32.mrb[86].mxu0  ;;  %v2163_v9 = vpop.f32.mrb[86].mxu1 }
 0x1bf   :  { %v2480_v12 = vmax.f32 %v1705_v2, 0.0  ;;  %v1708_v13 = vadd.f32 %v5824_v7, %v1707_v8  ;;  %v1709_v14 = vpop.f32.mrb[87].mxu0  ;;  %v2594_v15 = vmax.f32 %v2161_v63, 0.0  ;;  %v2164_v16 = vadd.f32 %v5824_v7, %v2163_v9  ;;  %v2165_v17 = vpop.f32.mrb[87].mxu1 }
 0x1c1   :  { %v4304_v18 = vpack.c.bf16 %v2480_v12, %v2480_v12  ;;  %v2481_v19 = vmax.f32 %v1708_v13, 0.0  ;;  %1919 = vmatmul.mubr.bf16.gmra.mrb[192].mxu0 %v4826_v4  ;;  %v4418_v20 = vpack.c.bf16 %v2594_v15, %v2594_v15  ;;  %v2595_v21 = vmax.f32 %v2164_v16, 0.0  ;;  %2375 = vmatmul.mubr.bf16.gmra.mrb[192].mxu1 %v4831_v6  ;;  %v4844_v13 = vld [vmem:[%s6790_s0 + $0x330] ss:$8 sps:$4 sm:$0xff]   ;;  %v4849_v16 = vld [vmem:[%s6790_s0 + $0x6c0] ss:$8 sps:$4 sm:$0xff]  }
 0x1c2   :  { %1926 = vmatprep.mubr.bf16.mxu0 %v4829_v10  ;;  %2382 = vmatprep.mubr.bf16.mxu1 %v4833_v11 }
 0x1c3   :  { %3607 = vst.msk [vmem:[%s6792_s3 + $0xa8] sm:$0xf] %vm3564_vm0, %v4304_v18  ;;  %v4305_v22 = vpack.c.bf16 %v2481_v19, %v2481_v19  ;;  %3721 = vst.msk [vmem:[%s6792_s3 + $0x270] sm:$0xf] %vm3564_vm0, %v4418_v20  ;;  %v4419_v23 = vpack.c.bf16 %v2595_v21, %v2595_v21  ;;  %v4847_v19 = vld [vmem:[%s6790_s0 + $0x344] ss:$8 sps:$4 sm:$0xff]  }
 0x1c4   :  { %v1712_v24 = vpop.f32.mrb[88].mxu0  ;;  %v2168_v25 = vpop.f32.mrb[88].mxu1  ;;  %v4851_v20 = vld [vmem:[%s6790_s0 + $0x6d4] ss:$8 sps:$4 sm:$0xff]  }
 0x1c5   :  { %3608 = vst.msk [vmem:[%s6792_s3 + $0xac] sm:$0xf] %vm3564_vm0, %v4305_v22  ;;  %v1713_v26 = vadd.f32 %v5824_v7, %v1712_v24  ;;  %v1714_v27 = vpop.f32.mrb[89].mxu0  ;;  %3722 = vst.msk [vmem:[%s6792_s3 + $0x274] sm:$0xf] %vm3564_vm0, %v4419_v23  ;;  %v2169_v29 = vadd.f32 %v5824_v7, %v2168_v25  ;;  %v2170_v30 = vpop.f32.mrb[89].mxu1 }
 0x1c6   :  { %v1715_v32 = vpop.f32.mrb[90].mxu0  ;;  %v2171_v33 = vpop.f32.mrb[90].mxu1 }
 0x1c7   :  { %v2482_v36 = vmax.f32 %v1713_v26, 0.0  ;;  %v1716_v37 = vadd.f32 %v5824_v7, %v1715_v32  ;;  %v1717_v38 = vpop.f32.mrb[91].mxu0  ;;  %v2596_v39 = vmax.f32 %v2169_v29, 0.0  ;;  %v2172_v40 = vadd.f32 %v5824_v7, %v2171_v33  ;;  %v2173_v41 = vpop.f32.mrb[91].mxu1 }
 0x1c9   :  { %v4306_v42 = vpack.c.bf16 %v2482_v36, %v2482_v36  ;;  %v2483_v43 = vmax.f32 %v1716_v37, 0.0  ;;  %1927 = vmatmul.mubr.bf16.gmra.mrb[196].mxu0 %v4832_v28  ;;  %v4420_v44 = vpack.c.bf16 %v2596_v39, %v2596_v39  ;;  %v2597_v45 = vmax.f32 %v2172_v40, 0.0  ;;  %2383 = vmatmul.mubr.bf16.gmra.mrb[196].mxu1 %v4837_v31  ;;  %v4850_v37 = vld [vmem:[%s6790_s0 + $0x340] ss:$8 sps:$4 sm:$0xff]   ;;  %v4855_v40 = vld [vmem:[%s6790_s0 + $0x6d0] ss:$8 sps:$4 sm:$0xff]  }
 0x1ca   :  { %1934 = vmatprep.mubr.bf16.mxu0 %v4835_v34  ;;  %2390 = vmatprep.mubr.bf16.mxu1 %v4839_v35 }
 0x1cb   :  { %3609 = vst.msk [vmem:[%s6792_s3 + $0xb0] sm:$0xf] %vm3564_vm0, %v4306_v42  ;;  %v4307_v46 = vpack.c.bf16 %v2483_v43, %v2483_v43  ;;  %3723 = vst.msk [vmem:[%s6792_s3 + $0x278] sm:$0xf] %vm3564_vm0, %v4420_v44  ;;  %v4421_v47 = vpack.c.bf16 %v2597_v45, %v2597_v45  ;;  %v4853_v43 = vld [vmem:[%s6790_s0 + $0x354] ss:$8 sps:$4 sm:$0xff]  }
 0x1cc   :  { %v1720_v48 = vpop.f32.mrb[92].mxu0  ;;  %v2176_v49 = vpop.f32.mrb[92].mxu1  ;;  %v4857_v44 = vld [vmem:[%s6790_s0 + $0x6e4] ss:$8 sps:$4 sm:$0xff]  }
 0x1cd   :  { %3610 = vst.msk [vmem:[%s6792_s3 + $0xb4] sm:$0xf] %vm3564_vm0, %v4307_v46  ;;  %v1721_v50 = vadd.f32 %v5824_v7, %v1720_v48  ;;  %v1722_v51 = vpop.f32.mrb[93].mxu0  ;;  %3724 = vst.msk [vmem:[%s6792_s3 + $0x27c] sm:$0xf] %vm3564_vm0, %v4421_v47  ;;  %v2177_v53 = vadd.f32 %v5824_v7, %v2176_v49  ;;  %v2178_v54 = vpop.f32.mrb[93].mxu1 }
 0x1ce   :  { %v1723_v56 = vpop.f32.mrb[94].mxu0  ;;  %v2179_v57 = vpop.f32.mrb[94].mxu1 }
 0x1cf   :  { %v2484_v60 = vmax.f32 %v1721_v50, 0.0  ;;  %v1724_v61 = vadd.f32 %v5824_v7, %v1723_v56  ;;  %v1725_v62 = vpop.f32.mrb[95].mxu0  ;;  %v2598_v0 = vmax.f32 %v2177_v53, 0.0  ;;  %v2180_v1 = vadd.f32 %v5824_v7, %v2179_v57  ;;  %v2181_v2 = vpop.f32.mrb[95].mxu1 }
 0x1d1   :  { %v4308_v3 = vpack.c.bf16 %v2484_v60, %v2484_v60  ;;  %v2485_v4 = vmax.f32 %v1724_v61, 0.0  ;;  %1935 = vmatmul.mubr.bf16.gmra.mrb[200].mxu0 %v4838_v52  ;;  %v4422_v63 = vpack.c.bf16 %v2598_v0, %v2598_v0  ;;  %v2599_v5 = vmax.f32 %v2180_v1, 0.0  ;;  %2391 = vmatmul.mubr.bf16.gmra.mrb[200].mxu1 %v4843_v55  ;;  %v4856_v61 = vld [vmem:[%s6790_s0 + $0x350] ss:$8 sps:$4 sm:$0xff]   ;;  %v4861_v1 = vld [vmem:[%s6790_s0 + $0x6e0] ss:$8 sps:$4 sm:$0xff]  }
 0x1d2   :  { %1942 = vmatprep.mubr.bf16.mxu0 %v4841_v58  ;;  %2398 = vmatprep.mubr.bf16.mxu1 %v4845_v59 }
 0x1d3   :  { %3611 = vst.msk [vmem:[%s6792_s3 + $0xb8] sm:$0xf] %vm3564_vm0, %v4308_v3  ;;  %v4309_v6 = vpack.c.bf16 %v2485_v4, %v2485_v4  ;;  %3725 = vst.msk [vmem:[%s6792_s3 + $0x280] sm:$0xf] %vm3564_vm0, %v4422_v63  ;;  %v4423_v8 = vpack.c.bf16 %v2599_v5, %v2599_v5  ;;  %v4859_v4 = vld [vmem:[%s6790_s0 + $0x364] ss:$8 sps:$4 sm:$0xff]  }
 0x1d4   :  { %v1728_v9 = vpop.f32.mrb[96].mxu0  ;;  %v2184_v10 = vpop.f32.mrb[96].mxu1  ;;  %v4863_v63 = vld [vmem:[%s6790_s0 + $0x6f4] ss:$8 sps:$4 sm:$0xff]  }
 0x1d5   :  { %3612 = vst.msk [vmem:[%s6792_s3 + $0xbc] sm:$0xf] %vm3564_vm0, %v4309_v6  ;;  %v1729_v11 = vadd.f32 %v5824_v7, %v1728_v9  ;;  %v1730_v12 = vpop.f32.mrb[97].mxu0  ;;  %3726 = vst.msk [vmem:[%s6792_s3 + $0x284] sm:$0xf] %vm3564_vm0, %v4423_v8  ;;  %v2185_v14 = vadd.f32 %v5824_v7, %v2184_v10  ;;  %v2186_v15 = vpop.f32.mrb[97].mxu1 }
 0x1d6   :  { %v1731_v17 = vpop.f32.mrb[98].mxu0  ;;  %v2187_v18 = vpop.f32.mrb[98].mxu1 }
 0x1d7   :  { %v2486_v21 = vmax.f32 %v1729_v11, 0.0  ;;  %v1732_v22 = vadd.f32 %v5824_v7, %v1731_v17  ;;  %v1733_v23 = vpop.f32.mrb[99].mxu0  ;;  %v2600_v24 = vmax.f32 %v2185_v14, 0.0  ;;  %v2188_v25 = vadd.f32 %v5824_v7, %v2187_v18  ;;  %v2189_v26 = vpop.f32.mrb[99].mxu1  ;;  %v239_v18 = vld [vmem:[%s6790_s0 + $0x700] sm:$0xff] }
 0x1d8   :  { %v4862_v23 = vld [vmem:[%s6790_s0 + $0x360] ss:$8 sps:$4 sm:$0xff]   ;;  %v4867_v26 = vld [vmem:[%s6790_s0 + $0x6f0] ss:$8 sps:$4 sm:$0xff]  }
 0x1d9   :  { %v4310_v27 = vpack.c.bf16 %v2486_v21, %v2486_v21  ;;  %v2487_v28 = vmax.f32 %v1732_v22, 0.0  ;;  %1943 = vmatmul.mubr.bf16.gmra.mrb[204].mxu0 %v4844_v13  ;;  %v4424_v29 = vpack.c.bf16 %v2600_v24, %v2600_v24  ;;  %v2601_v30 = vmax.f32 %v2188_v25, 0.0  ;;  %2399 = vmatmul.mubr.bf16.gmra.mrb[204].mxu1 %v4849_v16 }
 0x1da   :  { %1950 = vmatprep.mubr.bf16.mxu0 %v4847_v19  ;;  %2406 = vmatprep.mubr.bf16.mxu1 %v4851_v20 }
 0x1db   :  { %3613 = vst.msk [vmem:[%s6792_s3 + $0xc0] sm:$0xf] %vm3564_vm0, %v4310_v27  ;;  %v4311_v31 = vpack.c.bf16 %v2487_v28, %v2487_v28  ;;  %3727 = vst.msk [vmem:[%s6792_s3 + $0x288] sm:$0xf] %vm3564_vm0, %v4424_v29  ;;  %v4425_v32 = vpack.c.bf16 %v2601_v30, %v2601_v30  ;;  %v4865_v29 = vld [vmem:[%s6790_s0 + $0x374] ss:$8 sps:$4 sm:$0xff]   ;;  %v4020_v30 = vcombine.high %v239_v18, %v239_v18 }
 0x1dc   :  { %v1736_v33 = vpop.f32.mrb[100].mxu0  ;;  %v2192_v34 = vpop.f32.mrb[100].mxu1 }
 0x1dd   :  { %3614 = vst.msk [vmem:[%s6792_s3 + $0xc4] sm:$0xf] %vm3564_vm0, %v4311_v31  ;;  %v1737_v35 = vadd.f32 %v5824_v7, %v1736_v33  ;;  %v1738_v36 = vpop.f32.mrb[101].mxu0  ;;  %3728 = vst.msk [vmem:[%s6792_s3 + $0x28c] sm:$0xf] %vm3564_vm0, %v4425_v32  ;;  %v2193_v38 = vadd.f32 %v5824_v7, %v2192_v34  ;;  %v2194_v39 = vpop.f32.mrb[101].mxu1 }
 0x1de   :  { %v1739_v41 = vpop.f32.mrb[102].mxu0  ;;  %v2195_v42 = vpop.f32.mrb[102].mxu1 }
 0x1df   :  { %v2488_v45 = vmax.f32 %v1737_v35, 0.0  ;;  %v1740_v46 = vadd.f32 %v5824_v7, %v1739_v41  ;;  %v1741_v47 = vpop.f32.mrb[103].mxu0  ;;  %v2602_v48 = vmax.f32 %v2193_v38, 0.0  ;;  %v2196_v49 = vadd.f32 %v5824_v7, %v2195_v42  ;;  %v2197_v50 = vpop.f32.mrb[103].mxu1 }
 0x1e0   :  { %v4868_v47 = vld [vmem:[%s6790_s0 + $0x370] ss:$8 sps:$4 sm:$0xff]   ;;  %v4019_v50 = vcombine.low %v239_v18, %v239_v18 }
 0x1e1   :  { %v4312_v51 = vpack.c.bf16 %v2488_v45, %v2488_v45  ;;  %v2489_v52 = vmax.f32 %v1740_v46, 0.0  ;;  %1951 = vmatmul.mubr.bf16.gmra.mrb[208].mxu0 %v4850_v37  ;;  %v4426_v53 = vpack.c.bf16 %v2602_v48, %v2602_v48  ;;  %v2603_v54 = vmax.f32 %v2196_v49, 0.0  ;;  %2407 = vmatmul.mubr.bf16.gmra.mrb[208].mxu1 %v4855_v40 }
 0x1e2   :  { %1958 = vmatprep.mubr.bf16.mxu0 %v4853_v43  ;;  %2414 = vmatprep.mubr.bf16.mxu1 %v4857_v44 }
 0x1e3   :  { %3615 = vst.msk [vmem:[%s6792_s3 + $0xc8] sm:$0xf] %vm3564_vm0, %v4312_v51  ;;  %v4313_v55 = vpack.c.bf16 %v2489_v52, %v2489_v52  ;;  %3729 = vst.msk [vmem:[%s6792_s3 + $0x290] sm:$0xf] %vm3564_vm0, %v4426_v53  ;;  %v4427_v56 = vpack.c.bf16 %v2603_v54, %v2603_v54  ;;  %v4870_v53 = vld [vmem:[%s6790_s0 + $0x384] ss:$8 sps:$4 sm:$0xff]  }
 0x1e4   :  { %v1744_v57 = vpop.f32.mrb[104].mxu0  ;;  %v2200_v58 = vpop.f32.mrb[104].mxu1 }
 0x1e5   :  { %3616 = vst.msk [vmem:[%s6792_s3 + $0xcc] sm:$0xf] %vm3564_vm0, %v4313_v55  ;;  %v1745_v59 = vadd.f32 %v5824_v7, %v1744_v57  ;;  %v1746_v60 = vpop.f32.mrb[105].mxu0  ;;  %3730 = vst.msk [vmem:[%s6792_s3 + $0x294] sm:$0xf] %vm3564_vm0, %v4427_v56  ;;  %v2201_v62 = vadd.f32 %v5824_v7, %v2200_v58  ;;  %v2202_v0 = vpop.f32.mrb[105].mxu1 }
 0x1e6   :  { %v1747_v2 = vpop.f32.mrb[106].mxu0  ;;  %v2203_v3 = vpop.f32.mrb[106].mxu1 }
 0x1e7   :  { %v2490_v5 = vmax.f32 %v1745_v59, 0.0  ;;  %v1748_v6 = vadd.f32 %v5824_v7, %v1747_v2  ;;  %v1749_v8 = vpop.f32.mrb[107].mxu0  ;;  %v2604_v9 = vmax.f32 %v2201_v62, 0.0  ;;  %v2204_v10 = vadd.f32 %v5824_v7, %v2203_v3  ;;  %v2205_v11 = vpop.f32.mrb[107].mxu1 }
 0x1e9   :  { %v4314_v12 = vpack.c.bf16 %v2490_v5, %v2490_v5  ;;  %v2491_v13 = vmax.f32 %v1748_v6, 0.0  ;;  %1959 = vmatmul.mubr.bf16.gmra.mrb[212].mxu0 %v4856_v61  ;;  %v4428_v14 = vpack.c.bf16 %v2604_v9, %v2604_v9  ;;  %v2605_v15 = vmax.f32 %v2204_v10, 0.0  ;;  %2415 = vmatmul.mubr.bf16.gmra.mrb[212].mxu1 %v4861_v1  ;;  %v4873_v6 = vld [vmem:[%s6790_s0 + $0x380] ss:$8 sps:$4 sm:$0xff]  }
 0x1ea   :  { %1966 = vmatprep.mubr.bf16.mxu0 %v4859_v4  ;;  %2422 = vmatprep.mubr.bf16.mxu1 %v4863_v63 }
 0x1eb   :  { %3617 = vst.msk [vmem:[%s6792_s3 + $0xd0] sm:$0xf] %vm3564_vm0, %v4314_v12  ;;  %v4315_v16 = vpack.c.bf16 %v2491_v13, %v2491_v13  ;;  %3731 = vst.msk [vmem:[%s6792_s3 + $0x298] sm:$0xf] %vm3564_vm0, %v4428_v14  ;;  %v4429_v17 = vpack.c.bf16 %v2605_v15, %v2605_v15 }
 0x1ec   :  { %v1752_v19 = vpop.f32.mrb[108].mxu0  ;;  %v2208_v20 = vpop.f32.mrb[108].mxu1 }
 0x1ed   :  { %3618 = vst.msk [vmem:[%s6792_s3 + $0xd4] sm:$0xf] %vm3564_vm0, %v4315_v16  ;;  %v1753_v21 = vadd.f32 %v5824_v7, %v1752_v19  ;;  %v1754_v22 = vpop.f32.mrb[109].mxu0  ;;  %3732 = vst.msk [vmem:[%s6792_s3 + $0x29c] sm:$0xf] %vm3564_vm0, %v4429_v17  ;;  %v2209_v24 = vadd.f32 %v5824_v7, %v2208_v20  ;;  %v2210_v25 = vpop.f32.mrb[109].mxu1 }
 0x1ee   :  { %v1755_v27 = vpop.f32.mrb[110].mxu0  ;;  %v2211_v28 = vpop.f32.mrb[110].mxu1 }
 0x1ef   :  { %v2492_v31 = vmax.f32 %v1753_v21, 0.0  ;;  %v1756_v32 = vadd.f32 %v5824_v7, %v1755_v27  ;;  %v1757_v33 = vpop.f32.mrb[111].mxu0  ;;  %v2606_v34 = vmax.f32 %v2209_v24, 0.0  ;;  %v2212_v35 = vadd.f32 %v5824_v7, %v2211_v28  ;;  %v2213_v36 = vpop.f32.mrb[111].mxu1 }
 0x1f1   :  { %v4316_v37 = vpack.c.bf16 %v2492_v31, %v2492_v31  ;;  %v2493_v38 = vmax.f32 %v1756_v32, 0.0  ;;  %1967 = vmatmul.mubr.bf16.gmra.mrb[216].mxu0 %v4862_v23  ;;  %v4430_v39 = vpack.c.bf16 %v2606_v34, %v2606_v34  ;;  %v2607_v40 = vmax.f32 %v2212_v35, 0.0  ;;  %2423 = vmatmul.mubr.bf16.gmra.mrb[216].mxu1 %v4867_v26 }
 0x1f2   :  { %1974 = vmatprep.mubr.bf16.mxu0 %v4865_v29  ;;  %2430 = vmatprep.mubr.bf16.mxu1 %v4020_v30 }
 0x1f3   :  { %3619 = vst.msk [vmem:[%s6792_s3 + $0xd8] sm:$0xf] %vm3564_vm0, %v4316_v37  ;;  %v4317_v41 = vpack.c.bf16 %v2493_v38, %v2493_v38  ;;  %3733 = vst.msk [vmem:[%s6792_s3 + $0x2a0] sm:$0xf] %vm3564_vm0, %v4430_v39  ;;  %v4431_v42 = vpack.c.bf16 %v2607_v40, %v2607_v40 }
 0x1f4   :  { %v1760_v43 = vpop.f32.mrb[112].mxu0  ;;  %v2216_v44 = vpop.f32.mrb[112].mxu1 }
 0x1f5   :  { %3620 = vst.msk [vmem:[%s6792_s3 + $0xdc] sm:$0xf] %vm3564_vm0, %v4317_v41  ;;  %v1761_v45 = vadd.f32 %v5824_v7, %v1760_v43  ;;  %v1762_v46 = vpop.f32.mrb[113].mxu0  ;;  %3734 = vst.msk [vmem:[%s6792_s3 + $0x2a4] sm:$0xf] %vm3564_vm0, %v4431_v42  ;;  %v2217_v48 = vadd.f32 %v5824_v7, %v2216_v44  ;;  %v2218_v49 = vpop.f32.mrb[113].mxu1 }
 0x1f6   :  { %v1763_v51 = vpop.f32.mrb[114].mxu0  ;;  %v2219_v52 = vpop.f32.mrb[114].mxu1 }
 0x1f7   :  { %v2494_v54 = vmax.f32 %v1761_v45, 0.0  ;;  %v1764_v55 = vadd.f32 %v5824_v7, %v1763_v51  ;;  %v1765_v56 = vpop.f32.mrb[115].mxu0  ;;  %v2608_v57 = vmax.f32 %v2217_v48, 0.0  ;;  %v2220_v58 = vadd.f32 %v5824_v7, %v2219_v52  ;;  %v2221_v59 = vpop.f32.mrb[115].mxu1 }
 0x1f9   :  { %v4318_v60 = vpack.c.bf16 %v2494_v54, %v2494_v54  ;;  %v2495_v61 = vmax.f32 %v1764_v55, 0.0  ;;  %1975 = vmatmul.mubr.bf16.gmra.mrb[220].mxu0 %v4868_v47  ;;  %v4432_v62 = vpack.c.bf16 %v2608_v57, %v2608_v57  ;;  %v2609_v0 = vmax.f32 %v2220_v58, 0.0  ;;  %2431 = vmatmul.mubr.bf16.gmra.mrb[220].mxu1 %v4019_v50 }
 0x1fa   :  { %1982 = vmatprep.mubr.bf16.mxu0 %v4870_v53 }
 0x1fb   :  { %3621 = vst.msk [vmem:[%s6792_s3 + $0xe0] sm:$0xf] %vm3564_vm0, %v4318_v60  ;;  %v4319_v1 = vpack.c.bf16 %v2495_v61, %v2495_v61  ;;  %3735 = vst.msk [vmem:[%s6792_s3 + $0x2a8] sm:$0xf] %vm3564_vm0, %v4432_v62  ;;  %v4433_v2 = vpack.c.bf16 %v2609_v0, %v2609_v0 }
 0x1fc   :  { %v1768_v3 = vpop.f32.mrb[116].mxu0  ;;  %v2224_v4 = vpop.f32.mrb[116].mxu1 }
 0x1fd   :  { %3622 = vst.msk [vmem:[%s6792_s3 + $0xe4] sm:$0xf] %vm3564_vm0, %v4319_v1  ;;  %v1769_v63 = vadd.f32 %v5824_v7, %v1768_v3  ;;  %v1770_v5 = vpop.f32.mrb[117].mxu0  ;;  %3736 = vst.msk [vmem:[%s6792_s3 + $0x2ac] sm:$0xf] %vm3564_vm0, %v4433_v2  ;;  %v2225_v8 = vadd.f32 %v5824_v7, %v2224_v4  ;;  %v2226_v9 = vpop.f32.mrb[117].mxu1 }
 0x1fe   :  { %v1771_v10 = vpop.f32.mrb[118].mxu0  ;;  %v2227_v11 = vpop.f32.mrb[118].mxu1 }
 0x1ff   :  { %v2496_v12 = vmax.f32 %v1769_v63, 0.0  ;;  %v1772_v13 = vadd.f32 %v5824_v7, %v1771_v10  ;;  %v1773_v14 = vpop.f32.mrb[119].mxu0  ;;  %v2610_v15 = vmax.f32 %v2225_v8, 0.0  ;;  %v2228_v16 = vadd.f32 %v5824_v7, %v2227_v11  ;;  %v2229_v17 = vpop.f32.mrb[119].mxu1 }
 0x201   :  { %v4320_v18 = vpack.c.bf16 %v2496_v12, %v2496_v12  ;;  %v2497_v19 = vmax.f32 %v1772_v13, 0.0  ;;  %1983 = vmatmul.mubr.bf16.gmra.mrb[224].mxu0 %v4873_v6  ;;  %v4434_v20 = vpack.c.bf16 %v2610_v15, %v2610_v15  ;;  %v2611_v21 = vmax.f32 %v2228_v16, 0.0 }
 0x203   :  { %3623 = vst.msk [vmem:[%s6792_s3 + $0xe8] sm:$0xf] %vm3564_vm0, %v4320_v18  ;;  %v4321_v22 = vpack.c.bf16 %v2497_v19, %v2497_v19  ;;  %3737 = vst.msk [vmem:[%s6792_s3 + $0x2b0] sm:$0xf] %vm3564_vm0, %v4434_v20  ;;  %v4435_v23 = vpack.c.bf16 %v2611_v21, %v2611_v21 }
 0x204   :  { %v1776_v24 = vpop.f32.mrb[120].mxu0  ;;  %v2232_v25 = vpop.f32.mrb[120].mxu1 }
 0x205   :  { %3624 = vst.msk [vmem:[%s6792_s3 + $0xec] sm:$0xf] %vm3564_vm0, %v4321_v22  ;;  %v1777_v26 = vadd.f32 %v5824_v7, %v1776_v24  ;;  %v1778_v27 = vpop.f32.mrb[121].mxu0  ;;  %3738 = vst.msk [vmem:[%s6792_s3 + $0x2b4] sm:$0xf] %vm3564_vm0, %v4435_v23  ;;  %v2233_v28 = vadd.f32 %v5824_v7, %v2232_v25  ;;  %v2234_v29 = vpop.f32.mrb[121].mxu1 }
 0x206   :  { %v1779_v30 = vpop.f32.mrb[122].mxu0  ;;  %v2235_v31 = vpop.f32.mrb[122].mxu1 }
 0x207   :  { %v2498_v32 = vmax.f32 %v1777_v26, 0.0  ;;  %v1780_v33 = vadd.f32 %v5824_v7, %v1779_v30  ;;  %v1781_v34 = vpop.f32.mrb[123].mxu0  ;;  %v2612_v35 = vmax.f32 %v2233_v28, 0.0  ;;  %v2236_v36 = vadd.f32 %v5824_v7, %v2235_v31  ;;  %v2237_v37 = vpop.f32.mrb[123].mxu1 }
 0x209   :  { %v4322_v38 = vpack.c.bf16 %v2498_v32, %v2498_v32  ;;  %v2499_v39 = vmax.f32 %v1780_v33, 0.0  ;;  %v4436_v40 = vpack.c.bf16 %v2612_v35, %v2612_v35  ;;  %v2613_v41 = vmax.f32 %v2236_v36, 0.0 }
 0x20b   :  { %3625 = vst.msk [vmem:[%s6792_s3 + $0xf0] sm:$0xf] %vm3564_vm0, %v4322_v38  ;;  %v4323_v42 = vpack.c.bf16 %v2499_v39, %v2499_v39  ;;  %3739 = vst.msk [vmem:[%s6792_s3 + $0x2b8] sm:$0xf] %vm3564_vm0, %v4436_v40  ;;  %v4437_v43 = vpack.c.bf16 %v2613_v41, %v2613_v41 }
 0x20c   :  { %v1784_v44 = vpop.f32.mrb[124].mxu0  ;;  %v2240_v45 = vpop.f32.mrb[124].mxu1 }
 0x20d   :  { %3626 = vst.msk [vmem:[%s6792_s3 + $0xf4] sm:$0xf] %vm3564_vm0, %v4323_v42  ;;  %v1785_v46 = vadd.f32 %v5824_v7, %v1784_v44  ;;  %v1786_v47 = vpop.f32.mrb[125].mxu0  ;;  %3740 = vst.msk [vmem:[%s6792_s3 + $0x2bc] sm:$0xf] %vm3564_vm0, %v4437_v43  ;;  %v2241_v48 = vadd.f32 %v5824_v7, %v2240_v45  ;;  %v2242_v49 = vpop.f32.mrb[125].mxu1 }
 0x20e   :  { %v1787_v50 = vpop.f32.mrb[126].mxu0  ;;  %v2243_v51 = vpop.f32.mrb[126].mxu1 }
 0x20f   :  { %v2500_v52 = vmax.f32 %v1785_v46, 0.0  ;;  %v1788_v53 = vadd.f32 %v5824_v7, %v1787_v50  ;;  %v1789_v54 = vpop.f32.mrb[127].mxu0  ;;  %v2614_v55 = vmax.f32 %v2241_v48, 0.0  ;;  %v2244_v56 = vadd.f32 %v5824_v7, %v2243_v51  ;;  %v2245_v57 = vpop.f32.mrb[127].mxu1 }
 0x211   :  { %v4324_v58 = vpack.c.bf16 %v2500_v52, %v2500_v52  ;;  %v2501_v59 = vmax.f32 %v1788_v53, 0.0  ;;  %v4438_v60 = vpack.c.bf16 %v2614_v55, %v2614_v55  ;;  %v2615_v61 = vmax.f32 %v2244_v56, 0.0 }
 0x213   :  { %3627 = vst.msk [vmem:[%s6792_s3 + $0xf8] sm:$0xf] %vm3564_vm0, %v4324_v58  ;;  %v4325_v62 = vpack.c.bf16 %v2501_v59, %v2501_v59  ;;  %3741 = vst.msk [vmem:[%s6792_s3 + $0x2c0] sm:$0xf] %vm3564_vm0, %v4438_v60  ;;  %v4439_v0 = vpack.c.bf16 %v2615_v61, %v2615_v61 }
 0x214   :  { %v1792_v1 = vpop.f32.mrb[128].mxu0  ;;  %v2248_v2 = vpop.f32.mrb[128].mxu1 }
 0x215   :  { %3628 = vst.msk [vmem:[%s6792_s3 + $0xfc] sm:$0xf] %vm3564_vm0, %v4325_v62  ;;  %v1793_v3 = vadd.f32 %v5824_v7, %v1792_v1  ;;  %v1794_v4 = vpop.f32.mrb[129].mxu0  ;;  %3742 = vst.msk [vmem:[%s6792_s3 + $0x2c4] sm:$0xf] %vm3564_vm0, %v4439_v0  ;;  %v2249_v63 = vadd.f32 %v5824_v7, %v2248_v2  ;;  %v2250_v5 = vpop.f32.mrb[129].mxu1 }
 0x216   :  { %v1795_v6 = vpop.f32.mrb[130].mxu0  ;;  %v2251_v8 = vpop.f32.mrb[130].mxu1 }
 0x217   :  { %v2502_v9 = vmax.f32 %v1793_v3, 0.0  ;;  %v1796_v10 = vadd.f32 %v5824_v7, %v1795_v6  ;;  %v1797_v11 = vpop.f32.mrb[131].mxu0  ;;  %v2616_v12 = vmax.f32 %v2249_v63, 0.0  ;;  %v2252_v13 = vadd.f32 %v5824_v7, %v2251_v8  ;;  %v2253_v14 = vpop.f32.mrb[131].mxu1  ;;  %v6322_v7 = vld [vmem:[%s6791_s2] ss:$0 sm:$0xff] }
 0x219   :  { %v4326_v15 = vpack.c.bf16 %v2502_v9, %v2502_v9  ;;  %v2503_v16 = vmax.f32 %v1796_v10, 0.0  ;;  %v4440_v17 = vpack.c.bf16 %v2616_v12, %v2616_v12  ;;  %v2617_v18 = vmax.f32 %v2252_v13, 0.0 }
 0x21b   :  { %3629 = vst.msk [vmem:[%s6792_s3 + $0x100] sm:$0xf] %vm3564_vm0, %v4326_v15  ;;  %v4327_v19 = vpack.c.bf16 %v2503_v16, %v2503_v16  ;;  %3743 = vst.msk [vmem:[%s6792_s3 + $0x2c8] sm:$0xf] %vm3564_vm0, %v4440_v17  ;;  %v4441_v20 = vpack.c.bf16 %v2617_v18, %v2617_v18 }
 0x21c   :  { %v1800_v21 = vpop.f32.mrb[132].mxu0  ;;  %v2256_v22 = vpop.f32.mrb[132].mxu1 }
 0x21d   :  { %3630 = vst.msk [vmem:[%s6792_s3 + $0x104] sm:$0xf] %vm3564_vm0, %v4327_v19  ;;  %v1801_v23 = vadd.f32 %v6322_v7, %v1800_v21  ;;  %v1802_v24 = vpop.f32.mrb[133].mxu0  ;;  %3744 = vst.msk [vmem:[%s6792_s3 + $0x2cc] sm:$0xf] %vm3564_vm0, %v4441_v20  ;;  %v2257_v25 = vadd.f32 %v6322_v7, %v2256_v22  ;;  %v2258_v26 = vpop.f32.mrb[133].mxu1 }
 0x21e   :  { %v1803_v27 = vpop.f32.mrb[134].mxu0  ;;  %v2259_v28 = vpop.f32.mrb[134].mxu1 }
 0x21f   :  { %v2504_v29 = vmax.f32 %v1801_v23, 0.0  ;;  %v1804_v30 = vadd.f32 %v6322_v7, %v1803_v27  ;;  %v1805_v31 = vpop.f32.mrb[135].mxu0  ;;  %v2618_v32 = vmax.f32 %v2257_v25, 0.0  ;;  %v2260_v33 = vadd.f32 %v6322_v7, %v2259_v28  ;;  %v2261_v34 = vpop.f32.mrb[135].mxu1 }
 0x221   :  { %v4328_v35 = vpack.c.bf16 %v2504_v29, %v2504_v29  ;;  %v2505_v36 = vmax.f32 %v1804_v30, 0.0  ;;  %v4442_v37 = vpack.c.bf16 %v2618_v32, %v2618_v32  ;;  %v2619_v38 = vmax.f32 %v2260_v33, 0.0 }
 0x223   :  { %3631 = vst.msk [vmem:[%s6792_s3 + $0x108] sm:$0xf] %vm3564_vm0, %v4328_v35  ;;  %v4329_v39 = vpack.c.bf16 %v2505_v36, %v2505_v36  ;;  %3745 = vst.msk [vmem:[%s6792_s3 + $0x2d0] sm:$0xf] %vm3564_vm0, %v4442_v37  ;;  %v4443_v40 = vpack.c.bf16 %v2619_v38, %v2619_v38 }
 0x224   :  { %v1808_v41 = vpop.f32.mrb[136].mxu0  ;;  %v2264_v42 = vpop.f32.mrb[136].mxu1 }
 0x225   :  { %3632 = vst.msk [vmem:[%s6792_s3 + $0x10c] sm:$0xf] %vm3564_vm0, %v4329_v39  ;;  %v1809_v43 = vadd.f32 %v6322_v7, %v1808_v41  ;;  %v1810_v44 = vpop.f32.mrb[137].mxu0  ;;  %3746 = vst.msk [vmem:[%s6792_s3 + $0x2d4] sm:$0xf] %vm3564_vm0, %v4443_v40  ;;  %v2265_v45 = vadd.f32 %v6322_v7, %v2264_v42  ;;  %v2266_v46 = vpop.f32.mrb[137].mxu1 }
 0x226   :  { %v1811_v47 = vpop.f32.mrb[138].mxu0  ;;  %v2267_v48 = vpop.f32.mrb[138].mxu1 }
 0x227   :  { %v2506_v49 = vmax.f32 %v1809_v43, 0.0  ;;  %v1812_v50 = vadd.f32 %v6322_v7, %v1811_v47  ;;  %v1813_v51 = vpop.f32.mrb[139].mxu0  ;;  %v2620_v52 = vmax.f32 %v2265_v45, 0.0  ;;  %v2268_v53 = vadd.f32 %v6322_v7, %v2267_v48  ;;  %v2269_v54 = vpop.f32.mrb[139].mxu1 }
 0x229   :  { %v4330_v55 = vpack.c.bf16 %v2506_v49, %v2506_v49  ;;  %v2507_v56 = vmax.f32 %v1812_v50, 0.0  ;;  %v4444_v57 = vpack.c.bf16 %v2620_v52, %v2620_v52  ;;  %v2621_v58 = vmax.f32 %v2268_v53, 0.0 }
 0x22b   :  { %3633 = vst.msk [vmem:[%s6792_s3 + $0x110] sm:$0xf] %vm3564_vm0, %v4330_v55  ;;  %v4331_v59 = vpack.c.bf16 %v2507_v56, %v2507_v56  ;;  %3747 = vst.msk [vmem:[%s6792_s3 + $0x2d8] sm:$0xf] %vm3564_vm0, %v4444_v57  ;;  %v4445_v60 = vpack.c.bf16 %v2621_v58, %v2621_v58 }
 0x22c   :  { %v1816_v61 = vpop.f32.mrb[140].mxu0  ;;  %v2272_v62 = vpop.f32.mrb[140].mxu1 }
 0x22d   :  { %3634 = vst.msk [vmem:[%s6792_s3 + $0x114] sm:$0xf] %vm3564_vm0, %v4331_v59  ;;  %v1817_v0 = vadd.f32 %v6322_v7, %v1816_v61  ;;  %v1818_v1 = vpop.f32.mrb[141].mxu0  ;;  %3748 = vst.msk [vmem:[%s6792_s3 + $0x2dc] sm:$0xf] %vm3564_vm0, %v4445_v60  ;;  %v2273_v2 = vadd.f32 %v6322_v7, %v2272_v62  ;;  %v2274_v3 = vpop.f32.mrb[141].mxu1 }
 0x22e   :  { %v1819_v4 = vpop.f32.mrb[142].mxu0  ;;  %v2275_v63 = vpop.f32.mrb[142].mxu1 }
 0x22f   :  { %v2508_v5 = vmax.f32 %v1817_v0, 0.0  ;;  %v1820_v6 = vadd.f32 %v6322_v7, %v1819_v4  ;;  %v1821_v8 = vpop.f32.mrb[143].mxu0  ;;  %v2622_v9 = vmax.f32 %v2273_v2, 0.0  ;;  %v2276_v10 = vadd.f32 %v6322_v7, %v2275_v63  ;;  %v2277_v11 = vpop.f32.mrb[143].mxu1 }
 0x231   :  { %v4332_v12 = vpack.c.bf16 %v2508_v5, %v2508_v5  ;;  %v2509_v13 = vmax.f32 %v1820_v6, 0.0  ;;  %v4446_v14 = vpack.c.bf16 %v2622_v9, %v2622_v9  ;;  %v2623_v15 = vmax.f32 %v2276_v10, 0.0 }
 0x233   :  { %3635 = vst.msk [vmem:[%s6792_s3 + $0x118] sm:$0xf] %vm3564_vm0, %v4332_v12  ;;  %v4333_v16 = vpack.c.bf16 %v2509_v13, %v2509_v13  ;;  %3749 = vst.msk [vmem:[%s6792_s3 + $0x2e0] sm:$0xf] %vm3564_vm0, %v4446_v14  ;;  %v4447_v17 = vpack.c.bf16 %v2623_v15, %v2623_v15 }
 0x234   :  { %v1824_v18 = vpop.f32.mrb[144].mxu0  ;;  %v2280_v19 = vpop.f32.mrb[144].mxu1 }
 0x235   :  { %3636 = vst.msk [vmem:[%s6792_s3 + $0x11c] sm:$0xf] %vm3564_vm0, %v4333_v16  ;;  %v1825_v20 = vadd.f32 %v6322_v7, %v1824_v18  ;;  %v1826_v21 = vpop.f32.mrb[145].mxu0  ;;  %3750 = vst.msk [vmem:[%s6792_s3 + $0x2e4] sm:$0xf] %vm3564_vm0, %v4447_v17  ;;  %v2281_v22 = vadd.f32 %v6322_v7, %v2280_v19  ;;  %v2282_v23 = vpop.f32.mrb[145].mxu1 }
 0x236   :  { %v1827_v24 = vpop.f32.mrb[146].mxu0  ;;  %v2283_v25 = vpop.f32.mrb[146].mxu1 }
 0x237   :  { %v2510_v26 = vmax.f32 %v1825_v20, 0.0  ;;  %v1828_v27 = vadd.f32 %v6322_v7, %v1827_v24  ;;  %v1829_v28 = vpop.f32.mrb[147].mxu0  ;;  %v2624_v29 = vmax.f32 %v2281_v22, 0.0  ;;  %v2284_v30 = vadd.f32 %v6322_v7, %v2283_v25  ;;  %v2285_v31 = vpop.f32.mrb[147].mxu1 }
 0x239   :  { %v4334_v32 = vpack.c.bf16 %v2510_v26, %v2510_v26  ;;  %v2511_v33 = vmax.f32 %v1828_v27, 0.0  ;;  %v4448_v34 = vpack.c.bf16 %v2624_v29, %v2624_v29  ;;  %v2625_v35 = vmax.f32 %v2284_v30, 0.0 }
 0x23b   :  { %3637 = vst.msk [vmem:[%s6792_s3 + $0x120] sm:$0xf] %vm3564_vm0, %v4334_v32  ;;  %v4335_v36 = vpack.c.bf16 %v2511_v33, %v2511_v33  ;;  %3751 = vst.msk [vmem:[%s6792_s3 + $0x2e8] sm:$0xf] %vm3564_vm0, %v4448_v34  ;;  %v4449_v37 = vpack.c.bf16 %v2625_v35, %v2625_v35 }
 0x23c   :  { %v1832_v38 = vpop.f32.mrb[148].mxu0  ;;  %v2288_v39 = vpop.f32.mrb[148].mxu1 }
 0x23d   :  { %3638 = vst.msk [vmem:[%s6792_s3 + $0x124] sm:$0xf] %vm3564_vm0, %v4335_v36  ;;  %v1833_v40 = vadd.f32 %v6322_v7, %v1832_v38  ;;  %v1834_v41 = vpop.f32.mrb[149].mxu0  ;;  %3752 = vst.msk [vmem:[%s6792_s3 + $0x2ec] sm:$0xf] %vm3564_vm0, %v4449_v37  ;;  %v2289_v42 = vadd.f32 %v6322_v7, %v2288_v39  ;;  %v2290_v43 = vpop.f32.mrb[149].mxu1 }
 0x23e   :  { %v1835_v44 = vpop.f32.mrb[150].mxu0  ;;  %v2291_v45 = vpop.f32.mrb[150].mxu1 }
 0x23f   :  { %v2512_v46 = vmax.f32 %v1833_v40, 0.0  ;;  %v1836_v47 = vadd.f32 %v6322_v7, %v1835_v44  ;;  %v1837_v48 = vpop.f32.mrb[151].mxu0  ;;  %v2626_v49 = vmax.f32 %v2289_v42, 0.0  ;;  %v2292_v50 = vadd.f32 %v6322_v7, %v2291_v45  ;;  %v2293_v51 = vpop.f32.mrb[151].mxu1 }
 0x241   :  { %v4336_v52 = vpack.c.bf16 %v2512_v46, %v2512_v46  ;;  %v2513_v53 = vmax.f32 %v1836_v47, 0.0  ;;  %v4450_v54 = vpack.c.bf16 %v2626_v49, %v2626_v49  ;;  %v2627_v55 = vmax.f32 %v2292_v50, 0.0 }
 0x243   :  { %3639 = vst.msk [vmem:[%s6792_s3 + $0x128] sm:$0xf] %vm3564_vm0, %v4336_v52  ;;  %v4337_v56 = vpack.c.bf16 %v2513_v53, %v2513_v53  ;;  %3753 = vst.msk [vmem:[%s6792_s3 + $0x2f0] sm:$0xf] %vm3564_vm0, %v4450_v54  ;;  %v4451_v57 = vpack.c.bf16 %v2627_v55, %v2627_v55 }
 0x244   :  { %v1840_v58 = vpop.f32.mrb[152].mxu0  ;;  %v2296_v59 = vpop.f32.mrb[152].mxu1 }
 0x245   :  { %3640 = vst.msk [vmem:[%s6792_s3 + $0x12c] sm:$0xf] %vm3564_vm0, %v4337_v56  ;;  %v1841_v60 = vadd.f32 %v6322_v7, %v1840_v58  ;;  %v1842_v61 = vpop.f32.mrb[153].mxu0  ;;  %3754 = vst.msk [vmem:[%s6792_s3 + $0x2f4] sm:$0xf] %vm3564_vm0, %v4451_v57  ;;  %v2297_v62 = vadd.f32 %v6322_v7, %v2296_v59  ;;  %v2298_v0 = vpop.f32.mrb[153].mxu1 }
 0x246   :  { %v1843_v1 = vpop.f32.mrb[154].mxu0  ;;  %v2299_v2 = vpop.f32.mrb[154].mxu1 }
 0x247   :  { %v2514_v3 = vmax.f32 %v1841_v60, 0.0  ;;  %v1844_v4 = vadd.f32 %v6322_v7, %v1843_v1  ;;  %v1845_v63 = vpop.f32.mrb[155].mxu0  ;;  %v2628_v5 = vmax.f32 %v2297_v62, 0.0  ;;  %v2300_v6 = vadd.f32 %v6322_v7, %v2299_v2  ;;  %v2301_v8 = vpop.f32.mrb[155].mxu1 }
 0x249   :  { %v4338_v9 = vpack.c.bf16 %v2514_v3, %v2514_v3  ;;  %v2515_v10 = vmax.f32 %v1844_v4, 0.0  ;;  %v4452_v11 = vpack.c.bf16 %v2628_v5, %v2628_v5  ;;  %v2629_v12 = vmax.f32 %v2300_v6, 0.0 }
 0x24b   :  { %3641 = vst.msk [vmem:[%s6792_s3 + $0x130] sm:$0xf] %vm3564_vm0, %v4338_v9  ;;  %v4339_v13 = vpack.c.bf16 %v2515_v10, %v2515_v10  ;;  %3755 = vst.msk [vmem:[%s6792_s3 + $0x2f8] sm:$0xf] %vm3564_vm0, %v4452_v11  ;;  %v4453_v14 = vpack.c.bf16 %v2629_v12, %v2629_v12 }
 0x24c   :  { %v1848_v15 = vpop.f32.mrb[156].mxu0  ;;  %v2304_v16 = vpop.f32.mrb[156].mxu1 }
 0x24d   :  { %3642 = vst.msk [vmem:[%s6792_s3 + $0x134] sm:$0xf] %vm3564_vm0, %v4339_v13  ;;  %v1849_v17 = vadd.f32 %v6322_v7, %v1848_v15  ;;  %v1850_v18 = vpop.f32.mrb[157].mxu0  ;;  %3756 = vst.msk [vmem:[%s6792_s3 + $0x2fc] sm:$0xf] %vm3564_vm0, %v4453_v14  ;;  %v2305_v19 = vadd.f32 %v6322_v7, %v2304_v16  ;;  %v2306_v20 = vpop.f32.mrb[157].mxu1 }
 0x24e   :  { %v1851_v21 = vpop.f32.mrb[158].mxu0  ;;  %v2307_v22 = vpop.f32.mrb[158].mxu1 }
 0x24f   :  { %v2516_v23 = vmax.f32 %v1849_v17, 0.0  ;;  %v1852_v24 = vadd.f32 %v6322_v7, %v1851_v21  ;;  %v1853_v25 = vpop.f32.mrb[159].mxu0  ;;  %v2630_v26 = vmax.f32 %v2305_v19, 0.0  ;;  %v2308_v27 = vadd.f32 %v6322_v7, %v2307_v22  ;;  %v2309_v28 = vpop.f32.mrb[159].mxu1 }
 0x251   :  { %v4340_v29 = vpack.c.bf16 %v2516_v23, %v2516_v23  ;;  %v2517_v30 = vmax.f32 %v1852_v24, 0.0  ;;  %v4454_v31 = vpack.c.bf16 %v2630_v26, %v2630_v26  ;;  %v2631_v32 = vmax.f32 %v2308_v27, 0.0 }
 0x253   :  { %3643 = vst.msk [vmem:[%s6792_s3 + $0x138] sm:$0xf] %vm3564_vm0, %v4340_v29  ;;  %v4341_v33 = vpack.c.bf16 %v2517_v30, %v2517_v30  ;;  %3757 = vst.msk [vmem:[%s6792_s3 + $0x300] sm:$0xf] %vm3564_vm0, %v4454_v31  ;;  %v4455_v34 = vpack.c.bf16 %v2631_v32, %v2631_v32 }
 0x254   :  { %v1856_v35 = vpop.f32.mrb[160].mxu0  ;;  %v2312_v36 = vpop.f32.mrb[160].mxu1 }
 0x255   :  { %3644 = vst.msk [vmem:[%s6792_s3 + $0x13c] sm:$0xf] %vm3564_vm0, %v4341_v33  ;;  %v1857_v37 = vadd.f32 %v6322_v7, %v1856_v35  ;;  %v1858_v38 = vpop.f32.mrb[161].mxu0  ;;  %3758 = vst.msk [vmem:[%s6792_s3 + $0x304] sm:$0xf] %vm3564_vm0, %v4455_v34  ;;  %v2313_v39 = vadd.f32 %v6322_v7, %v2312_v36  ;;  %v2314_v40 = vpop.f32.mrb[161].mxu1 }
 0x256   :  { %v1859_v41 = vpop.f32.mrb[162].mxu0  ;;  %v2315_v42 = vpop.f32.mrb[162].mxu1 }
 0x257   :  { %v2518_v43 = vmax.f32 %v1857_v37, 0.0  ;;  %v1860_v44 = vadd.f32 %v6322_v7, %v1859_v41  ;;  %v1861_v45 = vpop.f32.mrb[163].mxu0  ;;  %v2632_v46 = vmax.f32 %v2313_v39, 0.0  ;;  %v2316_v47 = vadd.f32 %v6322_v7, %v2315_v42  ;;  %v2317_v48 = vpop.f32.mrb[163].mxu1 }
 0x259   :  { %v4342_v49 = vpack.c.bf16 %v2518_v43, %v2518_v43  ;;  %v2519_v50 = vmax.f32 %v1860_v44, 0.0  ;;  %v4456_v51 = vpack.c.bf16 %v2632_v46, %v2632_v46  ;;  %v2633_v52 = vmax.f32 %v2316_v47, 0.0 }
 0x25b   :  { %3645 = vst.msk [vmem:[%s6792_s3 + $0x140] sm:$0xf] %vm3564_vm0, %v4342_v49  ;;  %v4343_v53 = vpack.c.bf16 %v2519_v50, %v2519_v50  ;;  %3759 = vst.msk [vmem:[%s6792_s3 + $0x308] sm:$0xf] %vm3564_vm0, %v4456_v51  ;;  %v4457_v54 = vpack.c.bf16 %v2633_v52, %v2633_v52 }
 0x25c   :  { %v1864_v55 = vpop.f32.mrb[164].mxu0  ;;  %v2320_v56 = vpop.f32.mrb[164].mxu1 }
 0x25d   :  { %3646 = vst.msk [vmem:[%s6792_s3 + $0x144] sm:$0xf] %vm3564_vm0, %v4343_v53  ;;  %v1865_v57 = vadd.f32 %v6322_v7, %v1864_v55  ;;  %v1866_v58 = vpop.f32.mrb[165].mxu0  ;;  %3760 = vst.msk [vmem:[%s6792_s3 + $0x30c] sm:$0xf] %vm3564_vm0, %v4457_v54  ;;  %v2321_v59 = vadd.f32 %v6322_v7, %v2320_v56  ;;  %v2322_v60 = vpop.f32.mrb[165].mxu1 }
 0x25e   :  { %v1867_v61 = vpop.f32.mrb[166].mxu0  ;;  %v2323_v62 = vpop.f32.mrb[166].mxu1 }
 0x25f   :  { %v2520_v0 = vmax.f32 %v1865_v57, 0.0  ;;  %v1868_v1 = vadd.f32 %v6322_v7, %v1867_v61  ;;  %v1869_v2 = vpop.f32.mrb[167].mxu0  ;;  %v2634_v3 = vmax.f32 %v2321_v59, 0.0  ;;  %v2324_v4 = vadd.f32 %v6322_v7, %v2323_v62  ;;  %v2325_v63 = vpop.f32.mrb[167].mxu1 }
 0x261   :  { %v4344_v5 = vpack.c.bf16 %v2520_v0, %v2520_v0  ;;  %v2521_v6 = vmax.f32 %v1868_v1, 0.0  ;;  %v4458_v8 = vpack.c.bf16 %v2634_v3, %v2634_v3  ;;  %v2635_v9 = vmax.f32 %v2324_v4, 0.0 }
 0x263   :  { %3647 = vst.msk [vmem:[%s6792_s3 + $0x148] sm:$0xf] %vm3564_vm0, %v4344_v5  ;;  %v4345_v10 = vpack.c.bf16 %v2521_v6, %v2521_v6  ;;  %3761 = vst.msk [vmem:[%s6792_s3 + $0x310] sm:$0xf] %vm3564_vm0, %v4458_v8  ;;  %v4459_v11 = vpack.c.bf16 %v2635_v9, %v2635_v9 }
 0x264   :  { %v1872_v12 = vpop.f32.mrb[168].mxu0  ;;  %v2328_v13 = vpop.f32.mrb[168].mxu1 }
 0x265   :  { %3648 = vst.msk [vmem:[%s6792_s3 + $0x14c] sm:$0xf] %vm3564_vm0, %v4345_v10  ;;  %v1873_v14 = vadd.f32 %v6322_v7, %v1872_v12  ;;  %v1874_v15 = vpop.f32.mrb[169].mxu0  ;;  %3762 = vst.msk [vmem:[%s6792_s3 + $0x314] sm:$0xf] %vm3564_vm0, %v4459_v11  ;;  %v2329_v16 = vadd.f32 %v6322_v7, %v2328_v13  ;;  %v2330_v17 = vpop.f32.mrb[169].mxu1 }
 0x266   :  { %v1875_v18 = vpop.f32.mrb[170].mxu0  ;;  %v2331_v19 = vpop.f32.mrb[170].mxu1 }
 0x267   :  { %v2522_v20 = vmax.f32 %v1873_v14, 0.0  ;;  %v1876_v21 = vadd.f32 %v6322_v7, %v1875_v18  ;;  %v1877_v22 = vpop.f32.mrb[171].mxu0  ;;  %v2636_v23 = vmax.f32 %v2329_v16, 0.0  ;;  %v2332_v24 = vadd.f32 %v6322_v7, %v2331_v19  ;;  %v2333_v25 = vpop.f32.mrb[171].mxu1 }
 0x269   :  { %v4346_v26 = vpack.c.bf16 %v2522_v20, %v2522_v20  ;;  %v2523_v27 = vmax.f32 %v1876_v21, 0.0  ;;  %v4460_v28 = vpack.c.bf16 %v2636_v23, %v2636_v23  ;;  %v2637_v29 = vmax.f32 %v2332_v24, 0.0 }
 0x26b   :  { %3649 = vst.msk [vmem:[%s6792_s3 + $0x150] sm:$0xf] %vm3564_vm0, %v4346_v26  ;;  %v4347_v30 = vpack.c.bf16 %v2523_v27, %v2523_v27  ;;  %3763 = vst.msk [vmem:[%s6792_s3 + $0x318] sm:$0xf] %vm3564_vm0, %v4460_v28  ;;  %v4461_v31 = vpack.c.bf16 %v2637_v29, %v2637_v29 }
 0x26c   :  { %v1880_v32 = vpop.f32.mrb[172].mxu0  ;;  %v2336_v33 = vpop.f32.mrb[172].mxu1 }
 0x26d   :  { %3650 = vst.msk [vmem:[%s6792_s3 + $0x154] sm:$0xf] %vm3564_vm0, %v4347_v30  ;;  %v1881_v34 = vadd.f32 %v6322_v7, %v1880_v32  ;;  %v1882_v35 = vpop.f32.mrb[173].mxu0  ;;  %3764 = vst.msk [vmem:[%s6792_s3 + $0x31c] sm:$0xf] %vm3564_vm0, %v4461_v31  ;;  %v2337_v36 = vadd.f32 %v6322_v7, %v2336_v33  ;;  %v2338_v37 = vpop.f32.mrb[173].mxu1 }
 0x26e   :  { %v1883_v38 = vpop.f32.mrb[174].mxu0  ;;  %v2339_v39 = vpop.f32.mrb[174].mxu1 }
 0x26f   :  { %v2524_v40 = vmax.f32 %v1881_v34, 0.0  ;;  %v1884_v41 = vadd.f32 %v6322_v7, %v1883_v38  ;;  %v1885_v42 = vpop.f32.mrb[175].mxu0  ;;  %v2638_v43 = vmax.f32 %v2337_v36, 0.0  ;;  %v2340_v44 = vadd.f32 %v6322_v7, %v2339_v39  ;;  %v2341_v45 = vpop.f32.mrb[175].mxu1 }
 0x271   :  { %v4348_v46 = vpack.c.bf16 %v2524_v40, %v2524_v40  ;;  %v2525_v47 = vmax.f32 %v1884_v41, 0.0  ;;  %v4462_v48 = vpack.c.bf16 %v2638_v43, %v2638_v43  ;;  %v2639_v49 = vmax.f32 %v2340_v44, 0.0 }
 0x273   :  { %3651 = vst.msk [vmem:[%s6792_s3 + $0x158] sm:$0xf] %vm3564_vm0, %v4348_v46  ;;  %v4349_v50 = vpack.c.bf16 %v2525_v47, %v2525_v47  ;;  %3765 = vst.msk [vmem:[%s6792_s3 + $0x320] sm:$0xf] %vm3564_vm0, %v4462_v48  ;;  %v4463_v51 = vpack.c.bf16 %v2639_v49, %v2639_v49 }
 0x274   :  { %v1888_v52 = vpop.f32.mrb[176].mxu0  ;;  %v2344_v53 = vpop.f32.mrb[176].mxu1 }
 0x275   :  { %3652 = vst.msk [vmem:[%s6792_s3 + $0x15c] sm:$0xf] %vm3564_vm0, %v4349_v50  ;;  %v1889_v54 = vadd.f32 %v6322_v7, %v1888_v52  ;;  %v1890_v55 = vpop.f32.mrb[177].mxu0  ;;  %3766 = vst.msk [vmem:[%s6792_s3 + $0x324] sm:$0xf] %vm3564_vm0, %v4463_v51  ;;  %v2345_v56 = vadd.f32 %v6322_v7, %v2344_v53  ;;  %v2346_v57 = vpop.f32.mrb[177].mxu1 }
 0x276   :  { %v1891_v58 = vpop.f32.mrb[178].mxu0  ;;  %v2347_v59 = vpop.f32.mrb[178].mxu1 }
 0x277   :  { %v2526_v60 = vmax.f32 %v1889_v54, 0.0  ;;  %v1892_v61 = vadd.f32 %v6322_v7, %v1891_v58  ;;  %v1893_v62 = vpop.f32.mrb[179].mxu0  ;;  %v2640_v0 = vmax.f32 %v2345_v56, 0.0  ;;  %v2348_v1 = vadd.f32 %v6322_v7, %v2347_v59  ;;  %v2349_v2 = vpop.f32.mrb[179].mxu1 }
 0x279   :  { %v4350_v3 = vpack.c.bf16 %v2526_v60, %v2526_v60  ;;  %v2527_v4 = vmax.f32 %v1892_v61, 0.0  ;;  %v4464_v63 = vpack.c.bf16 %v2640_v0, %v2640_v0  ;;  %v2641_v5 = vmax.f32 %v2348_v1, 0.0 }
 0x27b   :  { %3653 = vst.msk [vmem:[%s6792_s3 + $0x160] sm:$0xf] %vm3564_vm0, %v4350_v3  ;;  %v4351_v6 = vpack.c.bf16 %v2527_v4, %v2527_v4  ;;  %3767 = vst.msk [vmem:[%s6792_s3 + $0x328] sm:$0xf] %vm3564_vm0, %v4464_v63  ;;  %v4465_v8 = vpack.c.bf16 %v2641_v5, %v2641_v5 }
 0x27c   :  { %v1896_v9 = vpop.f32.mrb[180].mxu0  ;;  %v2352_v10 = vpop.f32.mrb[180].mxu1 }
 0x27d   :  { %3654 = vst.msk [vmem:[%s6792_s3 + $0x164] sm:$0xf] %vm3564_vm0, %v4351_v6  ;;  %v1897_v11 = vadd.f32 %v6322_v7, %v1896_v9  ;;  %v1898_v12 = vpop.f32.mrb[181].mxu0  ;;  %3768 = vst.msk [vmem:[%s6792_s3 + $0x32c] sm:$0xf] %vm3564_vm0, %v4465_v8  ;;  %v2353_v13 = vadd.f32 %v6322_v7, %v2352_v10  ;;  %v2354_v14 = vpop.f32.mrb[181].mxu1 }
 0x27e   :  { %v1899_v15 = vpop.f32.mrb[182].mxu0  ;;  %v2355_v16 = vpop.f32.mrb[182].mxu1 }
 0x27f   :  { %v2528_v17 = vmax.f32 %v1897_v11, 0.0  ;;  %v1900_v18 = vadd.f32 %v6322_v7, %v1899_v15  ;;  %v1901_v19 = vpop.f32.mrb[183].mxu0  ;;  %v2642_v20 = vmax.f32 %v2353_v13, 0.0  ;;  %v2356_v21 = vadd.f32 %v6322_v7, %v2355_v16  ;;  %v2357_v22 = vpop.f32.mrb[183].mxu1 }
 0x281   :  { %v4352_v23 = vpack.c.bf16 %v2528_v17, %v2528_v17  ;;  %v2529_v24 = vmax.f32 %v1900_v18, 0.0  ;;  %v4466_v25 = vpack.c.bf16 %v2642_v20, %v2642_v20  ;;  %v2643_v26 = vmax.f32 %v2356_v21, 0.0 }
 0x283   :  { %3655 = vst.msk [vmem:[%s6792_s3 + $0x168] sm:$0xf] %vm3564_vm0, %v4352_v23  ;;  %v4353_v27 = vpack.c.bf16 %v2529_v24, %v2529_v24  ;;  %3769 = vst.msk [vmem:[%s6792_s3 + $0x330] sm:$0xf] %vm3564_vm0, %v4466_v25  ;;  %v4467_v28 = vpack.c.bf16 %v2643_v26, %v2643_v26 }
 0x284   :  { %v1904_v29 = vpop.f32.mrb[184].mxu0  ;;  %v2360_v30 = vpop.f32.mrb[184].mxu1 }
 0x285   :  { %3656 = vst.msk [vmem:[%s6792_s3 + $0x16c] sm:$0xf] %vm3564_vm0, %v4353_v27  ;;  %v1905_v31 = vadd.f32 %v6322_v7, %v1904_v29  ;;  %v1906_v32 = vpop.f32.mrb[185].mxu0  ;;  %3770 = vst.msk [vmem:[%s6792_s3 + $0x334] sm:$0xf] %vm3564_vm0, %v4467_v28  ;;  %v2361_v33 = vadd.f32 %v6322_v7, %v2360_v30  ;;  %v2362_v34 = vpop.f32.mrb[185].mxu1 }
 0x286   :  { %v1907_v35 = vpop.f32.mrb[186].mxu0  ;;  %v2363_v36 = vpop.f32.mrb[186].mxu1 }
 0x287   :  { %v2530_v37 = vmax.f32 %v1905_v31, 0.0  ;;  %v1908_v38 = vadd.f32 %v6322_v7, %v1907_v35  ;;  %v1909_v39 = vpop.f32.mrb[187].mxu0  ;;  %v2644_v40 = vmax.f32 %v2361_v33, 0.0  ;;  %v2364_v41 = vadd.f32 %v6322_v7, %v2363_v36  ;;  %v2365_v42 = vpop.f32.mrb[187].mxu1 }
 0x289   :  { %v4354_v43 = vpack.c.bf16 %v2530_v37, %v2530_v37  ;;  %v2531_v44 = vmax.f32 %v1908_v38, 0.0  ;;  %v4468_v45 = vpack.c.bf16 %v2644_v40, %v2644_v40  ;;  %v2645_v46 = vmax.f32 %v2364_v41, 0.0 }
 0x28b   :  { %3657 = vst.msk [vmem:[%s6792_s3 + $0x170] sm:$0xf] %vm3564_vm0, %v4354_v43  ;;  %v4355_v47 = vpack.c.bf16 %v2531_v44, %v2531_v44  ;;  %3771 = vst.msk [vmem:[%s6792_s3 + $0x338] sm:$0xf] %vm3564_vm0, %v4468_v45  ;;  %v4469_v48 = vpack.c.bf16 %v2645_v46, %v2645_v46 }
 0x28c   :  { %v1912_v49 = vpop.f32.mrb[188].mxu0  ;;  %v2368_v50 = vpop.f32.mrb[188].mxu1 }
 0x28d   :  { %3658 = vst.msk [vmem:[%s6792_s3 + $0x174] sm:$0xf] %vm3564_vm0, %v4355_v47  ;;  %v1913_v51 = vadd.f32 %v6322_v7, %v1912_v49  ;;  %v1914_v52 = vpop.f32.mrb[189].mxu0  ;;  %3772 = vst.msk [vmem:[%s6792_s3 + $0x33c] sm:$0xf] %vm3564_vm0, %v4469_v48  ;;  %v2369_v53 = vadd.f32 %v6322_v7, %v2368_v50  ;;  %v2370_v54 = vpop.f32.mrb[189].mxu1 }
 0x28e   :  { %v1915_v55 = vpop.f32.mrb[190].mxu0  ;;  %v2371_v56 = vpop.f32.mrb[190].mxu1 }
 0x28f   :  { %v2532_v57 = vmax.f32 %v1913_v51, 0.0  ;;  %v1916_v58 = vadd.f32 %v6322_v7, %v1915_v55  ;;  %v1917_v59 = vpop.f32.mrb[191].mxu0  ;;  %v2646_v60 = vmax.f32 %v2369_v53, 0.0  ;;  %v2372_v61 = vadd.f32 %v6322_v7, %v2371_v56  ;;  %v2373_v62 = vpop.f32.mrb[191].mxu1 }
 0x291   :  { %v4356_v0 = vpack.c.bf16 %v2532_v57, %v2532_v57  ;;  %v2533_v1 = vmax.f32 %v1916_v58, 0.0  ;;  %v4470_v2 = vpack.c.bf16 %v2646_v60, %v2646_v60  ;;  %v2647_v3 = vmax.f32 %v2372_v61, 0.0 }
 0x293   :  { %3659 = vst.msk [vmem:[%s6792_s3 + $0x178] sm:$0xf] %vm3564_vm0, %v4356_v0  ;;  %v4357_v4 = vpack.c.bf16 %v2533_v1, %v2533_v1  ;;  %3773 = vst.msk [vmem:[%s6792_s3 + $0x340] sm:$0xf] %vm3564_vm0, %v4470_v2  ;;  %v4471_v63 = vpack.c.bf16 %v2647_v3, %v2647_v3 }
 0x294   :  { %v1920_v5 = vpop.f32.mrb[192].mxu0  ;;  %v2376_v6 = vpop.f32.mrb[192].mxu1 }
 0x295   :  { %3660 = vst.msk [vmem:[%s6792_s3 + $0x17c] sm:$0xf] %vm3564_vm0, %v4357_v4  ;;  %v1921_v8 = vadd.f32 %v6322_v7, %v1920_v5  ;;  %v1922_v9 = vpop.f32.mrb[193].mxu0  ;;  %3774 = vst.msk [vmem:[%s6792_s3 + $0x344] sm:$0xf] %vm3564_vm0, %v4471_v63  ;;  %v2377_v10 = vadd.f32 %v6322_v7, %v2376_v6  ;;  %v2378_v11 = vpop.f32.mrb[193].mxu1 }
 0x296   :  { %v1923_v12 = vpop.f32.mrb[194].mxu0  ;;  %v2379_v13 = vpop.f32.mrb[194].mxu1 }
 0x297   :  { %v2534_v14 = vmax.f32 %v1921_v8, 0.0  ;;  %v1924_v15 = vadd.f32 %v6322_v7, %v1923_v12  ;;  %v1925_v16 = vpop.f32.mrb[195].mxu0  ;;  %v2648_v17 = vmax.f32 %v2377_v10, 0.0  ;;  %v2380_v18 = vadd.f32 %v6322_v7, %v2379_v13  ;;  %v2381_v19 = vpop.f32.mrb[195].mxu1 }
 0x299   :  { %v4358_v20 = vpack.c.bf16 %v2534_v14, %v2534_v14  ;;  %v2535_v21 = vmax.f32 %v1924_v15, 0.0  ;;  %v4472_v22 = vpack.c.bf16 %v2648_v17, %v2648_v17  ;;  %v2649_v23 = vmax.f32 %v2380_v18, 0.0 }
 0x29b   :  { %3661 = vst.msk [vmem:[%s6792_s3 + $0x180] sm:$0xf] %vm3564_vm0, %v4358_v20  ;;  %v4359_v24 = vpack.c.bf16 %v2535_v21, %v2535_v21  ;;  %3775 = vst.msk [vmem:[%s6792_s3 + $0x348] sm:$0xf] %vm3564_vm0, %v4472_v22  ;;  %v4473_v25 = vpack.c.bf16 %v2649_v23, %v2649_v23 }
 0x29c   :  { %v1928_v26 = vpop.f32.mrb[196].mxu0  ;;  %v2384_v27 = vpop.f32.mrb[196].mxu1 }
 0x29d   :  { %3662 = vst.msk [vmem:[%s6792_s3 + $0x184] sm:$0xf] %vm3564_vm0, %v4359_v24  ;;  %v1929_v28 = vadd.f32 %v6322_v7, %v1928_v26  ;;  %v1930_v29 = vpop.f32.mrb[197].mxu0  ;;  %3776 = vst.msk [vmem:[%s6792_s3 + $0x34c] sm:$0xf] %vm3564_vm0, %v4473_v25  ;;  %v2385_v30 = vadd.f32 %v6322_v7, %v2384_v27  ;;  %v2386_v31 = vpop.f32.mrb[197].mxu1 }
 0x29e   :  { %v1931_v32 = vpop.f32.mrb[198].mxu0  ;;  %v2387_v33 = vpop.f32.mrb[198].mxu1 }
 0x29f   :  { %v2536_v34 = vmax.f32 %v1929_v28, 0.0  ;;  %v1932_v35 = vadd.f32 %v6322_v7, %v1931_v32  ;;  %v1933_v36 = vpop.f32.mrb[199].mxu0  ;;  %v2650_v37 = vmax.f32 %v2385_v30, 0.0  ;;  %v2388_v38 = vadd.f32 %v6322_v7, %v2387_v33  ;;  %v2389_v39 = vpop.f32.mrb[199].mxu1 }
 0x2a1   :  { %v4360_v40 = vpack.c.bf16 %v2536_v34, %v2536_v34  ;;  %v2537_v41 = vmax.f32 %v1932_v35, 0.0  ;;  %v4474_v42 = vpack.c.bf16 %v2650_v37, %v2650_v37  ;;  %v2651_v43 = vmax.f32 %v2388_v38, 0.0 }
 0x2a3   :  { %3663 = vst.msk [vmem:[%s6792_s3 + $0x188] sm:$0xf] %vm3564_vm0, %v4360_v40  ;;  %v4361_v44 = vpack.c.bf16 %v2537_v41, %v2537_v41  ;;  %3777 = vst.msk [vmem:[%s6792_s3 + $0x350] sm:$0xf] %vm3564_vm0, %v4474_v42  ;;  %v4475_v45 = vpack.c.bf16 %v2651_v43, %v2651_v43 }
 0x2a4   :  { %v1936_v46 = vpop.f32.mrb[200].mxu0  ;;  %v2392_v47 = vpop.f32.mrb[200].mxu1 }
 0x2a5   :  { %3664 = vst.msk [vmem:[%s6792_s3 + $0x18c] sm:$0xf] %vm3564_vm0, %v4361_v44  ;;  %v1937_v48 = vadd.f32 %v6322_v7, %v1936_v46  ;;  %v1938_v49 = vpop.f32.mrb[201].mxu0  ;;  %3778 = vst.msk [vmem:[%s6792_s3 + $0x354] sm:$0xf] %vm3564_vm0, %v4475_v45  ;;  %v2393_v50 = vadd.f32 %v6322_v7, %v2392_v47  ;;  %v2394_v51 = vpop.f32.mrb[201].mxu1 }
 0x2a6   :  { %v1939_v52 = vpop.f32.mrb[202].mxu0  ;;  %v2395_v53 = vpop.f32.mrb[202].mxu1 }
 0x2a7   :  { %v2538_v54 = vmax.f32 %v1937_v48, 0.0  ;;  %v1940_v55 = vadd.f32 %v6322_v7, %v1939_v52  ;;  %v1941_v56 = vpop.f32.mrb[203].mxu0  ;;  %v2652_v57 = vmax.f32 %v2393_v50, 0.0  ;;  %v2396_v58 = vadd.f32 %v6322_v7, %v2395_v53  ;;  %v2397_v59 = vpop.f32.mrb[203].mxu1 }
 0x2a9   :  { %v4362_v60 = vpack.c.bf16 %v2538_v54, %v2538_v54  ;;  %v2539_v61 = vmax.f32 %v1940_v55, 0.0  ;;  %v4476_v62 = vpack.c.bf16 %v2652_v57, %v2652_v57  ;;  %v2653_v0 = vmax.f32 %v2396_v58, 0.0 }
 0x2ab   :  { %3665 = vst.msk [vmem:[%s6792_s3 + $0x190] sm:$0xf] %vm3564_vm0, %v4362_v60  ;;  %v4363_v1 = vpack.c.bf16 %v2539_v61, %v2539_v61  ;;  %3779 = vst.msk [vmem:[%s6792_s3 + $0x358] sm:$0xf] %vm3564_vm0, %v4476_v62  ;;  %v4477_v2 = vpack.c.bf16 %v2653_v0, %v2653_v0 }
 0x2ac   :  { %v1944_v3 = vpop.f32.mrb[204].mxu0  ;;  %v2400_v4 = vpop.f32.mrb[204].mxu1 }
 0x2ad   :  { %3666 = vst.msk [vmem:[%s6792_s3 + $0x194] sm:$0xf] %vm3564_vm0, %v4363_v1  ;;  %v1945_v63 = vadd.f32 %v6322_v7, %v1944_v3  ;;  %v1946_v5 = vpop.f32.mrb[205].mxu0  ;;  %3780 = vst.msk [vmem:[%s6792_s3 + $0x35c] sm:$0xf] %vm3564_vm0, %v4477_v2  ;;  %v2401_v6 = vadd.f32 %v6322_v7, %v2400_v4  ;;  %v2402_v8 = vpop.f32.mrb[205].mxu1 }
 0x2ae   :  { %v1947_v9 = vpop.f32.mrb[206].mxu0  ;;  %v2403_v10 = vpop.f32.mrb[206].mxu1 }
 0x2af   :  { %v2540_v11 = vmax.f32 %v1945_v63, 0.0  ;;  %v1948_v12 = vadd.f32 %v6322_v7, %v1947_v9  ;;  %v1949_v13 = vpop.f32.mrb[207].mxu0  ;;  %v2654_v14 = vmax.f32 %v2401_v6, 0.0  ;;  %v2404_v15 = vadd.f32 %v6322_v7, %v2403_v10  ;;  %v2405_v16 = vpop.f32.mrb[207].mxu1  ;;  %v4876_v9 = vld [vmem:[%s6791_s2] ss:$0 sm:$0xff] }
 0x2b1   :  { %v4364_v17 = vpack.c.bf16 %v2540_v11, %v2540_v11  ;;  %v2541_v18 = vmax.f32 %v1948_v12, 0.0  ;;  %v4478_v19 = vpack.c.bf16 %v2654_v14, %v2654_v14  ;;  %v2655_v20 = vmax.f32 %v2404_v15, 0.0 }
 0x2b3   :  { %3667 = vst.msk [vmem:[%s6792_s3 + $0x198] sm:$0xf] %vm3564_vm0, %v4364_v17  ;;  %v4365_v21 = vpack.c.bf16 %v2541_v18, %v2541_v18  ;;  %3781 = vst.msk [vmem:[%s6792_s3 + $0x360] sm:$0xf] %vm3564_vm0, %v4478_v19  ;;  %v4479_v22 = vpack.c.bf16 %v2655_v20, %v2655_v20 }
 0x2b4   :  { %v1952_v23 = vpop.f32.mrb[208].mxu0  ;;  %v2408_v24 = vpop.f32.mrb[208].mxu1 }
 0x2b5   :  { %3668 = vst.msk [vmem:[%s6792_s3 + $0x19c] sm:$0xf] %vm3564_vm0, %v4365_v21  ;;  %v1953_v25 = vadd.f32 %v6322_v7, %v1952_v23  ;;  %v1954_v26 = vpop.f32.mrb[209].mxu0  ;;  %3782 = vst.msk [vmem:[%s6792_s3 + $0x364] sm:$0xf] %vm3564_vm0, %v4479_v22  ;;  %v2409_v27 = vadd.f32 %v6322_v7, %v2408_v24  ;;  %v2410_v28 = vpop.f32.mrb[209].mxu1 }
 0x2b6   :  { %v1955_v29 = vpop.f32.mrb[210].mxu0  ;;  %v2411_v30 = vpop.f32.mrb[210].mxu1 }
 0x2b7   :  { %v2542_v31 = vmax.f32 %v1953_v25, 0.0  ;;  %v1956_v32 = vadd.f32 %v6322_v7, %v1955_v29  ;;  %v1957_v33 = vpop.f32.mrb[211].mxu0  ;;  %v2656_v34 = vmax.f32 %v2409_v27, 0.0  ;;  %v2412_v35 = vadd.f32 %v6322_v7, %v2411_v30  ;;  %v2413_v36 = vpop.f32.mrb[211].mxu1 }
 0x2b9   :  { %v4366_v37 = vpack.c.bf16 %v2542_v31, %v2542_v31  ;;  %v2543_v38 = vmax.f32 %v1956_v32, 0.0  ;;  %v4480_v39 = vpack.c.bf16 %v2656_v34, %v2656_v34  ;;  %v2657_v40 = vmax.f32 %v2412_v35, 0.0 }
 0x2bb   :  { %3669 = vst.msk [vmem:[%s6792_s3 + $0x1a0] sm:$0xf] %vm3564_vm0, %v4366_v37  ;;  %v4367_v41 = vpack.c.bf16 %v2543_v38, %v2543_v38  ;;  %3783 = vst.msk [vmem:[%s6792_s3 + $0x368] sm:$0xf] %vm3564_vm0, %v4480_v39  ;;  %v4481_v42 = vpack.c.bf16 %v2657_v40, %v2657_v40 }
 0x2bc   :  { %v1960_v43 = vpop.f32.mrb[212].mxu0  ;;  %v2416_v44 = vpop.f32.mrb[212].mxu1 }
 0x2bd   :  { %3670 = vst.msk [vmem:[%s6792_s3 + $0x1a4] sm:$0xf] %vm3564_vm0, %v4367_v41  ;;  %v1961_v45 = vadd.f32 %v6322_v7, %v1960_v43  ;;  %v1962_v46 = vpop.f32.mrb[213].mxu0  ;;  %3784 = vst.msk [vmem:[%s6792_s3 + $0x36c] sm:$0xf] %vm3564_vm0, %v4481_v42  ;;  %v2417_v47 = vadd.f32 %v6322_v7, %v2416_v44  ;;  %v2418_v48 = vpop.f32.mrb[213].mxu1 }
 0x2be   :  { %v1963_v49 = vpop.f32.mrb[214].mxu0  ;;  %v2419_v50 = vpop.f32.mrb[214].mxu1 }
 0x2bf   :  { %v2544_v51 = vmax.f32 %v1961_v45, 0.0  ;;  %v1964_v52 = vadd.f32 %v6322_v7, %v1963_v49  ;;  %v1965_v53 = vpop.f32.mrb[215].mxu0  ;;  %v2658_v54 = vmax.f32 %v2417_v47, 0.0  ;;  %v2420_v55 = vadd.f32 %v6322_v7, %v2419_v50  ;;  %v2421_v56 = vpop.f32.mrb[215].mxu1 }
 0x2c1   :  { %v4368_v57 = vpack.c.bf16 %v2544_v51, %v2544_v51  ;;  %v2545_v58 = vmax.f32 %v1964_v52, 0.0  ;;  %v4482_v59 = vpack.c.bf16 %v2658_v54, %v2658_v54  ;;  %v2659_v60 = vmax.f32 %v2420_v55, 0.0 }
 0x2c3   :  { %3671 = vst.msk [vmem:[%s6792_s3 + $0x1a8] sm:$0xf] %vm3564_vm0, %v4368_v57  ;;  %v4369_v61 = vpack.c.bf16 %v2545_v58, %v2545_v58  ;;  %3785 = vst.msk [vmem:[%s6792_s3 + $0x370] sm:$0xf] %vm3564_vm0, %v4482_v59  ;;  %v4483_v62 = vpack.c.bf16 %v2659_v60, %v2659_v60 }
 0x2c4   :  { %v1968_v0 = vpop.f32.mrb[216].mxu0  ;;  %v2424_v1 = vpop.f32.mrb[216].mxu1 }
 0x2c5   :  { %3672 = vst.msk [vmem:[%s6792_s3 + $0x1ac] sm:$0xf] %vm3564_vm0, %v4369_v61  ;;  %v1969_v2 = vadd.f32 %v6322_v7, %v1968_v0  ;;  %v1970_v3 = vpop.f32.mrb[217].mxu0  ;;  %3786 = vst.msk [vmem:[%s6792_s3 + $0x374] sm:$0xf] %vm3564_vm0, %v4483_v62  ;;  %v2425_v4 = vadd.f32 %v6322_v7, %v2424_v1  ;;  %v2426_v63 = vpop.f32.mrb[217].mxu1 }
 0x2c6   :  { %v1971_v5 = vpop.f32.mrb[218].mxu0  ;;  %v2427_v6 = vpop.f32.mrb[218].mxu1 }
 0x2c7   :  { %v2546_v8 = vmax.f32 %v1969_v2, 0.0  ;;  %v1972_v10 = vadd.f32 %v4876_v9, %v1971_v5  ;;  %v1973_v11 = vpop.f32.mrb[219].mxu0  ;;  %v2660_v12 = vmax.f32 %v2425_v4, 0.0  ;;  %v2428_v13 = vadd.f32 %v4876_v9, %v2427_v6  ;;  %v2429_v14 = vpop.f32.mrb[219].mxu1 }
 0x2c9   :  { %v4370_v15 = vpack.c.bf16 %v2546_v8, %v2546_v8  ;;  %v2547_v16 = vmax.f32 %v1972_v10, 0.0  ;;  %v4484_v17 = vpack.c.bf16 %v2660_v12, %v2660_v12  ;;  %v2661_v18 = vmax.f32 %v2428_v13, 0.0 }
 0x2cb   :  { %3673 = vst.msk [vmem:[%s6792_s3 + $0x1b0] sm:$0xf] %vm3564_vm0, %v4370_v15  ;;  %v4371_v7 = vpack.c.bf16 %v2547_v16, %v2547_v16  ;;  %3787 = vst.msk [vmem:[%s6792_s3 + $0x378] sm:$0xf] %vm3564_vm0, %v4484_v17  ;;  %v4485_v19 = vpack.c.bf16 %v2661_v18, %v2661_v18 }
 0x2cc   :  { %v1976_v20 = vpop.f32.mrb[220].mxu0  ;;  %v2432_v21 = vpop.f32.mrb[220].mxu1 }
 0x2cd   :  { %3674 = vst.msk [vmem:[%s6792_s3 + $0x1b4] sm:$0xf] %vm3564_vm0, %v4371_v7  ;;  %v1977_v22 = vadd.f32 %v4876_v9, %v1976_v20  ;;  %v1978_v23 = vpop.f32.mrb[221].mxu0  ;;  %3788 = vst.msk [vmem:[%s6792_s3 + $0x37c] sm:$0xf] %vm3564_vm0, %v4485_v19  ;;  %v2433_v24 = vadd.f32 %v4876_v9, %v2432_v21  ;;  %v2434_v25 = vpop.f32.mrb[221].mxu1 }
 0x2ce   :  { %v1979_v26 = vpop.f32.mrb[222].mxu0  ;;  %v2435_v27 = vpop.f32.mrb[222].mxu1 }
 0x2cf   :  { %v2548_v28 = vmax.f32 %v1977_v22, 0.0  ;;  %v1980_v29 = vadd.f32 %v4876_v9, %v1979_v26  ;;  %v1981_v30 = vpop.f32.mrb[223].mxu0  ;;  %v2662_v31 = vmax.f32 %v2433_v24, 0.0  ;;  %v2436_v32 = vpop.f32.mrb[223].mxu1 }
 0x2d1   :  { %v4372_v33 = vpack.c.bf16 %v2548_v28, %v2548_v28  ;;  %v2549_v34 = vmax.f32 %v1980_v29, 0.0  ;;  %v4486_v35 = vpack.c.bf16 %v2662_v31, %v2662_v31 }
 0x2d3   :  { %3675 = vst.msk [vmem:[%s6792_s3 + $0x1b8] sm:$0xf] %vm3564_vm0, %v4372_v33  ;;  %v4373_v36 = vpack.c.bf16 %v2549_v34, %v2549_v34  ;;  %3789 = vst.msk [vmem:[%s6792_s3 + $0x380] sm:$0xf] %vm3564_vm0, %v4486_v35 }
 0x2d4   :  { %v1984_v37 = vpop.f32.mrb[224].mxu0 }
 0x2d5   :  { %3676 = vst.msk [vmem:[%s6792_s3 + $0x1bc] sm:$0xf] %vm3564_vm0, %v4373_v36  ;;  %v1985_v38 = vadd.f32 %v4876_v9, %v1984_v37  ;;  %v1986_v39 = vpop.f32.mrb[225].mxu0 }
 0x2d6   :  { %v1987_v40 = vpop.f32.mrb[226].mxu0 }
 0x2d7   :  { %v2550_v41 = vmax.f32 %v1985_v38, 0.0  ;;  %v1988_v42 = vadd.f32 %v4876_v9, %v1987_v40  ;;  %v1989_v43 = vpop.f32.mrb[227].mxu0 }
 0x2d9   :  { %v4374_v44 = vpack.c.bf16 %v2550_v41, %v2550_v41  ;;  %v2551_v45 = vmax.f32 %v1988_v42, 0.0 }
 0x2db   :  { %3677 = vst.msk [vmem:[%s6792_s3 + $0x1c0] sm:$0xf] %vm3564_vm0, %v4374_v44  ;;  %v4375_v46 = vpack.c.bf16 %v2551_v45, %v2551_v45 }
 0x2dd   :  { %3678 = vst.msk [vmem:[%s6792_s3 + $0x1c4] sm:$0xf] %vm3564_vm0, %v4375_v46 }

// kernel: dqn_forward.5
= control target key start
LH: loop header
LB: loop body
LE: loop exit
PB: predicated region body
PF: predicated region fallthrough
CT: control target
= control target key end

     0   :  { %v2144_v0 = vmov 0   ;;  %vm1580_vm0 = vcmask 519168   ;;  %s2837_s1 = inlined_call_operand.vmem [shape: bf16[512,64], index: 1, kind: input, shape index: {}]   ;;  %s2838_s0 = inlined_call_operand.vmem [shape: bf16[392,512], index: 0, kind: input, shape index: {}]   ;;  %s2839_s2 = inlined_call_operand.vmem [shape: f32[1,64], index: 2, kind: input, shape index: {}]   ;;  %s2840_s3 = inlined_call_operand.vmem [shape: bf16[392,64], index: 3, kind: output, shape index: {}]  }
   0x1   :  { %870 = vmatprep.subr.bf16.mxu1 %v2144_v0  ;;  %1102 = vmatprep.subr.bf16.mxu0 %v2144_v0  ;;  %v1964_v1 = vld [vmem:[%s2837_s1] sm:$0xff]   ;;  %v1966_v3 = vld [vmem:[%s2837_s1 + $0x8] sm:$0xff]   ;;  %v1968_v5 = vld [vmem:[%s2837_s1 + $0x10] sm:$0xff]  }
   0x2   :  { %v1965_v2 = vld [vmem:[%s2837_s1 + $0x80] sm:$0xff]   ;;  %871 = vmatpush1.bf16.msra.mxu1 %v1964_v1  ;;  %v1967_v4 = vld [vmem:[%s2837_s1 + $0x88] sm:$0xff]   ;;  %v1969_v6 = vld [vmem:[%s2837_s1 + $0x90] sm:$0xff]  }
   0x3   :  { %1103 = vmatpush1.bf16.msra.mxu0 %v1965_v2  ;;  %872 = vmatprep.subr.bf16.mxu1 %v2144_v0  ;;  %v1970_v7 = vld [vmem:[%s2837_s1 + $0x18] sm:$0xff]   ;;  %v1972_v9 = vld [vmem:[%s2837_s1 + $0x20] sm:$0xff]   ;;  %v1974_v11 = vld [vmem:[%s2837_s1 + $0x28] sm:$0xff]  }
   0x4   :  { %1104 = vmatprep.subr.bf16.mxu0 %v2144_v0  ;;  %v1971_v8 = vld [vmem:[%s2837_s1 + $0x98] sm:$0xff]   ;;  %v1973_v10 = vld [vmem:[%s2837_s1 + $0xa0] sm:$0xff]   ;;  %v1975_v12 = vld [vmem:[%s2837_s1 + $0xa8] sm:$0xff]  }
   0x5   :  { %v1976_v13 = vld [vmem:[%s2837_s1 + $0x30] sm:$0xff]   ;;  %v1978_v15 = vld [vmem:[%s2837_s1 + $0x38] sm:$0xff]   ;;  %v1980_v17 = vld [vmem:[%s2837_s1 + $0x40] sm:$0xff]  }
   0x6   :  { %873 = vmatpush1.bf16.msra.mxu1 %v1966_v3  ;;  %v1977_v14 = vld [vmem:[%s2837_s1 + $0xb0] sm:$0xff]   ;;  %v1979_v16 = vld [vmem:[%s2837_s1 + $0xb8] sm:$0xff]   ;;  %v1981_v18 = vld [vmem:[%s2837_s1 + $0xc0] sm:$0xff]  }
   0x7   :  { %1105 = vmatpush1.bf16.msra.mxu0 %v1967_v4  ;;  %874 = vmatprep.subr.bf16.mxu1 %v2144_v0  ;;  %v1998_v19 = vld [vmem:[%s2838_s0 + $0x4] ss:$16 sps:$4 sm:$0xff]   ;;  %v1982_v20 = vld [vmem:[%s2837_s1 + $0x48] sm:$0xff]   ;;  %v1986_v25 = vld [vmem:[%s2837_s1 + $0x58] sm:$0xff]  }
   0x8   :  { %1106 = vmatprep.subr.bf16.mxu0 %v2144_v0  ;;  %v2001_v21 = vld [vmem:[%s2838_s0 + $0xc] ss:$16 sps:$4 sm:$0xff]   ;;  %902 = vmatprep.mubr.bf16.mxu1 %v1998_v19  ;;  %v1984_v23 = vld [vmem:[%s2837_s1 + $0x50] sm:$0xff]   ;;  %v1988_v27 = vld [vmem:[%s2837_s1 + $0x60] sm:$0xff]  }
   0x9   :  { %v1983_v22 = vld [vmem:[%s2837_s1 + $0xc8] sm:$0xff]   ;;  %1134 = vmatprep.mubr.bf16.mxu0 %v2001_v21  ;;  %v1985_v24 = vld [vmem:[%s2837_s1 + $0xd0] sm:$0xff]   ;;  %v1987_v26 = vld [vmem:[%s2837_s1 + $0xd8] sm:$0xff]  }
   0xa   :  { %875 = vmatpush1.bf16.msra.mxu1 %v1968_v5  ;;  %v1989_v28 = vld [vmem:[%s2837_s1 + $0xe0] sm:$0xff]   ;;  %v1990_v29 = vld [vmem:[%s2837_s1 + $0x68] sm:$0xff]   ;;  %v1992_v31 = vld [vmem:[%s2837_s1 + $0x70] sm:$0xff]  }
   0xb   :  { %1107 = vmatpush1.bf16.msra.mxu0 %v1969_v6  ;;  %876 = vmatprep.subr.bf16.mxu1 %v2144_v0  ;;  %v1991_v30 = vld [vmem:[%s2837_s1 + $0xe8] sm:$0xff]   ;;  %v1993_v32 = vld [vmem:[%s2837_s1 + $0xf0] sm:$0xff]   ;;  %v1994_v33 = vld [vmem:[%s2837_s1 + $0x78] sm:$0xff]  }
   0xc   :  { %1108 = vmatprep.subr.bf16.mxu0 %v2144_v0  ;;  %v1995_v34 = vld [vmem:[%s2837_s1 + $0xf8] sm:$0xff]   ;;  %v1996_v35 = vld [vmem:[%s2838_s0] ss:$16 sps:$4 sm:$0xff]   ;;  %v2002_v37 = vld [vmem:[%s2838_s0 + $0x24] ss:$16 sps:$4 sm:$0xff]  }
   0xd   :  { %v1999_v36 = vld [vmem:[%s2838_s0 + $0x8] ss:$16 sps:$4 sm:$0xff]   ;;  %v2004_v38 = vld [vmem:[%s2838_s0 + $0x2c] ss:$16 sps:$4 sm:$0xff]   ;;  %v2006_v39 = vld [vmem:[%s2838_s0 + $0x20] ss:$16 sps:$4 sm:$0xff]  }
   0xe   :  { %877 = vmatpush1.bf16.msra.mxu1 %v1970_v7  ;;  %v2007_v40 = vld [vmem:[%s2838_s0 + $0x28] ss:$16 sps:$4 sm:$0xff]   ;;  %v2008_v41 = vld [vmem:[%s2838_s0 + $0x44] ss:$16 sps:$4 sm:$0xff]   ;;  %v2010_v42 = vld [vmem:[%s2838_s0 + $0x4c] ss:$16 sps:$4 sm:$0xff]  }
   0xf   :  { %1109 = vmatpush1.bf16.msra.mxu0 %v1971_v8  ;;  %878 = vmatprep.subr.bf16.mxu1 %v2144_v0  ;;  %v2012_v43 = vld [vmem:[%s2838_s0 + $0x40] ss:$16 sps:$4 sm:$0xff]   ;;  %v2013_v44 = vld [vmem:[%s2838_s0 + $0x48] ss:$16 sps:$4 sm:$0xff]   ;;  %v2014_v45 = vld [vmem:[%s2838_s0 + $0x64] ss:$16 sps:$4 sm:$0xff]  }
  0x10   :  { %1110 = vmatprep.subr.bf16.mxu0 %v2144_v0  ;;  %v2016_v46 = vld [vmem:[%s2838_s0 + $0x6c] ss:$16 sps:$4 sm:$0xff]   ;;  %v2018_v47 = vld [vmem:[%s2838_s0 + $0x60] ss:$16 sps:$4 sm:$0xff]   ;;  %v2019_v48 = vld [vmem:[%s2838_s0 + $0x68] ss:$16 sps:$4 sm:$0xff]  }
  0x11   :  { %v2020_v49 = vld [vmem:[%s2838_s0 + $0x84] ss:$16 sps:$4 sm:$0xff]   ;;  %v2022_v50 = vld [vmem:[%s2838_s0 + $0x8c] ss:$16 sps:$4 sm:$0xff]   ;;  %v2024_v51 = vld [vmem:[%s2838_s0 + $0x80] ss:$16 sps:$4 sm:$0xff]  }
  0x12   :  { %879 = vmatpush1.bf16.msra.mxu1 %v1972_v9  ;;  %v2025_v52 = vld [vmem:[%s2838_s0 + $0x88] ss:$16 sps:$4 sm:$0xff]   ;;  %v2026_v53 = vld [vmem:[%s2838_s0 + $0xa4] ss:$16 sps:$4 sm:$0xff]   ;;  %v2028_v54 = vld [vmem:[%s2838_s0 + $0xac] ss:$16 sps:$4 sm:$0xff]  }
  0x13   :  { %1111 = vmatpush1.bf16.msra.mxu0 %v1973_v10  ;;  %880 = vmatprep.subr.bf16.mxu1 %v2144_v0  ;;  %v2030_v55 = vld [vmem:[%s2838_s0 + $0xa0] ss:$16 sps:$4 sm:$0xff]   ;;  %v2031_v56 = vld [vmem:[%s2838_s0 + $0xa8] ss:$16 sps:$4 sm:$0xff]   ;;  %v2032_v57 = vld [vmem:[%s2838_s0 + $0xc4] ss:$16 sps:$4 sm:$0xff]  }
  0x14   :  { %1112 = vmatprep.subr.bf16.mxu0 %v2144_v0  ;;  %v2034_v58 = vld [vmem:[%s2838_s0 + $0xcc] ss:$16 sps:$4 sm:$0xff]   ;;  %v2036_v59 = vld [vmem:[%s2838_s0 + $0xc0] ss:$16 sps:$4 sm:$0xff]   ;;  %v2037_v60 = vld [vmem:[%s2838_s0 + $0xc8] ss:$16 sps:$4 sm:$0xff]  }
  0x15   :  { %v2038_v61 = vld [vmem:[%s2838_s0 + $0xe4] ss:$16 sps:$4 sm:$0xff]   ;;  %v2040_v62 = vld [vmem:[%s2838_s0 + $0xec] ss:$16 sps:$4 sm:$0xff]   ;;  %v2042_v63 = vld [vmem:[%s2838_s0 + $0xe0] ss:$16 sps:$4 sm:$0xff]  }
  0x16   :  { %881 = vmatpush1.bf16.msra.mxu1 %v1974_v11  ;;  %v2044_v1 = vld [vmem:[%s2838_s0 + $0x104] ss:$16 sps:$4 sm:$0xff]   ;;  %v2046_v2 = vld [vmem:[%s2838_s0 + $0x10c] ss:$16 sps:$4 sm:$0xff]   ;;  %v2048_v3 = vld [vmem:[%s2838_s0 + $0x100] ss:$16 sps:$4 sm:$0xff]  }
  0x17   :  { %1113 = vmatpush1.bf16.msra.mxu0 %v1975_v12  ;;  %882 = vmatprep.subr.bf16.mxu1 %v2144_v0  ;;  %v2049_v4 = vld [vmem:[%s2838_s0 + $0x108] ss:$16 sps:$4 sm:$0xff]   ;;  %v2050_v5 = vld [vmem:[%s2838_s0 + $0x124] ss:$16 sps:$4 sm:$0xff]   ;;  %v2052_v6 = vld [vmem:[%s2838_s0 + $0x12c] ss:$16 sps:$4 sm:$0xff]  }
  0x18   :  { %1114 = vmatprep.subr.bf16.mxu0 %v2144_v0  ;;  %v2054_v7 = vld [vmem:[%s2838_s0 + $0x120] ss:$16 sps:$4 sm:$0xff]   ;;  %v2055_v8 = vld [vmem:[%s2838_s0 + $0x128] ss:$16 sps:$4 sm:$0xff]   ;;  %v2056_v9 = vld [vmem:[%s2838_s0 + $0x144] ss:$16 sps:$4 sm:$0xff]  }
  0x19   :  { %v2058_v10 = vld [vmem:[%s2838_s0 + $0x14c] ss:$16 sps:$4 sm:$0xff]   ;;  %v2060_v11 = vld [vmem:[%s2838_s0 + $0x140] ss:$16 sps:$4 sm:$0xff]   ;;  %v2061_v12 = vld [vmem:[%s2838_s0 + $0x148] ss:$16 sps:$4 sm:$0xff]  }
  0x1a   :  { %883 = vmatpush1.bf16.msra.mxu1 %v1976_v13  ;;  %v2062_v13 = vld [vmem:[%s2838_s0 + $0x164] ss:$16 sps:$4 sm:$0xff]   ;;  %v2072_v19 = vld [vmem:[%s2838_s0 + $0x180] ss:$16 sps:$4 sm:$0xff]  }
  0x1b   :  { %1115 = vmatpush1.bf16.msra.mxu0 %v1977_v14  ;;  %884 = vmatprep.subr.bf16.mxu1 %v2144_v0  ;;  %v2064_v14 = vld [vmem:[%s2838_s0 + $0x16c] ss:$16 sps:$4 sm:$0xff]   ;;  %v2074_v21 = vld [vmem:[%s2838_s0 + $0x1a4] ss:$16 sps:$4 sm:$0xff]  }
  0x1c   :  { %1116 = vmatprep.subr.bf16.mxu0 %v2144_v0 }
  0x1e   :  { %885 = vmatpush1.bf16.msra.mxu1 %v1978_v15  ;;  %v2066_v15 = vld [vmem:[%s2838_s0 + $0x160] ss:$16 sps:$4 sm:$0xff]  }
  0x1f   :  { %1117 = vmatpush1.bf16.msra.mxu0 %v1979_v16  ;;  %886 = vmatprep.subr.bf16.mxu1 %v2144_v0  ;;  %v2067_v16 = vld [vmem:[%s2838_s0 + $0x168] ss:$16 sps:$4 sm:$0xff]  }
  0x20   :  { %1118 = vmatprep.subr.bf16.mxu0 %v2144_v0 }
  0x22   :  { %887 = vmatpush1.bf16.msra.mxu1 %v1980_v17  ;;  %v2068_v17 = vld [vmem:[%s2838_s0 + $0x184] ss:$16 sps:$4 sm:$0xff]  }
  0x23   :  { %1119 = vmatpush1.bf16.msra.mxu0 %v1981_v18  ;;  %888 = vmatprep.subr.bf16.mxu1 %v2144_v0  ;;  %v2070_v18 = vld [vmem:[%s2838_s0 + $0x18c] ss:$16 sps:$4 sm:$0xff]  }
  0x24   :  { %1120 = vmatprep.subr.bf16.mxu0 %v2144_v0 }
  0x26   :  { %889 = vmatpush1.bf16.msra.mxu1 %v1982_v20  ;;  %v2073_v20 = vld [vmem:[%s2838_s0 + $0x188] ss:$16 sps:$4 sm:$0xff]  }
  0x27   :  { %1121 = vmatpush1.bf16.msra.mxu0 %v1983_v22  ;;  %890 = vmatprep.subr.bf16.mxu1 %v2144_v0  ;;  %v2076_v22 = vld [vmem:[%s2838_s0 + $0x1ac] ss:$16 sps:$4 sm:$0xff]  }
  0x28   :  { %1122 = vmatprep.subr.bf16.mxu0 %v2144_v0 }
  0x2a   :  { %891 = vmatpush1.bf16.msra.mxu1 %v1984_v23  ;;  %v2078_v23 = vld [vmem:[%s2838_s0 + $0x1a0] ss:$16 sps:$4 sm:$0xff]  }
  0x2b   :  { %1123 = vmatpush1.bf16.msra.mxu0 %v1985_v24  ;;  %892 = vmatprep.subr.bf16.mxu1 %v2144_v0  ;;  %v2079_v24 = vld [vmem:[%s2838_s0 + $0x1a8] ss:$16 sps:$4 sm:$0xff]  }
  0x2c   :  { %1124 = vmatprep.subr.bf16.mxu0 %v2144_v0 }
  0x2e   :  { %893 = vmatpush1.bf16.msra.mxu1 %v1986_v25  ;;  %v2080_v25 = vld [vmem:[%s2838_s0 + $0x1c4] ss:$16 sps:$4 sm:$0xff]  }
  0x2f   :  { %1125 = vmatpush1.bf16.msra.mxu0 %v1987_v26  ;;  %894 = vmatprep.subr.bf16.mxu1 %v2144_v0  ;;  %v2082_v26 = vld [vmem:[%s2838_s0 + $0x1cc] ss:$16 sps:$4 sm:$0xff]  }
  0x30   :  { %1126 = vmatprep.subr.bf16.mxu0 %v2144_v0 }
  0x32   :  { %895 = vmatpush1.bf16.msra.mxu1 %v1988_v27  ;;  %v2084_v27 = vld [vmem:[%s2838_s0 + $0x1c0] ss:$16 sps:$4 sm:$0xff]  }
  0x33   :  { %1127 = vmatpush1.bf16.msra.mxu0 %v1989_v28  ;;  %896 = vmatprep.subr.bf16.mxu1 %v2144_v0  ;;  %v2085_v28 = vld [vmem:[%s2838_s0 + $0x1c8] ss:$16 sps:$4 sm:$0xff]  }
  0x34   :  { %1128 = vmatprep.subr.bf16.mxu0 %v2144_v0 }
  0x36   :  { %897 = vmatpush1.bf16.msra.mxu1 %v1990_v29  ;;  %v2086_v29 = vld [vmem:[%s2838_s0 + $0x1e4] ss:$16 sps:$4 sm:$0xff]  }
  0x37   :  { %1129 = vmatpush1.bf16.msra.mxu0 %v1991_v30  ;;  %898 = vmatprep.subr.bf16.mxu1 %v2144_v0  ;;  %v2088_v30 = vld [vmem:[%s2838_s0 + $0x1ec] ss:$16 sps:$4 sm:$0xff]  }
  0x38   :  { %1130 = vmatprep.subr.bf16.mxu0 %v2144_v0 }
  0x3a   :  { %899 = vmatpush1.bf16.msra.mxu1 %v1992_v31  ;;  %v2090_v31 = vld [vmem:[%s2838_s0 + $0x1e0] ss:$16 sps:$4 sm:$0xff]  }
  0x3b   :  { %1131 = vmatpush1.bf16.msra.mxu0 %v1993_v32  ;;  %900 = vmatprep.subr.bf16.mxu1 %v2144_v0  ;;  %v2091_v32 = vld [vmem:[%s2838_s0 + $0x1e8] ss:$16 sps:$4 sm:$0xff]  }
  0x3c   :  { %1132 = vmatprep.subr.bf16.mxu0 %v2144_v0  ;;  %v2043_v0 = vld [vmem:[%s2838_s0 + $0xe8] ss:$16 sps:$4 sm:$0xff]  }
  0x3e   :  { %901 = vmatpush1.bf16.msra.mxu1 %v1994_v33  ;;  %v2092_v33 = vld [vmem:[%s2838_s0 + $0x204] ss:$16 sps:$4 sm:$0xff]  }
  0x3f   :  { %1133 = vmatpush1.bf16.msra.mxu0 %v1995_v34  ;;  %v2094_v34 = vld [vmem:[%s2838_s0 + $0x20c] ss:$16 sps:$4 sm:$0xff]  }
  0x41   :  { %903 = vmatmul.mubr.bf16.vlgmr.msra.gmra.mrb[0].mxu1 %v1996_v35  ;;  %v2096_v35 = vld [vmem:[%s2838_s0 + $0x200] ss:$16 sps:$4 sm:$0xff]  }
  0x42   :  { %1135 = vmatmul.mubr.bf16.vlgmr.msra.gmra.mrb[0].mxu0 %v1999_v36  ;;  %910 = vmatprep.mubr.bf16.mxu1 %v2002_v37  ;;  %v2097_v36 = vld [vmem:[%s2838_s0 + $0x208] ss:$16 sps:$4 sm:$0xff]   ;;  %v2098_v37 = vld [vmem:[%s2838_s0 + $0x224] ss:$16 sps:$4 sm:$0xff]  }
  0x43   :  { %1142 = vmatprep.mubr.bf16.mxu0 %v2004_v38  ;;  %v2100_v38 = vld [vmem:[%s2838_s0 + $0x22c] ss:$16 sps:$4 sm:$0xff]  }
  0x49   :  { %911 = vmatmul.mubr.bf16.gmra.mrb[4].mxu1 %v2006_v39  ;;  %v2102_v39 = vld [vmem:[%s2838_s0 + $0x220] ss:$16 sps:$4 sm:$0xff]  }
  0x4a   :  { %1143 = vmatmul.mubr.bf16.gmra.mrb[4].mxu0 %v2007_v40  ;;  %918 = vmatprep.mubr.bf16.mxu1 %v2008_v41  ;;  %v2103_v40 = vld [vmem:[%s2838_s0 + $0x228] ss:$16 sps:$4 sm:$0xff]   ;;  %v2104_v41 = vld [vmem:[%s2838_s0 + $0x244] ss:$16 sps:$4 sm:$0xff]  }
  0x4b   :  { %1150 = vmatprep.mubr.bf16.mxu0 %v2010_v42  ;;  %v2106_v42 = vld [vmem:[%s2838_s0 + $0x24c] ss:$16 sps:$4 sm:$0xff]  }
  0x51   :  { %919 = vmatmul.mubr.bf16.gmra.mrb[8].mxu1 %v2012_v43  ;;  %v2108_v43 = vld [vmem:[%s2838_s0 + $0x240] ss:$16 sps:$4 sm:$0xff]  }
  0x52   :  { %1151 = vmatmul.mubr.bf16.gmra.mrb[8].mxu0 %v2013_v44  ;;  %926 = vmatprep.mubr.bf16.mxu1 %v2014_v45  ;;  %v2109_v44 = vld [vmem:[%s2838_s0 + $0x248] ss:$16 sps:$4 sm:$0xff]   ;;  %v2110_v45 = vld [vmem:[%s2838_s0 + $0x264] ss:$16 sps:$4 sm:$0xff]  }
  0x53   :  { %1158 = vmatprep.mubr.bf16.mxu0 %v2016_v46  ;;  %v2112_v46 = vld [vmem:[%s2838_s0 + $0x26c] ss:$16 sps:$4 sm:$0xff]  }
  0x59   :  { %927 = vmatmul.mubr.bf16.gmra.mrb[12].mxu1 %v2018_v47  ;;  %v2114_v47 = vld [vmem:[%s2838_s0 + $0x260] ss:$16 sps:$4 sm:$0xff]  }
  0x5a   :  { %1159 = vmatmul.mubr.bf16.gmra.mrb[12].mxu0 %v2019_v48  ;;  %934 = vmatprep.mubr.bf16.mxu1 %v2020_v49  ;;  %v2115_v48 = vld [vmem:[%s2838_s0 + $0x268] ss:$16 sps:$4 sm:$0xff]   ;;  %v2116_v49 = vld [vmem:[%s2838_s0 + $0x284] ss:$16 sps:$4 sm:$0xff]  }
  0x5b   :  { %1166 = vmatprep.mubr.bf16.mxu0 %v2022_v50  ;;  %v2118_v50 = vld [vmem:[%s2838_s0 + $0x28c] ss:$16 sps:$4 sm:$0xff]  }
  0x61   :  { %935 = vmatmul.mubr.bf16.gmra.mrb[16].mxu1 %v2024_v51  ;;  %v2120_v51 = vld [vmem:[%s2838_s0 + $0x280] ss:$16 sps:$4 sm:$0xff]  }
  0x62   :  { %1167 = vmatmul.mubr.bf16.gmra.mrb[16].mxu0 %v2025_v52  ;;  %942 = vmatprep.mubr.bf16.mxu1 %v2026_v53  ;;  %v2121_v52 = vld [vmem:[%s2838_s0 + $0x288] ss:$16 sps:$4 sm:$0xff]   ;;  %v2122_v53 = vld [vmem:[%s2838_s0 + $0x2a4] ss:$16 sps:$4 sm:$0xff]  }
  0x63   :  { %1174 = vmatprep.mubr.bf16.mxu0 %v2028_v54  ;;  %v2124_v54 = vld [vmem:[%s2838_s0 + $0x2ac] ss:$16 sps:$4 sm:$0xff]  }
  0x69   :  { %943 = vmatmul.mubr.bf16.gmra.mrb[20].mxu1 %v2030_v55  ;;  %v2126_v55 = vld [vmem:[%s2838_s0 + $0x2a0] ss:$16 sps:$4 sm:$0xff]  }
  0x6a   :  { %1175 = vmatmul.mubr.bf16.gmra.mrb[20].mxu0 %v2031_v56  ;;  %950 = vmatprep.mubr.bf16.mxu1 %v2032_v57  ;;  %v2127_v56 = vld [vmem:[%s2838_s0 + $0x2a8] ss:$16 sps:$4 sm:$0xff]   ;;  %v2128_v57 = vld [vmem:[%s2838_s0 + $0x2c4] ss:$16 sps:$4 sm:$0xff]  }
  0x6b   :  { %1182 = vmatprep.mubr.bf16.mxu0 %v2034_v58  ;;  %v2130_v58 = vld [vmem:[%s2838_s0 + $0x2cc] ss:$16 sps:$4 sm:$0xff]  }
  0x71   :  { %951 = vmatmul.mubr.bf16.gmra.mrb[24].mxu1 %v2036_v59  ;;  %v2132_v59 = vld [vmem:[%s2838_s0 + $0x2c0] ss:$16 sps:$4 sm:$0xff]  }
  0x72   :  { %1183 = vmatmul.mubr.bf16.gmra.mrb[24].mxu0 %v2037_v60  ;;  %958 = vmatprep.mubr.bf16.mxu1 %v2038_v61  ;;  %v2133_v60 = vld [vmem:[%s2838_s0 + $0x2c8] ss:$16 sps:$4 sm:$0xff]   ;;  %v2134_v61 = vld [vmem:[%s2838_s0 + $0x2e4] ss:$16 sps:$4 sm:$0xff]  }
  0x73   :  { %1190 = vmatprep.mubr.bf16.mxu0 %v2040_v62  ;;  %v2136_v62 = vld [vmem:[%s2838_s0 + $0x2ec] ss:$16 sps:$4 sm:$0xff]  }
  0x79   :  { %959 = vmatmul.mubr.bf16.gmra.mrb[28].mxu1 %v2042_v63  ;;  %v111_v63 = vld [vmem:[%s2838_s0 + $0x300] sm:$0xff] }
  0x7a   :  { %1191 = vmatmul.mubr.bf16.gmra.mrb[28].mxu0 %v2043_v0  ;;  %966 = vmatprep.mubr.bf16.mxu1 %v2044_v1  ;;  %v112_v0 = vld [vmem:[%s2838_s0 + $0x308] sm:$0xff]  ;;  %v2138_v1 = vld [vmem:[%s2838_s0 + $0x2e0] ss:$16 sps:$4 sm:$0xff]  }
  0x7b   :  { %1198 = vmatprep.mubr.bf16.mxu0 %v2046_v2  ;;  %v2139_v2 = vld [vmem:[%s2838_s0 + $0x2e8] ss:$16 sps:$4 sm:$0xff]  }
  0x81   :  { %967 = vmatmul.mubr.bf16.gmra.mrb[32].mxu1 %v2048_v3  ;;  %v1732_v3 = vcombine.high %v111_v63, %v111_v63 }
  0x82   :  { %1199 = vmatmul.mubr.bf16.gmra.mrb[32].mxu0 %v2049_v4  ;;  %974 = vmatprep.mubr.bf16.mxu1 %v2050_v5  ;;  %v1734_v4 = vcombine.high %v112_v0, %v112_v0  ;;  %v1731_v5 = vcombine.low %v111_v63, %v111_v63 }
  0x83   :  { %1206 = vmatprep.mubr.bf16.mxu0 %v2052_v6  ;;  %v1733_v6 = vcombine.low %v112_v0, %v112_v0 }
  0x89   :  { %975 = vmatmul.mubr.bf16.gmra.mrb[36].mxu1 %v2054_v7  ;;  %v2590_v7 = vld [vmem:[%s2839_s2] ss:$0 sm:$0xff] }
  0x8a   :  { %1207 = vmatmul.mubr.bf16.gmra.mrb[36].mxu0 %v2055_v8  ;;  %982 = vmatprep.mubr.bf16.mxu1 %v2056_v9 }
  0x8b   :  { %1214 = vmatprep.mubr.bf16.mxu0 %v2058_v10 }
  0x91   :  { %983 = vmatmul.mubr.bf16.gmra.mrb[40].mxu1 %v2060_v11 }
  0x92   :  { %1215 = vmatmul.mubr.bf16.gmra.mrb[40].mxu0 %v2061_v12  ;;  %990 = vmatprep.mubr.bf16.mxu1 %v2062_v13 }
  0x93   :  { %1222 = vmatprep.mubr.bf16.mxu0 %v2064_v14 }
  0x99   :  { %991 = vmatmul.mubr.bf16.gmra.mrb[44].mxu1 %v2066_v15 }
  0x9a   :  { %1223 = vmatmul.mubr.bf16.gmra.mrb[44].mxu0 %v2067_v16  ;;  %998 = vmatprep.mubr.bf16.mxu1 %v2068_v17 }
  0x9b   :  { %1230 = vmatprep.mubr.bf16.mxu0 %v2070_v18 }
  0xa1   :  { %999 = vmatmul.mubr.bf16.gmra.mrb[48].mxu1 %v2072_v19 }
  0xa2   :  { %1231 = vmatmul.mubr.bf16.gmra.mrb[48].mxu0 %v2073_v20  ;;  %1006 = vmatprep.mubr.bf16.mxu1 %v2074_v21 }
  0xa3   :  { %1238 = vmatprep.mubr.bf16.mxu0 %v2076_v22 }
  0xa9   :  { %1007 = vmatmul.mubr.bf16.gmra.mrb[52].mxu1 %v2078_v23 }
  0xaa   :  { %1239 = vmatmul.mubr.bf16.gmra.mrb[52].mxu0 %v2079_v24  ;;  %1014 = vmatprep.mubr.bf16.mxu1 %v2080_v25 }
  0xab   :  { %1246 = vmatprep.mubr.bf16.mxu0 %v2082_v26 }
  0xb1   :  { %1015 = vmatmul.mubr.bf16.gmra.mrb[56].mxu1 %v2084_v27 }
  0xb2   :  { %1247 = vmatmul.mubr.bf16.gmra.mrb[56].mxu0 %v2085_v28  ;;  %1022 = vmatprep.mubr.bf16.mxu1 %v2086_v29 }
  0xb3   :  { %1254 = vmatprep.mubr.bf16.mxu0 %v2088_v30 }
  0xb9   :  { %1023 = vmatmul.mubr.bf16.gmra.mrb[60].mxu1 %v2090_v31 }
  0xba   :  { %1255 = vmatmul.mubr.bf16.gmra.mrb[60].mxu0 %v2091_v32  ;;  %1030 = vmatprep.mubr.bf16.mxu1 %v2092_v33 }
  0xbb   :  { %1262 = vmatprep.mubr.bf16.mxu0 %v2094_v34 }
  0xc1   :  { %1031 = vmatmul.mubr.bf16.gmra.mrb[64].mxu1 %v2096_v35 }
  0xc2   :  { %1263 = vmatmul.mubr.bf16.gmra.mrb[64].mxu0 %v2097_v36  ;;  %1038 = vmatprep.mubr.bf16.mxu1 %v2098_v37 }
  0xc3   :  { %1270 = vmatprep.mubr.bf16.mxu0 %v2100_v38 }
  0xc9   :  { %1039 = vmatmul.mubr.bf16.gmra.mrb[68].mxu1 %v2102_v39 }
  0xca   :  { %1271 = vmatmul.mubr.bf16.gmra.mrb[68].mxu0 %v2103_v40  ;;  %1046 = vmatprep.mubr.bf16.mxu1 %v2104_v41 }
  0xcb   :  { %1278 = vmatprep.mubr.bf16.mxu0 %v2106_v42 }
  0xd1   :  { %1047 = vmatmul.mubr.bf16.gmra.mrb[72].mxu1 %v2108_v43 }
  0xd2   :  { %1279 = vmatmul.mubr.bf16.gmra.mrb[72].mxu0 %v2109_v44  ;;  %1054 = vmatprep.mubr.bf16.mxu1 %v2110_v45 }
  0xd3   :  { %1286 = vmatprep.mubr.bf16.mxu0 %v2112_v46 }
  0xd9   :  { %1055 = vmatmul.mubr.bf16.gmra.mrb[76].mxu1 %v2114_v47 }
  0xda   :  { %1287 = vmatmul.mubr.bf16.gmra.mrb[76].mxu0 %v2115_v48  ;;  %1062 = vmatprep.mubr.bf16.mxu1 %v2116_v49 }
  0xdb   :  { %1294 = vmatprep.mubr.bf16.mxu0 %v2118_v50 }
  0xe1   :  { %1063 = vmatmul.mubr.bf16.gmra.mrb[80].mxu1 %v2120_v51 }
  0xe2   :  { %1295 = vmatmul.mubr.bf16.gmra.mrb[80].mxu0 %v2121_v52  ;;  %1070 = vmatprep.mubr.bf16.mxu1 %v2122_v53 }
  0xe3   :  { %1302 = vmatprep.mubr.bf16.mxu0 %v2124_v54 }
  0xe9   :  { %1071 = vmatmul.mubr.bf16.gmra.mrb[84].mxu1 %v2126_v55 }
  0xea   :  { %1303 = vmatmul.mubr.bf16.gmra.mrb[84].mxu0 %v2127_v56  ;;  %1078 = vmatprep.mubr.bf16.mxu1 %v2128_v57 }
  0xeb   :  { %1310 = vmatprep.mubr.bf16.mxu0 %v2130_v58 }
  0xf1   :  { %1079 = vmatmul.mubr.bf16.gmra.mrb[88].mxu1 %v2132_v59 }
  0xf2   :  { %1311 = vmatmul.mubr.bf16.gmra.mrb[88].mxu0 %v2133_v60  ;;  %1086 = vmatprep.mubr.bf16.mxu1 %v2134_v61 }
  0xf3   :  { %1318 = vmatprep.mubr.bf16.mxu0 %v2136_v62 }
  0xf9   :  { %1087 = vmatmul.mubr.bf16.gmra.mrb[92].mxu1 %v2138_v1 }
  0xfa   :  { %1319 = vmatmul.mubr.bf16.gmra.mrb[92].mxu0 %v2139_v2  ;;  %1094 = vmatprep.mubr.bf16.mxu1 %v1732_v3 }
  0xfb   :  { %1326 = vmatprep.mubr.bf16.mxu0 %v1734_v4 }
 0x101   :  { %1095 = vmatmul.mubr.bf16.gmra.mrb[96].mxu1 %v1731_v5 }
 0x102   :  { %1327 = vmatmul.mubr.bf16.gmra.mrb[96].mxu0 %v1733_v6 }
 0x114   :  { %v904_v8 = vpop.f32.mrb[0].mxu1 }
 0x115   :  { %v905_v9 = vadd.f32 %v2590_v7, %v904_v8  ;;  %v1136_v10 = vpop.f32.mrb[0].mxu0  ;;  %v906_v11 = vpop.f32.mrb[1].mxu1 }
 0x116   :  { %v1138_v12 = vpop.f32.mrb[1].mxu0  ;;  %v907_v13 = vpop.f32.mrb[2].mxu1 }
 0x117   :  { %v1137_v14 = vadd.f32 %v1136_v10, %v905_v9  ;;  %v908_v15 = vadd.f32 %v2590_v7, %v907_v13  ;;  %v1139_v16 = vpop.f32.mrb[2].mxu0  ;;  %v909_v17 = vpop.f32.mrb[3].mxu1 }
 0x118   :  { %v1141_v18 = vpop.f32.mrb[3].mxu0 }
 0x119   :  { %v1334_v19 = vmax.f32 %v1137_v14, 0.0  ;;  %v1140_v20 = vadd.f32 %v1139_v16, %v908_v15 }
 0x11b   :  { %v1816_v21 = vpack.c.bf16 %v1334_v19, %v1334_v19  ;;  %v1335_v22 = vmax.f32 %v1140_v20, 0.0 }
 0x11c   :  { %v912_v23 = vpop.f32.mrb[4].mxu1 }
 0x11d   :  { %1581 = vst.msk [vmem:[%s2840_s3] sm:$0xf] %vm1580_vm0, %v1816_v21  ;;  %v1817_v24 = vpack.c.bf16 %v1335_v22, %v1335_v22  ;;  %v913_v25 = vadd.f32 %v2590_v7, %v912_v23  ;;  %v1144_v26 = vpop.f32.mrb[4].mxu0  ;;  %v914_v27 = vpop.f32.mrb[5].mxu1 }
 0x11e   :  { %v1146_v28 = vpop.f32.mrb[5].mxu0  ;;  %v915_v29 = vpop.f32.mrb[6].mxu1 }
 0x11f   :  { %1582 = vst.msk [vmem:[%s2840_s3 + $0x4] sm:$0xf] %vm1580_vm0, %v1817_v24  ;;  %v1145_v30 = vadd.f32 %v1144_v26, %v913_v25  ;;  %v916_v31 = vadd.f32 %v2590_v7, %v915_v29  ;;  %v1147_v32 = vpop.f32.mrb[6].mxu0  ;;  %v917_v33 = vpop.f32.mrb[7].mxu1 }
 0x120   :  { %v1149_v34 = vpop.f32.mrb[7].mxu0 }
 0x121   :  { %v1336_v35 = vmax.f32 %v1145_v30, 0.0  ;;  %v1148_v36 = vadd.f32 %v1147_v32, %v916_v31 }
 0x123   :  { %v1818_v37 = vpack.c.bf16 %v1336_v35, %v1336_v35  ;;  %v1337_v38 = vmax.f32 %v1148_v36, 0.0 }
 0x124   :  { %v920_v39 = vpop.f32.mrb[8].mxu1 }
 0x125   :  { %1583 = vst.msk [vmem:[%s2840_s3 + $0x8] sm:$0xf] %vm1580_vm0, %v1818_v37  ;;  %v1819_v40 = vpack.c.bf16 %v1337_v38, %v1337_v38  ;;  %v921_v41 = vadd.f32 %v2590_v7, %v920_v39  ;;  %v1152_v42 = vpop.f32.mrb[8].mxu0  ;;  %v922_v43 = vpop.f32.mrb[9].mxu1 }
 0x126   :  { %v1154_v44 = vpop.f32.mrb[9].mxu0  ;;  %v923_v45 = vpop.f32.mrb[10].mxu1 }
 0x127   :  { %1584 = vst.msk [vmem:[%s2840_s3 + $0xc] sm:$0xf] %vm1580_vm0, %v1819_v40  ;;  %v1153_v46 = vadd.f32 %v1152_v42, %v921_v41  ;;  %v924_v47 = vadd.f32 %v2590_v7, %v923_v45  ;;  %v1155_v48 = vpop.f32.mrb[10].mxu0  ;;  %v925_v49 = vpop.f32.mrb[11].mxu1 }
 0x128   :  { %v1157_v50 = vpop.f32.mrb[11].mxu0 }
 0x129   :  { %v1338_v51 = vmax.f32 %v1153_v46, 0.0  ;;  %v1156_v52 = vadd.f32 %v1155_v48, %v924_v47 }
 0x12b   :  { %v1820_v53 = vpack.c.bf16 %v1338_v51, %v1338_v51  ;;  %v1339_v54 = vmax.f32 %v1156_v52, 0.0 }
 0x12c   :  { %v928_v55 = vpop.f32.mrb[12].mxu1 }
 0x12d   :  { %1585 = vst.msk [vmem:[%s2840_s3 + $0x10] sm:$0xf] %vm1580_vm0, %v1820_v53  ;;  %v1821_v56 = vpack.c.bf16 %v1339_v54, %v1339_v54  ;;  %v929_v57 = vadd.f32 %v2590_v7, %v928_v55  ;;  %v1160_v58 = vpop.f32.mrb[12].mxu0  ;;  %v930_v59 = vpop.f32.mrb[13].mxu1 }
 0x12e   :  { %v1162_v60 = vpop.f32.mrb[13].mxu0  ;;  %v931_v61 = vpop.f32.mrb[14].mxu1 }
 0x12f   :  { %1586 = vst.msk [vmem:[%s2840_s3 + $0x14] sm:$0xf] %vm1580_vm0, %v1821_v56  ;;  %v1161_v62 = vadd.f32 %v1160_v58, %v929_v57  ;;  %v932_v63 = vadd.f32 %v2590_v7, %v931_v61  ;;  %v1163_v0 = vpop.f32.mrb[14].mxu0  ;;  %v933_v1 = vpop.f32.mrb[15].mxu1 }
 0x130   :  { %v1165_v2 = vpop.f32.mrb[15].mxu0 }
 0x131   :  { %v1340_v3 = vmax.f32 %v1161_v62, 0.0  ;;  %v1164_v4 = vadd.f32 %v1163_v0, %v932_v63 }
 0x133   :  { %v1822_v5 = vpack.c.bf16 %v1340_v3, %v1340_v3  ;;  %v1341_v6 = vmax.f32 %v1164_v4, 0.0 }
 0x134   :  { %v936_v8 = vpop.f32.mrb[16].mxu1 }
 0x135   :  { %1587 = vst.msk [vmem:[%s2840_s3 + $0x18] sm:$0xf] %vm1580_vm0, %v1822_v5  ;;  %v1823_v9 = vpack.c.bf16 %v1341_v6, %v1341_v6  ;;  %v937_v10 = vadd.f32 %v2590_v7, %v936_v8  ;;  %v1168_v11 = vpop.f32.mrb[16].mxu0  ;;  %v938_v12 = vpop.f32.mrb[17].mxu1 }
 0x136   :  { %v1170_v13 = vpop.f32.mrb[17].mxu0  ;;  %v939_v14 = vpop.f32.mrb[18].mxu1 }
 0x137   :  { %1588 = vst.msk [vmem:[%s2840_s3 + $0x1c] sm:$0xf] %vm1580_vm0, %v1823_v9  ;;  %v1169_v15 = vadd.f32 %v1168_v11, %v937_v10  ;;  %v940_v16 = vadd.f32 %v2590_v7, %v939_v14  ;;  %v1171_v17 = vpop.f32.mrb[18].mxu0  ;;  %v941_v18 = vpop.f32.mrb[19].mxu1 }
 0x138   :  { %v1173_v19 = vpop.f32.mrb[19].mxu0 }
 0x139   :  { %v1342_v20 = vmax.f32 %v1169_v15, 0.0  ;;  %v1172_v21 = vadd.f32 %v1171_v17, %v940_v16 }
 0x13b   :  { %v1824_v22 = vpack.c.bf16 %v1342_v20, %v1342_v20  ;;  %v1343_v23 = vmax.f32 %v1172_v21, 0.0 }
 0x13c   :  { %v944_v24 = vpop.f32.mrb[20].mxu1 }
 0x13d   :  { %1589 = vst.msk [vmem:[%s2840_s3 + $0x20] sm:$0xf] %vm1580_vm0, %v1824_v22  ;;  %v1825_v25 = vpack.c.bf16 %v1343_v23, %v1343_v23  ;;  %v945_v26 = vadd.f32 %v2590_v7, %v944_v24  ;;  %v1176_v27 = vpop.f32.mrb[20].mxu0  ;;  %v946_v28 = vpop.f32.mrb[21].mxu1 }
 0x13e   :  { %v1178_v29 = vpop.f32.mrb[21].mxu0  ;;  %v947_v30 = vpop.f32.mrb[22].mxu1 }
 0x13f   :  { %1590 = vst.msk [vmem:[%s2840_s3 + $0x24] sm:$0xf] %vm1580_vm0, %v1825_v25  ;;  %v1177_v31 = vadd.f32 %v1176_v27, %v945_v26  ;;  %v948_v32 = vadd.f32 %v2590_v7, %v947_v30  ;;  %v1179_v33 = vpop.f32.mrb[22].mxu0  ;;  %v949_v34 = vpop.f32.mrb[23].mxu1 }
 0x140   :  { %v1181_v35 = vpop.f32.mrb[23].mxu0 }
 0x141   :  { %v1344_v36 = vmax.f32 %v1177_v31, 0.0  ;;  %v1180_v37 = vadd.f32 %v1179_v33, %v948_v32 }
 0x143   :  { %v1826_v38 = vpack.c.bf16 %v1344_v36, %v1344_v36  ;;  %v1345_v39 = vmax.f32 %v1180_v37, 0.0 }
 0x144   :  { %v952_v40 = vpop.f32.mrb[24].mxu1 }
 0x145   :  { %1591 = vst.msk [vmem:[%s2840_s3 + $0x28] sm:$0xf] %vm1580_vm0, %v1826_v38  ;;  %v1827_v41 = vpack.c.bf16 %v1345_v39, %v1345_v39  ;;  %v953_v42 = vadd.f32 %v2590_v7, %v952_v40  ;;  %v1184_v43 = vpop.f32.mrb[24].mxu0  ;;  %v954_v44 = vpop.f32.mrb[25].mxu1 }
 0x146   :  { %v1186_v45 = vpop.f32.mrb[25].mxu0  ;;  %v955_v46 = vpop.f32.mrb[26].mxu1 }
 0x147   :  { %1592 = vst.msk [vmem:[%s2840_s3 + $0x2c] sm:$0xf] %vm1580_vm0, %v1827_v41  ;;  %v1185_v47 = vadd.f32 %v1184_v43, %v953_v42  ;;  %v956_v48 = vadd.f32 %v2590_v7, %v955_v46  ;;  %v1187_v49 = vpop.f32.mrb[26].mxu0  ;;  %v957_v50 = vpop.f32.mrb[27].mxu1 }
 0x148   :  { %v1189_v51 = vpop.f32.mrb[27].mxu0 }
 0x149   :  { %v1346_v52 = vmax.f32 %v1185_v47, 0.0  ;;  %v1188_v53 = vadd.f32 %v1187_v49, %v956_v48 }
 0x14b   :  { %v1828_v54 = vpack.c.bf16 %v1346_v52, %v1346_v52  ;;  %v1347_v55 = vmax.f32 %v1188_v53, 0.0 }
 0x14c   :  { %v960_v56 = vpop.f32.mrb[28].mxu1 }
 0x14d   :  { %1593 = vst.msk [vmem:[%s2840_s3 + $0x30] sm:$0xf] %vm1580_vm0, %v1828_v54  ;;  %v1829_v57 = vpack.c.bf16 %v1347_v55, %v1347_v55  ;;  %v961_v58 = vadd.f32 %v2590_v7, %v960_v56  ;;  %v1192_v59 = vpop.f32.mrb[28].mxu0  ;;  %v962_v60 = vpop.f32.mrb[29].mxu1 }
 0x14e   :  { %v1194_v61 = vpop.f32.mrb[29].mxu0  ;;  %v963_v62 = vpop.f32.mrb[30].mxu1 }
 0x14f   :  { %1594 = vst.msk [vmem:[%s2840_s3 + $0x34] sm:$0xf] %vm1580_vm0, %v1829_v57  ;;  %v1193_v63 = vadd.f32 %v1192_v59, %v961_v58  ;;  %v964_v0 = vadd.f32 %v2590_v7, %v963_v62  ;;  %v1195_v1 = vpop.f32.mrb[30].mxu0  ;;  %v965_v2 = vpop.f32.mrb[31].mxu1 }
 0x150   :  { %v1197_v3 = vpop.f32.mrb[31].mxu0 }
 0x151   :  { %v1348_v4 = vmax.f32 %v1193_v63, 0.0  ;;  %v1196_v5 = vadd.f32 %v1195_v1, %v964_v0 }
 0x153   :  { %v1830_v6 = vpack.c.bf16 %v1348_v4, %v1348_v4  ;;  %v1349_v8 = vmax.f32 %v1196_v5, 0.0 }
 0x154   :  { %v968_v9 = vpop.f32.mrb[32].mxu1 }
 0x155   :  { %1595 = vst.msk [vmem:[%s2840_s3 + $0x38] sm:$0xf] %vm1580_vm0, %v1830_v6  ;;  %v1831_v10 = vpack.c.bf16 %v1349_v8, %v1349_v8  ;;  %v969_v11 = vadd.f32 %v2590_v7, %v968_v9  ;;  %v1200_v12 = vpop.f32.mrb[32].mxu0  ;;  %v970_v13 = vpop.f32.mrb[33].mxu1 }
 0x156   :  { %v1202_v14 = vpop.f32.mrb[33].mxu0  ;;  %v971_v15 = vpop.f32.mrb[34].mxu1 }
 0x157   :  { %1596 = vst.msk [vmem:[%s2840_s3 + $0x3c] sm:$0xf] %vm1580_vm0, %v1831_v10  ;;  %v1201_v16 = vadd.f32 %v1200_v12, %v969_v11  ;;  %v972_v17 = vadd.f32 %v2590_v7, %v971_v15  ;;  %v1203_v18 = vpop.f32.mrb[34].mxu0  ;;  %v973_v19 = vpop.f32.mrb[35].mxu1 }
 0x158   :  { %v1205_v20 = vpop.f32.mrb[35].mxu0 }
 0x159   :  { %v1350_v21 = vmax.f32 %v1201_v16, 0.0  ;;  %v1204_v22 = vadd.f32 %v1203_v18, %v972_v17 }
 0x15b   :  { %v1832_v23 = vpack.c.bf16 %v1350_v21, %v1350_v21  ;;  %v1351_v24 = vmax.f32 %v1204_v22, 0.0 }
 0x15c   :  { %v976_v25 = vpop.f32.mrb[36].mxu1 }
 0x15d   :  { %1597 = vst.msk [vmem:[%s2840_s3 + $0x40] sm:$0xf] %vm1580_vm0, %v1832_v23  ;;  %v1833_v26 = vpack.c.bf16 %v1351_v24, %v1351_v24  ;;  %v977_v27 = vadd.f32 %v2590_v7, %v976_v25  ;;  %v1208_v28 = vpop.f32.mrb[36].mxu0  ;;  %v978_v29 = vpop.f32.mrb[37].mxu1 }
 0x15e   :  { %v1210_v30 = vpop.f32.mrb[37].mxu0  ;;  %v979_v31 = vpop.f32.mrb[38].mxu1 }
 0x15f   :  { %1598 = vst.msk [vmem:[%s2840_s3 + $0x44] sm:$0xf] %vm1580_vm0, %v1833_v26  ;;  %v1209_v32 = vadd.f32 %v1208_v28, %v977_v27  ;;  %v980_v33 = vadd.f32 %v2590_v7, %v979_v31  ;;  %v1211_v34 = vpop.f32.mrb[38].mxu0  ;;  %v981_v35 = vpop.f32.mrb[39].mxu1 }
 0x160   :  { %v1213_v36 = vpop.f32.mrb[39].mxu0 }
 0x161   :  { %v1352_v37 = vmax.f32 %v1209_v32, 0.0  ;;  %v1212_v38 = vadd.f32 %v1211_v34, %v980_v33 }
 0x163   :  { %v1834_v39 = vpack.c.bf16 %v1352_v37, %v1352_v37  ;;  %v1353_v40 = vmax.f32 %v1212_v38, 0.0 }
 0x164   :  { %v984_v41 = vpop.f32.mrb[40].mxu1 }
 0x165   :  { %1599 = vst.msk [vmem:[%s2840_s3 + $0x48] sm:$0xf] %vm1580_vm0, %v1834_v39  ;;  %v1835_v42 = vpack.c.bf16 %v1353_v40, %v1353_v40  ;;  %v985_v43 = vadd.f32 %v2590_v7, %v984_v41  ;;  %v1216_v44 = vpop.f32.mrb[40].mxu0  ;;  %v986_v45 = vpop.f32.mrb[41].mxu1 }
 0x166   :  { %v1218_v46 = vpop.f32.mrb[41].mxu0  ;;  %v987_v47 = vpop.f32.mrb[42].mxu1 }
 0x167   :  { %1600 = vst.msk [vmem:[%s2840_s3 + $0x4c] sm:$0xf] %vm1580_vm0, %v1835_v42  ;;  %v1217_v48 = vadd.f32 %v1216_v44, %v985_v43  ;;  %v988_v49 = vadd.f32 %v2590_v7, %v987_v47  ;;  %v1219_v50 = vpop.f32.mrb[42].mxu0  ;;  %v989_v51 = vpop.f32.mrb[43].mxu1 }
 0x168   :  { %v1221_v52 = vpop.f32.mrb[43].mxu0 }
 0x169   :  { %v1354_v53 = vmax.f32 %v1217_v48, 0.0  ;;  %v1220_v54 = vadd.f32 %v1219_v50, %v988_v49 }
 0x16b   :  { %v1836_v55 = vpack.c.bf16 %v1354_v53, %v1354_v53  ;;  %v1355_v56 = vmax.f32 %v1220_v54, 0.0 }
 0x16c   :  { %v992_v57 = vpop.f32.mrb[44].mxu1 }
 0x16d   :  { %1601 = vst.msk [vmem:[%s2840_s3 + $0x50] sm:$0xf] %vm1580_vm0, %v1836_v55  ;;  %v1837_v58 = vpack.c.bf16 %v1355_v56, %v1355_v56  ;;  %v993_v59 = vadd.f32 %v2590_v7, %v992_v57  ;;  %v1224_v60 = vpop.f32.mrb[44].mxu0  ;;  %v994_v61 = vpop.f32.mrb[45].mxu1 }
 0x16e   :  { %v1226_v62 = vpop.f32.mrb[45].mxu0  ;;  %v995_v63 = vpop.f32.mrb[46].mxu1 }
 0x16f   :  { %1602 = vst.msk [vmem:[%s2840_s3 + $0x54] sm:$0xf] %vm1580_vm0, %v1837_v58  ;;  %v1225_v0 = vadd.f32 %v1224_v60, %v993_v59  ;;  %v996_v1 = vadd.f32 %v2590_v7, %v995_v63  ;;  %v1227_v2 = vpop.f32.mrb[46].mxu0  ;;  %v997_v3 = vpop.f32.mrb[47].mxu1 }
 0x170   :  { %v1229_v4 = vpop.f32.mrb[47].mxu0 }
 0x171   :  { %v1356_v5 = vmax.f32 %v1225_v0, 0.0  ;;  %v1228_v6 = vadd.f32 %v1227_v2, %v996_v1 }
 0x173   :  { %v1838_v8 = vpack.c.bf16 %v1356_v5, %v1356_v5  ;;  %v1357_v9 = vmax.f32 %v1228_v6, 0.0 }
 0x174   :  { %v1000_v10 = vpop.f32.mrb[48].mxu1 }
 0x175   :  { %1603 = vst.msk [vmem:[%s2840_s3 + $0x58] sm:$0xf] %vm1580_vm0, %v1838_v8  ;;  %v1839_v11 = vpack.c.bf16 %v1357_v9, %v1357_v9  ;;  %v1001_v12 = vadd.f32 %v2590_v7, %v1000_v10  ;;  %v1232_v13 = vpop.f32.mrb[48].mxu0  ;;  %v1002_v14 = vpop.f32.mrb[49].mxu1 }
 0x176   :  { %v1234_v15 = vpop.f32.mrb[49].mxu0  ;;  %v1003_v16 = vpop.f32.mrb[50].mxu1 }
 0x177   :  { %1604 = vst.msk [vmem:[%s2840_s3 + $0x5c] sm:$0xf] %vm1580_vm0, %v1839_v11  ;;  %v1233_v17 = vadd.f32 %v1232_v13, %v1001_v12  ;;  %v1004_v18 = vadd.f32 %v2590_v7, %v1003_v16  ;;  %v1235_v19 = vpop.f32.mrb[50].mxu0  ;;  %v1005_v20 = vpop.f32.mrb[51].mxu1 }
 0x178   :  { %v1237_v21 = vpop.f32.mrb[51].mxu0 }
 0x179   :  { %v1358_v22 = vmax.f32 %v1233_v17, 0.0  ;;  %v1236_v23 = vadd.f32 %v1235_v19, %v1004_v18 }
 0x17b   :  { %v1840_v24 = vpack.c.bf16 %v1358_v22, %v1358_v22  ;;  %v1359_v25 = vmax.f32 %v1236_v23, 0.0 }
 0x17c   :  { %v1008_v26 = vpop.f32.mrb[52].mxu1 }
 0x17d   :  { %1605 = vst.msk [vmem:[%s2840_s3 + $0x60] sm:$0xf] %vm1580_vm0, %v1840_v24  ;;  %v1841_v27 = vpack.c.bf16 %v1359_v25, %v1359_v25  ;;  %v1009_v28 = vadd.f32 %v2590_v7, %v1008_v26  ;;  %v1240_v29 = vpop.f32.mrb[52].mxu0  ;;  %v1010_v30 = vpop.f32.mrb[53].mxu1 }
 0x17e   :  { %v1242_v31 = vpop.f32.mrb[53].mxu0  ;;  %v1011_v32 = vpop.f32.mrb[54].mxu1 }
 0x17f   :  { %1606 = vst.msk [vmem:[%s2840_s3 + $0x64] sm:$0xf] %vm1580_vm0, %v1841_v27  ;;  %v1241_v33 = vadd.f32 %v1240_v29, %v1009_v28  ;;  %v1012_v34 = vadd.f32 %v2590_v7, %v1011_v32  ;;  %v1243_v35 = vpop.f32.mrb[54].mxu0  ;;  %v1013_v36 = vpop.f32.mrb[55].mxu1 }
 0x180   :  { %v1245_v37 = vpop.f32.mrb[55].mxu0 }
 0x181   :  { %v1360_v38 = vmax.f32 %v1241_v33, 0.0  ;;  %v1244_v39 = vadd.f32 %v1243_v35, %v1012_v34 }
 0x183   :  { %v1842_v40 = vpack.c.bf16 %v1360_v38, %v1360_v38  ;;  %v1361_v41 = vmax.f32 %v1244_v39, 0.0 }
 0x184   :  { %v1016_v42 = vpop.f32.mrb[56].mxu1 }
 0x185   :  { %1607 = vst.msk [vmem:[%s2840_s3 + $0x68] sm:$0xf] %vm1580_vm0, %v1842_v40  ;;  %v1843_v43 = vpack.c.bf16 %v1361_v41, %v1361_v41  ;;  %v1017_v44 = vadd.f32 %v2590_v7, %v1016_v42  ;;  %v1248_v45 = vpop.f32.mrb[56].mxu0  ;;  %v1018_v46 = vpop.f32.mrb[57].mxu1 }
 0x186   :  { %v1250_v47 = vpop.f32.mrb[57].mxu0  ;;  %v1019_v48 = vpop.f32.mrb[58].mxu1 }
 0x187   :  { %1608 = vst.msk [vmem:[%s2840_s3 + $0x6c] sm:$0xf] %vm1580_vm0, %v1843_v43  ;;  %v1249_v49 = vadd.f32 %v1248_v45, %v1017_v44  ;;  %v1020_v50 = vadd.f32 %v2590_v7, %v1019_v48  ;;  %v1251_v51 = vpop.f32.mrb[58].mxu0  ;;  %v1021_v52 = vpop.f32.mrb[59].mxu1 }
 0x188   :  { %v1253_v53 = vpop.f32.mrb[59].mxu0 }
 0x189   :  { %v1362_v54 = vmax.f32 %v1249_v49, 0.0  ;;  %v1252_v55 = vadd.f32 %v1251_v51, %v1020_v50 }
 0x18b   :  { %v1844_v56 = vpack.c.bf16 %v1362_v54, %v1362_v54  ;;  %v1363_v57 = vmax.f32 %v1252_v55, 0.0 }
 0x18c   :  { %v1024_v58 = vpop.f32.mrb[60].mxu1 }
 0x18d   :  { %1609 = vst.msk [vmem:[%s2840_s3 + $0x70] sm:$0xf] %vm1580_vm0, %v1844_v56  ;;  %v1845_v59 = vpack.c.bf16 %v1363_v57, %v1363_v57  ;;  %v1025_v60 = vadd.f32 %v2590_v7, %v1024_v58  ;;  %v1256_v61 = vpop.f32.mrb[60].mxu0  ;;  %v1026_v62 = vpop.f32.mrb[61].mxu1 }
 0x18e   :  { %v1258_v63 = vpop.f32.mrb[61].mxu0  ;;  %v1027_v0 = vpop.f32.mrb[62].mxu1 }
 0x18f   :  { %1610 = vst.msk [vmem:[%s2840_s3 + $0x74] sm:$0xf] %vm1580_vm0, %v1845_v59  ;;  %v1257_v1 = vadd.f32 %v1256_v61, %v1025_v60  ;;  %v1028_v2 = vadd.f32 %v2590_v7, %v1027_v0  ;;  %v1259_v3 = vpop.f32.mrb[62].mxu0  ;;  %v1029_v4 = vpop.f32.mrb[63].mxu1 }
 0x190   :  { %v1261_v5 = vpop.f32.mrb[63].mxu0 }
 0x191   :  { %v1364_v6 = vmax.f32 %v1257_v1, 0.0  ;;  %v1260_v8 = vadd.f32 %v1259_v3, %v1028_v2 }
 0x193   :  { %v1846_v9 = vpack.c.bf16 %v1364_v6, %v1364_v6  ;;  %v1365_v10 = vmax.f32 %v1260_v8, 0.0 }
 0x194   :  { %v1032_v11 = vpop.f32.mrb[64].mxu1 }
 0x195   :  { %1611 = vst.msk [vmem:[%s2840_s3 + $0x78] sm:$0xf] %vm1580_vm0, %v1846_v9  ;;  %v1847_v12 = vpack.c.bf16 %v1365_v10, %v1365_v10  ;;  %v1033_v13 = vadd.f32 %v2590_v7, %v1032_v11  ;;  %v1264_v14 = vpop.f32.mrb[64].mxu0  ;;  %v1034_v15 = vpop.f32.mrb[65].mxu1 }
 0x196   :  { %v1266_v16 = vpop.f32.mrb[65].mxu0  ;;  %v1035_v17 = vpop.f32.mrb[66].mxu1 }
 0x197   :  { %1612 = vst.msk [vmem:[%s2840_s3 + $0x7c] sm:$0xf] %vm1580_vm0, %v1847_v12  ;;  %v1265_v18 = vadd.f32 %v1264_v14, %v1033_v13  ;;  %v1036_v19 = vadd.f32 %v2590_v7, %v1035_v17  ;;  %v1267_v20 = vpop.f32.mrb[66].mxu0  ;;  %v1037_v21 = vpop.f32.mrb[67].mxu1 }
 0x198   :  { %v1269_v22 = vpop.f32.mrb[67].mxu0 }
 0x199   :  { %v1366_v23 = vmax.f32 %v1265_v18, 0.0  ;;  %v1268_v24 = vadd.f32 %v1267_v20, %v1036_v19 }
 0x19b   :  { %v1848_v25 = vpack.c.bf16 %v1366_v23, %v1366_v23  ;;  %v1367_v26 = vmax.f32 %v1268_v24, 0.0 }
 0x19c   :  { %v1040_v27 = vpop.f32.mrb[68].mxu1 }
 0x19d   :  { %1613 = vst.msk [vmem:[%s2840_s3 + $0x80] sm:$0xf] %vm1580_vm0, %v1848_v25  ;;  %v1849_v28 = vpack.c.bf16 %v1367_v26, %v1367_v26  ;;  %v1041_v29 = vadd.f32 %v2590_v7, %v1040_v27  ;;  %v1272_v30 = vpop.f32.mrb[68].mxu0  ;;  %v1042_v31 = vpop.f32.mrb[69].mxu1 }
 0x19e   :  { %v1274_v32 = vpop.f32.mrb[69].mxu0  ;;  %v1043_v33 = vpop.f32.mrb[70].mxu1 }
 0x19f   :  { %1614 = vst.msk [vmem:[%s2840_s3 + $0x84] sm:$0xf] %vm1580_vm0, %v1849_v28  ;;  %v1273_v34 = vadd.f32 %v1272_v30, %v1041_v29  ;;  %v1044_v35 = vadd.f32 %v2590_v7, %v1043_v33  ;;  %v1275_v36 = vpop.f32.mrb[70].mxu0  ;;  %v1045_v37 = vpop.f32.mrb[71].mxu1 }
 0x1a0   :  { %v1277_v38 = vpop.f32.mrb[71].mxu0 }
 0x1a1   :  { %v1368_v39 = vmax.f32 %v1273_v34, 0.0  ;;  %v1276_v40 = vadd.f32 %v1275_v36, %v1044_v35 }
 0x1a3   :  { %v1850_v41 = vpack.c.bf16 %v1368_v39, %v1368_v39  ;;  %v1369_v42 = vmax.f32 %v1276_v40, 0.0 }
 0x1a4   :  { %v1048_v43 = vpop.f32.mrb[72].mxu1 }
 0x1a5   :  { %1615 = vst.msk [vmem:[%s2840_s3 + $0x88] sm:$0xf] %vm1580_vm0, %v1850_v41  ;;  %v1851_v44 = vpack.c.bf16 %v1369_v42, %v1369_v42  ;;  %v1049_v45 = vadd.f32 %v2590_v7, %v1048_v43  ;;  %v1280_v46 = vpop.f32.mrb[72].mxu0  ;;  %v1050_v47 = vpop.f32.mrb[73].mxu1 }
 0x1a6   :  { %v1282_v48 = vpop.f32.mrb[73].mxu0  ;;  %v1051_v49 = vpop.f32.mrb[74].mxu1 }
 0x1a7   :  { %1616 = vst.msk [vmem:[%s2840_s3 + $0x8c] sm:$0xf] %vm1580_vm0, %v1851_v44  ;;  %v1281_v50 = vadd.f32 %v1280_v46, %v1049_v45  ;;  %v1052_v51 = vadd.f32 %v2590_v7, %v1051_v49  ;;  %v1283_v52 = vpop.f32.mrb[74].mxu0  ;;  %v1053_v53 = vpop.f32.mrb[75].mxu1 }
 0x1a8   :  { %v1285_v54 = vpop.f32.mrb[75].mxu0 }
 0x1a9   :  { %v1370_v55 = vmax.f32 %v1281_v50, 0.0  ;;  %v1284_v56 = vadd.f32 %v1283_v52, %v1052_v51 }
 0x1ab   :  { %v1852_v57 = vpack.c.bf16 %v1370_v55, %v1370_v55  ;;  %v1371_v58 = vmax.f32 %v1284_v56, 0.0 }
 0x1ac   :  { %v1056_v59 = vpop.f32.mrb[76].mxu1 }
 0x1ad   :  { %1617 = vst.msk [vmem:[%s2840_s3 + $0x90] sm:$0xf] %vm1580_vm0, %v1852_v57  ;;  %v1853_v60 = vpack.c.bf16 %v1371_v58, %v1371_v58  ;;  %v1057_v61 = vadd.f32 %v2590_v7, %v1056_v59  ;;  %v1288_v62 = vpop.f32.mrb[76].mxu0  ;;  %v1058_v63 = vpop.f32.mrb[77].mxu1 }
 0x1ae   :  { %v1290_v0 = vpop.f32.mrb[77].mxu0  ;;  %v1059_v1 = vpop.f32.mrb[78].mxu1 }
 0x1af   :  { %1618 = vst.msk [vmem:[%s2840_s3 + $0x94] sm:$0xf] %vm1580_vm0, %v1853_v60  ;;  %v1289_v2 = vadd.f32 %v1288_v62, %v1057_v61  ;;  %v1060_v3 = vadd.f32 %v2590_v7, %v1059_v1  ;;  %v1291_v4 = vpop.f32.mrb[78].mxu0  ;;  %v1061_v5 = vpop.f32.mrb[79].mxu1 }
 0x1b0   :  { %v1293_v6 = vpop.f32.mrb[79].mxu0 }
 0x1b1   :  { %v1372_v8 = vmax.f32 %v1289_v2, 0.0  ;;  %v1292_v9 = vadd.f32 %v1291_v4, %v1060_v3 }
 0x1b3   :  { %v1854_v10 = vpack.c.bf16 %v1372_v8, %v1372_v8  ;;  %v1373_v11 = vmax.f32 %v1292_v9, 0.0 }
 0x1b4   :  { %v1064_v12 = vpop.f32.mrb[80].mxu1 }
 0x1b5   :  { %1619 = vst.msk [vmem:[%s2840_s3 + $0x98] sm:$0xf] %vm1580_vm0, %v1854_v10  ;;  %v1855_v13 = vpack.c.bf16 %v1373_v11, %v1373_v11  ;;  %v1065_v14 = vadd.f32 %v2590_v7, %v1064_v12  ;;  %v1296_v15 = vpop.f32.mrb[80].mxu0  ;;  %v1066_v16 = vpop.f32.mrb[81].mxu1 }
 0x1b6   :  { %v1298_v17 = vpop.f32.mrb[81].mxu0  ;;  %v1067_v18 = vpop.f32.mrb[82].mxu1 }
 0x1b7   :  { %1620 = vst.msk [vmem:[%s2840_s3 + $0x9c] sm:$0xf] %vm1580_vm0, %v1855_v13  ;;  %v1297_v19 = vadd.f32 %v1296_v15, %v1065_v14  ;;  %v1068_v20 = vadd.f32 %v2590_v7, %v1067_v18  ;;  %v1299_v21 = vpop.f32.mrb[82].mxu0  ;;  %v1069_v22 = vpop.f32.mrb[83].mxu1 }
 0x1b8   :  { %v1301_v23 = vpop.f32.mrb[83].mxu0 }
 0x1b9   :  { %v1374_v24 = vmax.f32 %v1297_v19, 0.0  ;;  %v1300_v25 = vadd.f32 %v1299_v21, %v1068_v20 }
 0x1bb   :  { %v1856_v26 = vpack.c.bf16 %v1374_v24, %v1374_v24  ;;  %v1375_v27 = vmax.f32 %v1300_v25, 0.0 }
 0x1bc   :  { %v1072_v28 = vpop.f32.mrb[84].mxu1 }
 0x1bd   :  { %1621 = vst.msk [vmem:[%s2840_s3 + $0xa0] sm:$0xf] %vm1580_vm0, %v1856_v26  ;;  %v1857_v29 = vpack.c.bf16 %v1375_v27, %v1375_v27  ;;  %v1073_v30 = vadd.f32 %v2590_v7, %v1072_v28  ;;  %v1304_v31 = vpop.f32.mrb[84].mxu0  ;;  %v1074_v32 = vpop.f32.mrb[85].mxu1 }
 0x1be   :  { %v1306_v33 = vpop.f32.mrb[85].mxu0  ;;  %v1075_v34 = vpop.f32.mrb[86].mxu1 }
 0x1bf   :  { %1622 = vst.msk [vmem:[%s2840_s3 + $0xa4] sm:$0xf] %vm1580_vm0, %v1857_v29  ;;  %v1305_v35 = vadd.f32 %v1304_v31, %v1073_v30  ;;  %v1076_v36 = vadd.f32 %v2590_v7, %v1075_v34  ;;  %v1307_v37 = vpop.f32.mrb[86].mxu0  ;;  %v1077_v38 = vpop.f32.mrb[87].mxu1 }
 0x1c0   :  { %v1309_v39 = vpop.f32.mrb[87].mxu0 }
 0x1c1   :  { %v1376_v40 = vmax.f32 %v1305_v35, 0.0  ;;  %v1308_v41 = vadd.f32 %v1307_v37, %v1076_v36 }
 0x1c3   :  { %v1858_v42 = vpack.c.bf16 %v1376_v40, %v1376_v40  ;;  %v1377_v43 = vmax.f32 %v1308_v41, 0.0 }
 0x1c4   :  { %v1080_v44 = vpop.f32.mrb[88].mxu1 }
 0x1c5   :  { %1623 = vst.msk [vmem:[%s2840_s3 + $0xa8] sm:$0xf] %vm1580_vm0, %v1858_v42  ;;  %v1859_v45 = vpack.c.bf16 %v1377_v43, %v1377_v43  ;;  %v1081_v46 = vadd.f32 %v2590_v7, %v1080_v44  ;;  %v1312_v47 = vpop.f32.mrb[88].mxu0  ;;  %v1082_v48 = vpop.f32.mrb[89].mxu1 }
 0x1c6   :  { %v1314_v49 = vpop.f32.mrb[89].mxu0  ;;  %v1083_v50 = vpop.f32.mrb[90].mxu1 }
 0x1c7   :  { %1624 = vst.msk [vmem:[%s2840_s3 + $0xac] sm:$0xf] %vm1580_vm0, %v1859_v45  ;;  %v1313_v51 = vadd.f32 %v1312_v47, %v1081_v46  ;;  %v1084_v52 = vadd.f32 %v2590_v7, %v1083_v50  ;;  %v1315_v53 = vpop.f32.mrb[90].mxu0  ;;  %v1085_v54 = vpop.f32.mrb[91].mxu1 }
 0x1c8   :  { %v1317_v55 = vpop.f32.mrb[91].mxu0 }
 0x1c9   :  { %v1378_v56 = vmax.f32 %v1313_v51, 0.0  ;;  %v1316_v57 = vadd.f32 %v1315_v53, %v1084_v52 }
 0x1cb   :  { %v1860_v58 = vpack.c.bf16 %v1378_v56, %v1378_v56  ;;  %v1379_v59 = vmax.f32 %v1316_v57, 0.0 }
 0x1cc   :  { %v1088_v60 = vpop.f32.mrb[92].mxu1 }
 0x1cd   :  { %1625 = vst.msk [vmem:[%s2840_s3 + $0xb0] sm:$0xf] %vm1580_vm0, %v1860_v58  ;;  %v1861_v61 = vpack.c.bf16 %v1379_v59, %v1379_v59  ;;  %v1089_v62 = vadd.f32 %v2590_v7, %v1088_v60  ;;  %v1320_v63 = vpop.f32.mrb[92].mxu0  ;;  %v1090_v0 = vpop.f32.mrb[93].mxu1 }
 0x1ce   :  { %v1322_v1 = vpop.f32.mrb[93].mxu0  ;;  %v1091_v2 = vpop.f32.mrb[94].mxu1 }
 0x1cf   :  { %1626 = vst.msk [vmem:[%s2840_s3 + $0xb4] sm:$0xf] %vm1580_vm0, %v1861_v61  ;;  %v1321_v3 = vadd.f32 %v1320_v63, %v1089_v62  ;;  %v1092_v4 = vadd.f32 %v2590_v7, %v1091_v2  ;;  %v1323_v5 = vpop.f32.mrb[94].mxu0  ;;  %v1093_v6 = vpop.f32.mrb[95].mxu1 }
 0x1d0   :  { %v1325_v8 = vpop.f32.mrb[95].mxu0 }
 0x1d1   :  { %v1380_v9 = vmax.f32 %v1321_v3, 0.0  ;;  %v1324_v10 = vadd.f32 %v1323_v5, %v1092_v4 }
 0x1d3   :  { %v1862_v11 = vpack.c.bf16 %v1380_v9, %v1380_v9  ;;  %v1381_v12 = vmax.f32 %v1324_v10, 0.0 }
 0x1d4   :  { %v1096_v13 = vpop.f32.mrb[96].mxu1 }
 0x1d5   :  { %1627 = vst.msk [vmem:[%s2840_s3 + $0xb8] sm:$0xf] %vm1580_vm0, %v1862_v11  ;;  %v1863_v14 = vpack.c.bf16 %v1381_v12, %v1381_v12  ;;  %v1097_v15 = vadd.f32 %v2590_v7, %v1096_v13  ;;  %v1328_v16 = vpop.f32.mrb[96].mxu0  ;;  %v1098_v17 = vpop.f32.mrb[97].mxu1 }
 0x1d6   :  { %v1330_v18 = vpop.f32.mrb[97].mxu0  ;;  %v1099_v19 = vpop.f32.mrb[98].mxu1 }
 0x1d7   :  { %1628 = vst.msk [vmem:[%s2840_s3 + $0xbc] sm:$0xf] %vm1580_vm0, %v1863_v14  ;;  %v1329_v20 = vadd.f32 %v1328_v16, %v1097_v15  ;;  %v1331_v21 = vpop.f32.mrb[98].mxu0  ;;  %v1100_v22 = vpop.f32.mrb[99].mxu1 }
 0x1d8   :  { %v1332_v23 = vpop.f32.mrb[99].mxu0 }
 0x1d9   :  { %v1382_v24 = vmax.f32 %v1329_v20, 0.0 }
 0x1db   :  { %v1864_v25 = vpack.c.bf16 %v1382_v24, %v1382_v24 }
 0x1dd   :  { %1629 = vst.msk [vmem:[%s2840_s3 + $0xc0] sm:$0xf] %vm1580_vm0, %v1864_v25 }

// kernel: dqn_forward.6
= control target key start
LH: loop header
LB: loop body
LE: loop exit
PB: predicated region body
PF: predicated region fallthrough
CT: control target
= control target key end

     0   :  { %v2235_v0 = vmov 0   ;;  %vm868_vm0 = vcmask 523264   ;;  %vm1634_vm1 = vcmask 519168   ;;  %s3108_s1 = inlined_call_operand.vmem [shape: bf16[576,64], index: 1, kind: input, shape index: {}]   ;;  %s3109_s0 = inlined_call_operand.vmem [shape: bf16[288,576], index: 0, kind: input, shape index: {}]   ;;  %s3110_s2 = inlined_call_operand.vmem [shape: f32[1,64], index: 2, kind: input, shape index: {}]   ;;  %s3111_s3 = inlined_call_operand.vmem [shape: bf16[288,64], index: 3, kind: output, shape index: {}]  }
   0x1   :  { %923 = vmatprep.subr.bf16.mxu0 %v2235_v0  ;;  %1958 = vmatprep.subr.bf16.mxu1 %v2235_v0  ;;  %v2073_v1 = vld [vmem:[%s3108_s1] sm:$0xff]   ;;  %v2075_v3 = vld [vmem:[%s3108_s1 + $0x8] sm:$0xff]   ;;  %v2077_v5 = vld [vmem:[%s3108_s1 + $0x10] sm:$0xff]  }
   0x2   :  { %v2264_v2 = vld [vmem:[%s3108_s1 + $0x80] sm:$0xff]   ;;  %924 = vmatpush1.bf16.msra.mxu0 %v2073_v1  ;;  %v2274_v4 = vld [vmem:[%s3108_s1 + $0x88] sm:$0xff]   ;;  %v2285_v6 = vld [vmem:[%s3108_s1 + $0x90] sm:$0xff]  }
   0x3   :  { %1974 = vmatpush1.bf16.msra.mxu1 %v2264_v2  ;;  %925 = vmatprep.subr.bf16.mxu0 %v2235_v0  ;;  %v2079_v7 = vld [vmem:[%s3108_s1 + $0x18] sm:$0xff]   ;;  %v2081_v9 = vld [vmem:[%s3108_s1 + $0x20] sm:$0xff]   ;;  %v2083_v11 = vld [vmem:[%s3108_s1 + $0x28] sm:$0xff]  }
   0x4   :  { %1959 = vmatprep.subr.bf16.mxu1 %v2235_v0  ;;  %v2296_v8 = vld [vmem:[%s3108_s1 + $0x98] sm:$0xff]   ;;  %v2307_v10 = vld [vmem:[%s3108_s1 + $0xa0] sm:$0xff]   ;;  %v2318_v12 = vld [vmem:[%s3108_s1 + $0xa8] sm:$0xff]  }
   0x5   :  { %v2085_v13 = vld [vmem:[%s3108_s1 + $0x30] sm:$0xff]   ;;  %v2087_v15 = vld [vmem:[%s3108_s1 + $0x38] sm:$0xff]   ;;  %v2089_v17 = vld [vmem:[%s3108_s1 + $0x40] sm:$0xff]  }
   0x6   :  { %926 = vmatpush1.bf16.msra.mxu0 %v2075_v3  ;;  %v2329_v14 = vld [vmem:[%s3108_s1 + $0xb0] sm:$0xff]   ;;  %v2340_v16 = vld [vmem:[%s3108_s1 + $0xb8] sm:$0xff]   ;;  %v2351_v18 = vld [vmem:[%s3108_s1 + $0xc0] sm:$0xff]  }
   0x7   :  { %1975 = vmatpush1.bf16.msra.mxu1 %v2274_v4  ;;  %927 = vmatprep.subr.bf16.mxu0 %v2235_v0  ;;  %v2107_v19 = vld [vmem:[%s3109_s0 + $0x4] ss:$20 sps:$4 sm:$0xff]   ;;  %v2091_v20 = vld [vmem:[%s3108_s1 + $0x48] sm:$0xff]   ;;  %v2093_v23 = vld [vmem:[%s3108_s1 + $0x50] sm:$0xff]  }
   0x8   :  { %1960 = vmatprep.subr.bf16.mxu1 %v2235_v0  ;;  %v2110_v21 = vld [vmem:[%s3109_s0 + $0xd4] ss:$20 sps:$4 sm:$0xff]   ;;  %955 = vmatprep.mubr.bf16.mxu0 %v2107_v19  ;;  %v2095_v25 = vld [vmem:[%s3108_s1 + $0x58] sm:$0xff]   ;;  %v2097_v27 = vld [vmem:[%s3108_s1 + $0x60] sm:$0xff]  }
   0x9   :  { %v2368_v22 = vld [vmem:[%s3108_s1 + $0xc8] sm:$0xff]   ;;  %1172 = vmatprep.mubr.bf16.mxu1 %v2110_v21  ;;  %v2379_v24 = vld [vmem:[%s3108_s1 + $0xd0] sm:$0xff]   ;;  %v2390_v26 = vld [vmem:[%s3108_s1 + $0xd8] sm:$0xff]  }
   0xa   :  { %928 = vmatpush1.bf16.msra.mxu0 %v2077_v5  ;;  %v2401_v28 = vld [vmem:[%s3108_s1 + $0xe0] sm:$0xff]   ;;  %v2099_v29 = vld [vmem:[%s3108_s1 + $0x68] sm:$0xff]   ;;  %v2101_v31 = vld [vmem:[%s3108_s1 + $0x70] sm:$0xff]  }
   0xb   :  { %1976 = vmatpush1.bf16.msra.mxu1 %v2285_v6  ;;  %929 = vmatprep.subr.bf16.mxu0 %v2235_v0  ;;  %v2412_v30 = vld [vmem:[%s3108_s1 + $0xe8] sm:$0xff]   ;;  %v2423_v32 = vld [vmem:[%s3108_s1 + $0xf0] sm:$0xff]   ;;  %v2103_v33 = vld [vmem:[%s3108_s1 + $0x78] sm:$0xff]  }
   0xc   :  { %1961 = vmatprep.subr.bf16.mxu1 %v2235_v0  ;;  %v2434_v34 = vld [vmem:[%s3108_s1 + $0xf8] sm:$0xff]   ;;  %v2117_v35 = vld [vmem:[%s3108_s1 + $0x100] sm:$0xff]   ;;  %v2136_v40 = vld [vmem:[%s3108_s1 + $0x108] sm:$0xff]  }
   0xd   :  { %v2105_v36 = vld [vmem:[%s3109_s0] ss:$20 sps:$4 sm:$0xff]   ;;  %v2108_v37 = vld [vmem:[%s3109_s0 + $0xd0] ss:$20 sps:$4 sm:$0xff]   ;;  %v2115_v41 = vld [vmem:[%s3109_s0 + $0x28] ss:$20 sps:$4 sm:$0xff]  }
   0xe   :  { %930 = vmatpush1.bf16.msra.mxu0 %v2079_v7  ;;  %v2111_v38 = vld [vmem:[%s3109_s0 + $0x2c] ss:$20 sps:$4 sm:$0xff]   ;;  %v2113_v39 = vld [vmem:[%s3109_s0 + $0xfc] ss:$20 sps:$4 sm:$0xff]   ;;  %v2118_v44 = vld [vmem:[%s3109_s0 + $0x54] ss:$20 sps:$4 sm:$0xff]  }
   0xf   :  { %1977 = vmatpush1.bf16.msra.mxu1 %v2296_v8  ;;  %931 = vmatprep.subr.bf16.mxu0 %v2235_v0  ;;  %v2155_v42 = vld [vmem:[%s3108_s1 + $0x110] sm:$0xff]   ;;  %v2116_v43 = vld [vmem:[%s3109_s0 + $0xf8] ss:$20 sps:$4 sm:$0xff]   ;;  %v2129_v52 = vld [vmem:[%s3109_s0 + $0x148] ss:$20 sps:$4 sm:$0xff]  }
  0x10   :  { %1962 = vmatprep.subr.bf16.mxu1 %v2235_v0  ;;  %v2120_v45 = vld [vmem:[%s3109_s0 + $0x124] ss:$20 sps:$4 sm:$0xff]   ;;  %v2123_v48 = vld [vmem:[%s3109_s0 + $0x120] ss:$20 sps:$4 sm:$0xff]   ;;  %v2124_v49 = vld [vmem:[%s3109_s0 + $0x7c] ss:$20 sps:$4 sm:$0xff]  }
  0x11   :  { %v2178_v46 = vld [vmem:[%s3108_s1 + $0x118] sm:$0xff]   ;;  %v2122_v47 = vld [vmem:[%s3109_s0 + $0x50] ss:$20 sps:$4 sm:$0xff]   ;;  %v2126_v50 = vld [vmem:[%s3109_s0 + $0x14c] ss:$20 sps:$4 sm:$0xff]  }
  0x12   :  { %932 = vmatpush1.bf16.msra.mxu0 %v2081_v9  ;;  %v2128_v51 = vld [vmem:[%s3109_s0 + $0x78] ss:$20 sps:$4 sm:$0xff]   ;;  %v2132_v54 = vld [vmem:[%s3109_s0 + $0x174] ss:$20 sps:$4 sm:$0xff]   ;;  %v2135_v56 = vld [vmem:[%s3109_s0 + $0x170] ss:$20 sps:$4 sm:$0xff]  }
  0x13   :  { %1978 = vmatpush1.bf16.msra.mxu1 %v2307_v10  ;;  %933 = vmatprep.subr.bf16.mxu0 %v2235_v0  ;;  %v2130_v53 = vld [vmem:[%s3109_s0 + $0xa4] ss:$20 sps:$4 sm:$0xff]   ;;  %v2134_v55 = vld [vmem:[%s3109_s0 + $0xa0] ss:$20 sps:$4 sm:$0xff]   ;;  %v2139_v58 = vld [vmem:[%s3109_s0 + $0x19c] ss:$20 sps:$4 sm:$0xff]  }
  0x14   :  { %1963 = vmatprep.subr.bf16.mxu1 %v2235_v0  ;;  %v2137_v57 = vld [vmem:[%s3109_s0 + $0xcc] ss:$20 sps:$4 sm:$0xff]   ;;  %v2141_v59 = vld [vmem:[%s3109_s0 + $0xc8] ss:$20 sps:$4 sm:$0xff]   ;;  %v2145_v62 = vld [vmem:[%s3109_s0 + $0x1c4] ss:$20 sps:$4 sm:$0xff]  }
  0x15   :  { %v2142_v60 = vld [vmem:[%s3109_s0 + $0x198] ss:$20 sps:$4 sm:$0xff]   ;;  %v2143_v61 = vld [vmem:[%s3109_s0 + $0xf4] ss:$20 sps:$4 sm:$0xff]   ;;  %v2147_v63 = vld [vmem:[%s3109_s0 + $0xf0] ss:$20 sps:$4 sm:$0xff]  }
  0x16   :  { %934 = vmatpush1.bf16.msra.mxu0 %v2083_v11  ;;  %v2148_v1 = vld [vmem:[%s3109_s0 + $0x1c0] ss:$20 sps:$4 sm:$0xff]   ;;  %v2154_v5 = vld [vmem:[%s3109_s0 + $0x1e8] ss:$20 sps:$4 sm:$0xff]   ;;  %v2161_v9 = vld [vmem:[%s3109_s0 + $0x210] ss:$20 sps:$4 sm:$0xff]  }
  0x17   :  { %1979 = vmatpush1.bf16.msra.mxu1 %v2318_v12  ;;  %935 = vmatprep.subr.bf16.mxu0 %v2235_v0  ;;  %v2151_v3 = vld [vmem:[%s3109_s0 + $0x1ec] ss:$20 sps:$4 sm:$0xff]   ;;  %v2158_v7 = vld [vmem:[%s3109_s0 + $0x214] ss:$20 sps:$4 sm:$0xff]   ;;  %v2164_v11 = vld [vmem:[%s3109_s0 + $0x23c] ss:$20 sps:$4 sm:$0xff]  }
  0x18   :  { %1964 = vmatprep.subr.bf16.mxu1 %v2235_v0  ;;  %v2179_v19 = vld [vmem:[%s3109_s0 + $0x1b8] ss:$20 sps:$4 sm:$0xff]  }
  0x19   :  { %v2181_v21 = vld [vmem:[%s3109_s0 + $0x1e4] ss:$20 sps:$4 sm:$0xff]  }
  0x1a   :  { %936 = vmatpush1.bf16.msra.mxu0 %v2085_v13  ;;  %v2168_v13 = vld [vmem:[%s3109_s0 + $0x194] ss:$20 sps:$4 sm:$0xff]  }
  0x1b   :  { %1980 = vmatpush1.bf16.msra.mxu1 %v2329_v14  ;;  %937 = vmatprep.subr.bf16.mxu0 %v2235_v0 }
  0x1c   :  { %1965 = vmatprep.subr.bf16.mxu1 %v2235_v0 }
  0x1e   :  { %938 = vmatpush1.bf16.msra.mxu0 %v2087_v15  ;;  %v2172_v15 = vld [vmem:[%s3109_s0 + $0x190] ss:$20 sps:$4 sm:$0xff]  }
  0x1f   :  { %1981 = vmatpush1.bf16.msra.mxu1 %v2340_v16  ;;  %939 = vmatprep.subr.bf16.mxu0 %v2235_v0 }
  0x20   :  { %1966 = vmatprep.subr.bf16.mxu1 %v2235_v0 }
  0x22   :  { %940 = vmatpush1.bf16.msra.mxu0 %v2089_v17  ;;  %v2174_v17 = vld [vmem:[%s3109_s0 + $0x1bc] ss:$20 sps:$4 sm:$0xff]  }
  0x23   :  { %1982 = vmatpush1.bf16.msra.mxu1 %v2351_v18  ;;  %941 = vmatprep.subr.bf16.mxu0 %v2235_v0 }
  0x24   :  { %1967 = vmatprep.subr.bf16.mxu1 %v2235_v0 }
  0x26   :  { %942 = vmatpush1.bf16.msra.mxu0 %v2091_v20  ;;  %v2180_v20 = vld [vmem:[%s3109_s0 + $0x288] ss:$20 sps:$4 sm:$0xff]  }
  0x27   :  { %1983 = vmatpush1.bf16.msra.mxu1 %v2368_v22  ;;  %943 = vmatprep.subr.bf16.mxu0 %v2235_v0 }
  0x28   :  { %1968 = vmatprep.subr.bf16.mxu1 %v2235_v0 }
  0x2a   :  { %944 = vmatpush1.bf16.msra.mxu0 %v2093_v23  ;;  %v2185_v23 = vld [vmem:[%s3109_s0 + $0x1e0] ss:$20 sps:$4 sm:$0xff]  }
  0x2b   :  { %1984 = vmatpush1.bf16.msra.mxu1 %v2379_v24  ;;  %945 = vmatprep.subr.bf16.mxu0 %v2235_v0 }
  0x2c   :  { %1969 = vmatprep.subr.bf16.mxu1 %v2235_v0 }
  0x2e   :  { %946 = vmatpush1.bf16.msra.mxu0 %v2095_v25  ;;  %v2187_v25 = vld [vmem:[%s3109_s0 + $0x20c] ss:$20 sps:$4 sm:$0xff]  }
  0x2f   :  { %1985 = vmatpush1.bf16.msra.mxu1 %v2390_v26  ;;  %947 = vmatprep.subr.bf16.mxu0 %v2235_v0 }
  0x30   :  { %1970 = vmatprep.subr.bf16.mxu1 %v2235_v0 }
  0x32   :  { %948 = vmatpush1.bf16.msra.mxu0 %v2097_v27  ;;  %v2190_v27 = vld [vmem:[%s3109_s0 + $0x208] ss:$20 sps:$4 sm:$0xff]  }
  0x33   :  { %1986 = vmatpush1.bf16.msra.mxu1 %v2401_v28  ;;  %949 = vmatprep.subr.bf16.mxu0 %v2235_v0 }
  0x34   :  { %1971 = vmatprep.subr.bf16.mxu1 %v2235_v0 }
  0x36   :  { %950 = vmatpush1.bf16.msra.mxu0 %v2099_v29  ;;  %v2192_v29 = vld [vmem:[%s3109_s0 + $0x234] ss:$20 sps:$4 sm:$0xff]  }
  0x37   :  { %1987 = vmatpush1.bf16.msra.mxu1 %v2412_v30  ;;  %951 = vmatprep.subr.bf16.mxu0 %v2235_v0 }
  0x38   :  { %1972 = vmatprep.subr.bf16.mxu1 %v2235_v0 }
  0x3a   :  { %952 = vmatpush1.bf16.msra.mxu0 %v2101_v31  ;;  %v2195_v31 = vld [vmem:[%s3109_s0 + $0x230] ss:$20 sps:$4 sm:$0xff]  }
  0x3b   :  { %1988 = vmatpush1.bf16.msra.mxu1 %v2423_v32  ;;  %953 = vmatprep.subr.bf16.mxu0 %v2235_v0 }
  0x3c   :  { %1973 = vmatprep.subr.bf16.mxu1 %v2235_v0 }
  0x3e   :  { %954 = vmatpush1.bf16.msra.mxu0 %v2103_v33  ;;  %v2197_v33 = vld [vmem:[%s3109_s0 + $0x25c] ss:$20 sps:$4 sm:$0xff]  }
  0x3f   :  { %1989 = vmatpush1.bf16.msra.mxu1 %v2434_v34  ;;  %1100 = vmatprep.subr.bf16.mxu0 %v2235_v0 }
  0x40   :  { %1914 = vmatprep.subr.bf16.mxu1 %v2117_v35 }
  0x41   :  { %956 = vmatmul.mubr.bf16.vlgmr.msra.gmra.mrb[0].mxu0 %v2105_v36  ;;  %v2201_v36 = vld [vmem:[%s3109_s0 + $0xd8] ss:$20 sps:$4 sm:$0xff]  }
  0x42   :  { %1173 = vmatmul.mubr.bf16.vlgmr.msra.gmra.mrb[0].mxu1 %v2108_v37  ;;  %1101 = vmatpush1.bf16.msra.mxu0 %v2264_v2  ;;  %v2149_v2 = vld [vmem:[%s3109_s0 + $0x11c] ss:$20 sps:$4 sm:$0xff]   ;;  %v2202_v37 = vld [vmem:[%s3109_s0 + $0x284] ss:$20 sps:$4 sm:$0xff]  }
  0x43   :  { %963 = vmatprep.mubr.bf16.mxu0 %v2111_v38  ;;  %1180 = vmatprep.mubr.bf16.mxu1 %v2113_v39  ;;  %v2204_v38 = vld [vmem:[%s3109_s0 + $0x100] ss:$20 sps:$4 sm:$0xff]  }
  0x44   :  { %1102 = vmatprep.subr.bf16.mxu0 %v2235_v0  ;;  %1915 = vmatpush3.bf16.msra.mxu1 %v2117_v35  ;;  %v2200_v35 = vld [vmem:[%s3109_s0 + $0x258] ss:$20 sps:$4 sm:$0xff]   ;;  %v2205_v39 = vld [vmem:[%s3109_s0 + $0x280] ss:$20 sps:$4 sm:$0xff]  }
  0x45   :  { %1916 = vmatprep.subr.bf16.mxu1 %v2136_v40 }
  0x46   :  { %1103 = vmatpush1.bf16.msra.mxu0 %v2274_v4  ;;  %v2153_v4 = vld [vmem:[%s3109_s0 + $0x118] ss:$20 sps:$4 sm:$0xff]  }
  0x47   :  { %1104 = vmatprep.subr.bf16.mxu0 %v2235_v0 }
  0x48   :  { %1917 = vmatpush3.bf16.msra.mxu1 %v2136_v40  ;;  %v2206_v40 = vld [vmem:[%s3109_s0 + $0x128] ss:$20 sps:$4 sm:$0xff]  }
  0x49   :  { %964 = vmatmul.mubr.bf16.gmra.mrb[4].mxu0 %v2115_v41  ;;  %1918 = vmatprep.subr.bf16.mxu1 %v2155_v42  ;;  %v2207_v41 = vld [vmem:[%s3109_s0 + $0x2ac] ss:$20 sps:$4 sm:$0xff]  }
  0x4a   :  { %1181 = vmatmul.mubr.bf16.gmra.mrb[4].mxu1 %v2116_v43  ;;  %971 = vmatprep.mubr.bf16.mxu0 %v2118_v44  ;;  %v2210_v43 = vld [vmem:[%s3109_s0 + $0x2a8] ss:$20 sps:$4 sm:$0xff]   ;;  %v2211_v44 = vld [vmem:[%s3109_s0 + $0x178] ss:$20 sps:$4 sm:$0xff]  }
  0x4b   :  { %1188 = vmatprep.mubr.bf16.mxu1 %v2120_v45  ;;  %1105 = vmatpush1.bf16.msra.mxu0 %v2285_v6  ;;  %v2156_v6 = vld [vmem:[%s3109_s0 + $0x144] ss:$20 sps:$4 sm:$0xff]   ;;  %v2214_v45 = vld [vmem:[%s3109_s0 + $0xc] ss:$20 sps:$4 sm:$0xff]  }
  0x4c   :  { %1106 = vmatprep.subr.bf16.mxu0 %v2235_v0  ;;  %1919 = vmatpush3.bf16.msra.mxu1 %v2155_v42  ;;  %v2209_v42 = vld [vmem:[%s3109_s0 + $0x150] ss:$20 sps:$4 sm:$0xff]  }
  0x4d   :  { %1920 = vmatprep.subr.bf16.mxu1 %v2178_v46 }
  0x4f   :  { %1107 = vmatpush1.bf16.msra.mxu0 %v2296_v8  ;;  %v2160_v8 = vld [vmem:[%s3109_s0 + $0x140] ss:$20 sps:$4 sm:$0xff]  }
  0x50   :  { %1108 = vmatprep.subr.bf16.mxu0 %v2235_v0  ;;  %1921 = vmatpush3.bf16.msra.mxu1 %v2178_v46  ;;  %v2215_v46 = vld [vmem:[%s3109_s0 + $0x1a0] ss:$20 sps:$4 sm:$0xff]  }
  0x51   :  { %972 = vmatmul.mubr.bf16.gmra.mrb[8].mxu0 %v2122_v47  ;;  %v2212_v47 = vld [vmem:[%s3109_s0 + $0x8] ss:$20 sps:$4 sm:$0xff]  }
  0x52   :  { %1189 = vmatmul.mubr.bf16.gmra.mrb[8].mxu1 %v2123_v48  ;;  %979 = vmatprep.mubr.bf16.mxu0 %v2124_v49  ;;  %v2216_v48 = vld [vmem:[%s3109_s0 + $0x1c8] ss:$20 sps:$4 sm:$0xff]  }
  0x53   :  { %1196 = vmatprep.mubr.bf16.mxu1 %v2126_v50  ;;  %1109 = vmatpush1.bf16.msra.mxu0 %v2307_v10  ;;  %v2162_v10 = vld [vmem:[%s3109_s0 + $0x16c] ss:$20 sps:$4 sm:$0xff]   ;;  %v2217_v49 = vld [vmem:[%s3109_s0 + $0x34] ss:$20 sps:$4 sm:$0xff]   ;;  %v2219_v50 = vld [vmem:[%s3109_s0 + $0x1f0] ss:$20 sps:$4 sm:$0xff]  }
  0x54   :  { %1110 = vmatprep.subr.bf16.mxu0 %v2235_v0 }
  0x57   :  { %1111 = vmatpush1.bf16.msra.mxu0 %v2318_v12  ;;  %v2167_v12 = vld [vmem:[%s3109_s0 + $0x238] ss:$20 sps:$4 sm:$0xff]  }
  0x58   :  { %1112 = vmatprep.subr.bf16.mxu0 %v2235_v0 }
  0x59   :  { %980 = vmatmul.mubr.bf16.gmra.mrb[12].mxu0 %v2128_v51  ;;  %v2220_v51 = vld [vmem:[%s3109_s0 + $0x30] ss:$20 sps:$4 sm:$0xff]  }
  0x5a   :  { %1197 = vmatmul.mubr.bf16.gmra.mrb[12].mxu1 %v2129_v52  ;;  %987 = vmatprep.mubr.bf16.mxu0 %v2130_v53  ;;  %v2221_v52 = vld [vmem:[%s3109_s0 + $0x218] ss:$20 sps:$4 sm:$0xff]   ;;  %v2222_v53 = vld [vmem:[%s3109_s0 + $0x5c] ss:$20 sps:$4 sm:$0xff]  }
  0x5b   :  { %1204 = vmatprep.mubr.bf16.mxu1 %v2132_v54  ;;  %1113 = vmatpush1.bf16.msra.mxu0 %v2329_v14  ;;  %v2170_v14 = vld [vmem:[%s3109_s0 + $0x264] ss:$20 sps:$4 sm:$0xff]   ;;  %v2224_v54 = vld [vmem:[%s3109_s0 + $0x240] ss:$20 sps:$4 sm:$0xff]  }
  0x5c   :  { %1114 = vmatprep.subr.bf16.mxu0 %v2235_v0 }
  0x5f   :  { %1115 = vmatpush1.bf16.msra.mxu0 %v2340_v16  ;;  %v2173_v16 = vld [vmem:[%s3109_s0 + $0x260] ss:$20 sps:$4 sm:$0xff]  }
  0x60   :  { %1116 = vmatprep.subr.bf16.mxu0 %v2235_v0 }
  0x61   :  { %988 = vmatmul.mubr.bf16.gmra.mrb[16].mxu0 %v2134_v55  ;;  %v2225_v55 = vld [vmem:[%s3109_s0 + $0x58] ss:$20 sps:$4 sm:$0xff]  }
  0x62   :  { %1205 = vmatmul.mubr.bf16.gmra.mrb[16].mxu1 %v2135_v56  ;;  %995 = vmatprep.mubr.bf16.mxu0 %v2137_v57  ;;  %v2226_v56 = vld [vmem:[%s3109_s0 + $0x268] ss:$20 sps:$4 sm:$0xff]   ;;  %v2227_v57 = vld [vmem:[%s3109_s0 + $0x84] ss:$20 sps:$4 sm:$0xff]  }
  0x63   :  { %1212 = vmatprep.mubr.bf16.mxu1 %v2139_v58  ;;  %1117 = vmatpush1.bf16.msra.mxu0 %v2351_v18  ;;  %v2176_v18 = vld [vmem:[%s3109_s0 + $0x28c] ss:$20 sps:$4 sm:$0xff]   ;;  %v2229_v58 = vld [vmem:[%s3109_s0 + $0x290] ss:$20 sps:$4 sm:$0xff]  }
  0x64   :  { %1118 = vmatprep.subr.bf16.mxu0 %v2235_v0 }
  0x67   :  { %1119 = vmatpush1.bf16.msra.mxu0 %v2368_v22  ;;  %v2183_v22 = vld [vmem:[%s3109_s0 + $0x2b4] ss:$20 sps:$4 sm:$0xff]  }
  0x68   :  { %1120 = vmatprep.subr.bf16.mxu0 %v2235_v0 }
  0x69   :  { %996 = vmatmul.mubr.bf16.gmra.mrb[20].mxu0 %v2141_v59  ;;  %v2230_v59 = vld [vmem:[%s3109_s0 + $0x80] ss:$20 sps:$4 sm:$0xff]  }
  0x6a   :  { %1213 = vmatmul.mubr.bf16.gmra.mrb[20].mxu1 %v2142_v60  ;;  %1003 = vmatprep.mubr.bf16.mxu0 %v2143_v61  ;;  %v2231_v60 = vld [vmem:[%s3109_s0 + $0x2b8] ss:$20 sps:$4 sm:$0xff]  }
  0x6b   :  { %1220 = vmatprep.mubr.bf16.mxu1 %v2145_v62  ;;  %1121 = vmatpush1.bf16.msra.mxu0 %v2379_v24  ;;  %v2186_v24 = vld [vmem:[%s3109_s0 + $0x2b0] ss:$20 sps:$4 sm:$0xff]   ;;  %v2232_v61 = vld [vmem:[%s3109_s0 + $0xac] ss:$20 sps:$4 sm:$0xff]   ;;  %v2234_v62 = vld [vmem:[%s3109_s0 + $0xa8] ss:$20 sps:$4 sm:$0xff]  }
  0x6c   :  { %1122 = vmatprep.subr.bf16.mxu0 %v2235_v0 }
  0x6f   :  { %1123 = vmatpush1.bf16.msra.mxu0 %v2390_v26  ;;  %v2189_v26 = vld [vmem:[%s3109_s0 + $0x10] ss:$20 sps:$4 sm:$0xff]  }
  0x70   :  { %1124 = vmatprep.subr.bf16.mxu0 %v2235_v0 }
  0x71   :  { %1004 = vmatmul.mubr.bf16.gmra.mrb[24].mxu0 %v2147_v63 }
  0x72   :  { %1221 = vmatmul.mubr.bf16.gmra.mrb[24].mxu1 %v2148_v1  ;;  %1011 = vmatprep.mubr.bf16.mxu0 %v2149_v2 }
  0x73   :  { %1228 = vmatprep.mubr.bf16.mxu1 %v2151_v3  ;;  %1125 = vmatpush1.bf16.msra.mxu0 %v2401_v28  ;;  %v2191_v28 = vld [vmem:[%s3109_s0 + $0x38] ss:$20 sps:$4 sm:$0xff]  }
  0x74   :  { %1126 = vmatprep.subr.bf16.mxu0 %v2235_v0 }
  0x77   :  { %1127 = vmatpush1.bf16.msra.mxu0 %v2412_v30  ;;  %v2194_v30 = vld [vmem:[%s3109_s0 + $0x60] ss:$20 sps:$4 sm:$0xff]  }
  0x78   :  { %1128 = vmatprep.subr.bf16.mxu0 %v2235_v0 }
  0x79   :  { %1012 = vmatmul.mubr.bf16.gmra.mrb[28].mxu0 %v2153_v4 }
  0x7a   :  { %1229 = vmatmul.mubr.bf16.gmra.mrb[28].mxu1 %v2154_v5  ;;  %1019 = vmatprep.mubr.bf16.mxu0 %v2156_v6 }
  0x7b   :  { %1236 = vmatprep.mubr.bf16.mxu1 %v2158_v7  ;;  %1129 = vmatpush1.bf16.msra.mxu0 %v2423_v32  ;;  %v2196_v32 = vld [vmem:[%s3109_s0 + $0x88] ss:$20 sps:$4 sm:$0xff]  }
  0x7c   :  { %1130 = vmatprep.subr.bf16.mxu0 %v2235_v0  ;;  %v2166_v0 = vld [vmem:[%s3109_s0 + $0x168] ss:$20 sps:$4 sm:$0xff]  }
  0x7f   :  { %1131 = vmatpush1.bf16.msra.mxu0 %v2434_v34  ;;  %v2199_v34 = vld [vmem:[%s3109_s0 + $0xb0] ss:$20 sps:$4 sm:$0xff]  }
  0x81   :  { %1020 = vmatmul.mubr.bf16.gmra.mrb[32].mxu0 %v2160_v8 }
  0x82   :  { %1237 = vmatmul.mubr.bf16.gmra.mrb[32].mxu1 %v2161_v9  ;;  %1027 = vmatprep.mubr.bf16.mxu0 %v2162_v10 }
  0x83   :  { %1244 = vmatprep.mubr.bf16.mxu1 %v2164_v11 }
  0x89   :  { %1028 = vmatmul.mubr.bf16.gmra.mrb[36].mxu0 %v2166_v0 }
  0x8a   :  { %1245 = vmatmul.mubr.bf16.gmra.mrb[36].mxu1 %v2167_v12  ;;  %1035 = vmatprep.mubr.bf16.mxu0 %v2168_v13 }
  0x8b   :  { %1252 = vmatprep.mubr.bf16.mxu1 %v2170_v14 }
  0x91   :  { %1036 = vmatmul.mubr.bf16.gmra.mrb[40].mxu0 %v2172_v15 }
  0x92   :  { %1253 = vmatmul.mubr.bf16.gmra.mrb[40].mxu1 %v2173_v16  ;;  %1043 = vmatprep.mubr.bf16.mxu0 %v2174_v17 }
  0x93   :  { %1260 = vmatprep.mubr.bf16.mxu1 %v2176_v18 }
  0x99   :  { %1044 = vmatmul.mubr.bf16.gmra.mrb[44].mxu0 %v2179_v19  ;;  %v2769_v19 = vld [vmem:[%s3110_s2] ss:$0 sm:$0xff] }
  0x9a   :  { %1261 = vmatmul.mubr.bf16.gmra.mrb[44].mxu1 %v2180_v20  ;;  %1051 = vmatprep.mubr.bf16.mxu0 %v2181_v21 }
  0x9b   :  { %1268 = vmatprep.mubr.bf16.mxu1 %v2183_v22 }
  0xa1   :  { %1052 = vmatmul.mubr.bf16.gmra.mrb[48].mxu0 %v2185_v23 }
  0xa2   :  { %1269 = vmatmul.mubr.bf16.gmra.mrb[48].mxu1 %v2186_v24  ;;  %1059 = vmatprep.mubr.bf16.mxu0 %v2187_v25 }
  0xa3   :  { %1922 = vmatprep.mubr.msk.bf16.mxu1 %vm868_vm0, %v2189_v26 }
  0xa9   :  { %1060 = vmatmul.mubr.bf16.gmra.mrb[52].mxu0 %v2190_v27 }
  0xaa   :  { %1923 = vmatmul.mubr.msk.bf16.vlgmr.msra.gmra.mrb[52].mxu1 %vm868_vm0, %v2191_v28  ;;  %1067 = vmatprep.mubr.bf16.mxu0 %v2192_v29 }
  0xab   :  { %1926 = vmatprep.mubr.msk.bf16.mxu1 %vm868_vm0, %v2194_v30 }
  0xb1   :  { %1068 = vmatmul.mubr.bf16.gmra.mrb[56].mxu0 %v2195_v31 }
  0xb2   :  { %1927 = vmatmul.mubr.msk.bf16.gmra.mrb[56].mxu1 %vm868_vm0, %v2196_v32  ;;  %1075 = vmatprep.mubr.bf16.mxu0 %v2197_v33 }
  0xb3   :  { %1930 = vmatprep.mubr.msk.bf16.mxu1 %vm868_vm0, %v2199_v34 }
  0xb9   :  { %1076 = vmatmul.mubr.bf16.gmra.mrb[60].mxu0 %v2200_v35 }
  0xba   :  { %1931 = vmatmul.mubr.msk.bf16.gmra.mrb[60].mxu1 %vm868_vm0, %v2201_v36  ;;  %1083 = vmatprep.mubr.bf16.mxu0 %v2202_v37 }
  0xbb   :  { %1934 = vmatprep.mubr.msk.bf16.mxu1 %vm868_vm0, %v2204_v38 }
  0xc1   :  { %1084 = vmatmul.mubr.bf16.gmra.mrb[64].mxu0 %v2205_v39 }
  0xc2   :  { %1935 = vmatmul.mubr.msk.bf16.gmra.mrb[64].mxu1 %vm868_vm0, %v2206_v40  ;;  %1091 = vmatprep.mubr.bf16.mxu0 %v2207_v41 }
  0xc3   :  { %1938 = vmatprep.mubr.msk.bf16.mxu1 %vm868_vm0, %v2209_v42 }
  0xc9   :  { %1092 = vmatmul.mubr.bf16.gmra.mrb[68].mxu0 %v2210_v43 }
  0xca   :  { %1939 = vmatmul.mubr.msk.bf16.gmra.mrb[68].mxu1 %vm868_vm0, %v2211_v44  ;;  %1132 = vmatprep.mubr.bf16.mxu0 %v2214_v45 }
  0xcb   :  { %1942 = vmatprep.mubr.msk.bf16.mxu1 %vm868_vm0, %v2215_v46 }
  0xd1   :  { %1133 = vmatmul.mubr.bf16.vlgmr.msra.gmra.mrb[0].mxu0 %v2212_v47 }
  0xd2   :  { %1943 = vmatmul.mubr.msk.bf16.gmra.mrb[72].mxu1 %vm868_vm0, %v2216_v48  ;;  %1140 = vmatprep.mubr.bf16.mxu0 %v2217_v49 }
  0xd3   :  { %1946 = vmatprep.mubr.msk.bf16.mxu1 %vm868_vm0, %v2219_v50 }
  0xd9   :  { %1141 = vmatmul.mubr.bf16.gmra.mrb[4].mxu0 %v2220_v51 }
  0xda   :  { %1947 = vmatmul.mubr.msk.bf16.gmra.mrb[76].mxu1 %vm868_vm0, %v2221_v52  ;;  %1148 = vmatprep.mubr.bf16.mxu0 %v2222_v53 }
  0xdb   :  { %1950 = vmatprep.mubr.msk.bf16.mxu1 %vm868_vm0, %v2224_v54 }
  0xe1   :  { %1149 = vmatmul.mubr.bf16.gmra.mrb[8].mxu0 %v2225_v55 }
  0xe2   :  { %1951 = vmatmul.mubr.msk.bf16.gmra.mrb[80].mxu1 %vm868_vm0, %v2226_v56  ;;  %1156 = vmatprep.mubr.bf16.mxu0 %v2227_v57 }
  0xe3   :  { %1954 = vmatprep.mubr.msk.bf16.mxu1 %vm868_vm0, %v2229_v58 }
  0xe9   :  { %1157 = vmatmul.mubr.bf16.gmra.mrb[12].mxu0 %v2230_v59 }
  0xea   :  { %1955 = vmatmul.mubr.msk.bf16.gmra.mrb[84].mxu1 %vm868_vm0, %v2231_v60  ;;  %1164 = vmatprep.mubr.bf16.mxu0 %v2232_v61 }
  0xf1   :  { %1165 = vmatmul.mubr.bf16.gmra.mrb[16].mxu0 %v2234_v62 }
 0x115   :  { %v1174_v63 = vpop.f32.mrb[0].mxu1 }
 0x116   :  { %v1176_v1 = vpop.f32.mrb[1].mxu1 }
 0x117   :  { %v1177_v2 = vpop.f32.mrb[2].mxu1 }
 0x118   :  { %v1179_v3 = vpop.f32.mrb[3].mxu1 }
 0x11d   :  { %v1182_v4 = vpop.f32.mrb[4].mxu1 }
 0x11e   :  { %v1184_v5 = vpop.f32.mrb[5].mxu1 }
 0x11f   :  { %v1185_v6 = vpop.f32.mrb[6].mxu1 }
 0x120   :  { %v1187_v7 = vpop.f32.mrb[7].mxu1 }
 0x125   :  { %v1190_v8 = vpop.f32.mrb[8].mxu1 }
 0x126   :  { %v1192_v9 = vpop.f32.mrb[9].mxu1 }
 0x127   :  { %v1193_v10 = vpop.f32.mrb[10].mxu1 }
 0x128   :  { %v1195_v11 = vpop.f32.mrb[11].mxu1 }
 0x12d   :  { %v1198_v0 = vpop.f32.mrb[12].mxu1 }
 0x12e   :  { %v1200_v12 = vpop.f32.mrb[13].mxu1 }
 0x12f   :  { %v1201_v13 = vpop.f32.mrb[14].mxu1 }
 0x130   :  { %v1203_v14 = vpop.f32.mrb[15].mxu1 }
 0x135   :  { %v2764_v15 = vpop.f32.mrb[16].mxu1 }
 0x136   :  { %v1208_v16 = vpop.f32.mrb[17].mxu1 }
 0x137   :  { %v1209_v17 = vpop.f32.mrb[18].mxu1 }
 0x138   :  { %v1211_v18 = vpop.f32.mrb[19].mxu1 }
 0x13c   :  { %v997_v20 = vpop.f32.mrb[20].mxu0 }
 0x13d   :  { %v998_v21 = vadd.f32 %v2769_v19, %v997_v20  ;;  %v999_v22 = vpop.f32.mrb[21].mxu0  ;;  %v2772_v23 = vpop.f32.mrb[20].mxu1 }
 0x13e   :  { %v1000_v24 = vpop.f32.mrb[22].mxu0  ;;  %v1216_v25 = vpop.f32.mrb[21].mxu1 }
 0x13f   :  { %v1001_v26 = vadd.f32 %v2769_v19, %v1000_v24  ;;  %v1002_v27 = vpop.f32.mrb[23].mxu0  ;;  %v2775_v28 = vpop.f32.mrb[22].mxu1  ;;  %v2777_v29 = vadd.f32 %v1174_v63, %v998_v21 }
 0x140   :  { %v1219_v30 = vpop.f32.mrb[23].mxu1 }
 0x141   :  { %v2779_v31 = vadd.f32 %v1177_v2, %v1001_v26 }
 0x144   :  { %v1005_v32 = vpop.f32.mrb[24].mxu0 }
 0x145   :  { %v1006_v33 = vadd.f32 %v2769_v19, %v1005_v32  ;;  %v1007_v34 = vpop.f32.mrb[25].mxu0  ;;  %v2782_v35 = vpop.f32.mrb[24].mxu1 }
 0x146   :  { %v1008_v36 = vpop.f32.mrb[26].mxu0  ;;  %v1224_v37 = vpop.f32.mrb[25].mxu1 }
 0x147   :  { %v1009_v38 = vadd.f32 %v2769_v19, %v1008_v36  ;;  %v1010_v39 = vpop.f32.mrb[27].mxu0  ;;  %v2785_v40 = vpop.f32.mrb[26].mxu1  ;;  %v2787_v41 = vadd.f32 %v1182_v4, %v1006_v33 }
 0x148   :  { %v1227_v42 = vpop.f32.mrb[27].mxu1 }
 0x149   :  { %v2789_v43 = vadd.f32 %v1185_v6, %v1009_v38 }
 0x14c   :  { %v1013_v44 = vpop.f32.mrb[28].mxu0 }
 0x14d   :  { %v1014_v45 = vadd.f32 %v2769_v19, %v1013_v44  ;;  %v1015_v46 = vpop.f32.mrb[29].mxu0  ;;  %v2792_v47 = vpop.f32.mrb[28].mxu1 }
 0x14e   :  { %v1016_v48 = vpop.f32.mrb[30].mxu0  ;;  %v1232_v49 = vpop.f32.mrb[29].mxu1 }
 0x14f   :  { %v1017_v50 = vadd.f32 %v2769_v19, %v1016_v48  ;;  %v1018_v51 = vpop.f32.mrb[31].mxu0  ;;  %v2795_v52 = vpop.f32.mrb[30].mxu1  ;;  %v2797_v53 = vadd.f32 %v1190_v8, %v1014_v45 }
 0x150   :  { %v1235_v54 = vpop.f32.mrb[31].mxu1 }
 0x151   :  { %v2799_v55 = vadd.f32 %v1193_v10, %v1017_v50 }
 0x154   :  { %v1021_v56 = vpop.f32.mrb[32].mxu0 }
 0x155   :  { %v1022_v57 = vadd.f32 %v2769_v19, %v1021_v56  ;;  %v1023_v58 = vpop.f32.mrb[33].mxu0  ;;  %v2802_v59 = vpop.f32.mrb[32].mxu1 }
 0x156   :  { %v1024_v60 = vpop.f32.mrb[34].mxu0  ;;  %v1240_v61 = vpop.f32.mrb[33].mxu1 }
 0x157   :  { %v1025_v62 = vadd.f32 %v2769_v19, %v1024_v60  ;;  %v1026_v63 = vpop.f32.mrb[35].mxu0  ;;  %v2805_v1 = vpop.f32.mrb[34].mxu1  ;;  %v2807_v2 = vadd.f32 %v1198_v0, %v1022_v57 }
 0x158   :  { %v1243_v3 = vpop.f32.mrb[35].mxu1 }
 0x159   :  { %v2809_v4 = vadd.f32 %v1201_v13, %v1025_v62 }
 0x15c   :  { %v1029_v5 = vpop.f32.mrb[36].mxu0 }
 0x15d   :  { %v1030_v6 = vadd.f32 %v2769_v19, %v1029_v5  ;;  %v1031_v7 = vpop.f32.mrb[37].mxu0  ;;  %v2812_v8 = vpop.f32.mrb[36].mxu1 }
 0x15e   :  { %v1032_v9 = vpop.f32.mrb[38].mxu0  ;;  %v1248_v10 = vpop.f32.mrb[37].mxu1 }
 0x15f   :  { %v1033_v11 = vadd.f32 %v2769_v19, %v1032_v9  ;;  %v1034_v12 = vpop.f32.mrb[39].mxu0  ;;  %v2815_v14 = vpop.f32.mrb[38].mxu1  ;;  %v2818_v16 = vadd.f32 %v2764_v15, %v1030_v6 }
 0x160   :  { %v1251_v0 = vpop.f32.mrb[39].mxu1 }
 0x161   :  { %v2820_v18 = vadd.f32 %v1209_v17, %v1033_v11 }
 0x164   :  { %v1037_v13 = vpop.f32.mrb[40].mxu0 }
 0x165   :  { %v1038_v20 = vadd.f32 %v2769_v19, %v1037_v13  ;;  %v1039_v21 = vpop.f32.mrb[41].mxu0  ;;  %v2823_v22 = vpop.f32.mrb[40].mxu1 }
 0x166   :  { %v1040_v24 = vpop.f32.mrb[42].mxu0  ;;  %v1256_v25 = vpop.f32.mrb[41].mxu1 }
 0x167   :  { %v1041_v26 = vadd.f32 %v2769_v19, %v1040_v24  ;;  %v1042_v27 = vpop.f32.mrb[43].mxu0  ;;  %v2826_v30 = vpop.f32.mrb[42].mxu1  ;;  %v2829_v32 = vadd.f32 %v2772_v23, %v1038_v20 }
 0x168   :  { %v1259_v15 = vpop.f32.mrb[43].mxu1 }
 0x169   :  { %v2832_v17 = vadd.f32 %v2775_v28, %v1041_v26 }
 0x16c   :  { %v1045_v33 = vpop.f32.mrb[44].mxu0 }
 0x16d   :  { %v1046_v34 = vadd.f32 %v2769_v19, %v1045_v33  ;;  %v1047_v36 = vpop.f32.mrb[45].mxu0  ;;  %v2835_v37 = vpop.f32.mrb[44].mxu1 }
 0x16e   :  { %v1048_v38 = vpop.f32.mrb[46].mxu0  ;;  %v1264_v39 = vpop.f32.mrb[45].mxu1 }
 0x16f   :  { %v1049_v42 = vadd.f32 %v2769_v19, %v1048_v38  ;;  %v1050_v44 = vpop.f32.mrb[47].mxu0  ;;  %v2838_v45 = vpop.f32.mrb[46].mxu1  ;;  %v2841_v23 = vadd.f32 %v2782_v35, %v1046_v34 }
 0x170   :  { %v1267_v46 = vpop.f32.mrb[47].mxu1 }
 0x171   :  { %v2844_v28 = vadd.f32 %v2785_v40, %v1049_v42 }
 0x174   :  { %v1053_v48 = vpop.f32.mrb[48].mxu0 }
 0x175   :  { %v1054_v49 = vadd.f32 %v2769_v19, %v1053_v48  ;;  %v1055_v50 = vpop.f32.mrb[49].mxu0  ;;  %v2847_v51 = vpop.f32.mrb[48].mxu1 }
 0x176   :  { %v1056_v54 = vpop.f32.mrb[50].mxu0  ;;  %v1272_v56 = vpop.f32.mrb[49].mxu1 }
 0x177   :  { %v1057_v57 = vadd.f32 %v2769_v19, %v1056_v54  ;;  %v1058_v58 = vpop.f32.mrb[51].mxu0  ;;  %v2850_v60 = vpop.f32.mrb[50].mxu1  ;;  %v2853_v35 = vadd.f32 %v2792_v47, %v1054_v49 }
 0x178   :  { %v1275_v61 = vpop.f32.mrb[51].mxu1 }
 0x179   :  { %v2856_v40 = vadd.f32 %v2795_v52, %v1057_v57 }
 0x17c   :  { %v1061_v62 = vpop.f32.mrb[52].mxu0 }
 0x17d   :  { %v1062_v63 = vadd.f32 %v2769_v19, %v1061_v62  ;;  %v1063_v3 = vpop.f32.mrb[53].mxu0  ;;  %v2859_v5 = vpop.f32.mrb[52].mxu1 }
 0x17e   :  { %v1064_v6 = vpop.f32.mrb[54].mxu0  ;;  %v2861_v7 = vpop.f32.mrb[53].mxu1 }
 0x17f   :  { %v1065_v9 = vadd.f32 %v2769_v19, %v1064_v6  ;;  %v1066_v10 = vpop.f32.mrb[55].mxu0  ;;  %v2864_v11 = vpop.f32.mrb[54].mxu1  ;;  %v2867_v47 = vadd.f32 %v2802_v59, %v1062_v63 }
 0x180   :  { %v2869_v12 = vpop.f32.mrb[55].mxu1 }
 0x181   :  { %v2872_v52 = vadd.f32 %v2805_v1, %v1065_v9 }
 0x184   :  { %v1069_v0 = vpop.f32.mrb[56].mxu0 }
 0x185   :  { %v1070_v13 = vadd.f32 %v2769_v19, %v1069_v0  ;;  %v1071_v20 = vpop.f32.mrb[57].mxu0  ;;  %v2875_v21 = vpop.f32.mrb[56].mxu1 }
 0x186   :  { %v1072_v24 = vpop.f32.mrb[58].mxu0  ;;  %v2877_v25 = vpop.f32.mrb[57].mxu1 }
 0x187   :  { %v1073_v26 = vadd.f32 %v2769_v19, %v1072_v24  ;;  %v1074_v27 = vpop.f32.mrb[59].mxu0  ;;  %v2880_v15 = vpop.f32.mrb[58].mxu1  ;;  %v2883_v59 = vadd.f32 %v2812_v8, %v1070_v13 }
 0x188   :  { %v2885_v33 = vpop.f32.mrb[59].mxu1 }
 0x189   :  { %v2888_v1 = vadd.f32 %v2815_v14, %v1073_v26 }
 0x18c   :  { %v1077_v34 = vpop.f32.mrb[60].mxu0 }
 0x18d   :  { %v1078_v36 = vadd.f32 %v2769_v19, %v1077_v34  ;;  %v1932_v38 = vpop.f32.mrb[60].mxu1  ;;  %v1079_v39 = vpop.f32.mrb[61].mxu0 }
 0x18e   :  { %v1352_v42 = vadd.f32 %v1932_v38, %v2777_v29  ;;  %v2892_v44 = vpop.f32.mrb[61].mxu1  ;;  %v1080_v46 = vpop.f32.mrb[62].mxu0 }
 0x18f   :  { %v1081_v48 = vadd.f32 %v2769_v19, %v1080_v46  ;;  %v1933_v49 = vpop.f32.mrb[62].mxu1  ;;  %v1082_v8 = vpop.f32.mrb[63].mxu0  ;;  %v2896_v50 = vadd.f32 %v2823_v22, %v1078_v36 }
 0x190   :  { %v1464_v54 = vmax.f32 %v1352_v42, 0.0  ;;  %v1355_v14 = vadd.f32 %v1933_v49, %v2779_v31  ;;  %v2899_v56 = vpop.f32.mrb[63].mxu1 }
 0x191   :  { %v2902_v57 = vadd.f32 %v2826_v30, %v1081_v48 }
 0x192   :  { %v1866_v29 = vpack.c.bf16 %v1464_v54, %v1464_v54  ;;  %v1465_v58 = vmax.f32 %v1355_v14, 0.0 }
 0x194   :  { %1645 = vst.msk [vmem:[%s3111_s3 + $0x28] sm:$0xf] %vm1634_vm1, %v1866_v29  ;;  %v1867_v61 = vpack.c.bf16 %v1465_v58, %v1465_v58  ;;  %v1085_v62 = vpop.f32.mrb[64].mxu0 }
 0x195   :  { %v1086_v22 = vadd.f32 %v2769_v19, %v1085_v62  ;;  %v1936_v63 = vpop.f32.mrb[64].mxu1  ;;  %v1087_v3 = vpop.f32.mrb[65].mxu0 }
 0x196   :  { %1646 = vst.msk [vmem:[%s3111_s3 + $0x2c] sm:$0xf] %vm1634_vm1, %v1867_v61  ;;  %v1368_v31 = vadd.f32 %v1936_v63, %v2797_v53  ;;  %v1359_v30 = vpop.f32.mrb[65].mxu1  ;;  %v1088_v6 = vpop.f32.mrb[66].mxu0 }
 0x197   :  { %v1360_v9 = vadd.f32 %v1359_v30, %v2787_v41  ;;  %v1089_v10 = vadd.f32 %v2769_v19, %v1088_v6  ;;  %v1937_v0 = vpop.f32.mrb[66].mxu1  ;;  %v1090_v13 = vpop.f32.mrb[67].mxu0  ;;  %v2917_v20 = vadd.f32 %v2835_v37, %v1086_v22 }
 0x198   :  { %v1468_v24 = vmax.f32 %v1368_v31, 0.0  ;;  %v1371_v26 = vadd.f32 %v1937_v0, %v2799_v55  ;;  %v1362_v27 = vpop.f32.mrb[67].mxu1 }
 0x199   :  { %v1466_v34 = vmax.f32 %v1360_v9, 0.0  ;;  %v1363_v36 = vadd.f32 %v1362_v27, %v2789_v43  ;;  %v2922_v53 = vadd.f32 %v2838_v45, %v1089_v10 }
 0x19a   :  { %v1870_v38 = vpack.c.bf16 %v1468_v24, %v1468_v24  ;;  %v1469_v39 = vmax.f32 %v1371_v26, 0.0 }
 0x19b   :  { %v1868_v41 = vpack.c.bf16 %v1466_v34, %v1466_v34  ;;  %v1467_v42 = vmax.f32 %v1363_v36, 0.0 }
 0x19c   :  { %1649 = vst.msk [vmem:[%s3111_s3 + $0x38] sm:$0xf] %vm1634_vm1, %v1870_v38  ;;  %v1871_v37 = vpack.c.bf16 %v1469_v39, %v1469_v39  ;;  %v1093_v46 = vpop.f32.mrb[68].mxu0 }
 0x19d   :  { %1647 = vst.msk [vmem:[%s3111_s3 + $0x30] sm:$0xf] %vm1634_vm1, %v1868_v41  ;;  %v1869_v43 = vpack.c.bf16 %v1467_v42, %v1467_v42  ;;  %v1094_v55 = vadd.f32 %v2769_v19, %v1093_v46  ;;  %v1940_v45 = vpop.f32.mrb[68].mxu1  ;;  %v1095_v48 = vpop.f32.mrb[69].mxu0 }
 0x19e   :  { %1650 = vst.msk [vmem:[%s3111_s3 + $0x3c] sm:$0xf] %vm1634_vm1, %v1871_v37  ;;  %v1384_v49 = vadd.f32 %v1940_v45, %v2818_v16  ;;  %v1375_v8 = vpop.f32.mrb[69].mxu1  ;;  %v1096_v54 = vpop.f32.mrb[70].mxu0 }
 0x19f   :  { %1648 = vst.msk [vmem:[%s3111_s3 + $0x34] sm:$0xf] %vm1634_vm1, %v1869_v43  ;;  %v1376_v14 = vadd.f32 %v1375_v8, %v2807_v2  ;;  %v1097_v29 = vadd.f32 %v2769_v19, %v1096_v54  ;;  %v1941_v58 = vpop.f32.mrb[70].mxu1  ;;  %v1098_v61 = vpop.f32.mrb[71].mxu0  ;;  %v2945_v62 = vadd.f32 %v2847_v51, %v1094_v55 }
 0x1a0   :  { %v1472_v22 = vmax.f32 %v1384_v49, 0.0  ;;  %v1387_v63 = vadd.f32 %v1941_v58, %v2820_v18  ;;  %v1378_v16 = vpop.f32.mrb[71].mxu1 }
 0x1a1   :  { %v1470_v3 = vmax.f32 %v1376_v14, 0.0  ;;  %v1379_v31 = vadd.f32 %v1378_v16, %v2809_v4  ;;  %v2950_v30 = vadd.f32 %v2850_v60, %v1097_v29 }
 0x1a2   :  { %v1874_v6 = vpack.c.bf16 %v1472_v22, %v1472_v22  ;;  %v1473_v9 = vmax.f32 %v1387_v63, 0.0 }
 0x1a3   :  { %v1872_v2 = vpack.c.bf16 %v1470_v3, %v1470_v3  ;;  %v1471_v10 = vmax.f32 %v1379_v31, 0.0 }
 0x1a4   :  { %1653 = vst.msk [vmem:[%s3111_s3 + $0x48] sm:$0xf] %vm1634_vm1, %v1874_v6  ;;  %v1875_v51 = vpack.c.bf16 %v1473_v9, %v1473_v9  ;;  %v1134_v0 = vpop.f32.mrb[0].mxu0 }
 0x1a5   :  { %1651 = vst.msk [vmem:[%s3111_s3 + $0x40] sm:$0xf] %vm1634_vm1, %v1872_v2  ;;  %v1873_v4 = vpack.c.bf16 %v1471_v10, %v1471_v10  ;;  %v1990_v18 = vadd.f32 %v2769_v19, %v1134_v0  ;;  %v1944_v60 = vpop.f32.mrb[72].mxu1  ;;  %v1136_v13 = vpop.f32.mrb[1].mxu0 }
 0x1a6   :  { %1654 = vst.msk [vmem:[%s3111_s3 + $0x4c] sm:$0xf] %vm1634_vm1, %v1875_v51  ;;  %v1400_v24 = vadd.f32 %v1944_v60, %v2841_v23  ;;  %v1391_v26 = vpop.f32.mrb[73].mxu1  ;;  %v1137_v27 = vpop.f32.mrb[2].mxu0 }
 0x1a7   :  { %1652 = vst.msk [vmem:[%s3111_s3 + $0x44] sm:$0xf] %vm1634_vm1, %v1873_v4  ;;  %v1312_v34 = vadd.f32 %v1990_v18, %v2861_v7  ;;  %v1392_v36 = vadd.f32 %v1391_v26, %v2829_v32  ;;  %v1991_v38 = vadd.f32 %v2769_v19, %v1137_v27  ;;  %v1945_v39 = vpop.f32.mrb[74].mxu1  ;;  %v1139_v41 = vpop.f32.mrb[3].mxu0 }
 0x1a8   :  { %v1476_v42 = vmax.f32 %v1400_v24, 0.0  ;;  %v1403_v37 = vadd.f32 %v1945_v39, %v2844_v28  ;;  %v1394_v46 = vpop.f32.mrb[75].mxu1 }
 0x1a9   :  { %v1454_v23 = vmax.f32 %v1312_v34, 0.0  ;;  %v1474_v43 = vmax.f32 %v1392_v36, 0.0  ;;  %v1315_v55 = vadd.f32 %v1991_v38, %v2869_v12  ;;  %v1395_v45 = vadd.f32 %v1394_v46, %v2832_v17 }
 0x1aa   :  { %v1878_v48 = vpack.c.bf16 %v1476_v42, %v1476_v42  ;;  %v1477_v49 = vmax.f32 %v1403_v37, 0.0 }
 0x1ab   :  { %v1856_v8 = vpack.c.bf16 %v1454_v23, %v1454_v23  ;;  %v1876_v7 = vpack.c.bf16 %v1474_v43, %v1474_v43  ;;  %v1455_v54 = vmax.f32 %v1315_v55, 0.0  ;;  %v1475_v32 = vmax.f32 %v1395_v45, 0.0 }
 0x1ac   :  { %1657 = vst.msk [vmem:[%s3111_s3 + $0x58] sm:$0xf] %vm1634_vm1, %v1878_v48  ;;  %v1879_v14 = vpack.c.bf16 %v1477_v49, %v1477_v49  ;;  %v1142_v28 = vpop.f32.mrb[4].mxu0 }
 0x1ad   :  { %1635 = vst.msk [vmem:[%s3111_s3] sm:$0xf] %vm1634_vm1, %v1856_v8  ;;  %1655 = vst.msk [vmem:[%s3111_s3 + $0x50] sm:$0xf] %vm1634_vm1, %v1876_v7  ;;  %v1857_v17 = vpack.c.bf16 %v1455_v54, %v1455_v54  ;;  %v1877_v12 = vpack.c.bf16 %v1475_v32, %v1475_v32  ;;  %v1992_v29 = vadd.f32 %v2769_v19, %v1142_v28  ;;  %v1948_v58 = vpop.f32.mrb[76].mxu1  ;;  %v1144_v61 = vpop.f32.mrb[5].mxu0 }
 0x1ae   :  { %1658 = vst.msk [vmem:[%s3111_s3 + $0x5c] sm:$0xf] %vm1634_vm1, %v1879_v14  ;;  %v1416_v22 = vadd.f32 %v1948_v58, %v2867_v47  ;;  %v1407_v63 = vpop.f32.mrb[77].mxu1  ;;  %v1145_v16 = vpop.f32.mrb[6].mxu0 }
 0x1af   :  { %1636 = vst.msk [vmem:[%s3111_s3 + $0x4] sm:$0xf] %vm1634_vm1, %v1857_v17  ;;  %1656 = vst.msk [vmem:[%s3111_s3 + $0x54] sm:$0xf] %vm1634_vm1, %v1877_v12  ;;  %v1320_v3 = vadd.f32 %v1992_v29, %v2859_v5  ;;  %v1408_v31 = vadd.f32 %v1407_v63, %v2853_v35  ;;  %v1993_v6 = vadd.f32 %v2769_v19, %v1145_v16  ;;  %v1949_v9 = vpop.f32.mrb[78].mxu1  ;;  %v1147_v47 = vpop.f32.mrb[7].mxu0 }
 0x1b0   :  { %v1480_v2 = vmax.f32 %v1416_v22, 0.0  ;;  %v1419_v10 = vadd.f32 %v1949_v9, %v2872_v52  ;;  %v1410_v51 = vpop.f32.mrb[79].mxu1 }
 0x1b1   :  { %v1456_v0 = vmax.f32 %v1320_v3, 0.0  ;;  %v1478_v4 = vmax.f32 %v1408_v31, 0.0  ;;  %v1323_v18 = vadd.f32 %v1993_v6, %v2864_v11  ;;  %v1411_v60 = vadd.f32 %v1410_v51, %v2856_v40 }
 0x1b2   :  { %v1882_v13 = vpack.c.bf16 %v1480_v2, %v1480_v2  ;;  %v1481_v24 = vmax.f32 %v1419_v10, 0.0 }
 0x1b3   :  { %v1858_v26 = vpack.c.bf16 %v1456_v0, %v1456_v0  ;;  %v1880_v5 = vpack.c.bf16 %v1478_v4, %v1478_v4  ;;  %v1457_v27 = vmax.f32 %v1323_v18, 0.0  ;;  %v1479_v35 = vmax.f32 %v1411_v60, 0.0 }
 0x1b4   :  { %1661 = vst.msk [vmem:[%s3111_s3 + $0x68] sm:$0xf] %vm1634_vm1, %v1882_v13  ;;  %v1883_v34 = vpack.c.bf16 %v1481_v24, %v1481_v24  ;;  %v1150_v52 = vpop.f32.mrb[8].mxu0 }
 0x1b5   :  { %1637 = vst.msk [vmem:[%s3111_s3 + $0x8] sm:$0xf] %vm1634_vm1, %v1858_v26  ;;  %1659 = vst.msk [vmem:[%s3111_s3 + $0x60] sm:$0xf] %vm1634_vm1, %v1880_v5  ;;  %v1859_v40 = vpack.c.bf16 %v1457_v27, %v1457_v27  ;;  %v1881_v11 = vpack.c.bf16 %v1479_v35, %v1479_v35  ;;  %v1994_v36 = vadd.f32 %v2769_v19, %v1150_v52  ;;  %v1952_v38 = vpop.f32.mrb[80].mxu1  ;;  %v1152_v39 = vpop.f32.mrb[9].mxu0 }
 0x1b6   :  { %1662 = vst.msk [vmem:[%s3111_s3 + $0x6c] sm:$0xf] %vm1634_vm1, %v1883_v34  ;;  %v1432_v41 = vadd.f32 %v1952_v38, %v2896_v50  ;;  %v1423_v42 = vpop.f32.mrb[81].mxu1  ;;  %v1153_v37 = vpop.f32.mrb[10].mxu0 }
 0x1b7   :  { %1638 = vst.msk [vmem:[%s3111_s3 + $0xc] sm:$0xf] %vm1634_vm1, %v1859_v40  ;;  %1660 = vst.msk [vmem:[%s3111_s3 + $0x64] sm:$0xf] %vm1634_vm1, %v1881_v11  ;;  %v1328_v46 = vadd.f32 %v1994_v36, %v2877_v25  ;;  %v1424_v23 = vadd.f32 %v1423_v42, %v2883_v59  ;;  %v1995_v43 = vadd.f32 %v2769_v19, %v1153_v37  ;;  %v1953_v55 = vpop.f32.mrb[82].mxu1  ;;  %v1155_v50 = vpop.f32.mrb[11].mxu0 }
 0x1b8   :  { %v1484_v45 = vmax.f32 %v1432_v41, 0.0  ;;  %v1435_v48 = vadd.f32 %v1953_v55, %v2902_v57  ;;  %v1426_v49 = vpop.f32.mrb[83].mxu1 }
 0x1b9   :  { %v1458_v8 = vmax.f32 %v1328_v46, 0.0  ;;  %v1482_v7 = vmax.f32 %v1424_v23, 0.0  ;;  %v1331_v54 = vadd.f32 %v1995_v43, %v2885_v33  ;;  %v1427_v32 = vadd.f32 %v1426_v49, %v2888_v1 }
 0x1ba   :  { %v1886_v14 = vpack.c.bf16 %v1484_v45, %v1484_v45  ;;  %v1485_v28 = vmax.f32 %v1435_v48, 0.0 }
 0x1bb   :  { %v1860_v17 = vpack.c.bf16 %v1458_v8, %v1458_v8  ;;  %v1884_v25 = vpack.c.bf16 %v1482_v7, %v1482_v7  ;;  %v1459_v12 = vmax.f32 %v1331_v54, 0.0  ;;  %v1483_v59 = vmax.f32 %v1427_v32, 0.0 }
 0x1bc   :  { %1665 = vst.msk [vmem:[%s3111_s3 + $0x78] sm:$0xf] %vm1634_vm1, %v1886_v14  ;;  %v1887_v29 = vpack.c.bf16 %v1485_v28, %v1485_v28  ;;  %v1158_v57 = vpop.f32.mrb[12].mxu0 }
 0x1bd   :  { %1639 = vst.msk [vmem:[%s3111_s3 + $0x10] sm:$0xf] %vm1634_vm1, %v1860_v17  ;;  %1663 = vst.msk [vmem:[%s3111_s3 + $0x70] sm:$0xf] %vm1634_vm1, %v1884_v25  ;;  %v1861_v33 = vpack.c.bf16 %v1459_v12, %v1459_v12  ;;  %v1885_v1 = vpack.c.bf16 %v1483_v59, %v1483_v59  ;;  %v1996_v58 = vadd.f32 %v2769_v19, %v1158_v57  ;;  %v1956_v61 = vpop.f32.mrb[84].mxu1  ;;  %v1160_v22 = vpop.f32.mrb[13].mxu0 }
 0x1be   :  { %1666 = vst.msk [vmem:[%s3111_s3 + $0x7c] sm:$0xf] %vm1634_vm1, %v1887_v29  ;;  %v1448_v63 = vadd.f32 %v1956_v61, %v2945_v62  ;;  %v1439_v16 = vpop.f32.mrb[85].mxu1  ;;  %v1161_v3 = vpop.f32.mrb[14].mxu0 }
 0x1bf   :  { %1640 = vst.msk [vmem:[%s3111_s3 + $0x14] sm:$0xf] %vm1634_vm1, %v1861_v33  ;;  %1664 = vst.msk [vmem:[%s3111_s3 + $0x74] sm:$0xf] %vm1634_vm1, %v1885_v1  ;;  %v1336_v31 = vadd.f32 %v1996_v58, %v2875_v21  ;;  %v1440_v6 = vadd.f32 %v1439_v16, %v2917_v20  ;;  %v1997_v9 = vadd.f32 %v2769_v19, %v1161_v3  ;;  %v1957_v47 = vpop.f32.mrb[86].mxu1  ;;  %v1163_v62 = vpop.f32.mrb[15].mxu0 }
 0x1c0   :  { %v1488_v2 = vmax.f32 %v1448_v63, 0.0  ;;  %v1451_v10 = vadd.f32 %v1957_v47, %v2950_v30  ;;  %v1442_v51 = vpop.f32.mrb[87].mxu1 }
 0x1c1   :  { %v1460_v0 = vmax.f32 %v1336_v31, 0.0  ;;  %v1486_v4 = vmax.f32 %v1440_v6, 0.0  ;;  %v1339_v18 = vadd.f32 %v1997_v9, %v2880_v15  ;;  %v1443_v60 = vadd.f32 %v1442_v51, %v2922_v53 }
 0x1c2   :  { %v1890_v13 = vpack.c.bf16 %v1488_v2, %v1488_v2  ;;  %v1489_v24 = vmax.f32 %v1451_v10, 0.0 }
 0x1c3   :  { %v1862_v26 = vpack.c.bf16 %v1460_v0, %v1460_v0  ;;  %v1888_v21 = vpack.c.bf16 %v1486_v4, %v1486_v4  ;;  %v1461_v5 = vmax.f32 %v1339_v18, 0.0  ;;  %v1487_v20 = vmax.f32 %v1443_v60, 0.0 }
 0x1c4   :  { %1669 = vst.msk [vmem:[%s3111_s3 + $0x88] sm:$0xf] %vm1634_vm1, %v1890_v13  ;;  %v1891_v27 = vpack.c.bf16 %v1489_v24, %v1489_v24  ;;  %v1166_v30 = vpop.f32.mrb[16].mxu0 }
 0x1c5   :  { %1641 = vst.msk [vmem:[%s3111_s3 + $0x18] sm:$0xf] %vm1634_vm1, %v1862_v26  ;;  %1667 = vst.msk [vmem:[%s3111_s3 + $0x80] sm:$0xf] %vm1634_vm1, %v1888_v21  ;;  %v1863_v15 = vpack.c.bf16 %v1461_v5, %v1461_v5  ;;  %v1889_v53 = vpack.c.bf16 %v1487_v20, %v1487_v20  ;;  %v1998_v35 = vadd.f32 %v2769_v19, %v1166_v30  ;;  %v1168_v34 = vpop.f32.mrb[17].mxu0 }
 0x1c6   :  { %1670 = vst.msk [vmem:[%s3111_s3 + $0x8c] sm:$0xf] %vm1634_vm1, %v1891_v27  ;;  %v1169_v52 = vpop.f32.mrb[18].mxu0 }
 0x1c7   :  { %1642 = vst.msk [vmem:[%s3111_s3 + $0x1c] sm:$0xf] %vm1634_vm1, %v1863_v15  ;;  %1668 = vst.msk [vmem:[%s3111_s3 + $0x84] sm:$0xf] %vm1634_vm1, %v1889_v53  ;;  %v1344_v40 = vadd.f32 %v1998_v35, %v2892_v44  ;;  %v1999_v11 = vadd.f32 %v2769_v19, %v1169_v52  ;;  %v1171_v36 = vpop.f32.mrb[19].mxu0 }
 0x1c9   :  { %v1462_v38 = vmax.f32 %v1344_v40, 0.0  ;;  %v1347_v39 = vadd.f32 %v1999_v11, %v2899_v56 }
 0x1cb   :  { %v1864_v41 = vpack.c.bf16 %v1462_v38, %v1462_v38  ;;  %v1463_v42 = vmax.f32 %v1347_v39, 0.0 }
 0x1cd   :  { %1643 = vst.msk [vmem:[%s3111_s3 + $0x20] sm:$0xf] %vm1634_vm1, %v1864_v41  ;;  %v1865_v37 = vpack.c.bf16 %v1463_v42, %v1463_v42 }
 0x1cf   :  { %1644 = vst.msk [vmem:[%s3111_s3 + $0x24] sm:$0xf] %vm1634_vm1, %v1865_v37 }

// kernel: dqn_forward.7
= control target key start
LH: loop header
LB: loop body
LE: loop exit
PB: predicated region body
PF: predicated region fallthrough
CT: control target
= control target key end

     0   :  { %s16298_s1 = inlined_call_operand.vmem [shape: bf16[9216,256], index: 1, kind: input, shape index: {}]   ;;  %s16299_s0 = inlined_call_operand.vmem [shape: bf16[16,9216], index: 0, kind: input, shape index: {}]   ;;  %s16300_s3 = inlined_call_operand.vmem [shape: bf16[256,128], index: 3, kind: input, shape index: {}]   ;;  %s16301_s2 = inlined_call_operand.vmem [shape: f32[1,256], index: 2, kind: input, shape index: {}]   ;;  %s16302_s4 = inlined_call_operand.vmem [shape: f32[1,128], index: 4, kind: input, shape index: {}]   ;;  %s16303_s5 = inlined_call_operand.vmem [shape: f32[16,128], index: 5, kind: output, shape index: {}]  }
   0x1   :  { %v10520_v0 = vld [vmem:[%s16298_s1 + $0x4] ss:$8 sps:$4 sm:$0xff]   ;;  %v10524_v2 = vld [vmem:[%s16298_s1] ss:$8 sps:$4 sm:$0xff]   ;;  %v10526_v4 = vld [vmem:[%s16298_s1 + $0x14] ss:$8 sps:$4 sm:$0xff]  }
   0x2   :  { %v10522_v1 = vld [vmem:[%s16298_s1 + $0x1204] ss:$8 sps:$4 sm:$0xff]   ;;  %7377 = vmatprep.subr.bf16.mxu1 %v10520_v0  ;;  %v10525_v3 = vld [vmem:[%s16298_s1 + $0x1200] ss:$8 sps:$4 sm:$0xff]   ;;  %v10528_v5 = vld [vmem:[%s16298_s1 + $0x1214] ss:$8 sps:$4 sm:$0xff]  }
   0x3   :  { %8151 = vmatprep.subr.bf16.mxu0 %v10522_v1  ;;  %7378 = vmatpush1.bf16.msra.mxu1 %v10524_v2  ;;  %v10530_v6 = vld [vmem:[%s16298_s1 + $0x10] ss:$8 sps:$4 sm:$0xff]   ;;  %v10532_v8 = vld [vmem:[%s16298_s1 + $0x24] ss:$8 sps:$4 sm:$0xff]   ;;  %v10536_v10 = vld [vmem:[%s16298_s1 + $0x20] ss:$8 sps:$4 sm:$0xff]  }
   0x4   :  { %8152 = vmatpush1.bf16.msra.mxu0 %v10525_v3  ;;  %7379 = vmatprep.subr.bf16.mxu1 %v10526_v4  ;;  %v10531_v7 = vld [vmem:[%s16298_s1 + $0x1210] ss:$8 sps:$4 sm:$0xff]   ;;  %v10534_v9 = vld [vmem:[%s16298_s1 + $0x1224] ss:$8 sps:$4 sm:$0xff]   ;;  %v10537_v11 = vld [vmem:[%s16298_s1 + $0x1220] ss:$8 sps:$4 sm:$0xff]  }
   0x5   :  { %8153 = vmatprep.subr.bf16.mxu0 %v10528_v5  ;;  %v10538_v12 = vld [vmem:[%s16298_s1 + $0x34] ss:$8 sps:$4 sm:$0xff]   ;;  %v10542_v14 = vld [vmem:[%s16298_s1 + $0x30] ss:$8 sps:$4 sm:$0xff]   ;;  %v10544_v16 = vld [vmem:[%s16298_s1 + $0x44] ss:$8 sps:$4 sm:$0xff]  }
   0x6   :  { %v10540_v13 = vld [vmem:[%s16298_s1 + $0x1234] ss:$8 sps:$4 sm:$0xff]   ;;  %v10543_v15 = vld [vmem:[%s16298_s1 + $0x1230] ss:$8 sps:$4 sm:$0xff]   ;;  %v10546_v17 = vld [vmem:[%s16298_s1 + $0x1244] ss:$8 sps:$4 sm:$0xff]  }
   0x7   :  { %7380 = vmatpush1.bf16.msra.mxu1 %v10530_v6  ;;  %v10548_v18 = vld [vmem:[%s16298_s1 + $0x40] ss:$8 sps:$4 sm:$0xff]   ;;  %v10550_v20 = vld [vmem:[%s16298_s1 + $0x54] ss:$8 sps:$4 sm:$0xff]   ;;  %v10554_v22 = vld [vmem:[%s16298_s1 + $0x50] ss:$8 sps:$4 sm:$0xff]  }
   0x8   :  { %8154 = vmatpush1.bf16.msra.mxu0 %v10531_v7  ;;  %7381 = vmatprep.subr.bf16.mxu1 %v10532_v8  ;;  %v10549_v19 = vld [vmem:[%s16298_s1 + $0x1240] ss:$8 sps:$4 sm:$0xff]   ;;  %v10552_v21 = vld [vmem:[%s16298_s1 + $0x1254] ss:$8 sps:$4 sm:$0xff]   ;;  %v10555_v23 = vld [vmem:[%s16298_s1 + $0x1250] ss:$8 sps:$4 sm:$0xff]  }
   0x9   :  { %8155 = vmatprep.subr.bf16.mxu0 %v10534_v9  ;;  %v10556_v24 = vld [vmem:[%s16298_s1 + $0x64] ss:$8 sps:$4 sm:$0xff]   ;;  %v10560_v26 = vld [vmem:[%s16298_s1 + $0x60] ss:$8 sps:$4 sm:$0xff]   ;;  %v10562_v28 = vld [vmem:[%s16298_s1 + $0x74] ss:$8 sps:$4 sm:$0xff]  }
   0xa   :  { %v10558_v25 = vld [vmem:[%s16298_s1 + $0x1264] ss:$8 sps:$4 sm:$0xff]   ;;  %v10561_v27 = vld [vmem:[%s16298_s1 + $0x1260] ss:$8 sps:$4 sm:$0xff]   ;;  %v10564_v29 = vld [vmem:[%s16298_s1 + $0x1274] ss:$8 sps:$4 sm:$0xff]  }
   0xb   :  { %7382 = vmatpush1.bf16.msra.mxu1 %v10536_v10  ;;  %v10566_v30 = vld [vmem:[%s16298_s1 + $0x70] ss:$8 sps:$4 sm:$0xff]   ;;  %v10568_v32 = vld [vmem:[%s16298_s1 + $0x84] ss:$8 sps:$4 sm:$0xff]   ;;  %v10572_v34 = vld [vmem:[%s16298_s1 + $0x80] ss:$8 sps:$4 sm:$0xff]  }
   0xc   :  { %8156 = vmatpush1.bf16.msra.mxu0 %v10537_v11  ;;  %7383 = vmatprep.subr.bf16.mxu1 %v10538_v12  ;;  %v10567_v31 = vld [vmem:[%s16298_s1 + $0x1270] ss:$8 sps:$4 sm:$0xff]   ;;  %v10570_v33 = vld [vmem:[%s16298_s1 + $0x1284] ss:$8 sps:$4 sm:$0xff]   ;;  %v10573_v35 = vld [vmem:[%s16298_s1 + $0x1280] ss:$8 sps:$4 sm:$0xff]  }
   0xd   :  { %8157 = vmatprep.subr.bf16.mxu0 %v10540_v13  ;;  %v10574_v36 = vld [vmem:[%s16298_s1 + $0x94] ss:$8 sps:$4 sm:$0xff]   ;;  %v10578_v38 = vld [vmem:[%s16298_s1 + $0x90] ss:$8 sps:$4 sm:$0xff]   ;;  %v10580_v40 = vld [vmem:[%s16298_s1 + $0xa4] ss:$8 sps:$4 sm:$0xff]  }
   0xe   :  { %v10576_v37 = vld [vmem:[%s16298_s1 + $0x1294] ss:$8 sps:$4 sm:$0xff]   ;;  %v10579_v39 = vld [vmem:[%s16298_s1 + $0x1290] ss:$8 sps:$4 sm:$0xff]   ;;  %v10582_v41 = vld [vmem:[%s16298_s1 + $0x12a4] ss:$8 sps:$4 sm:$0xff]  }
   0xf   :  { %7384 = vmatpush1.bf16.msra.mxu1 %v10542_v14  ;;  %v10584_v42 = vld [vmem:[%s16298_s1 + $0xa0] ss:$8 sps:$4 sm:$0xff]   ;;  %v10586_v44 = vld [vmem:[%s16298_s1 + $0xb4] ss:$8 sps:$4 sm:$0xff]   ;;  %v10590_v46 = vld [vmem:[%s16298_s1 + $0xb0] ss:$8 sps:$4 sm:$0xff]  }
  0x10   :  { %8158 = vmatpush1.bf16.msra.mxu0 %v10543_v15  ;;  %7385 = vmatprep.subr.bf16.mxu1 %v10544_v16  ;;  %v10585_v43 = vld [vmem:[%s16298_s1 + $0x12a0] ss:$8 sps:$4 sm:$0xff]   ;;  %v10588_v45 = vld [vmem:[%s16298_s1 + $0x12b4] ss:$8 sps:$4 sm:$0xff]   ;;  %v10591_v47 = vld [vmem:[%s16298_s1 + $0x12b0] ss:$8 sps:$4 sm:$0xff]  }
  0x11   :  { %8159 = vmatprep.subr.bf16.mxu0 %v10546_v17  ;;  %v21_v48 = vld [vmem:[%s16299_s0] sm:$0xff]  ;;  %v39_v53 = vld [vmem:[%s16299_s0 + $0x90] sm:$0xff] }
  0x12   :  { %v57_v49 = vld [vmem:[%s16299_s0 + $0x120] sm:$0xff]  ;;  %v75_v54 = vld [vmem:[%s16299_s0 + $0x1b0] sm:$0xff] }
  0x13   :  { %7386 = vmatpush1.bf16.msra.mxu1 %v10548_v18  ;;  %v10592_v50 = vld [vmem:[%s16298_s1 + $0xc4] ss:$8 sps:$4 sm:$0xff]   ;;  %v9114_v52 = vcombine.high %v21_v48, %v57_v49  ;;  %v9150_v55 = vcombine.high %v39_v53, %v75_v54  ;;  %v10596_v56 = vld [vmem:[%s16298_s1 + $0xc0] ss:$8 sps:$4 sm:$0xff]   ;;  %v10598_v58 = vld [vmem:[%s16298_s1 + $0xd4] ss:$8 sps:$4 sm:$0xff]   ;;  %v9113_v8 = vcombine.low %v21_v48, %v57_v49  ;;  %v9149_v10 = vcombine.low %v39_v53, %v75_v54 }
  0x14   :  { %8160 = vmatpush1.bf16.msra.mxu0 %v10549_v19  ;;  %7387 = vmatprep.subr.bf16.mxu1 %v10550_v20  ;;  %v10594_v51 = vld [vmem:[%s16298_s1 + $0x12c4] ss:$8 sps:$4 sm:$0xff]   ;;  %v10597_v57 = vld [vmem:[%s16298_s1 + $0x12c0] ss:$8 sps:$4 sm:$0xff]   ;;  %v10600_v59 = vld [vmem:[%s16298_s1 + $0x12d4] ss:$8 sps:$4 sm:$0xff]  }
  0x15   :  { %8161 = vmatprep.subr.bf16.mxu0 %v10552_v21  ;;  %7409 = vmatprep.mubr.bf16.mxu1 %v9114_v52  ;;  %v10602_v60 = vld [vmem:[%s16298_s1 + $0xd0] ss:$8 sps:$4 sm:$0xff]   ;;  %v10604_v62 = vld [vmem:[%s16298_s1 + $0xe4] ss:$8 sps:$4 sm:$0xff]   ;;  %v10608_v0 = vld [vmem:[%s16298_s1 + $0xe0] ss:$8 sps:$4 sm:$0xff]  }
  0x16   :  { %8183 = vmatprep.mubr.bf16.mxu0 %v9150_v55  ;;  %v10603_v61 = vld [vmem:[%s16298_s1 + $0x12d0] ss:$8 sps:$4 sm:$0xff]   ;;  %v10606_v63 = vld [vmem:[%s16298_s1 + $0x12e4] ss:$8 sps:$4 sm:$0xff]   ;;  %v10609_v1 = vld [vmem:[%s16298_s1 + $0x12e0] ss:$8 sps:$4 sm:$0xff]  }
  0x17   :  { %7388 = vmatpush1.bf16.msra.mxu1 %v10554_v22  ;;  %v10610_v2 = vld [vmem:[%s16298_s1 + $0xf4] ss:$8 sps:$4 sm:$0xff]   ;;  %v10614_v4 = vld [vmem:[%s16298_s1 + $0xf0] ss:$8 sps:$4 sm:$0xff]   ;;  %v10618_v6 = vld [vmem:[%s16298_s1 + $0x104] ss:$8 sps:$4 sm:$0xff]  }
  0x18   :  { %8162 = vmatpush1.bf16.msra.mxu0 %v10555_v23  ;;  %7389 = vmatprep.subr.bf16.mxu1 %v10556_v24  ;;  %v10612_v3 = vld [vmem:[%s16298_s1 + $0x12f4] ss:$8 sps:$4 sm:$0xff]   ;;  %v10615_v5 = vld [vmem:[%s16298_s1 + $0x12f0] ss:$8 sps:$4 sm:$0xff]   ;;  %v10621_v7 = vld [vmem:[%s16298_s1 + $0x1304] ss:$8 sps:$4 sm:$0xff]  }
  0x19   :  { %8163 = vmatprep.subr.bf16.mxu0 %v10558_v25  ;;  %v10616_v9 = vld [vmem:[%s16298_s1 + $0x100] ss:$8 sps:$4 sm:$0xff]   ;;  %v10624_v12 = vld [vmem:[%s16298_s1 + $0x114] ss:$8 sps:$4 sm:$0xff]   ;;  %v10622_v14 = vld [vmem:[%s16298_s1 + $0x110] ss:$8 sps:$4 sm:$0xff]  }
  0x1a   :  { %v10619_v11 = vld [vmem:[%s16298_s1 + $0x1300] ss:$8 sps:$4 sm:$0xff]   ;;  %v10627_v13 = vld [vmem:[%s16298_s1 + $0x1314] ss:$8 sps:$4 sm:$0xff]   ;;  %v10625_v15 = vld [vmem:[%s16298_s1 + $0x1310] ss:$8 sps:$4 sm:$0xff]  }
  0x1b   :  { %7390 = vmatpush1.bf16.msra.mxu1 %v10560_v26  ;;  %v10630_v16 = vld [vmem:[%s16298_s1 + $0x124] ss:$8 sps:$4 sm:$0xff]   ;;  %v10628_v18 = vld [vmem:[%s16298_s1 + $0x120] ss:$8 sps:$4 sm:$0xff]   ;;  %v10636_v20 = vld [vmem:[%s16298_s1 + $0x134] ss:$8 sps:$4 sm:$0xff]  }
  0x1c   :  { %8164 = vmatpush1.bf16.msra.mxu0 %v10561_v27  ;;  %7391 = vmatprep.subr.bf16.mxu1 %v10562_v28  ;;  %v10633_v17 = vld [vmem:[%s16298_s1 + $0x1324] ss:$8 sps:$4 sm:$0xff]   ;;  %v10631_v19 = vld [vmem:[%s16298_s1 + $0x1320] ss:$8 sps:$4 sm:$0xff]   ;;  %v10639_v21 = vld [vmem:[%s16298_s1 + $0x1334] ss:$8 sps:$4 sm:$0xff]  }
  0x1d   :  { %8165 = vmatprep.subr.bf16.mxu0 %v10564_v29  ;;  %v10634_v22 = vld [vmem:[%s16298_s1 + $0x130] ss:$8 sps:$4 sm:$0xff]   ;;  %v10642_v24 = vld [vmem:[%s16298_s1 + $0x144] ss:$8 sps:$4 sm:$0xff]   ;;  %v10640_v26 = vld [vmem:[%s16298_s1 + $0x140] ss:$8 sps:$4 sm:$0xff]  }
  0x1e   :  { %v10637_v23 = vld [vmem:[%s16298_s1 + $0x1330] ss:$8 sps:$4 sm:$0xff]   ;;  %v10645_v25 = vld [vmem:[%s16298_s1 + $0x1344] ss:$8 sps:$4 sm:$0xff]   ;;  %v10643_v27 = vld [vmem:[%s16298_s1 + $0x1340] ss:$8 sps:$4 sm:$0xff]  }
  0x1f   :  { %7392 = vmatpush1.bf16.msra.mxu1 %v10566_v30  ;;  %v10648_v28 = vld [vmem:[%s16298_s1 + $0x154] ss:$8 sps:$4 sm:$0xff]   ;;  %v10646_v30 = vld [vmem:[%s16298_s1 + $0x150] ss:$8 sps:$4 sm:$0xff]   ;;  %v10664_v48 = vld [vmem:[%s16298_s1 + $0x180] ss:$8 sps:$4 sm:$0xff]  }
  0x20   :  { %8166 = vmatpush1.bf16.msra.mxu0 %v10567_v31  ;;  %7393 = vmatprep.subr.bf16.mxu1 %v10568_v32  ;;  %v10651_v29 = vld [vmem:[%s16298_s1 + $0x1354] ss:$8 sps:$4 sm:$0xff]   ;;  %v10649_v31 = vld [vmem:[%s16298_s1 + $0x1350] ss:$8 sps:$4 sm:$0xff]   ;;  %v10654_v32 = vld [vmem:[%s16298_s1 + $0x164] ss:$8 sps:$4 sm:$0xff]  }
  0x21   :  { %8167 = vmatprep.subr.bf16.mxu0 %v10570_v33  ;;  %v10657_v33 = vld [vmem:[%s16298_s1 + $0x1364] ss:$8 sps:$4 sm:$0xff]   ;;  %v10667_v49 = vld [vmem:[%s16298_s1 + $0x1380] ss:$8 sps:$4 sm:$0xff]   ;;  %v10670_v52 = vld [vmem:[%s16298_s1 + $0x190] ss:$8 sps:$4 sm:$0xff]  }
  0x22   :  { %v10673_v53 = vld [vmem:[%s16298_s1 + $0x1390] ss:$8 sps:$4 sm:$0xff]   ;;  %v10678_v54 = vld [vmem:[%s16298_s1 + $0x1a4] ss:$8 sps:$4 sm:$0xff]  }
  0x23   :  { %7394 = vmatpush1.bf16.msra.mxu1 %v10572_v34  ;;  %v10652_v34 = vld [vmem:[%s16298_s1 + $0x160] ss:$8 sps:$4 sm:$0xff]   ;;  %v10681_v55 = vld [vmem:[%s16298_s1 + $0x13a4] ss:$8 sps:$4 sm:$0xff]  }
  0x24   :  { %8168 = vmatpush1.bf16.msra.mxu0 %v10573_v35  ;;  %7395 = vmatprep.subr.bf16.mxu1 %v10574_v36  ;;  %v10655_v35 = vld [vmem:[%s16298_s1 + $0x1360] ss:$8 sps:$4 sm:$0xff]  }
  0x25   :  { %8169 = vmatprep.subr.bf16.mxu0 %v10576_v37  ;;  %v12585_v36 = vld [vmem:[%s16299_s0 + $0x8] sm:$0xff] }
  0x26   :  { %v12590_v37 = vld [vmem:[%s16299_s0 + $0x128] sm:$0xff] }
  0x27   :  { %7396 = vmatpush1.bf16.msra.mxu1 %v10578_v38  ;;  %v10660_v38 = vld [vmem:[%s16298_s1 + $0x174] ss:$8 sps:$4 sm:$0xff]  }
  0x28   :  { %8170 = vmatpush1.bf16.msra.mxu0 %v10579_v39  ;;  %7397 = vmatprep.subr.bf16.mxu1 %v10580_v40  ;;  %v10663_v39 = vld [vmem:[%s16298_s1 + $0x1374] ss:$8 sps:$4 sm:$0xff]   ;;  %v9116_v40 = vcombine.high %v12585_v36, %v12590_v37 }
  0x29   :  { %8171 = vmatprep.subr.bf16.mxu0 %v10582_v41  ;;  %v12603_v41 = vld [vmem:[%s16299_s0 + $0x98] sm:$0xff] }
  0x2b   :  { %7398 = vmatpush1.bf16.msra.mxu1 %v10584_v42  ;;  %v12608_v42 = vld [vmem:[%s16299_s0 + $0x1b8] sm:$0xff] }
  0x2c   :  { %8172 = vmatpush1.bf16.msra.mxu0 %v10585_v43  ;;  %7399 = vmatprep.subr.bf16.mxu1 %v10586_v44  ;;  %v9152_v43 = vcombine.high %v12603_v41, %v12608_v42  ;;  %v10658_v44 = vld [vmem:[%s16298_s1 + $0x170] ss:$8 sps:$4 sm:$0xff]  }
  0x2d   :  { %8173 = vmatprep.subr.bf16.mxu0 %v10588_v45  ;;  %v10661_v45 = vld [vmem:[%s16298_s1 + $0x1370] ss:$8 sps:$4 sm:$0xff]  }
  0x2f   :  { %7400 = vmatpush1.bf16.msra.mxu1 %v10590_v46  ;;  %v10666_v46 = vld [vmem:[%s16298_s1 + $0x184] ss:$8 sps:$4 sm:$0xff]  }
  0x30   :  { %8174 = vmatpush1.bf16.msra.mxu0 %v10591_v47  ;;  %7401 = vmatprep.subr.bf16.mxu1 %v10592_v50  ;;  %v10669_v47 = vld [vmem:[%s16298_s1 + $0x1384] ss:$8 sps:$4 sm:$0xff]   ;;  %v10672_v50 = vld [vmem:[%s16298_s1 + $0x194] ss:$8 sps:$4 sm:$0xff]  }
  0x31   :  { %8175 = vmatprep.subr.bf16.mxu0 %v10594_v51  ;;  %v10675_v51 = vld [vmem:[%s16298_s1 + $0x1394] ss:$8 sps:$4 sm:$0xff]  }
  0x33   :  { %7402 = vmatpush1.bf16.msra.mxu1 %v10596_v56  ;;  %v10676_v56 = vld [vmem:[%s16298_s1 + $0x1a0] ss:$8 sps:$4 sm:$0xff]  }
  0x34   :  { %8176 = vmatpush1.bf16.msra.mxu0 %v10597_v57  ;;  %7403 = vmatprep.subr.bf16.mxu1 %v10598_v58  ;;  %v10679_v57 = vld [vmem:[%s16298_s1 + $0x13a0] ss:$8 sps:$4 sm:$0xff]   ;;  %v10684_v58 = vld [vmem:[%s16298_s1 + $0x1b4] ss:$8 sps:$4 sm:$0xff]  }
  0x35   :  { %8177 = vmatprep.subr.bf16.mxu0 %v10600_v59  ;;  %v10687_v59 = vld [vmem:[%s16298_s1 + $0x13b4] ss:$8 sps:$4 sm:$0xff]  }
  0x37   :  { %7404 = vmatpush1.bf16.msra.mxu1 %v10602_v60  ;;  %v10682_v60 = vld [vmem:[%s16298_s1 + $0x1b0] ss:$8 sps:$4 sm:$0xff]  }
  0x38   :  { %8178 = vmatpush1.bf16.msra.mxu0 %v10603_v61  ;;  %7405 = vmatprep.subr.bf16.mxu1 %v10604_v62  ;;  %v10685_v61 = vld [vmem:[%s16298_s1 + $0x13b0] ss:$8 sps:$4 sm:$0xff]   ;;  %v10690_v62 = vld [vmem:[%s16298_s1 + $0x1c4] ss:$8 sps:$4 sm:$0xff]  }
  0x39   :  { %8179 = vmatprep.subr.bf16.mxu0 %v10606_v63  ;;  %v10693_v63 = vld [vmem:[%s16298_s1 + $0x13c4] ss:$8 sps:$4 sm:$0xff]  }
  0x3b   :  { %7406 = vmatpush1.bf16.msra.mxu1 %v10608_v0  ;;  %v10688_v0 = vld [vmem:[%s16298_s1 + $0x1c0] ss:$8 sps:$4 sm:$0xff]  }
  0x3c   :  { %8180 = vmatpush1.bf16.msra.mxu0 %v10609_v1  ;;  %7407 = vmatprep.subr.bf16.mxu1 %v10610_v2  ;;  %v10691_v1 = vld [vmem:[%s16298_s1 + $0x13c0] ss:$8 sps:$4 sm:$0xff]   ;;  %v10696_v2 = vld [vmem:[%s16298_s1 + $0x1d4] ss:$8 sps:$4 sm:$0xff]  }
  0x3d   :  { %8181 = vmatprep.subr.bf16.mxu0 %v10612_v3  ;;  %v10699_v3 = vld [vmem:[%s16298_s1 + $0x13d4] ss:$8 sps:$4 sm:$0xff]  }
  0x3f   :  { %7408 = vmatpush1.bf16.msra.mxu1 %v10614_v4  ;;  %v10694_v4 = vld [vmem:[%s16298_s1 + $0x1d0] ss:$8 sps:$4 sm:$0xff]  }
  0x40   :  { %8182 = vmatpush1.bf16.msra.mxu0 %v10615_v5  ;;  %7420 = vmatprep.subr.bf16.mxu1 %v10618_v6  ;;  %v10697_v5 = vld [vmem:[%s16298_s1 + $0x13d0] ss:$8 sps:$4 sm:$0xff]   ;;  %v10702_v6 = vld [vmem:[%s16298_s1 + $0x1e4] ss:$8 sps:$4 sm:$0xff]  }
  0x41   :  { %8194 = vmatprep.subr.bf16.mxu0 %v10621_v7  ;;  %v10705_v7 = vld [vmem:[%s16298_s1 + $0x13e4] ss:$8 sps:$4 sm:$0xff]  }
  0x42   :  { %7410 = vmatmul.mubr.bf16.vlgmr.msra.gmra.mrb[0].mxu1 %v9113_v8  ;;  %v10700_v8 = vld [vmem:[%s16298_s1 + $0x1e0] ss:$8 sps:$4 sm:$0xff]  }
  0x43   :  { %8184 = vmatmul.mubr.bf16.vlgmr.msra.gmra.mrb[0].mxu0 %v9149_v10  ;;  %7421 = vmatpush1.bf16.msra.mxu1 %v10616_v9  ;;  %v10703_v9 = vld [vmem:[%s16298_s1 + $0x13e0] ss:$8 sps:$4 sm:$0xff]   ;;  %v10708_v10 = vld [vmem:[%s16298_s1 + $0x1f4] ss:$8 sps:$4 sm:$0xff]  }
  0x44   :  { %8195 = vmatpush1.bf16.msra.mxu0 %v10619_v11  ;;  %7422 = vmatprep.subr.bf16.mxu1 %v10624_v12  ;;  %v10711_v11 = vld [vmem:[%s16298_s1 + $0x13f4] ss:$8 sps:$4 sm:$0xff]   ;;  %v10706_v12 = vld [vmem:[%s16298_s1 + $0x1f0] ss:$8 sps:$4 sm:$0xff]  }
  0x45   :  { %8196 = vmatprep.subr.bf16.mxu0 %v10627_v13  ;;  %7452 = vmatprep.mubr.bf16.mxu1 %v9116_v40  ;;  %v10709_v13 = vld [vmem:[%s16298_s1 + $0x13f0] ss:$8 sps:$4 sm:$0xff]   ;;  %v10736_v40 = vld [vmem:[%s16298_s1 + $0x240] ss:$8 sps:$4 sm:$0xff]  }
  0x46   :  { %8226 = vmatprep.mubr.bf16.mxu0 %v9152_v43  ;;  %v10747_v43 = vld [vmem:[%s16298_s1 + $0x1454] ss:$8 sps:$4 sm:$0xff]  }
  0x47   :  { %7423 = vmatpush1.bf16.msra.mxu1 %v10622_v14  ;;  %v10714_v14 = vld [vmem:[%s16298_s1 + $0x204] ss:$8 sps:$4 sm:$0xff]  }
  0x48   :  { %8197 = vmatpush1.bf16.msra.mxu0 %v10625_v15  ;;  %7424 = vmatprep.subr.bf16.mxu1 %v10630_v16  ;;  %v10717_v15 = vld [vmem:[%s16298_s1 + $0x1404] ss:$8 sps:$4 sm:$0xff]   ;;  %v9115_v16 = vcombine.low %v12585_v36, %v12590_v37  ;;  %v10730_v36 = vld [vmem:[%s16298_s1 + $0x230] ss:$8 sps:$4 sm:$0xff]  }
  0x49   :  { %8198 = vmatprep.subr.bf16.mxu0 %v10633_v17  ;;  %v10712_v17 = vld [vmem:[%s16298_s1 + $0x200] ss:$8 sps:$4 sm:$0xff]   ;;  %v10733_v37 = vld [vmem:[%s16298_s1 + $0x1430] ss:$8 sps:$4 sm:$0xff]  }
  0x4b   :  { %7425 = vmatpush1.bf16.msra.mxu1 %v10628_v18  ;;  %v9151_v18 = vcombine.low %v12603_v41, %v12608_v42  ;;  %v10739_v41 = vld [vmem:[%s16298_s1 + $0x1440] ss:$8 sps:$4 sm:$0xff]   ;;  %v10744_v42 = vld [vmem:[%s16298_s1 + $0x254] ss:$8 sps:$4 sm:$0xff]  }
  0x4c   :  { %8199 = vmatpush1.bf16.msra.mxu0 %v10631_v19  ;;  %7426 = vmatprep.subr.bf16.mxu1 %v10636_v20  ;;  %v10715_v19 = vld [vmem:[%s16298_s1 + $0x1400] ss:$8 sps:$4 sm:$0xff]   ;;  %v10720_v20 = vld [vmem:[%s16298_s1 + $0x214] ss:$8 sps:$4 sm:$0xff]  }
  0x4d   :  { %8200 = vmatprep.subr.bf16.mxu0 %v10639_v21  ;;  %v10723_v21 = vld [vmem:[%s16298_s1 + $0x1414] ss:$8 sps:$4 sm:$0xff]  }
  0x4f   :  { %7427 = vmatpush1.bf16.msra.mxu1 %v10634_v22  ;;  %v10718_v22 = vld [vmem:[%s16298_s1 + $0x210] ss:$8 sps:$4 sm:$0xff]  }
  0x50   :  { %8201 = vmatpush1.bf16.msra.mxu0 %v10637_v23  ;;  %7428 = vmatprep.subr.bf16.mxu1 %v10642_v24  ;;  %v10721_v23 = vld [vmem:[%s16298_s1 + $0x1410] ss:$8 sps:$4 sm:$0xff]  }
  0x51   :  { %8202 = vmatprep.subr.bf16.mxu0 %v10645_v25  ;;  %v12745_v24 = vld [vmem:[%s16299_s0 + $0x10] sm:$0xff] }
  0x52   :  { %v12750_v25 = vld [vmem:[%s16299_s0 + $0x130] sm:$0xff] }
  0x53   :  { %7429 = vmatpush1.bf16.msra.mxu1 %v10640_v26  ;;  %v10726_v26 = vld [vmem:[%s16298_s1 + $0x224] ss:$8 sps:$4 sm:$0xff]  }
  0x54   :  { %8203 = vmatpush1.bf16.msra.mxu0 %v10643_v27  ;;  %7430 = vmatprep.subr.bf16.mxu1 %v10648_v28  ;;  %v10729_v27 = vld [vmem:[%s16298_s1 + $0x1424] ss:$8 sps:$4 sm:$0xff]   ;;  %v9118_v28 = vcombine.high %v12745_v24, %v12750_v25 }
  0x55   :  { %8204 = vmatprep.subr.bf16.mxu0 %v10651_v29  ;;  %v12763_v29 = vld [vmem:[%s16299_s0 + $0xa0] sm:$0xff] }
  0x57   :  { %7431 = vmatpush1.bf16.msra.mxu1 %v10646_v30  ;;  %v12768_v30 = vld [vmem:[%s16299_s0 + $0x1c0] sm:$0xff] }
  0x58   :  { %8205 = vmatpush1.bf16.msra.mxu0 %v10649_v31  ;;  %7432 = vmatprep.subr.bf16.mxu1 %v10654_v32  ;;  %v9154_v31 = vcombine.high %v12763_v29, %v12768_v30  ;;  %v10724_v32 = vld [vmem:[%s16298_s1 + $0x220] ss:$8 sps:$4 sm:$0xff]  }
  0x59   :  { %8206 = vmatprep.subr.bf16.mxu0 %v10657_v33  ;;  %v10727_v33 = vld [vmem:[%s16298_s1 + $0x1420] ss:$8 sps:$4 sm:$0xff]  }
  0x5b   :  { %7433 = vmatpush1.bf16.msra.mxu1 %v10652_v34  ;;  %v10732_v34 = vld [vmem:[%s16298_s1 + $0x234] ss:$8 sps:$4 sm:$0xff]  }
  0x5c   :  { %8207 = vmatpush1.bf16.msra.mxu0 %v10655_v35  ;;  %7434 = vmatprep.subr.bf16.mxu1 %v10660_v38  ;;  %v10735_v35 = vld [vmem:[%s16298_s1 + $0x1434] ss:$8 sps:$4 sm:$0xff]   ;;  %v10738_v38 = vld [vmem:[%s16298_s1 + $0x244] ss:$8 sps:$4 sm:$0xff]  }
  0x5d   :  { %8208 = vmatprep.subr.bf16.mxu0 %v10663_v39  ;;  %v10741_v39 = vld [vmem:[%s16298_s1 + $0x1444] ss:$8 sps:$4 sm:$0xff]  }
  0x5f   :  { %7435 = vmatpush1.bf16.msra.mxu1 %v10658_v44  ;;  %v10742_v44 = vld [vmem:[%s16298_s1 + $0x250] ss:$8 sps:$4 sm:$0xff]  }
  0x60   :  { %8209 = vmatpush1.bf16.msra.mxu0 %v10661_v45  ;;  %7436 = vmatprep.subr.bf16.mxu1 %v10666_v46  ;;  %v10745_v45 = vld [vmem:[%s16298_s1 + $0x1450] ss:$8 sps:$4 sm:$0xff]   ;;  %v10750_v46 = vld [vmem:[%s16298_s1 + $0x264] ss:$8 sps:$4 sm:$0xff]  }
  0x61   :  { %8210 = vmatprep.subr.bf16.mxu0 %v10669_v47  ;;  %v10753_v47 = vld [vmem:[%s16298_s1 + $0x1464] ss:$8 sps:$4 sm:$0xff]  }
  0x63   :  { %7437 = vmatpush1.bf16.msra.mxu1 %v10664_v48  ;;  %v10748_v48 = vld [vmem:[%s16298_s1 + $0x260] ss:$8 sps:$4 sm:$0xff]  }
  0x64   :  { %8211 = vmatpush1.bf16.msra.mxu0 %v10667_v49  ;;  %7438 = vmatprep.subr.bf16.mxu1 %v10672_v50  ;;  %v10751_v49 = vld [vmem:[%s16298_s1 + $0x1460] ss:$8 sps:$4 sm:$0xff]   ;;  %v10756_v50 = vld [vmem:[%s16298_s1 + $0x274] ss:$8 sps:$4 sm:$0xff]  }
  0x65   :  { %8212 = vmatprep.subr.bf16.mxu0 %v10675_v51  ;;  %v10759_v51 = vld [vmem:[%s16298_s1 + $0x1474] ss:$8 sps:$4 sm:$0xff]  }
  0x67   :  { %7439 = vmatpush1.bf16.msra.mxu1 %v10670_v52  ;;  %v10754_v52 = vld [vmem:[%s16298_s1 + $0x270] ss:$8 sps:$4 sm:$0xff]  }
  0x68   :  { %8213 = vmatpush1.bf16.msra.mxu0 %v10673_v53  ;;  %7440 = vmatprep.subr.bf16.mxu1 %v10678_v54  ;;  %v10757_v53 = vld [vmem:[%s16298_s1 + $0x1470] ss:$8 sps:$4 sm:$0xff]   ;;  %v10762_v54 = vld [vmem:[%s16298_s1 + $0x284] ss:$8 sps:$4 sm:$0xff]  }
  0x69   :  { %8214 = vmatprep.subr.bf16.mxu0 %v10681_v55  ;;  %v10765_v55 = vld [vmem:[%s16298_s1 + $0x1484] ss:$8 sps:$4 sm:$0xff]  }
  0x6b   :  { %7441 = vmatpush1.bf16.msra.mxu1 %v10676_v56  ;;  %v10760_v56 = vld [vmem:[%s16298_s1 + $0x280] ss:$8 sps:$4 sm:$0xff]  }
  0x6c   :  { %8215 = vmatpush1.bf16.msra.mxu0 %v10679_v57  ;;  %7442 = vmatprep.subr.bf16.mxu1 %v10684_v58  ;;  %v10763_v57 = vld [vmem:[%s16298_s1 + $0x1480] ss:$8 sps:$4 sm:$0xff]   ;;  %v10768_v58 = vld [vmem:[%s16298_s1 + $0x294] ss:$8 sps:$4 sm:$0xff]  }
  0x6d   :  { %8216 = vmatprep.subr.bf16.mxu0 %v10687_v59  ;;  %v10771_v59 = vld [vmem:[%s16298_s1 + $0x1494] ss:$8 sps:$4 sm:$0xff]  }
  0x6f   :  { %7443 = vmatpush1.bf16.msra.mxu1 %v10682_v60  ;;  %v10766_v60 = vld [vmem:[%s16298_s1 + $0x290] ss:$8 sps:$4 sm:$0xff]  }
  0x70   :  { %8217 = vmatpush1.bf16.msra.mxu0 %v10685_v61  ;;  %7444 = vmatprep.subr.bf16.mxu1 %v10690_v62  ;;  %v10769_v61 = vld [vmem:[%s16298_s1 + $0x1490] ss:$8 sps:$4 sm:$0xff]   ;;  %v10774_v62 = vld [vmem:[%s16298_s1 + $0x2a4] ss:$8 sps:$4 sm:$0xff]  }
  0x71   :  { %8218 = vmatprep.subr.bf16.mxu0 %v10693_v63  ;;  %v10777_v63 = vld [vmem:[%s16298_s1 + $0x14a4] ss:$8 sps:$4 sm:$0xff]  }
  0x73   :  { %7445 = vmatpush1.bf16.msra.mxu1 %v10688_v0  ;;  %v10772_v0 = vld [vmem:[%s16298_s1 + $0x2a0] ss:$8 sps:$4 sm:$0xff]  }
  0x74   :  { %8219 = vmatpush1.bf16.msra.mxu0 %v10691_v1  ;;  %7446 = vmatprep.subr.bf16.mxu1 %v10696_v2  ;;  %v10775_v1 = vld [vmem:[%s16298_s1 + $0x14a0] ss:$8 sps:$4 sm:$0xff]   ;;  %v10780_v2 = vld [vmem:[%s16298_s1 + $0x2b4] ss:$8 sps:$4 sm:$0xff]  }
  0x75   :  { %8220 = vmatprep.subr.bf16.mxu0 %v10699_v3  ;;  %v10783_v3 = vld [vmem:[%s16298_s1 + $0x14b4] ss:$8 sps:$4 sm:$0xff]  }
  0x77   :  { %7447 = vmatpush1.bf16.msra.mxu1 %v10694_v4  ;;  %v10778_v4 = vld [vmem:[%s16298_s1 + $0x2b0] ss:$8 sps:$4 sm:$0xff]  }
  0x78   :  { %8221 = vmatpush1.bf16.msra.mxu0 %v10697_v5  ;;  %7448 = vmatprep.subr.bf16.mxu1 %v10702_v6  ;;  %v10781_v5 = vld [vmem:[%s16298_s1 + $0x14b0] ss:$8 sps:$4 sm:$0xff]   ;;  %v10786_v6 = vld [vmem:[%s16298_s1 + $0x2c4] ss:$8 sps:$4 sm:$0xff]  }
  0x79   :  { %8222 = vmatprep.subr.bf16.mxu0 %v10705_v7  ;;  %v10789_v7 = vld [vmem:[%s16298_s1 + $0x14c4] ss:$8 sps:$4 sm:$0xff]  }
  0x7b   :  { %7449 = vmatpush1.bf16.msra.mxu1 %v10700_v8  ;;  %v10784_v8 = vld [vmem:[%s16298_s1 + $0x2c0] ss:$8 sps:$4 sm:$0xff]  }
  0x7c   :  { %8223 = vmatpush1.bf16.msra.mxu0 %v10703_v9  ;;  %7450 = vmatprep.subr.bf16.mxu1 %v10708_v10  ;;  %v10787_v9 = vld [vmem:[%s16298_s1 + $0x14c0] ss:$8 sps:$4 sm:$0xff]   ;;  %v10792_v10 = vld [vmem:[%s16298_s1 + $0x2d4] ss:$8 sps:$4 sm:$0xff]  }
  0x7d   :  { %8224 = vmatprep.subr.bf16.mxu0 %v10711_v11  ;;  %v10795_v11 = vld [vmem:[%s16298_s1 + $0x14d4] ss:$8 sps:$4 sm:$0xff]  }
  0x7f   :  { %7451 = vmatpush1.bf16.msra.mxu1 %v10706_v12  ;;  %v10790_v12 = vld [vmem:[%s16298_s1 + $0x2d0] ss:$8 sps:$4 sm:$0xff]  }
  0x80   :  { %8225 = vmatpush1.bf16.msra.mxu0 %v10709_v13  ;;  %7463 = vmatprep.subr.bf16.mxu1 %v10714_v14  ;;  %v10793_v13 = vld [vmem:[%s16298_s1 + $0x14d0] ss:$8 sps:$4 sm:$0xff]   ;;  %v10798_v14 = vld [vmem:[%s16298_s1 + $0x2e4] ss:$8 sps:$4 sm:$0xff]  }
  0x81   :  { %8237 = vmatprep.subr.bf16.mxu0 %v10717_v15  ;;  %v10801_v15 = vld [vmem:[%s16298_s1 + $0x14e4] ss:$8 sps:$4 sm:$0xff]  }
  0x82   :  { %7453 = vmatmul.mubr.bf16.vlgmr.msra.gmra.mrb[0].mxu1 %v9115_v16  ;;  %v10796_v16 = vld [vmem:[%s16298_s1 + $0x2e0] ss:$8 sps:$4 sm:$0xff]  }
  0x83   :  { %8227 = vmatmul.mubr.bf16.vlgmr.msra.gmra.mrb[0].mxu0 %v9151_v18  ;;  %7464 = vmatpush1.bf16.msra.mxu1 %v10712_v17  ;;  %v10799_v17 = vld [vmem:[%s16298_s1 + $0x14e0] ss:$8 sps:$4 sm:$0xff]   ;;  %v10804_v18 = vld [vmem:[%s16298_s1 + $0x2f4] ss:$8 sps:$4 sm:$0xff]  }
  0x84   :  { %8238 = vmatpush1.bf16.msra.mxu0 %v10715_v19  ;;  %7465 = vmatprep.subr.bf16.mxu1 %v10720_v20  ;;  %v10807_v19 = vld [vmem:[%s16298_s1 + $0x14f4] ss:$8 sps:$4 sm:$0xff]   ;;  %v10802_v20 = vld [vmem:[%s16298_s1 + $0x2f0] ss:$8 sps:$4 sm:$0xff]  }
  0x85   :  { %8239 = vmatprep.subr.bf16.mxu0 %v10723_v21  ;;  %7495 = vmatprep.mubr.bf16.mxu1 %v9118_v28  ;;  %v10805_v21 = vld [vmem:[%s16298_s1 + $0x14f0] ss:$8 sps:$4 sm:$0xff]  }
  0x86   :  { %8269 = vmatprep.mubr.bf16.mxu0 %v9154_v31  ;;  %v12949_v28 = vld [vmem:[%s16299_s0 + $0x18] sm:$0xff] }
  0x87   :  { %7466 = vmatpush1.bf16.msra.mxu1 %v10718_v22  ;;  %v10810_v22 = vld [vmem:[%s16298_s1 + $0x304] ss:$8 sps:$4 sm:$0xff]   ;;  %v12954_v31 = vld [vmem:[%s16299_s0 + $0x138] sm:$0xff] }
  0x88   :  { %8240 = vmatpush1.bf16.msra.mxu0 %v10721_v23  ;;  %7467 = vmatprep.subr.bf16.mxu1 %v10726_v26  ;;  %v10813_v23 = vld [vmem:[%s16298_s1 + $0x1504] ss:$8 sps:$4 sm:$0xff]   ;;  %v10808_v26 = vld [vmem:[%s16298_s1 + $0x300] ss:$8 sps:$4 sm:$0xff]  }
  0x89   :  { %8241 = vmatprep.subr.bf16.mxu0 %v10729_v27  ;;  %v10811_v27 = vld [vmem:[%s16298_s1 + $0x1500] ss:$8 sps:$4 sm:$0xff]  }
  0x8b   :  { %7468 = vmatpush1.bf16.msra.mxu1 %v10724_v32  ;;  %v9117_v32 = vcombine.low %v12745_v24, %v12750_v25  ;;  %v10819_v24 = vld [vmem:[%s16298_s1 + $0x1514] ss:$8 sps:$4 sm:$0xff]   ;;  %v9120_v25 = vcombine.high %v12949_v28, %v12954_v31 }
  0x8c   :  { %8242 = vmatpush1.bf16.msra.mxu0 %v10727_v33  ;;  %7469 = vmatprep.subr.bf16.mxu1 %v10732_v34  ;;  %v9153_v33 = vcombine.low %v12763_v29, %v12768_v30  ;;  %v12963_v34 = vld [vmem:[%s16299_s0 + $0xa8] sm:$0xff]  ;;  %v10814_v30 = vld [vmem:[%s16298_s1 + $0x310] ss:$8 sps:$4 sm:$0xff]  }
  0x8d   :  { %8243 = vmatprep.subr.bf16.mxu0 %v10735_v35  ;;  %v12968_v35 = vld [vmem:[%s16299_s0 + $0x1c8] sm:$0xff] }
  0x8e   :  { %v9156_v29 = vcombine.high %v12963_v34, %v12968_v35 }
  0x8f   :  { %7470 = vmatpush1.bf16.msra.mxu1 %v10730_v36  ;;  %v10816_v36 = vld [vmem:[%s16298_s1 + $0x314] ss:$8 sps:$4 sm:$0xff]  }
  0x90   :  { %8244 = vmatpush1.bf16.msra.mxu0 %v10733_v37  ;;  %7471 = vmatprep.subr.bf16.mxu1 %v10738_v38  ;;  %v10817_v37 = vld [vmem:[%s16298_s1 + $0x1510] ss:$8 sps:$4 sm:$0xff]   ;;  %v10822_v38 = vld [vmem:[%s16298_s1 + $0x324] ss:$8 sps:$4 sm:$0xff]  }
  0x91   :  { %8245 = vmatprep.subr.bf16.mxu0 %v10741_v39  ;;  %v10825_v39 = vld [vmem:[%s16298_s1 + $0x1524] ss:$8 sps:$4 sm:$0xff]  }
  0x93   :  { %7472 = vmatpush1.bf16.msra.mxu1 %v10736_v40  ;;  %v10820_v40 = vld [vmem:[%s16298_s1 + $0x320] ss:$8 sps:$4 sm:$0xff]  }
  0x94   :  { %8246 = vmatpush1.bf16.msra.mxu0 %v10739_v41  ;;  %7473 = vmatprep.subr.bf16.mxu1 %v10744_v42  ;;  %v10823_v41 = vld [vmem:[%s16298_s1 + $0x1520] ss:$8 sps:$4 sm:$0xff]   ;;  %v10828_v42 = vld [vmem:[%s16298_s1 + $0x334] ss:$8 sps:$4 sm:$0xff]  }
  0x95   :  { %8247 = vmatprep.subr.bf16.mxu0 %v10747_v43  ;;  %v10831_v43 = vld [vmem:[%s16298_s1 + $0x1534] ss:$8 sps:$4 sm:$0xff]  }
  0x97   :  { %7474 = vmatpush1.bf16.msra.mxu1 %v10742_v44  ;;  %v10826_v44 = vld [vmem:[%s16298_s1 + $0x330] ss:$8 sps:$4 sm:$0xff]  }
  0x98   :  { %8248 = vmatpush1.bf16.msra.mxu0 %v10745_v45  ;;  %7475 = vmatprep.subr.bf16.mxu1 %v10750_v46  ;;  %v10829_v45 = vld [vmem:[%s16298_s1 + $0x1530] ss:$8 sps:$4 sm:$0xff]   ;;  %v10834_v46 = vld [vmem:[%s16298_s1 + $0x344] ss:$8 sps:$4 sm:$0xff]  }
  0x99   :  { %8249 = vmatprep.subr.bf16.mxu0 %v10753_v47  ;;  %v10837_v47 = vld [vmem:[%s16298_s1 + $0x1544] ss:$8 sps:$4 sm:$0xff]  }
  0x9b   :  { %7476 = vmatpush1.bf16.msra.mxu1 %v10748_v48  ;;  %v10832_v48 = vld [vmem:[%s16298_s1 + $0x340] ss:$8 sps:$4 sm:$0xff]  }
  0x9c   :  { %8250 = vmatpush1.bf16.msra.mxu0 %v10751_v49  ;;  %7477 = vmatprep.subr.bf16.mxu1 %v10756_v50  ;;  %v10835_v49 = vld [vmem:[%s16298_s1 + $0x1540] ss:$8 sps:$4 sm:$0xff]   ;;  %v10840_v50 = vld [vmem:[%s16298_s1 + $0x354] ss:$8 sps:$4 sm:$0xff]  }
  0x9d   :  { %8251 = vmatprep.subr.bf16.mxu0 %v10759_v51  ;;  %v10843_v51 = vld [vmem:[%s16298_s1 + $0x1554] ss:$8 sps:$4 sm:$0xff]  }
  0x9f   :  { %7478 = vmatpush1.bf16.msra.mxu1 %v10754_v52  ;;  %v10838_v52 = vld [vmem:[%s16298_s1 + $0x350] ss:$8 sps:$4 sm:$0xff]  }
  0xa0   :  { %8252 = vmatpush1.bf16.msra.mxu0 %v10757_v53  ;;  %7479 = vmatprep.subr.bf16.mxu1 %v10762_v54  ;;  %v10841_v53 = vld [vmem:[%s16298_s1 + $0x1550] ss:$8 sps:$4 sm:$0xff]   ;;  %v10846_v54 = vld [vmem:[%s16298_s1 + $0x364] ss:$8 sps:$4 sm:$0xff]  }
  0xa1   :  { %8253 = vmatprep.subr.bf16.mxu0 %v10765_v55  ;;  %v10849_v55 = vld [vmem:[%s16298_s1 + $0x1564] ss:$8 sps:$4 sm:$0xff]  }
  0xa3   :  { %7480 = vmatpush1.bf16.msra.mxu1 %v10760_v56  ;;  %v10844_v56 = vld [vmem:[%s16298_s1 + $0x360] ss:$8 sps:$4 sm:$0xff]  }
  0xa4   :  { %8254 = vmatpush1.bf16.msra.mxu0 %v10763_v57  ;;  %7481 = vmatprep.subr.bf16.mxu1 %v10768_v58  ;;  %v10847_v57 = vld [vmem:[%s16298_s1 + $0x1560] ss:$8 sps:$4 sm:$0xff]   ;;  %v10852_v58 = vld [vmem:[%s16298_s1 + $0x374] ss:$8 sps:$4 sm:$0xff]  }
  0xa5   :  { %8255 = vmatprep.subr.bf16.mxu0 %v10771_v59  ;;  %v10855_v59 = vld [vmem:[%s16298_s1 + $0x1574] ss:$8 sps:$4 sm:$0xff]  }
  0xa7   :  { %7482 = vmatpush1.bf16.msra.mxu1 %v10766_v60  ;;  %v10850_v60 = vld [vmem:[%s16298_s1 + $0x370] ss:$8 sps:$4 sm:$0xff]  }
  0xa8   :  { %8256 = vmatpush1.bf16.msra.mxu0 %v10769_v61  ;;  %7483 = vmatprep.subr.bf16.mxu1 %v10774_v62  ;;  %v10853_v61 = vld [vmem:[%s16298_s1 + $0x1570] ss:$8 sps:$4 sm:$0xff]   ;;  %v10858_v62 = vld [vmem:[%s16298_s1 + $0x384] ss:$8 sps:$4 sm:$0xff]  }
  0xa9   :  { %8257 = vmatprep.subr.bf16.mxu0 %v10777_v63  ;;  %v10861_v63 = vld [vmem:[%s16298_s1 + $0x1584] ss:$8 sps:$4 sm:$0xff]  }
  0xab   :  { %7484 = vmatpush1.bf16.msra.mxu1 %v10772_v0  ;;  %v10856_v0 = vld [vmem:[%s16298_s1 + $0x380] ss:$8 sps:$4 sm:$0xff]  }
  0xac   :  { %8258 = vmatpush1.bf16.msra.mxu0 %v10775_v1  ;;  %7485 = vmatprep.subr.bf16.mxu1 %v10780_v2  ;;  %v10859_v1 = vld [vmem:[%s16298_s1 + $0x1580] ss:$8 sps:$4 sm:$0xff]   ;;  %v10864_v2 = vld [vmem:[%s16298_s1 + $0x394] ss:$8 sps:$4 sm:$0xff]  }
  0xad   :  { %8259 = vmatprep.subr.bf16.mxu0 %v10783_v3  ;;  %v10867_v3 = vld [vmem:[%s16298_s1 + $0x1594] ss:$8 sps:$4 sm:$0xff]  }
  0xaf   :  { %7486 = vmatpush1.bf16.msra.mxu1 %v10778_v4  ;;  %v10862_v4 = vld [vmem:[%s16298_s1 + $0x390] ss:$8 sps:$4 sm:$0xff]  }
  0xb0   :  { %8260 = vmatpush1.bf16.msra.mxu0 %v10781_v5  ;;  %7487 = vmatprep.subr.bf16.mxu1 %v10786_v6  ;;  %v10865_v5 = vld [vmem:[%s16298_s1 + $0x1590] ss:$8 sps:$4 sm:$0xff]   ;;  %v10870_v6 = vld [vmem:[%s16298_s1 + $0x3a4] ss:$8 sps:$4 sm:$0xff]  }
  0xb1   :  { %8261 = vmatprep.subr.bf16.mxu0 %v10789_v7  ;;  %v10873_v7 = vld [vmem:[%s16298_s1 + $0x15a4] ss:$8 sps:$4 sm:$0xff]  }
  0xb3   :  { %7488 = vmatpush1.bf16.msra.mxu1 %v10784_v8  ;;  %v10868_v8 = vld [vmem:[%s16298_s1 + $0x3a0] ss:$8 sps:$4 sm:$0xff]  }
  0xb4   :  { %8262 = vmatpush1.bf16.msra.mxu0 %v10787_v9  ;;  %7489 = vmatprep.subr.bf16.mxu1 %v10792_v10  ;;  %v10871_v9 = vld [vmem:[%s16298_s1 + $0x15a0] ss:$8 sps:$4 sm:$0xff]   ;;  %v10876_v10 = vld [vmem:[%s16298_s1 + $0x3b4] ss:$8 sps:$4 sm:$0xff]  }
  0xb5   :  { %8263 = vmatprep.subr.bf16.mxu0 %v10795_v11  ;;  %v10879_v11 = vld [vmem:[%s16298_s1 + $0x15b4] ss:$8 sps:$4 sm:$0xff]  }
  0xb7   :  { %7490 = vmatpush1.bf16.msra.mxu1 %v10790_v12  ;;  %v10874_v12 = vld [vmem:[%s16298_s1 + $0x3b0] ss:$8 sps:$4 sm:$0xff]  }
  0xb8   :  { %8264 = vmatpush1.bf16.msra.mxu0 %v10793_v13  ;;  %7491 = vmatprep.subr.bf16.mxu1 %v10798_v14  ;;  %v10877_v13 = vld [vmem:[%s16298_s1 + $0x15b0] ss:$8 sps:$4 sm:$0xff]   ;;  %v10882_v14 = vld [vmem:[%s16298_s1 + $0x3c4] ss:$8 sps:$4 sm:$0xff]  }
  0xb9   :  { %8265 = vmatprep.subr.bf16.mxu0 %v10801_v15  ;;  %v10885_v15 = vld [vmem:[%s16298_s1 + $0x15c4] ss:$8 sps:$4 sm:$0xff]  }
  0xbb   :  { %7492 = vmatpush1.bf16.msra.mxu1 %v10796_v16  ;;  %v10880_v16 = vld [vmem:[%s16298_s1 + $0x3c0] ss:$8 sps:$4 sm:$0xff]  }
  0xbc   :  { %8266 = vmatpush1.bf16.msra.mxu0 %v10799_v17  ;;  %7493 = vmatprep.subr.bf16.mxu1 %v10804_v18  ;;  %v10883_v17 = vld [vmem:[%s16298_s1 + $0x15c0] ss:$8 sps:$4 sm:$0xff]   ;;  %v10888_v18 = vld [vmem:[%s16298_s1 + $0x3d4] ss:$8 sps:$4 sm:$0xff]  }
  0xbd   :  { %8267 = vmatprep.subr.bf16.mxu0 %v10807_v19  ;;  %v10891_v19 = vld [vmem:[%s16298_s1 + $0x15d4] ss:$8 sps:$4 sm:$0xff]  }
  0xbf   :  { %7494 = vmatpush1.bf16.msra.mxu1 %v10802_v20  ;;  %v10886_v20 = vld [vmem:[%s16298_s1 + $0x3d0] ss:$8 sps:$4 sm:$0xff]  }
  0xc0   :  { %8268 = vmatpush1.bf16.msra.mxu0 %v10805_v21  ;;  %7506 = vmatprep.subr.bf16.mxu1 %v10810_v22  ;;  %v10889_v21 = vld [vmem:[%s16298_s1 + $0x15d0] ss:$8 sps:$4 sm:$0xff]   ;;  %v10894_v22 = vld [vmem:[%s16298_s1 + $0x3e4] ss:$8 sps:$4 sm:$0xff]  }
  0xc1   :  { %8280 = vmatprep.subr.bf16.mxu0 %v10813_v23  ;;  %v10897_v23 = vld [vmem:[%s16298_s1 + $0x15e4] ss:$8 sps:$4 sm:$0xff]  }
  0xc2   :  { %7496 = vmatmul.mubr.bf16.vlgmr.msra.gmra.mrb[0].mxu1 %v9117_v32  ;;  %v10900_v32 = vld [vmem:[%s16298_s1 + $0x3f4] ss:$8 sps:$4 sm:$0xff]  }
  0xc3   :  { %8270 = vmatmul.mubr.bf16.vlgmr.msra.gmra.mrb[0].mxu0 %v9153_v33  ;;  %7507 = vmatpush1.bf16.msra.mxu1 %v10808_v26  ;;  %v10892_v26 = vld [vmem:[%s16298_s1 + $0x3e0] ss:$8 sps:$4 sm:$0xff]   ;;  %v10903_v33 = vld [vmem:[%s16298_s1 + $0x15f4] ss:$8 sps:$4 sm:$0xff]  }
  0xc4   :  { %8281 = vmatpush1.bf16.msra.mxu0 %v10811_v27  ;;  %7508 = vmatprep.subr.bf16.mxu1 %v10816_v36  ;;  %v10895_v27 = vld [vmem:[%s16298_s1 + $0x15e0] ss:$8 sps:$4 sm:$0xff]   ;;  %v10898_v36 = vld [vmem:[%s16298_s1 + $0x3f0] ss:$8 sps:$4 sm:$0xff]  }
  0xc5   :  { %8282 = vmatprep.subr.bf16.mxu0 %v10819_v24  ;;  %7538 = vmatprep.mubr.bf16.mxu1 %v9120_v25  ;;  %v10901_v24 = vld [vmem:[%s16298_s1 + $0x15f0] ss:$8 sps:$4 sm:$0xff]   ;;  %v10906_v25 = vld [vmem:[%s16298_s1 + $0x404] ss:$8 sps:$4 sm:$0xff]  }
  0xc6   :  { %8312 = vmatprep.mubr.bf16.mxu0 %v9156_v29  ;;  %v10909_v29 = vld [vmem:[%s16298_s1 + $0x1604] ss:$8 sps:$4 sm:$0xff]  }
  0xc7   :  { %7509 = vmatpush1.bf16.msra.mxu1 %v10814_v30  ;;  %v10904_v30 = vld [vmem:[%s16298_s1 + $0x400] ss:$8 sps:$4 sm:$0xff]  }
  0xc8   :  { %8283 = vmatpush1.bf16.msra.mxu0 %v10817_v37  ;;  %7510 = vmatprep.subr.bf16.mxu1 %v10822_v38  ;;  %v10907_v37 = vld [vmem:[%s16298_s1 + $0x1600] ss:$8 sps:$4 sm:$0xff]  }
  0xc9   :  { %8284 = vmatprep.subr.bf16.mxu0 %v10825_v39  ;;  %v13169_v38 = vld [vmem:[%s16299_s0 + $0x20] sm:$0xff] }
  0xca   :  { %v13174_v39 = vld [vmem:[%s16299_s0 + $0x140] sm:$0xff] }
  0xcb   :  { %7511 = vmatpush1.bf16.msra.mxu1 %v10820_v40  ;;  %v9119_v40 = vcombine.low %v12949_v28, %v12954_v31  ;;  %v10915_v28 = vld [vmem:[%s16298_s1 + $0x1614] ss:$8 sps:$4 sm:$0xff]   ;;  %v9122_v31 = vcombine.high %v13169_v38, %v13174_v39 }
  0xcc   :  { %8285 = vmatpush1.bf16.msra.mxu0 %v10823_v41  ;;  %7512 = vmatprep.subr.bf16.mxu1 %v10828_v42  ;;  %v9155_v41 = vcombine.low %v12963_v34, %v12968_v35  ;;  %v13183_v42 = vld [vmem:[%s16299_s0 + $0xb0] sm:$0xff] }
  0xcd   :  { %8286 = vmatprep.subr.bf16.mxu0 %v10831_v43  ;;  %v13188_v43 = vld [vmem:[%s16299_s0 + $0x1d0] sm:$0xff] }
  0xce   :  { %v9158_v34 = vcombine.high %v13183_v42, %v13188_v43  ;;  %v10910_v35 = vld [vmem:[%s16298_s1 + $0x410] ss:$8 sps:$4 sm:$0xff]  }
  0xcf   :  { %7513 = vmatpush1.bf16.msra.mxu1 %v10826_v44  ;;  %v10912_v44 = vld [vmem:[%s16298_s1 + $0x414] ss:$8 sps:$4 sm:$0xff]  }
  0xd0   :  { %8287 = vmatpush1.bf16.msra.mxu0 %v10829_v45  ;;  %7514 = vmatprep.subr.bf16.mxu1 %v10834_v46  ;;  %v10913_v45 = vld [vmem:[%s16298_s1 + $0x1610] ss:$8 sps:$4 sm:$0xff]   ;;  %v10918_v46 = vld [vmem:[%s16298_s1 + $0x424] ss:$8 sps:$4 sm:$0xff]  }
  0xd1   :  { %8288 = vmatprep.subr.bf16.mxu0 %v10837_v47  ;;  %v10921_v47 = vld [vmem:[%s16298_s1 + $0x1624] ss:$8 sps:$4 sm:$0xff]  }
  0xd3   :  { %7515 = vmatpush1.bf16.msra.mxu1 %v10832_v48  ;;  %v10916_v48 = vld [vmem:[%s16298_s1 + $0x420] ss:$8 sps:$4 sm:$0xff]  }
  0xd4   :  { %8289 = vmatpush1.bf16.msra.mxu0 %v10835_v49  ;;  %7516 = vmatprep.subr.bf16.mxu1 %v10840_v50  ;;  %v10919_v49 = vld [vmem:[%s16298_s1 + $0x1620] ss:$8 sps:$4 sm:$0xff]   ;;  %v10924_v50 = vld [vmem:[%s16298_s1 + $0x434] ss:$8 sps:$4 sm:$0xff]  }
  0xd5   :  { %8290 = vmatprep.subr.bf16.mxu0 %v10843_v51  ;;  %v10927_v51 = vld [vmem:[%s16298_s1 + $0x1634] ss:$8 sps:$4 sm:$0xff]  }
  0xd7   :  { %7517 = vmatpush1.bf16.msra.mxu1 %v10838_v52  ;;  %v10922_v52 = vld [vmem:[%s16298_s1 + $0x430] ss:$8 sps:$4 sm:$0xff]  }
  0xd8   :  { %8291 = vmatpush1.bf16.msra.mxu0 %v10841_v53  ;;  %7518 = vmatprep.subr.bf16.mxu1 %v10846_v54  ;;  %v10925_v53 = vld [vmem:[%s16298_s1 + $0x1630] ss:$8 sps:$4 sm:$0xff]   ;;  %v10930_v54 = vld [vmem:[%s16298_s1 + $0x444] ss:$8 sps:$4 sm:$0xff]  }
  0xd9   :  { %8292 = vmatprep.subr.bf16.mxu0 %v10849_v55  ;;  %v10933_v55 = vld [vmem:[%s16298_s1 + $0x1644] ss:$8 sps:$4 sm:$0xff]  }
  0xdb   :  { %7519 = vmatpush1.bf16.msra.mxu1 %v10844_v56  ;;  %v10928_v56 = vld [vmem:[%s16298_s1 + $0x440] ss:$8 sps:$4 sm:$0xff]  }
  0xdc   :  { %8293 = vmatpush1.bf16.msra.mxu0 %v10847_v57  ;;  %7520 = vmatprep.subr.bf16.mxu1 %v10852_v58  ;;  %v10931_v57 = vld [vmem:[%s16298_s1 + $0x1640] ss:$8 sps:$4 sm:$0xff]   ;;  %v10936_v58 = vld [vmem:[%s16298_s1 + $0x454] ss:$8 sps:$4 sm:$0xff]  }
  0xdd   :  { %8294 = vmatprep.subr.bf16.mxu0 %v10855_v59  ;;  %v10939_v59 = vld [vmem:[%s16298_s1 + $0x1654] ss:$8 sps:$4 sm:$0xff]  }
  0xdf   :  { %7521 = vmatpush1.bf16.msra.mxu1 %v10850_v60  ;;  %v10934_v60 = vld [vmem:[%s16298_s1 + $0x450] ss:$8 sps:$4 sm:$0xff]  }
  0xe0   :  { %8295 = vmatpush1.bf16.msra.mxu0 %v10853_v61  ;;  %7522 = vmatprep.subr.bf16.mxu1 %v10858_v62  ;;  %v10937_v61 = vld [vmem:[%s16298_s1 + $0x1650] ss:$8 sps:$4 sm:$0xff]   ;;  %v10942_v62 = vld [vmem:[%s16298_s1 + $0x464] ss:$8 sps:$4 sm:$0xff]  }
  0xe1   :  { %8296 = vmatprep.subr.bf16.mxu0 %v10861_v63  ;;  %v10945_v63 = vld [vmem:[%s16298_s1 + $0x1664] ss:$8 sps:$4 sm:$0xff]  }
  0xe3   :  { %7523 = vmatpush1.bf16.msra.mxu1 %v10856_v0  ;;  %v10940_v0 = vld [vmem:[%s16298_s1 + $0x460] ss:$8 sps:$4 sm:$0xff]  }
  0xe4   :  { %8297 = vmatpush1.bf16.msra.mxu0 %v10859_v1  ;;  %7524 = vmatprep.subr.bf16.mxu1 %v10864_v2  ;;  %v10943_v1 = vld [vmem:[%s16298_s1 + $0x1660] ss:$8 sps:$4 sm:$0xff]   ;;  %v10948_v2 = vld [vmem:[%s16298_s1 + $0x474] ss:$8 sps:$4 sm:$0xff]  }
  0xe5   :  { %8298 = vmatprep.subr.bf16.mxu0 %v10867_v3  ;;  %v10951_v3 = vld [vmem:[%s16298_s1 + $0x1674] ss:$8 sps:$4 sm:$0xff]  }
  0xe7   :  { %7525 = vmatpush1.bf16.msra.mxu1 %v10862_v4  ;;  %v10946_v4 = vld [vmem:[%s16298_s1 + $0x470] ss:$8 sps:$4 sm:$0xff]  }
  0xe8   :  { %8299 = vmatpush1.bf16.msra.mxu0 %v10865_v5  ;;  %7526 = vmatprep.subr.bf16.mxu1 %v10870_v6  ;;  %v10949_v5 = vld [vmem:[%s16298_s1 + $0x1670] ss:$8 sps:$4 sm:$0xff]   ;;  %v10954_v6 = vld [vmem:[%s16298_s1 + $0x484] ss:$8 sps:$4 sm:$0xff]  }
  0xe9   :  { %8300 = vmatprep.subr.bf16.mxu0 %v10873_v7  ;;  %v10957_v7 = vld [vmem:[%s16298_s1 + $0x1684] ss:$8 sps:$4 sm:$0xff]  }
  0xeb   :  { %7527 = vmatpush1.bf16.msra.mxu1 %v10868_v8  ;;  %v10952_v8 = vld [vmem:[%s16298_s1 + $0x480] ss:$8 sps:$4 sm:$0xff]  }
  0xec   :  { %8301 = vmatpush1.bf16.msra.mxu0 %v10871_v9  ;;  %7528 = vmatprep.subr.bf16.mxu1 %v10876_v10  ;;  %v10955_v9 = vld [vmem:[%s16298_s1 + $0x1680] ss:$8 sps:$4 sm:$0xff]   ;;  %v10960_v10 = vld [vmem:[%s16298_s1 + $0x494] ss:$8 sps:$4 sm:$0xff]  }
  0xed   :  { %8302 = vmatprep.subr.bf16.mxu0 %v10879_v11  ;;  %v10963_v11 = vld [vmem:[%s16298_s1 + $0x1694] ss:$8 sps:$4 sm:$0xff]  }
  0xef   :  { %7529 = vmatpush1.bf16.msra.mxu1 %v10874_v12  ;;  %v10958_v12 = vld [vmem:[%s16298_s1 + $0x490] ss:$8 sps:$4 sm:$0xff]  }
  0xf0   :  { %8303 = vmatpush1.bf16.msra.mxu0 %v10877_v13  ;;  %7530 = vmatprep.subr.bf16.mxu1 %v10882_v14  ;;  %v10961_v13 = vld [vmem:[%s16298_s1 + $0x1690] ss:$8 sps:$4 sm:$0xff]   ;;  %v10966_v14 = vld [vmem:[%s16298_s1 + $0x4a4] ss:$8 sps:$4 sm:$0xff]  }
  0xf1   :  { %8304 = vmatprep.subr.bf16.mxu0 %v10885_v15  ;;  %v10969_v15 = vld [vmem:[%s16298_s1 + $0x16a4] ss:$8 sps:$4 sm:$0xff]  }
  0xf3   :  { %7531 = vmatpush1.bf16.msra.mxu1 %v10880_v16  ;;  %v10964_v16 = vld [vmem:[%s16298_s1 + $0x4a0] ss:$8 sps:$4 sm:$0xff]  }
  0xf4   :  { %8305 = vmatpush1.bf16.msra.mxu0 %v10883_v17  ;;  %7532 = vmatprep.subr.bf16.mxu1 %v10888_v18  ;;  %v10967_v17 = vld [vmem:[%s16298_s1 + $0x16a0] ss:$8 sps:$4 sm:$0xff]   ;;  %v10972_v18 = vld [vmem:[%s16298_s1 + $0x4b4] ss:$8 sps:$4 sm:$0xff]  }
  0xf5   :  { %8306 = vmatprep.subr.bf16.mxu0 %v10891_v19  ;;  %v10975_v19 = vld [vmem:[%s16298_s1 + $0x16b4] ss:$8 sps:$4 sm:$0xff]  }
  0xf7   :  { %7533 = vmatpush1.bf16.msra.mxu1 %v10886_v20  ;;  %v10970_v20 = vld [vmem:[%s16298_s1 + $0x4b0] ss:$8 sps:$4 sm:$0xff]  }
  0xf8   :  { %8307 = vmatpush1.bf16.msra.mxu0 %v10889_v21  ;;  %7534 = vmatprep.subr.bf16.mxu1 %v10894_v22  ;;  %v10973_v21 = vld [vmem:[%s16298_s1 + $0x16b0] ss:$8 sps:$4 sm:$0xff]   ;;  %v10978_v22 = vld [vmem:[%s16298_s1 + $0x4c4] ss:$8 sps:$4 sm:$0xff]  }
  0xf9   :  { %8308 = vmatprep.subr.bf16.mxu0 %v10897_v23  ;;  %v10981_v23 = vld [vmem:[%s16298_s1 + $0x16c4] ss:$8 sps:$4 sm:$0xff]  }
  0xfb   :  { %7535 = vmatpush1.bf16.msra.mxu1 %v10892_v26  ;;  %v10976_v26 = vld [vmem:[%s16298_s1 + $0x4c0] ss:$8 sps:$4 sm:$0xff]  }
  0xfc   :  { %8309 = vmatpush1.bf16.msra.mxu0 %v10895_v27  ;;  %7536 = vmatprep.subr.bf16.mxu1 %v10900_v32  ;;  %v10979_v27 = vld [vmem:[%s16298_s1 + $0x16c0] ss:$8 sps:$4 sm:$0xff]   ;;  %v10984_v32 = vld [vmem:[%s16298_s1 + $0x4d4] ss:$8 sps:$4 sm:$0xff]  }
  0xfd   :  { %8310 = vmatprep.subr.bf16.mxu0 %v10903_v33  ;;  %v10987_v33 = vld [vmem:[%s16298_s1 + $0x16d4] ss:$8 sps:$4 sm:$0xff]  }
  0xff   :  { %7537 = vmatpush1.bf16.msra.mxu1 %v10898_v36  ;;  %v10982_v36 = vld [vmem:[%s16298_s1 + $0x4d0] ss:$8 sps:$4 sm:$0xff]  }
 0x100   :  { %8311 = vmatpush1.bf16.msra.mxu0 %v10901_v24  ;;  %7549 = vmatprep.subr.bf16.mxu1 %v10906_v25  ;;  %v10985_v24 = vld [vmem:[%s16298_s1 + $0x16d0] ss:$8 sps:$4 sm:$0xff]   ;;  %v10990_v25 = vld [vmem:[%s16298_s1 + $0x4e4] ss:$8 sps:$4 sm:$0xff]  }
 0x101   :  { %8323 = vmatprep.subr.bf16.mxu0 %v10909_v29  ;;  %v10993_v29 = vld [vmem:[%s16298_s1 + $0x16e4] ss:$8 sps:$4 sm:$0xff]  }
 0x102   :  { %7539 = vmatmul.mubr.bf16.vlgmr.msra.gmra.mrb[0].mxu1 %v9119_v40  ;;  %v10996_v40 = vld [vmem:[%s16298_s1 + $0x4f4] ss:$8 sps:$4 sm:$0xff]  }
 0x103   :  { %8313 = vmatmul.mubr.bf16.vlgmr.msra.gmra.mrb[0].mxu0 %v9155_v41  ;;  %7550 = vmatpush1.bf16.msra.mxu1 %v10904_v30  ;;  %v10988_v30 = vld [vmem:[%s16298_s1 + $0x4e0] ss:$8 sps:$4 sm:$0xff]   ;;  %v10999_v41 = vld [vmem:[%s16298_s1 + $0x16f4] ss:$8 sps:$4 sm:$0xff]  }
 0x104   :  { %8324 = vmatpush1.bf16.msra.mxu0 %v10907_v37  ;;  %7551 = vmatprep.subr.bf16.mxu1 %v10912_v44  ;;  %v10991_v37 = vld [vmem:[%s16298_s1 + $0x16e0] ss:$8 sps:$4 sm:$0xff]   ;;  %v10994_v44 = vld [vmem:[%s16298_s1 + $0x4f0] ss:$8 sps:$4 sm:$0xff]  }
 0x105   :  { %8325 = vmatprep.subr.bf16.mxu0 %v10915_v28  ;;  %7581 = vmatprep.mubr.bf16.mxu1 %v9122_v31  ;;  %v10997_v28 = vld [vmem:[%s16298_s1 + $0x16f0] ss:$8 sps:$4 sm:$0xff]   ;;  %v11002_v31 = vld [vmem:[%s16298_s1 + $0x504] ss:$8 sps:$4 sm:$0xff]  }
 0x106   :  { %8355 = vmatprep.mubr.bf16.mxu0 %v9158_v34  ;;  %v11005_v34 = vld [vmem:[%s16298_s1 + $0x1704] ss:$8 sps:$4 sm:$0xff]  }
 0x107   :  { %7552 = vmatpush1.bf16.msra.mxu1 %v10910_v35  ;;  %v13383_v35 = vld [vmem:[%s16299_s0 + $0x28] sm:$0xff] }
 0x108   :  { %8326 = vmatpush1.bf16.msra.mxu0 %v10913_v45  ;;  %7553 = vmatprep.subr.bf16.mxu1 %v10918_v46  ;;  %v13388_v45 = vld [vmem:[%s16299_s0 + $0x148] sm:$0xff]  ;;  %v13393_v46 = vld [vmem:[%s16299_s0 + $0xb8] sm:$0xff] }
 0x109   :  { %8327 = vmatprep.subr.bf16.mxu0 %v10921_v47  ;;  %v13398_v47 = vld [vmem:[%s16299_s0 + $0x1d8] sm:$0xff] }
 0x10b   :  { %7554 = vmatpush1.bf16.msra.mxu1 %v10916_v48  ;;  %v9121_v48 = vcombine.low %v13169_v38, %v13174_v39  ;;  %v11011_v38 = vld [vmem:[%s16298_s1 + $0x1714] ss:$8 sps:$4 sm:$0xff]   ;;  %v9124_v39 = vcombine.high %v13383_v35, %v13388_v45 }
 0x10c   :  { %8328 = vmatpush1.bf16.msra.mxu0 %v10919_v49  ;;  %7555 = vmatprep.subr.bf16.mxu1 %v10924_v50  ;;  %v9157_v49 = vcombine.low %v13183_v42, %v13188_v43  ;;  %v11000_v50 = vld [vmem:[%s16298_s1 + $0x500] ss:$8 sps:$4 sm:$0xff]   ;;  %v9160_v42 = vcombine.high %v13393_v46, %v13398_v47  ;;  %v11006_v43 = vld [vmem:[%s16298_s1 + $0x510] ss:$8 sps:$4 sm:$0xff]  }
 0x10d   :  { %8329 = vmatprep.subr.bf16.mxu0 %v10927_v51  ;;  %v11003_v51 = vld [vmem:[%s16298_s1 + $0x1700] ss:$8 sps:$4 sm:$0xff]  }
 0x10f   :  { %7556 = vmatpush1.bf16.msra.mxu1 %v10922_v52  ;;  %v11008_v52 = vld [vmem:[%s16298_s1 + $0x514] ss:$8 sps:$4 sm:$0xff]  }
 0x110   :  { %8330 = vmatpush1.bf16.msra.mxu0 %v10925_v53  ;;  %7557 = vmatprep.subr.bf16.mxu1 %v10930_v54  ;;  %v11009_v53 = vld [vmem:[%s16298_s1 + $0x1710] ss:$8 sps:$4 sm:$0xff]   ;;  %v11014_v54 = vld [vmem:[%s16298_s1 + $0x524] ss:$8 sps:$4 sm:$0xff]  }
 0x111   :  { %8331 = vmatprep.subr.bf16.mxu0 %v10933_v55  ;;  %v11017_v55 = vld [vmem:[%s16298_s1 + $0x1724] ss:$8 sps:$4 sm:$0xff]  }
 0x113   :  { %7558 = vmatpush1.bf16.msra.mxu1 %v10928_v56  ;;  %v11012_v56 = vld [vmem:[%s16298_s1 + $0x520] ss:$8 sps:$4 sm:$0xff]  }
 0x114   :  { %8332 = vmatpush1.bf16.msra.mxu0 %v10931_v57  ;;  %7559 = vmatprep.subr.bf16.mxu1 %v10936_v58  ;;  %v11015_v57 = vld [vmem:[%s16298_s1 + $0x1720] ss:$8 sps:$4 sm:$0xff]   ;;  %v11020_v58 = vld [vmem:[%s16298_s1 + $0x534] ss:$8 sps:$4 sm:$0xff]  }
 0x115   :  { %8333 = vmatprep.subr.bf16.mxu0 %v10939_v59  ;;  %v11023_v59 = vld [vmem:[%s16298_s1 + $0x1734] ss:$8 sps:$4 sm:$0xff]  }
 0x117   :  { %7560 = vmatpush1.bf16.msra.mxu1 %v10934_v60  ;;  %v11018_v60 = vld [vmem:[%s16298_s1 + $0x530] ss:$8 sps:$4 sm:$0xff]  }
 0x118   :  { %8334 = vmatpush1.bf16.msra.mxu0 %v10937_v61  ;;  %7561 = vmatprep.subr.bf16.mxu1 %v10942_v62  ;;  %v11021_v61 = vld [vmem:[%s16298_s1 + $0x1730] ss:$8 sps:$4 sm:$0xff]   ;;  %v11026_v62 = vld [vmem:[%s16298_s1 + $0x544] ss:$8 sps:$4 sm:$0xff]  }
 0x119   :  { %8335 = vmatprep.subr.bf16.mxu0 %v10945_v63  ;;  %v11029_v63 = vld [vmem:[%s16298_s1 + $0x1744] ss:$8 sps:$4 sm:$0xff]  }
 0x11b   :  { %7562 = vmatpush1.bf16.msra.mxu1 %v10940_v0  ;;  %v11024_v0 = vld [vmem:[%s16298_s1 + $0x540] ss:$8 sps:$4 sm:$0xff]  }
 0x11c   :  { %8336 = vmatpush1.bf16.msra.mxu0 %v10943_v1  ;;  %7563 = vmatprep.subr.bf16.mxu1 %v10948_v2  ;;  %v11027_v1 = vld [vmem:[%s16298_s1 + $0x1740] ss:$8 sps:$4 sm:$0xff]   ;;  %v11032_v2 = vld [vmem:[%s16298_s1 + $0x554] ss:$8 sps:$4 sm:$0xff]  }
 0x11d   :  { %8337 = vmatprep.subr.bf16.mxu0 %v10951_v3  ;;  %v11035_v3 = vld [vmem:[%s16298_s1 + $0x1754] ss:$8 sps:$4 sm:$0xff]  }
 0x11f   :  { %7564 = vmatpush1.bf16.msra.mxu1 %v10946_v4  ;;  %v11030_v4 = vld [vmem:[%s16298_s1 + $0x550] ss:$8 sps:$4 sm:$0xff]  }
 0x120   :  { %8338 = vmatpush1.bf16.msra.mxu0 %v10949_v5  ;;  %7565 = vmatprep.subr.bf16.mxu1 %v10954_v6  ;;  %v11033_v5 = vld [vmem:[%s16298_s1 + $0x1750] ss:$8 sps:$4 sm:$0xff]   ;;  %v11038_v6 = vld [vmem:[%s16298_s1 + $0x564] ss:$8 sps:$4 sm:$0xff]  }
 0x121   :  { %8339 = vmatprep.subr.bf16.mxu0 %v10957_v7  ;;  %v11041_v7 = vld [vmem:[%s16298_s1 + $0x1764] ss:$8 sps:$4 sm:$0xff]  }
 0x123   :  { %7566 = vmatpush1.bf16.msra.mxu1 %v10952_v8  ;;  %v11036_v8 = vld [vmem:[%s16298_s1 + $0x560] ss:$8 sps:$4 sm:$0xff]  }
 0x124   :  { %8340 = vmatpush1.bf16.msra.mxu0 %v10955_v9  ;;  %7567 = vmatprep.subr.bf16.mxu1 %v10960_v10  ;;  %v11039_v9 = vld [vmem:[%s16298_s1 + $0x1760] ss:$8 sps:$4 sm:$0xff]   ;;  %v11044_v10 = vld [vmem:[%s16298_s1 + $0x574] ss:$8 sps:$4 sm:$0xff]  }
 0x125   :  { %8341 = vmatprep.subr.bf16.mxu0 %v10963_v11  ;;  %v11047_v11 = vld [vmem:[%s16298_s1 + $0x1774] ss:$8 sps:$4 sm:$0xff]  }
 0x127   :  { %7568 = vmatpush1.bf16.msra.mxu1 %v10958_v12  ;;  %v11042_v12 = vld [vmem:[%s16298_s1 + $0x570] ss:$8 sps:$4 sm:$0xff]  }
 0x128   :  { %8342 = vmatpush1.bf16.msra.mxu0 %v10961_v13  ;;  %7569 = vmatprep.subr.bf16.mxu1 %v10966_v14  ;;  %v11045_v13 = vld [vmem:[%s16298_s1 + $0x1770] ss:$8 sps:$4 sm:$0xff]   ;;  %v11050_v14 = vld [vmem:[%s16298_s1 + $0x584] ss:$8 sps:$4 sm:$0xff]  }
 0x129   :  { %8343 = vmatprep.subr.bf16.mxu0 %v10969_v15  ;;  %v11053_v15 = vld [vmem:[%s16298_s1 + $0x1784] ss:$8 sps:$4 sm:$0xff]  }
 0x12b   :  { %7570 = vmatpush1.bf16.msra.mxu1 %v10964_v16  ;;  %v11048_v16 = vld [vmem:[%s16298_s1 + $0x580] ss:$8 sps:$4 sm:$0xff]  }
 0x12c   :  { %8344 = vmatpush1.bf16.msra.mxu0 %v10967_v17  ;;  %7571 = vmatprep.subr.bf16.mxu1 %v10972_v18  ;;  %v11051_v17 = vld [vmem:[%s16298_s1 + $0x1780] ss:$8 sps:$4 sm:$0xff]   ;;  %v11056_v18 = vld [vmem:[%s16298_s1 + $0x594] ss:$8 sps:$4 sm:$0xff]  }
 0x12d   :  { %8345 = vmatprep.subr.bf16.mxu0 %v10975_v19  ;;  %v11059_v19 = vld [vmem:[%s16298_s1 + $0x1794] ss:$8 sps:$4 sm:$0xff]  }
 0x12f   :  { %7572 = vmatpush1.bf16.msra.mxu1 %v10970_v20  ;;  %v11054_v20 = vld [vmem:[%s16298_s1 + $0x590] ss:$8 sps:$4 sm:$0xff]  }
 0x130   :  { %8346 = vmatpush1.bf16.msra.mxu0 %v10973_v21  ;;  %7573 = vmatprep.subr.bf16.mxu1 %v10978_v22  ;;  %v11057_v21 = vld [vmem:[%s16298_s1 + $0x1790] ss:$8 sps:$4 sm:$0xff]   ;;  %v11062_v22 = vld [vmem:[%s16298_s1 + $0x5a4] ss:$8 sps:$4 sm:$0xff]  }
 0x131   :  { %8347 = vmatprep.subr.bf16.mxu0 %v10981_v23  ;;  %v11065_v23 = vld [vmem:[%s16298_s1 + $0x17a4] ss:$8 sps:$4 sm:$0xff]  }
 0x133   :  { %7574 = vmatpush1.bf16.msra.mxu1 %v10976_v26  ;;  %v11060_v26 = vld [vmem:[%s16298_s1 + $0x5a0] ss:$8 sps:$4 sm:$0xff]  }
 0x134   :  { %8348 = vmatpush1.bf16.msra.mxu0 %v10979_v27  ;;  %7575 = vmatprep.subr.bf16.mxu1 %v10984_v32  ;;  %v11063_v27 = vld [vmem:[%s16298_s1 + $0x17a0] ss:$8 sps:$4 sm:$0xff]   ;;  %v11068_v32 = vld [vmem:[%s16298_s1 + $0x5b4] ss:$8 sps:$4 sm:$0xff]  }
 0x135   :  { %8349 = vmatprep.subr.bf16.mxu0 %v10987_v33  ;;  %v11071_v33 = vld [vmem:[%s16298_s1 + $0x17b4] ss:$8 sps:$4 sm:$0xff]  }
 0x137   :  { %7576 = vmatpush1.bf16.msra.mxu1 %v10982_v36  ;;  %v11066_v36 = vld [vmem:[%s16298_s1 + $0x5b0] ss:$8 sps:$4 sm:$0xff]  }
 0x138   :  { %8350 = vmatpush1.bf16.msra.mxu0 %v10985_v24  ;;  %7577 = vmatprep.subr.bf16.mxu1 %v10990_v25  ;;  %v11069_v24 = vld [vmem:[%s16298_s1 + $0x17b0] ss:$8 sps:$4 sm:$0xff]   ;;  %v11074_v25 = vld [vmem:[%s16298_s1 + $0x5c4] ss:$8 sps:$4 sm:$0xff]  }
 0x139   :  { %8351 = vmatprep.subr.bf16.mxu0 %v10993_v29  ;;  %v11077_v29 = vld [vmem:[%s16298_s1 + $0x17c4] ss:$8 sps:$4 sm:$0xff]  }
 0x13b   :  { %7578 = vmatpush1.bf16.msra.mxu1 %v10988_v30  ;;  %v11072_v30 = vld [vmem:[%s16298_s1 + $0x5c0] ss:$8 sps:$4 sm:$0xff]  }
 0x13c   :  { %8352 = vmatpush1.bf16.msra.mxu0 %v10991_v37  ;;  %7579 = vmatprep.subr.bf16.mxu1 %v10996_v40  ;;  %v11075_v37 = vld [vmem:[%s16298_s1 + $0x17c0] ss:$8 sps:$4 sm:$0xff]   ;;  %v11080_v40 = vld [vmem:[%s16298_s1 + $0x5d4] ss:$8 sps:$4 sm:$0xff]  }
 0x13d   :  { %8353 = vmatprep.subr.bf16.mxu0 %v10999_v41  ;;  %v11083_v41 = vld [vmem:[%s16298_s1 + $0x17d4] ss:$8 sps:$4 sm:$0xff]  }
 0x13f   :  { %7580 = vmatpush1.bf16.msra.mxu1 %v10994_v44  ;;  %v11078_v44 = vld [vmem:[%s16298_s1 + $0x5d0] ss:$8 sps:$4 sm:$0xff]  }
 0x140   :  { %8354 = vmatpush1.bf16.msra.mxu0 %v10997_v28  ;;  %7592 = vmatprep.subr.bf16.mxu1 %v11002_v31  ;;  %v11081_v28 = vld [vmem:[%s16298_s1 + $0x17d0] ss:$8 sps:$4 sm:$0xff]   ;;  %v11086_v31 = vld [vmem:[%s16298_s1 + $0x5e4] ss:$8 sps:$4 sm:$0xff]  }
 0x141   :  { %8366 = vmatprep.subr.bf16.mxu0 %v11005_v34  ;;  %v11089_v34 = vld [vmem:[%s16298_s1 + $0x17e4] ss:$8 sps:$4 sm:$0xff]  }
 0x142   :  { %7582 = vmatmul.mubr.bf16.vlgmr.msra.gmra.mrb[0].mxu1 %v9121_v48  ;;  %v11084_v48 = vld [vmem:[%s16298_s1 + $0x5e0] ss:$8 sps:$4 sm:$0xff]  }
 0x143   :  { %8356 = vmatmul.mubr.bf16.vlgmr.msra.gmra.mrb[0].mxu0 %v9157_v49  ;;  %7593 = vmatpush1.bf16.msra.mxu1 %v11000_v50  ;;  %v11087_v49 = vld [vmem:[%s16298_s1 + $0x17e0] ss:$8 sps:$4 sm:$0xff]   ;;  %v11092_v50 = vld [vmem:[%s16298_s1 + $0x5f4] ss:$8 sps:$4 sm:$0xff]  }
 0x144   :  { %8367 = vmatpush1.bf16.msra.mxu0 %v11003_v51  ;;  %7594 = vmatprep.subr.bf16.mxu1 %v11008_v52  ;;  %v11095_v51 = vld [vmem:[%s16298_s1 + $0x17f4] ss:$8 sps:$4 sm:$0xff]   ;;  %v11090_v52 = vld [vmem:[%s16298_s1 + $0x5f0] ss:$8 sps:$4 sm:$0xff]  }
 0x145   :  { %8368 = vmatprep.subr.bf16.mxu0 %v11011_v38  ;;  %7624 = vmatprep.mubr.bf16.mxu1 %v9124_v39  ;;  %v11093_v38 = vld [vmem:[%s16298_s1 + $0x17f0] ss:$8 sps:$4 sm:$0xff]   ;;  %v11098_v39 = vld [vmem:[%s16298_s1 + $0x604] ss:$8 sps:$4 sm:$0xff]  }
 0x146   :  { %8398 = vmatprep.mubr.bf16.mxu0 %v9160_v42  ;;  %v11101_v42 = vld [vmem:[%s16298_s1 + $0x1804] ss:$8 sps:$4 sm:$0xff]  }
 0x147   :  { %7595 = vmatpush1.bf16.msra.mxu1 %v11006_v43  ;;  %v13603_v43 = vld [vmem:[%s16299_s0 + $0x30] sm:$0xff] }
 0x148   :  { %8369 = vmatpush1.bf16.msra.mxu0 %v11009_v53  ;;  %7596 = vmatprep.subr.bf16.mxu1 %v11014_v54  ;;  %v13608_v53 = vld [vmem:[%s16299_s0 + $0x150] sm:$0xff]  ;;  %v13613_v54 = vld [vmem:[%s16299_s0 + $0xc0] sm:$0xff] }
 0x149   :  { %8370 = vmatprep.subr.bf16.mxu0 %v11017_v55  ;;  %v13618_v55 = vld [vmem:[%s16299_s0 + $0x1e0] sm:$0xff] }
 0x14b   :  { %7597 = vmatpush1.bf16.msra.mxu1 %v11012_v56  ;;  %v9123_v56 = vcombine.low %v13383_v35, %v13388_v45  ;;  %v11107_v35 = vld [vmem:[%s16298_s1 + $0x1814] ss:$8 sps:$4 sm:$0xff]   ;;  %v9126_v45 = vcombine.high %v13603_v43, %v13608_v53 }
 0x14c   :  { %8371 = vmatpush1.bf16.msra.mxu0 %v11015_v57  ;;  %7598 = vmatprep.subr.bf16.mxu1 %v11020_v58  ;;  %v9159_v57 = vcombine.low %v13393_v46, %v13398_v47  ;;  %v11096_v58 = vld [vmem:[%s16298_s1 + $0x600] ss:$8 sps:$4 sm:$0xff]   ;;  %v9162_v46 = vcombine.high %v13613_v54, %v13618_v55  ;;  %v11102_v47 = vld [vmem:[%s16298_s1 + $0x610] ss:$8 sps:$4 sm:$0xff]  }
 0x14d   :  { %8372 = vmatprep.subr.bf16.mxu0 %v11023_v59  ;;  %v11099_v59 = vld [vmem:[%s16298_s1 + $0x1800] ss:$8 sps:$4 sm:$0xff]  }
 0x14f   :  { %7599 = vmatpush1.bf16.msra.mxu1 %v11018_v60  ;;  %v11104_v60 = vld [vmem:[%s16298_s1 + $0x614] ss:$8 sps:$4 sm:$0xff]  }
 0x150   :  { %8373 = vmatpush1.bf16.msra.mxu0 %v11021_v61  ;;  %7600 = vmatprep.subr.bf16.mxu1 %v11026_v62  ;;  %v11105_v61 = vld [vmem:[%s16298_s1 + $0x1810] ss:$8 sps:$4 sm:$0xff]   ;;  %v11110_v62 = vld [vmem:[%s16298_s1 + $0x624] ss:$8 sps:$4 sm:$0xff]  }
 0x151   :  { %8374 = vmatprep.subr.bf16.mxu0 %v11029_v63  ;;  %v11113_v63 = vld [vmem:[%s16298_s1 + $0x1824] ss:$8 sps:$4 sm:$0xff]  }
 0x153   :  { %7601 = vmatpush1.bf16.msra.mxu1 %v11024_v0  ;;  %v11108_v0 = vld [vmem:[%s16298_s1 + $0x620] ss:$8 sps:$4 sm:$0xff]  }
 0x154   :  { %8375 = vmatpush1.bf16.msra.mxu0 %v11027_v1  ;;  %7602 = vmatprep.subr.bf16.mxu1 %v11032_v2  ;;  %v11111_v1 = vld [vmem:[%s16298_s1 + $0x1820] ss:$8 sps:$4 sm:$0xff]   ;;  %v11116_v2 = vld [vmem:[%s16298_s1 + $0x634] ss:$8 sps:$4 sm:$0xff]  }
 0x155   :  { %8376 = vmatprep.subr.bf16.mxu0 %v11035_v3  ;;  %v11119_v3 = vld [vmem:[%s16298_s1 + $0x1834] ss:$8 sps:$4 sm:$0xff]  }
 0x157   :  { %7603 = vmatpush1.bf16.msra.mxu1 %v11030_v4  ;;  %v11114_v4 = vld [vmem:[%s16298_s1 + $0x630] ss:$8 sps:$4 sm:$0xff]  }
 0x158   :  { %8377 = vmatpush1.bf16.msra.mxu0 %v11033_v5  ;;  %7604 = vmatprep.subr.bf16.mxu1 %v11038_v6  ;;  %v11117_v5 = vld [vmem:[%s16298_s1 + $0x1830] ss:$8 sps:$4 sm:$0xff]   ;;  %v11122_v6 = vld [vmem:[%s16298_s1 + $0x644] ss:$8 sps:$4 sm:$0xff]  }
 0x159   :  { %8378 = vmatprep.subr.bf16.mxu0 %v11041_v7  ;;  %v11125_v7 = vld [vmem:[%s16298_s1 + $0x1844] ss:$8 sps:$4 sm:$0xff]  }
 0x15b   :  { %7605 = vmatpush1.bf16.msra.mxu1 %v11036_v8  ;;  %v11120_v8 = vld [vmem:[%s16298_s1 + $0x640] ss:$8 sps:$4 sm:$0xff]  }
 0x15c   :  { %8379 = vmatpush1.bf16.msra.mxu0 %v11039_v9  ;;  %7606 = vmatprep.subr.bf16.mxu1 %v11044_v10  ;;  %v11123_v9 = vld [vmem:[%s16298_s1 + $0x1840] ss:$8 sps:$4 sm:$0xff]   ;;  %v11128_v10 = vld [vmem:[%s16298_s1 + $0x654] ss:$8 sps:$4 sm:$0xff]  }
 0x15d   :  { %8380 = vmatprep.subr.bf16.mxu0 %v11047_v11  ;;  %v11131_v11 = vld [vmem:[%s16298_s1 + $0x1854] ss:$8 sps:$4 sm:$0xff]  }
 0x15f   :  { %7607 = vmatpush1.bf16.msra.mxu1 %v11042_v12  ;;  %v11126_v12 = vld [vmem:[%s16298_s1 + $0x650] ss:$8 sps:$4 sm:$0xff]  }
 0x160   :  { %8381 = vmatpush1.bf16.msra.mxu0 %v11045_v13  ;;  %7608 = vmatprep.subr.bf16.mxu1 %v11050_v14  ;;  %v11129_v13 = vld [vmem:[%s16298_s1 + $0x1850] ss:$8 sps:$4 sm:$0xff]   ;;  %v11134_v14 = vld [vmem:[%s16298_s1 + $0x664] ss:$8 sps:$4 sm:$0xff]  }
 0x161   :  { %8382 = vmatprep.subr.bf16.mxu0 %v11053_v15  ;;  %v11137_v15 = vld [vmem:[%s16298_s1 + $0x1864] ss:$8 sps:$4 sm:$0xff]  }
 0x163   :  { %7609 = vmatpush1.bf16.msra.mxu1 %v11048_v16  ;;  %v11132_v16 = vld [vmem:[%s16298_s1 + $0x660] ss:$8 sps:$4 sm:$0xff]  }
 0x164   :  { %8383 = vmatpush1.bf16.msra.mxu0 %v11051_v17  ;;  %7610 = vmatprep.subr.bf16.mxu1 %v11056_v18  ;;  %v11135_v17 = vld [vmem:[%s16298_s1 + $0x1860] ss:$8 sps:$4 sm:$0xff]   ;;  %v11140_v18 = vld [vmem:[%s16298_s1 + $0x674] ss:$8 sps:$4 sm:$0xff]  }
 0x165   :  { %8384 = vmatprep.subr.bf16.mxu0 %v11059_v19  ;;  %v11143_v19 = vld [vmem:[%s16298_s1 + $0x1874] ss:$8 sps:$4 sm:$0xff]  }
 0x167   :  { %7611 = vmatpush1.bf16.msra.mxu1 %v11054_v20  ;;  %v11138_v20 = vld [vmem:[%s16298_s1 + $0x670] ss:$8 sps:$4 sm:$0xff]  }
 0x168   :  { %8385 = vmatpush1.bf16.msra.mxu0 %v11057_v21  ;;  %7612 = vmatprep.subr.bf16.mxu1 %v11062_v22  ;;  %v11141_v21 = vld [vmem:[%s16298_s1 + $0x1870] ss:$8 sps:$4 sm:$0xff]   ;;  %v11146_v22 = vld [vmem:[%s16298_s1 + $0x684] ss:$8 sps:$4 sm:$0xff]  }
 0x169   :  { %8386 = vmatprep.subr.bf16.mxu0 %v11065_v23  ;;  %v11149_v23 = vld [vmem:[%s16298_s1 + $0x1884] ss:$8 sps:$4 sm:$0xff]  }
 0x16b   :  { %7613 = vmatpush1.bf16.msra.mxu1 %v11060_v26  ;;  %v11144_v26 = vld [vmem:[%s16298_s1 + $0x680] ss:$8 sps:$4 sm:$0xff]  }
 0x16c   :  { %8387 = vmatpush1.bf16.msra.mxu0 %v11063_v27  ;;  %7614 = vmatprep.subr.bf16.mxu1 %v11068_v32  ;;  %v11147_v27 = vld [vmem:[%s16298_s1 + $0x1880] ss:$8 sps:$4 sm:$0xff]   ;;  %v11152_v32 = vld [vmem:[%s16298_s1 + $0x694] ss:$8 sps:$4 sm:$0xff]  }
 0x16d   :  { %8388 = vmatprep.subr.bf16.mxu0 %v11071_v33  ;;  %v11155_v33 = vld [vmem:[%s16298_s1 + $0x1894] ss:$8 sps:$4 sm:$0xff]  }
 0x16f   :  { %7615 = vmatpush1.bf16.msra.mxu1 %v11066_v36  ;;  %v11150_v36 = vld [vmem:[%s16298_s1 + $0x690] ss:$8 sps:$4 sm:$0xff]  }
 0x170   :  { %8389 = vmatpush1.bf16.msra.mxu0 %v11069_v24  ;;  %7616 = vmatprep.subr.bf16.mxu1 %v11074_v25  ;;  %v11153_v24 = vld [vmem:[%s16298_s1 + $0x1890] ss:$8 sps:$4 sm:$0xff]   ;;  %v11158_v25 = vld [vmem:[%s16298_s1 + $0x6a4] ss:$8 sps:$4 sm:$0xff]  }
 0x171   :  { %8390 = vmatprep.subr.bf16.mxu0 %v11077_v29  ;;  %v11161_v29 = vld [vmem:[%s16298_s1 + $0x18a4] ss:$8 sps:$4 sm:$0xff]  }
 0x173   :  { %7617 = vmatpush1.bf16.msra.mxu1 %v11072_v30  ;;  %v11156_v30 = vld [vmem:[%s16298_s1 + $0x6a0] ss:$8 sps:$4 sm:$0xff]  }
 0x174   :  { %8391 = vmatpush1.bf16.msra.mxu0 %v11075_v37  ;;  %7618 = vmatprep.subr.bf16.mxu1 %v11080_v40  ;;  %v11159_v37 = vld [vmem:[%s16298_s1 + $0x18a0] ss:$8 sps:$4 sm:$0xff]   ;;  %v11164_v40 = vld [vmem:[%s16298_s1 + $0x6b4] ss:$8 sps:$4 sm:$0xff]  }
 0x175   :  { %8392 = vmatprep.subr.bf16.mxu0 %v11083_v41  ;;  %v11167_v41 = vld [vmem:[%s16298_s1 + $0x18b4] ss:$8 sps:$4 sm:$0xff]  }
 0x177   :  { %7619 = vmatpush1.bf16.msra.mxu1 %v11078_v44  ;;  %v11162_v44 = vld [vmem:[%s16298_s1 + $0x6b0] ss:$8 sps:$4 sm:$0xff]  }
 0x178   :  { %8393 = vmatpush1.bf16.msra.mxu0 %v11081_v28  ;;  %7620 = vmatprep.subr.bf16.mxu1 %v11086_v31  ;;  %v11165_v28 = vld [vmem:[%s16298_s1 + $0x18b0] ss:$8 sps:$4 sm:$0xff]   ;;  %v11170_v31 = vld [vmem:[%s16298_s1 + $0x6c4] ss:$8 sps:$4 sm:$0xff]  }
 0x179   :  { %8394 = vmatprep.subr.bf16.mxu0 %v11089_v34  ;;  %v11173_v34 = vld [vmem:[%s16298_s1 + $0x18c4] ss:$8 sps:$4 sm:$0xff]  }
 0x17b   :  { %7621 = vmatpush1.bf16.msra.mxu1 %v11084_v48  ;;  %v11168_v48 = vld [vmem:[%s16298_s1 + $0x6c0] ss:$8 sps:$4 sm:$0xff]  }
 0x17c   :  { %8395 = vmatpush1.bf16.msra.mxu0 %v11087_v49  ;;  %7622 = vmatprep.subr.bf16.mxu1 %v11092_v50  ;;  %v11171_v49 = vld [vmem:[%s16298_s1 + $0x18c0] ss:$8 sps:$4 sm:$0xff]   ;;  %v11176_v50 = vld [vmem:[%s16298_s1 + $0x6d4] ss:$8 sps:$4 sm:$0xff]  }
 0x17d   :  { %8396 = vmatprep.subr.bf16.mxu0 %v11095_v51  ;;  %v11179_v51 = vld [vmem:[%s16298_s1 + $0x18d4] ss:$8 sps:$4 sm:$0xff]  }
 0x17f   :  { %7623 = vmatpush1.bf16.msra.mxu1 %v11090_v52  ;;  %v11174_v52 = vld [vmem:[%s16298_s1 + $0x6d0] ss:$8 sps:$4 sm:$0xff]  }
 0x180   :  { %8397 = vmatpush1.bf16.msra.mxu0 %v11093_v38  ;;  %7635 = vmatprep.subr.bf16.mxu1 %v11098_v39  ;;  %v11177_v38 = vld [vmem:[%s16298_s1 + $0x18d0] ss:$8 sps:$4 sm:$0xff]   ;;  %v11182_v39 = vld [vmem:[%s16298_s1 + $0x6e4] ss:$8 sps:$4 sm:$0xff]  }
 0x181   :  { %8409 = vmatprep.subr.bf16.mxu0 %v11101_v42  ;;  %v11185_v42 = vld [vmem:[%s16298_s1 + $0x18e4] ss:$8 sps:$4 sm:$0xff]  }
 0x182   :  { %7625 = vmatmul.mubr.bf16.vlgmr.msra.gmra.mrb[0].mxu1 %v9123_v56  ;;  %v11180_v56 = vld [vmem:[%s16298_s1 + $0x6e0] ss:$8 sps:$4 sm:$0xff]  }
 0x183   :  { %8399 = vmatmul.mubr.bf16.vlgmr.msra.gmra.mrb[0].mxu0 %v9159_v57  ;;  %7636 = vmatpush1.bf16.msra.mxu1 %v11096_v58  ;;  %v11183_v57 = vld [vmem:[%s16298_s1 + $0x18e0] ss:$8 sps:$4 sm:$0xff]   ;;  %v11188_v58 = vld [vmem:[%s16298_s1 + $0x6f4] ss:$8 sps:$4 sm:$0xff]  }
 0x184   :  { %8410 = vmatpush1.bf16.msra.mxu0 %v11099_v59  ;;  %7637 = vmatprep.subr.bf16.mxu1 %v11104_v60  ;;  %v11191_v59 = vld [vmem:[%s16298_s1 + $0x18f4] ss:$8 sps:$4 sm:$0xff]   ;;  %v11186_v60 = vld [vmem:[%s16298_s1 + $0x6f0] ss:$8 sps:$4 sm:$0xff]  }
 0x185   :  { %8411 = vmatprep.subr.bf16.mxu0 %v11107_v35  ;;  %7667 = vmatprep.mubr.bf16.mxu1 %v9126_v45  ;;  %v11189_v35 = vld [vmem:[%s16298_s1 + $0x18f0] ss:$8 sps:$4 sm:$0xff]   ;;  %v11194_v45 = vld [vmem:[%s16298_s1 + $0x704] ss:$8 sps:$4 sm:$0xff]  }
 0x186   :  { %8441 = vmatprep.mubr.bf16.mxu0 %v9162_v46  ;;  %v11197_v46 = vld [vmem:[%s16298_s1 + $0x1904] ss:$8 sps:$4 sm:$0xff]  }
 0x187   :  { %7638 = vmatpush1.bf16.msra.mxu1 %v11102_v47  ;;  %v13823_v47 = vld [vmem:[%s16299_s0 + $0x38] sm:$0xff] }
 0x188   :  { %8412 = vmatpush1.bf16.msra.mxu0 %v11105_v61  ;;  %7639 = vmatprep.subr.bf16.mxu1 %v11110_v62  ;;  %v13828_v61 = vld [vmem:[%s16299_s0 + $0x158] sm:$0xff]  ;;  %v13833_v62 = vld [vmem:[%s16299_s0 + $0xc8] sm:$0xff] }
 0x189   :  { %8413 = vmatprep.subr.bf16.mxu0 %v11113_v63  ;;  %v13838_v63 = vld [vmem:[%s16299_s0 + $0x1e8] sm:$0xff] }
 0x18b   :  { %7640 = vmatpush1.bf16.msra.mxu1 %v11108_v0  ;;  %v9125_v0 = vcombine.low %v13603_v43, %v13608_v53  ;;  %v11203_v43 = vld [vmem:[%s16298_s1 + $0x1914] ss:$8 sps:$4 sm:$0xff]   ;;  %v9128_v53 = vcombine.high %v13823_v47, %v13828_v61 }
 0x18c   :  { %8414 = vmatpush1.bf16.msra.mxu0 %v11111_v1  ;;  %7641 = vmatprep.subr.bf16.mxu1 %v11116_v2  ;;  %v9161_v1 = vcombine.low %v13613_v54, %v13618_v55  ;;  %v11192_v2 = vld [vmem:[%s16298_s1 + $0x700] ss:$8 sps:$4 sm:$0xff]   ;;  %v9164_v54 = vcombine.high %v13833_v62, %v13838_v63  ;;  %v11198_v55 = vld [vmem:[%s16298_s1 + $0x710] ss:$8 sps:$4 sm:$0xff]  }
 0x18d   :  { %8415 = vmatprep.subr.bf16.mxu0 %v11119_v3  ;;  %v11195_v3 = vld [vmem:[%s16298_s1 + $0x1900] ss:$8 sps:$4 sm:$0xff]  }
 0x18f   :  { %7642 = vmatpush1.bf16.msra.mxu1 %v11114_v4  ;;  %v11200_v4 = vld [vmem:[%s16298_s1 + $0x714] ss:$8 sps:$4 sm:$0xff]  }
 0x190   :  { %8416 = vmatpush1.bf16.msra.mxu0 %v11117_v5  ;;  %7643 = vmatprep.subr.bf16.mxu1 %v11122_v6  ;;  %v11201_v5 = vld [vmem:[%s16298_s1 + $0x1910] ss:$8 sps:$4 sm:$0xff]   ;;  %v11206_v6 = vld [vmem:[%s16298_s1 + $0x724] ss:$8 sps:$4 sm:$0xff]  }
 0x191   :  { %8417 = vmatprep.subr.bf16.mxu0 %v11125_v7  ;;  %v11209_v7 = vld [vmem:[%s16298_s1 + $0x1924] ss:$8 sps:$4 sm:$0xff]  }
 0x193   :  { %7644 = vmatpush1.bf16.msra.mxu1 %v11120_v8  ;;  %v11204_v8 = vld [vmem:[%s16298_s1 + $0x720] ss:$8 sps:$4 sm:$0xff]  }
 0x194   :  { %8418 = vmatpush1.bf16.msra.mxu0 %v11123_v9  ;;  %7645 = vmatprep.subr.bf16.mxu1 %v11128_v10  ;;  %v11207_v9 = vld [vmem:[%s16298_s1 + $0x1920] ss:$8 sps:$4 sm:$0xff]   ;;  %v11212_v10 = vld [vmem:[%s16298_s1 + $0x734] ss:$8 sps:$4 sm:$0xff]  }
 0x195   :  { %8419 = vmatprep.subr.bf16.mxu0 %v11131_v11  ;;  %v11215_v11 = vld [vmem:[%s16298_s1 + $0x1934] ss:$8 sps:$4 sm:$0xff]  }
 0x197   :  { %7646 = vmatpush1.bf16.msra.mxu1 %v11126_v12  ;;  %v11210_v12 = vld [vmem:[%s16298_s1 + $0x730] ss:$8 sps:$4 sm:$0xff]  }
 0x198   :  { %8420 = vmatpush1.bf16.msra.mxu0 %v11129_v13  ;;  %7647 = vmatprep.subr.bf16.mxu1 %v11134_v14  ;;  %v11213_v13 = vld [vmem:[%s16298_s1 + $0x1930] ss:$8 sps:$4 sm:$0xff]   ;;  %v11218_v14 = vld [vmem:[%s16298_s1 + $0x744] ss:$8 sps:$4 sm:$0xff]  }
 0x199   :  { %8421 = vmatprep.subr.bf16.mxu0 %v11137_v15  ;;  %v11221_v15 = vld [vmem:[%s16298_s1 + $0x1944] ss:$8 sps:$4 sm:$0xff]  }
 0x19b   :  { %7648 = vmatpush1.bf16.msra.mxu1 %v11132_v16  ;;  %v11216_v16 = vld [vmem:[%s16298_s1 + $0x740] ss:$8 sps:$4 sm:$0xff]  }
 0x19c   :  { %8422 = vmatpush1.bf16.msra.mxu0 %v11135_v17  ;;  %7649 = vmatprep.subr.bf16.mxu1 %v11140_v18  ;;  %v11219_v17 = vld [vmem:[%s16298_s1 + $0x1940] ss:$8 sps:$4 sm:$0xff]   ;;  %v11224_v18 = vld [vmem:[%s16298_s1 + $0x754] ss:$8 sps:$4 sm:$0xff]  }
 0x19d   :  { %8423 = vmatprep.subr.bf16.mxu0 %v11143_v19  ;;  %v11227_v19 = vld [vmem:[%s16298_s1 + $0x1954] ss:$8 sps:$4 sm:$0xff]  }
 0x19f   :  { %7650 = vmatpush1.bf16.msra.mxu1 %v11138_v20  ;;  %v11222_v20 = vld [vmem:[%s16298_s1 + $0x750] ss:$8 sps:$4 sm:$0xff]  }
 0x1a0   :  { %8424 = vmatpush1.bf16.msra.mxu0 %v11141_v21  ;;  %7651 = vmatprep.subr.bf16.mxu1 %v11146_v22  ;;  %v11225_v21 = vld [vmem:[%s16298_s1 + $0x1950] ss:$8 sps:$4 sm:$0xff]   ;;  %v11230_v22 = vld [vmem:[%s16298_s1 + $0x764] ss:$8 sps:$4 sm:$0xff]  }
 0x1a1   :  { %8425 = vmatprep.subr.bf16.mxu0 %v11149_v23  ;;  %v11233_v23 = vld [vmem:[%s16298_s1 + $0x1964] ss:$8 sps:$4 sm:$0xff]  }
 0x1a3   :  { %7652 = vmatpush1.bf16.msra.mxu1 %v11144_v26  ;;  %v11228_v26 = vld [vmem:[%s16298_s1 + $0x760] ss:$8 sps:$4 sm:$0xff]  }
 0x1a4   :  { %8426 = vmatpush1.bf16.msra.mxu0 %v11147_v27  ;;  %7653 = vmatprep.subr.bf16.mxu1 %v11152_v32  ;;  %v11231_v27 = vld [vmem:[%s16298_s1 + $0x1960] ss:$8 sps:$4 sm:$0xff]   ;;  %v11236_v32 = vld [vmem:[%s16298_s1 + $0x774] ss:$8 sps:$4 sm:$0xff]  }
 0x1a5   :  { %8427 = vmatprep.subr.bf16.mxu0 %v11155_v33  ;;  %v11239_v33 = vld [vmem:[%s16298_s1 + $0x1974] ss:$8 sps:$4 sm:$0xff]  }
 0x1a7   :  { %7654 = vmatpush1.bf16.msra.mxu1 %v11150_v36  ;;  %v11234_v36 = vld [vmem:[%s16298_s1 + $0x770] ss:$8 sps:$4 sm:$0xff]  }
 0x1a8   :  { %8428 = vmatpush1.bf16.msra.mxu0 %v11153_v24  ;;  %7655 = vmatprep.subr.bf16.mxu1 %v11158_v25  ;;  %v11237_v24 = vld [vmem:[%s16298_s1 + $0x1970] ss:$8 sps:$4 sm:$0xff]   ;;  %v11242_v25 = vld [vmem:[%s16298_s1 + $0x784] ss:$8 sps:$4 sm:$0xff]  }
 0x1a9   :  { %8429 = vmatprep.subr.bf16.mxu0 %v11161_v29  ;;  %v11245_v29 = vld [vmem:[%s16298_s1 + $0x1984] ss:$8 sps:$4 sm:$0xff]  }
 0x1ab   :  { %7656 = vmatpush1.bf16.msra.mxu1 %v11156_v30  ;;  %v11240_v30 = vld [vmem:[%s16298_s1 + $0x780] ss:$8 sps:$4 sm:$0xff]  }
 0x1ac   :  { %8430 = vmatpush1.bf16.msra.mxu0 %v11159_v37  ;;  %7657 = vmatprep.subr.bf16.mxu1 %v11164_v40  ;;  %v11243_v37 = vld [vmem:[%s16298_s1 + $0x1980] ss:$8 sps:$4 sm:$0xff]   ;;  %v11248_v40 = vld [vmem:[%s16298_s1 + $0x794] ss:$8 sps:$4 sm:$0xff]  }
 0x1ad   :  { %8431 = vmatprep.subr.bf16.mxu0 %v11167_v41  ;;  %v11251_v41 = vld [vmem:[%s16298_s1 + $0x1994] ss:$8 sps:$4 sm:$0xff]  }
 0x1af   :  { %7658 = vmatpush1.bf16.msra.mxu1 %v11162_v44  ;;  %v11246_v44 = vld [vmem:[%s16298_s1 + $0x790] ss:$8 sps:$4 sm:$0xff]  }
 0x1b0   :  { %8432 = vmatpush1.bf16.msra.mxu0 %v11165_v28  ;;  %7659 = vmatprep.subr.bf16.mxu1 %v11170_v31  ;;  %v11249_v28 = vld [vmem:[%s16298_s1 + $0x1990] ss:$8 sps:$4 sm:$0xff]   ;;  %v11254_v31 = vld [vmem:[%s16298_s1 + $0x7a4] ss:$8 sps:$4 sm:$0xff]  }
 0x1b1   :  { %8433 = vmatprep.subr.bf16.mxu0 %v11173_v34  ;;  %v11257_v34 = vld [vmem:[%s16298_s1 + $0x19a4] ss:$8 sps:$4 sm:$0xff]  }
 0x1b3   :  { %7660 = vmatpush1.bf16.msra.mxu1 %v11168_v48  ;;  %v11252_v48 = vld [vmem:[%s16298_s1 + $0x7a0] ss:$8 sps:$4 sm:$0xff]  }
 0x1b4   :  { %8434 = vmatpush1.bf16.msra.mxu0 %v11171_v49  ;;  %7661 = vmatprep.subr.bf16.mxu1 %v11176_v50  ;;  %v11255_v49 = vld [vmem:[%s16298_s1 + $0x19a0] ss:$8 sps:$4 sm:$0xff]   ;;  %v11260_v50 = vld [vmem:[%s16298_s1 + $0x7b4] ss:$8 sps:$4 sm:$0xff]  }
 0x1b5   :  { %8435 = vmatprep.subr.bf16.mxu0 %v11179_v51  ;;  %v11263_v51 = vld [vmem:[%s16298_s1 + $0x19b4] ss:$8 sps:$4 sm:$0xff]  }
 0x1b7   :  { %7662 = vmatpush1.bf16.msra.mxu1 %v11174_v52  ;;  %v11258_v52 = vld [vmem:[%s16298_s1 + $0x7b0] ss:$8 sps:$4 sm:$0xff]  }
 0x1b8   :  { %8436 = vmatpush1.bf16.msra.mxu0 %v11177_v38  ;;  %7663 = vmatprep.subr.bf16.mxu1 %v11182_v39  ;;  %v11261_v38 = vld [vmem:[%s16298_s1 + $0x19b0] ss:$8 sps:$4 sm:$0xff]   ;;  %v11266_v39 = vld [vmem:[%s16298_s1 + $0x7c4] ss:$8 sps:$4 sm:$0xff]  }
 0x1b9   :  { %8437 = vmatprep.subr.bf16.mxu0 %v11185_v42  ;;  %v11269_v42 = vld [vmem:[%s16298_s1 + $0x19c4] ss:$8 sps:$4 sm:$0xff]  }
 0x1bb   :  { %7664 = vmatpush1.bf16.msra.mxu1 %v11180_v56  ;;  %v11264_v56 = vld [vmem:[%s16298_s1 + $0x7c0] ss:$8 sps:$4 sm:$0xff]  }
 0x1bc   :  { %8438 = vmatpush1.bf16.msra.mxu0 %v11183_v57  ;;  %7665 = vmatprep.subr.bf16.mxu1 %v11188_v58  ;;  %v11267_v57 = vld [vmem:[%s16298_s1 + $0x19c0] ss:$8 sps:$4 sm:$0xff]   ;;  %v11272_v58 = vld [vmem:[%s16298_s1 + $0x7d4] ss:$8 sps:$4 sm:$0xff]  }
 0x1bd   :  { %8439 = vmatprep.subr.bf16.mxu0 %v11191_v59  ;;  %v11275_v59 = vld [vmem:[%s16298_s1 + $0x19d4] ss:$8 sps:$4 sm:$0xff]  }
 0x1bf   :  { %7666 = vmatpush1.bf16.msra.mxu1 %v11186_v60  ;;  %v11270_v60 = vld [vmem:[%s16298_s1 + $0x7d0] ss:$8 sps:$4 sm:$0xff]  }
 0x1c0   :  { %8440 = vmatpush1.bf16.msra.mxu0 %v11189_v35  ;;  %7678 = vmatprep.subr.bf16.mxu1 %v11194_v45  ;;  %v11273_v35 = vld [vmem:[%s16298_s1 + $0x19d0] ss:$8 sps:$4 sm:$0xff]   ;;  %v11278_v45 = vld [vmem:[%s16298_s1 + $0x7e4] ss:$8 sps:$4 sm:$0xff]  }
 0x1c1   :  { %8452 = vmatprep.subr.bf16.mxu0 %v11197_v46  ;;  %v11281_v46 = vld [vmem:[%s16298_s1 + $0x19e4] ss:$8 sps:$4 sm:$0xff]  }
 0x1c2   :  { %7668 = vmatmul.mubr.bf16.vlgmr.msra.gmra.mrb[0].mxu1 %v9125_v0  ;;  %v11276_v0 = vld [vmem:[%s16298_s1 + $0x7e0] ss:$8 sps:$4 sm:$0xff]  }
 0x1c3   :  { %8442 = vmatmul.mubr.bf16.vlgmr.msra.gmra.mrb[0].mxu0 %v9161_v1  ;;  %7679 = vmatpush1.bf16.msra.mxu1 %v11192_v2  ;;  %v11279_v1 = vld [vmem:[%s16298_s1 + $0x19e0] ss:$8 sps:$4 sm:$0xff]   ;;  %v11284_v2 = vld [vmem:[%s16298_s1 + $0x7f4] ss:$8 sps:$4 sm:$0xff]  }
 0x1c4   :  { %8453 = vmatpush1.bf16.msra.mxu0 %v11195_v3  ;;  %7680 = vmatprep.subr.bf16.mxu1 %v11200_v4  ;;  %v11287_v3 = vld [vmem:[%s16298_s1 + $0x19f4] ss:$8 sps:$4 sm:$0xff]   ;;  %v11282_v4 = vld [vmem:[%s16298_s1 + $0x7f0] ss:$8 sps:$4 sm:$0xff]  }
 0x1c5   :  { %8454 = vmatprep.subr.bf16.mxu0 %v11203_v43  ;;  %7710 = vmatprep.mubr.bf16.mxu1 %v9128_v53  ;;  %v11285_v43 = vld [vmem:[%s16298_s1 + $0x19f0] ss:$8 sps:$4 sm:$0xff]   ;;  %v11290_v53 = vld [vmem:[%s16298_s1 + $0x804] ss:$8 sps:$4 sm:$0xff]  }
 0x1c6   :  { %8484 = vmatprep.mubr.bf16.mxu0 %v9164_v54  ;;  %v11293_v54 = vld [vmem:[%s16298_s1 + $0x1a04] ss:$8 sps:$4 sm:$0xff]  }
 0x1c7   :  { %7681 = vmatpush1.bf16.msra.mxu1 %v11198_v55  ;;  %v14043_v55 = vld [vmem:[%s16299_s0 + $0x40] sm:$0xff] }
 0x1c8   :  { %8455 = vmatpush1.bf16.msra.mxu0 %v11201_v5  ;;  %7682 = vmatprep.subr.bf16.mxu1 %v11206_v6  ;;  %v14048_v5 = vld [vmem:[%s16299_s0 + $0x160] sm:$0xff]  ;;  %v14053_v6 = vld [vmem:[%s16299_s0 + $0xd0] sm:$0xff] }
 0x1c9   :  { %8456 = vmatprep.subr.bf16.mxu0 %v11209_v7  ;;  %v14058_v7 = vld [vmem:[%s16299_s0 + $0x1f0] sm:$0xff] }
 0x1cb   :  { %7683 = vmatpush1.bf16.msra.mxu1 %v11204_v8  ;;  %v9127_v8 = vcombine.low %v13823_v47, %v13828_v61  ;;  %v11299_v47 = vld [vmem:[%s16298_s1 + $0x1a14] ss:$8 sps:$4 sm:$0xff]   ;;  %v9130_v61 = vcombine.high %v14043_v55, %v14048_v5 }
 0x1cc   :  { %8457 = vmatpush1.bf16.msra.mxu0 %v11207_v9  ;;  %7684 = vmatprep.subr.bf16.mxu1 %v11212_v10  ;;  %v9163_v9 = vcombine.low %v13833_v62, %v13838_v63  ;;  %v11288_v10 = vld [vmem:[%s16298_s1 + $0x800] ss:$8 sps:$4 sm:$0xff]   ;;  %v9166_v62 = vcombine.high %v14053_v6, %v14058_v7  ;;  %v11294_v63 = vld [vmem:[%s16298_s1 + $0x810] ss:$8 sps:$4 sm:$0xff]  }
 0x1cd   :  { %8458 = vmatprep.subr.bf16.mxu0 %v11215_v11  ;;  %v11291_v11 = vld [vmem:[%s16298_s1 + $0x1a00] ss:$8 sps:$4 sm:$0xff]  }
 0x1cf   :  { %7685 = vmatpush1.bf16.msra.mxu1 %v11210_v12  ;;  %v11296_v12 = vld [vmem:[%s16298_s1 + $0x814] ss:$8 sps:$4 sm:$0xff]  }
 0x1d0   :  { %8459 = vmatpush1.bf16.msra.mxu0 %v11213_v13  ;;  %7686 = vmatprep.subr.bf16.mxu1 %v11218_v14  ;;  %v11297_v13 = vld [vmem:[%s16298_s1 + $0x1a10] ss:$8 sps:$4 sm:$0xff]   ;;  %v11302_v14 = vld [vmem:[%s16298_s1 + $0x824] ss:$8 sps:$4 sm:$0xff]  }
 0x1d1   :  { %8460 = vmatprep.subr.bf16.mxu0 %v11221_v15  ;;  %v11305_v15 = vld [vmem:[%s16298_s1 + $0x1a24] ss:$8 sps:$4 sm:$0xff]  }
 0x1d3   :  { %7687 = vmatpush1.bf16.msra.mxu1 %v11216_v16  ;;  %v11300_v16 = vld [vmem:[%s16298_s1 + $0x820] ss:$8 sps:$4 sm:$0xff]  }
 0x1d4   :  { %8461 = vmatpush1.bf16.msra.mxu0 %v11219_v17  ;;  %7688 = vmatprep.subr.bf16.mxu1 %v11224_v18  ;;  %v11303_v17 = vld [vmem:[%s16298_s1 + $0x1a20] ss:$8 sps:$4 sm:$0xff]   ;;  %v11308_v18 = vld [vmem:[%s16298_s1 + $0x834] ss:$8 sps:$4 sm:$0xff]  }
 0x1d5   :  { %8462 = vmatprep.subr.bf16.mxu0 %v11227_v19  ;;  %v11311_v19 = vld [vmem:[%s16298_s1 + $0x1a34] ss:$8 sps:$4 sm:$0xff]  }
 0x1d7   :  { %7689 = vmatpush1.bf16.msra.mxu1 %v11222_v20  ;;  %v11306_v20 = vld [vmem:[%s16298_s1 + $0x830] ss:$8 sps:$4 sm:$0xff]  }
 0x1d8   :  { %8463 = vmatpush1.bf16.msra.mxu0 %v11225_v21  ;;  %7690 = vmatprep.subr.bf16.mxu1 %v11230_v22  ;;  %v11309_v21 = vld [vmem:[%s16298_s1 + $0x1a30] ss:$8 sps:$4 sm:$0xff]   ;;  %v11314_v22 = vld [vmem:[%s16298_s1 + $0x844] ss:$8 sps:$4 sm:$0xff]  }
 0x1d9   :  { %8464 = vmatprep.subr.bf16.mxu0 %v11233_v23  ;;  %v11317_v23 = vld [vmem:[%s16298_s1 + $0x1a44] ss:$8 sps:$4 sm:$0xff]  }
 0x1db   :  { %7691 = vmatpush1.bf16.msra.mxu1 %v11228_v26  ;;  %v11312_v26 = vld [vmem:[%s16298_s1 + $0x840] ss:$8 sps:$4 sm:$0xff]  }
 0x1dc   :  { %8465 = vmatpush1.bf16.msra.mxu0 %v11231_v27  ;;  %7692 = vmatprep.subr.bf16.mxu1 %v11236_v32  ;;  %v11315_v27 = vld [vmem:[%s16298_s1 + $0x1a40] ss:$8 sps:$4 sm:$0xff]   ;;  %v11320_v32 = vld [vmem:[%s16298_s1 + $0x854] ss:$8 sps:$4 sm:$0xff]  }
 0x1dd   :  { %8466 = vmatprep.subr.bf16.mxu0 %v11239_v33  ;;  %v11323_v33 = vld [vmem:[%s16298_s1 + $0x1a54] ss:$8 sps:$4 sm:$0xff]  }
 0x1df   :  { %7693 = vmatpush1.bf16.msra.mxu1 %v11234_v36  ;;  %v11318_v36 = vld [vmem:[%s16298_s1 + $0x850] ss:$8 sps:$4 sm:$0xff]  }
 0x1e0   :  { %8467 = vmatpush1.bf16.msra.mxu0 %v11237_v24  ;;  %7694 = vmatprep.subr.bf16.mxu1 %v11242_v25  ;;  %v11321_v24 = vld [vmem:[%s16298_s1 + $0x1a50] ss:$8 sps:$4 sm:$0xff]   ;;  %v11326_v25 = vld [vmem:[%s16298_s1 + $0x864] ss:$8 sps:$4 sm:$0xff]  }
 0x1e1   :  { %8468 = vmatprep.subr.bf16.mxu0 %v11245_v29  ;;  %v11329_v29 = vld [vmem:[%s16298_s1 + $0x1a64] ss:$8 sps:$4 sm:$0xff]  }
 0x1e3   :  { %7695 = vmatpush1.bf16.msra.mxu1 %v11240_v30  ;;  %v11324_v30 = vld [vmem:[%s16298_s1 + $0x860] ss:$8 sps:$4 sm:$0xff]  }
 0x1e4   :  { %8469 = vmatpush1.bf16.msra.mxu0 %v11243_v37  ;;  %7696 = vmatprep.subr.bf16.mxu1 %v11248_v40  ;;  %v11327_v37 = vld [vmem:[%s16298_s1 + $0x1a60] ss:$8 sps:$4 sm:$0xff]   ;;  %v11332_v40 = vld [vmem:[%s16298_s1 + $0x874] ss:$8 sps:$4 sm:$0xff]  }
 0x1e5   :  { %8470 = vmatprep.subr.bf16.mxu0 %v11251_v41  ;;  %v11335_v41 = vld [vmem:[%s16298_s1 + $0x1a74] ss:$8 sps:$4 sm:$0xff]  }
 0x1e7   :  { %7697 = vmatpush1.bf16.msra.mxu1 %v11246_v44  ;;  %v11330_v44 = vld [vmem:[%s16298_s1 + $0x870] ss:$8 sps:$4 sm:$0xff]  }
 0x1e8   :  { %8471 = vmatpush1.bf16.msra.mxu0 %v11249_v28  ;;  %7698 = vmatprep.subr.bf16.mxu1 %v11254_v31  ;;  %v11333_v28 = vld [vmem:[%s16298_s1 + $0x1a70] ss:$8 sps:$4 sm:$0xff]   ;;  %v11338_v31 = vld [vmem:[%s16298_s1 + $0x884] ss:$8 sps:$4 sm:$0xff]  }
 0x1e9   :  { %8472 = vmatprep.subr.bf16.mxu0 %v11257_v34  ;;  %v11341_v34 = vld [vmem:[%s16298_s1 + $0x1a84] ss:$8 sps:$4 sm:$0xff]  }
 0x1eb   :  { %7699 = vmatpush1.bf16.msra.mxu1 %v11252_v48  ;;  %v11336_v48 = vld [vmem:[%s16298_s1 + $0x880] ss:$8 sps:$4 sm:$0xff]  }
 0x1ec   :  { %8473 = vmatpush1.bf16.msra.mxu0 %v11255_v49  ;;  %7700 = vmatprep.subr.bf16.mxu1 %v11260_v50  ;;  %v11339_v49 = vld [vmem:[%s16298_s1 + $0x1a80] ss:$8 sps:$4 sm:$0xff]   ;;  %v11344_v50 = vld [vmem:[%s16298_s1 + $0x894] ss:$8 sps:$4 sm:$0xff]  }
 0x1ed   :  { %8474 = vmatprep.subr.bf16.mxu0 %v11263_v51  ;;  %v11347_v51 = vld [vmem:[%s16298_s1 + $0x1a94] ss:$8 sps:$4 sm:$0xff]  }
 0x1ef   :  { %7701 = vmatpush1.bf16.msra.mxu1 %v11258_v52  ;;  %v11342_v52 = vld [vmem:[%s16298_s1 + $0x890] ss:$8 sps:$4 sm:$0xff]  }
 0x1f0   :  { %8475 = vmatpush1.bf16.msra.mxu0 %v11261_v38  ;;  %7702 = vmatprep.subr.bf16.mxu1 %v11266_v39  ;;  %v11345_v38 = vld [vmem:[%s16298_s1 + $0x1a90] ss:$8 sps:$4 sm:$0xff]   ;;  %v11350_v39 = vld [vmem:[%s16298_s1 + $0x8a4] ss:$8 sps:$4 sm:$0xff]  }
 0x1f1   :  { %8476 = vmatprep.subr.bf16.mxu0 %v11269_v42  ;;  %v11353_v42 = vld [vmem:[%s16298_s1 + $0x1aa4] ss:$8 sps:$4 sm:$0xff]  }
 0x1f3   :  { %7703 = vmatpush1.bf16.msra.mxu1 %v11264_v56  ;;  %v11348_v56 = vld [vmem:[%s16298_s1 + $0x8a0] ss:$8 sps:$4 sm:$0xff]  }
 0x1f4   :  { %8477 = vmatpush1.bf16.msra.mxu0 %v11267_v57  ;;  %7704 = vmatprep.subr.bf16.mxu1 %v11272_v58  ;;  %v11351_v57 = vld [vmem:[%s16298_s1 + $0x1aa0] ss:$8 sps:$4 sm:$0xff]   ;;  %v11356_v58 = vld [vmem:[%s16298_s1 + $0x8b4] ss:$8 sps:$4 sm:$0xff]  }
 0x1f5   :  { %8478 = vmatprep.subr.bf16.mxu0 %v11275_v59  ;;  %v11359_v59 = vld [vmem:[%s16298_s1 + $0x1ab4] ss:$8 sps:$4 sm:$0xff]  }
 0x1f7   :  { %7705 = vmatpush1.bf16.msra.mxu1 %v11270_v60  ;;  %v11354_v60 = vld [vmem:[%s16298_s1 + $0x8b0] ss:$8 sps:$4 sm:$0xff]  }
 0x1f8   :  { %8479 = vmatpush1.bf16.msra.mxu0 %v11273_v35  ;;  %7706 = vmatprep.subr.bf16.mxu1 %v11278_v45  ;;  %v11357_v35 = vld [vmem:[%s16298_s1 + $0x1ab0] ss:$8 sps:$4 sm:$0xff]   ;;  %v11362_v45 = vld [vmem:[%s16298_s1 + $0x8c4] ss:$8 sps:$4 sm:$0xff]  }
 0x1f9   :  { %8480 = vmatprep.subr.bf16.mxu0 %v11281_v46  ;;  %v11365_v46 = vld [vmem:[%s16298_s1 + $0x1ac4] ss:$8 sps:$4 sm:$0xff]  }
 0x1fb   :  { %7707 = vmatpush1.bf16.msra.mxu1 %v11276_v0  ;;  %v11360_v0 = vld [vmem:[%s16298_s1 + $0x8c0] ss:$8 sps:$4 sm:$0xff]  }
 0x1fc   :  { %8481 = vmatpush1.bf16.msra.mxu0 %v11279_v1  ;;  %7708 = vmatprep.subr.bf16.mxu1 %v11284_v2  ;;  %v11363_v1 = vld [vmem:[%s16298_s1 + $0x1ac0] ss:$8 sps:$4 sm:$0xff]   ;;  %v11368_v2 = vld [vmem:[%s16298_s1 + $0x8d4] ss:$8 sps:$4 sm:$0xff]  }
 0x1fd   :  { %8482 = vmatprep.subr.bf16.mxu0 %v11287_v3  ;;  %v11371_v3 = vld [vmem:[%s16298_s1 + $0x1ad4] ss:$8 sps:$4 sm:$0xff]  }
 0x1ff   :  { %7709 = vmatpush1.bf16.msra.mxu1 %v11282_v4  ;;  %v11366_v4 = vld [vmem:[%s16298_s1 + $0x8d0] ss:$8 sps:$4 sm:$0xff]  }
 0x200   :  { %8483 = vmatpush1.bf16.msra.mxu0 %v11285_v43  ;;  %7721 = vmatprep.subr.bf16.mxu1 %v11290_v53  ;;  %v11369_v43 = vld [vmem:[%s16298_s1 + $0x1ad0] ss:$8 sps:$4 sm:$0xff]   ;;  %v11374_v53 = vld [vmem:[%s16298_s1 + $0x8e4] ss:$8 sps:$4 sm:$0xff]  }
 0x201   :  { %8495 = vmatprep.subr.bf16.mxu0 %v11293_v54  ;;  %v11377_v54 = vld [vmem:[%s16298_s1 + $0x1ae4] ss:$8 sps:$4 sm:$0xff]  }
 0x202   :  { %7711 = vmatmul.mubr.bf16.vlgmr.msra.gmra.mrb[0].mxu1 %v9127_v8  ;;  %v11372_v8 = vld [vmem:[%s16298_s1 + $0x8e0] ss:$8 sps:$4 sm:$0xff]  }
 0x203   :  { %8485 = vmatmul.mubr.bf16.vlgmr.msra.gmra.mrb[0].mxu0 %v9163_v9  ;;  %7722 = vmatpush1.bf16.msra.mxu1 %v11288_v10  ;;  %v11375_v9 = vld [vmem:[%s16298_s1 + $0x1ae0] ss:$8 sps:$4 sm:$0xff]   ;;  %v11380_v10 = vld [vmem:[%s16298_s1 + $0x8f4] ss:$8 sps:$4 sm:$0xff]  }
 0x204   :  { %8496 = vmatpush1.bf16.msra.mxu0 %v11291_v11  ;;  %7723 = vmatprep.subr.bf16.mxu1 %v11296_v12  ;;  %v11383_v11 = vld [vmem:[%s16298_s1 + $0x1af4] ss:$8 sps:$4 sm:$0xff]   ;;  %v11378_v12 = vld [vmem:[%s16298_s1 + $0x8f0] ss:$8 sps:$4 sm:$0xff]  }
 0x205   :  { %8497 = vmatprep.subr.bf16.mxu0 %v11299_v47  ;;  %7753 = vmatprep.mubr.bf16.mxu1 %v9130_v61  ;;  %v11381_v47 = vld [vmem:[%s16298_s1 + $0x1af0] ss:$8 sps:$4 sm:$0xff]   ;;  %v11386_v61 = vld [vmem:[%s16298_s1 + $0x904] ss:$8 sps:$4 sm:$0xff]  }
 0x206   :  { %8527 = vmatprep.mubr.bf16.mxu0 %v9166_v62  ;;  %v11389_v62 = vld [vmem:[%s16298_s1 + $0x1b04] ss:$8 sps:$4 sm:$0xff]  }
 0x207   :  { %7724 = vmatpush1.bf16.msra.mxu1 %v11294_v63  ;;  %v14263_v63 = vld [vmem:[%s16299_s0 + $0x48] sm:$0xff] }
 0x208   :  { %8498 = vmatpush1.bf16.msra.mxu0 %v11297_v13  ;;  %7725 = vmatprep.subr.bf16.mxu1 %v11302_v14  ;;  %v14268_v13 = vld [vmem:[%s16299_s0 + $0x168] sm:$0xff]  ;;  %v14273_v14 = vld [vmem:[%s16299_s0 + $0xd8] sm:$0xff] }
 0x209   :  { %8499 = vmatprep.subr.bf16.mxu0 %v11305_v15  ;;  %v14278_v15 = vld [vmem:[%s16299_s0 + $0x1f8] sm:$0xff] }
 0x20b   :  { %7726 = vmatpush1.bf16.msra.mxu1 %v11300_v16  ;;  %v9129_v16 = vcombine.low %v14043_v55, %v14048_v5  ;;  %v11395_v55 = vld [vmem:[%s16298_s1 + $0x1b14] ss:$8 sps:$4 sm:$0xff]   ;;  %v9132_v5 = vcombine.high %v14263_v63, %v14268_v13 }
 0x20c   :  { %8500 = vmatpush1.bf16.msra.mxu0 %v11303_v17  ;;  %7727 = vmatprep.subr.bf16.mxu1 %v11308_v18  ;;  %v9165_v17 = vcombine.low %v14053_v6, %v14058_v7  ;;  %v11384_v18 = vld [vmem:[%s16298_s1 + $0x900] ss:$8 sps:$4 sm:$0xff]   ;;  %v9168_v6 = vcombine.high %v14273_v14, %v14278_v15  ;;  %v11390_v7 = vld [vmem:[%s16298_s1 + $0x910] ss:$8 sps:$4 sm:$0xff]  }
 0x20d   :  { %8501 = vmatprep.subr.bf16.mxu0 %v11311_v19  ;;  %v11387_v19 = vld [vmem:[%s16298_s1 + $0x1b00] ss:$8 sps:$4 sm:$0xff]  }
 0x20f   :  { %7728 = vmatpush1.bf16.msra.mxu1 %v11306_v20  ;;  %v11392_v20 = vld [vmem:[%s16298_s1 + $0x914] ss:$8 sps:$4 sm:$0xff]  }
 0x210   :  { %8502 = vmatpush1.bf16.msra.mxu0 %v11309_v21  ;;  %7729 = vmatprep.subr.bf16.mxu1 %v11314_v22  ;;  %v11393_v21 = vld [vmem:[%s16298_s1 + $0x1b10] ss:$8 sps:$4 sm:$0xff]   ;;  %v11398_v22 = vld [vmem:[%s16298_s1 + $0x924] ss:$8 sps:$4 sm:$0xff]  }
 0x211   :  { %8503 = vmatprep.subr.bf16.mxu0 %v11317_v23  ;;  %v11401_v23 = vld [vmem:[%s16298_s1 + $0x1b24] ss:$8 sps:$4 sm:$0xff]  }
 0x213   :  { %7730 = vmatpush1.bf16.msra.mxu1 %v11312_v26  ;;  %v11396_v26 = vld [vmem:[%s16298_s1 + $0x920] ss:$8 sps:$4 sm:$0xff]  }
 0x214   :  { %8504 = vmatpush1.bf16.msra.mxu0 %v11315_v27  ;;  %7731 = vmatprep.subr.bf16.mxu1 %v11320_v32  ;;  %v11399_v27 = vld [vmem:[%s16298_s1 + $0x1b20] ss:$8 sps:$4 sm:$0xff]   ;;  %v11404_v32 = vld [vmem:[%s16298_s1 + $0x934] ss:$8 sps:$4 sm:$0xff]  }
 0x215   :  { %8505 = vmatprep.subr.bf16.mxu0 %v11323_v33  ;;  %v11407_v33 = vld [vmem:[%s16298_s1 + $0x1b34] ss:$8 sps:$4 sm:$0xff]  }
 0x217   :  { %7732 = vmatpush1.bf16.msra.mxu1 %v11318_v36  ;;  %v11402_v36 = vld [vmem:[%s16298_s1 + $0x930] ss:$8 sps:$4 sm:$0xff]  }
 0x218   :  { %8506 = vmatpush1.bf16.msra.mxu0 %v11321_v24  ;;  %7733 = vmatprep.subr.bf16.mxu1 %v11326_v25  ;;  %v11405_v24 = vld [vmem:[%s16298_s1 + $0x1b30] ss:$8 sps:$4 sm:$0xff]   ;;  %v11410_v25 = vld [vmem:[%s16298_s1 + $0x944] ss:$8 sps:$4 sm:$0xff]  }
 0x219   :  { %8507 = vmatprep.subr.bf16.mxu0 %v11329_v29  ;;  %v11413_v29 = vld [vmem:[%s16298_s1 + $0x1b44] ss:$8 sps:$4 sm:$0xff]  }
 0x21b   :  { %7734 = vmatpush1.bf16.msra.mxu1 %v11324_v30  ;;  %v11408_v30 = vld [vmem:[%s16298_s1 + $0x940] ss:$8 sps:$4 sm:$0xff]  }
 0x21c   :  { %8508 = vmatpush1.bf16.msra.mxu0 %v11327_v37  ;;  %7735 = vmatprep.subr.bf16.mxu1 %v11332_v40  ;;  %v11411_v37 = vld [vmem:[%s16298_s1 + $0x1b40] ss:$8 sps:$4 sm:$0xff]   ;;  %v11416_v40 = vld [vmem:[%s16298_s1 + $0x954] ss:$8 sps:$4 sm:$0xff]  }
 0x21d   :  { %8509 = vmatprep.subr.bf16.mxu0 %v11335_v41  ;;  %v11419_v41 = vld [vmem:[%s16298_s1 + $0x1b54] ss:$8 sps:$4 sm:$0xff]  }
 0x21f   :  { %7736 = vmatpush1.bf16.msra.mxu1 %v11330_v44  ;;  %v11414_v44 = vld [vmem:[%s16298_s1 + $0x950] ss:$8 sps:$4 sm:$0xff]  }
 0x220   :  { %8510 = vmatpush1.bf16.msra.mxu0 %v11333_v28  ;;  %7737 = vmatprep.subr.bf16.mxu1 %v11338_v31  ;;  %v11417_v28 = vld [vmem:[%s16298_s1 + $0x1b50] ss:$8 sps:$4 sm:$0xff]   ;;  %v11422_v31 = vld [vmem:[%s16298_s1 + $0x964] ss:$8 sps:$4 sm:$0xff]  }
 0x221   :  { %8511 = vmatprep.subr.bf16.mxu0 %v11341_v34  ;;  %v11425_v34 = vld [vmem:[%s16298_s1 + $0x1b64] ss:$8 sps:$4 sm:$0xff]  }
 0x223   :  { %7738 = vmatpush1.bf16.msra.mxu1 %v11336_v48  ;;  %v11420_v48 = vld [vmem:[%s16298_s1 + $0x960] ss:$8 sps:$4 sm:$0xff]  }
 0x224   :  { %8512 = vmatpush1.bf16.msra.mxu0 %v11339_v49  ;;  %7739 = vmatprep.subr.bf16.mxu1 %v11344_v50  ;;  %v11423_v49 = vld [vmem:[%s16298_s1 + $0x1b60] ss:$8 sps:$4 sm:$0xff]   ;;  %v11428_v50 = vld [vmem:[%s16298_s1 + $0x974] ss:$8 sps:$4 sm:$0xff]  }
 0x225   :  { %8513 = vmatprep.subr.bf16.mxu0 %v11347_v51  ;;  %v11431_v51 = vld [vmem:[%s16298_s1 + $0x1b74] ss:$8 sps:$4 sm:$0xff]  }
 0x227   :  { %7740 = vmatpush1.bf16.msra.mxu1 %v11342_v52  ;;  %v11426_v52 = vld [vmem:[%s16298_s1 + $0x970] ss:$8 sps:$4 sm:$0xff]  }
 0x228   :  { %8514 = vmatpush1.bf16.msra.mxu0 %v11345_v38  ;;  %7741 = vmatprep.subr.bf16.mxu1 %v11350_v39  ;;  %v11429_v38 = vld [vmem:[%s16298_s1 + $0x1b70] ss:$8 sps:$4 sm:$0xff]   ;;  %v11434_v39 = vld [vmem:[%s16298_s1 + $0x984] ss:$8 sps:$4 sm:$0xff]  }
 0x229   :  { %8515 = vmatprep.subr.bf16.mxu0 %v11353_v42  ;;  %v11437_v42 = vld [vmem:[%s16298_s1 + $0x1b84] ss:$8 sps:$4 sm:$0xff]  }
 0x22b   :  { %7742 = vmatpush1.bf16.msra.mxu1 %v11348_v56  ;;  %v11432_v56 = vld [vmem:[%s16298_s1 + $0x980] ss:$8 sps:$4 sm:$0xff]  }
 0x22c   :  { %8516 = vmatpush1.bf16.msra.mxu0 %v11351_v57  ;;  %7743 = vmatprep.subr.bf16.mxu1 %v11356_v58  ;;  %v11435_v57 = vld [vmem:[%s16298_s1 + $0x1b80] ss:$8 sps:$4 sm:$0xff]   ;;  %v11440_v58 = vld [vmem:[%s16298_s1 + $0x994] ss:$8 sps:$4 sm:$0xff]  }
 0x22d   :  { %8517 = vmatprep.subr.bf16.mxu0 %v11359_v59  ;;  %v11443_v59 = vld [vmem:[%s16298_s1 + $0x1b94] ss:$8 sps:$4 sm:$0xff]  }
 0x22f   :  { %7744 = vmatpush1.bf16.msra.mxu1 %v11354_v60  ;;  %v11438_v60 = vld [vmem:[%s16298_s1 + $0x990] ss:$8 sps:$4 sm:$0xff]  }
 0x230   :  { %8518 = vmatpush1.bf16.msra.mxu0 %v11357_v35  ;;  %7745 = vmatprep.subr.bf16.mxu1 %v11362_v45  ;;  %v11441_v35 = vld [vmem:[%s16298_s1 + $0x1b90] ss:$8 sps:$4 sm:$0xff]   ;;  %v11446_v45 = vld [vmem:[%s16298_s1 + $0x9a4] ss:$8 sps:$4 sm:$0xff]  }
 0x231   :  { %8519 = vmatprep.subr.bf16.mxu0 %v11365_v46  ;;  %v11449_v46 = vld [vmem:[%s16298_s1 + $0x1ba4] ss:$8 sps:$4 sm:$0xff]  }
 0x233   :  { %7746 = vmatpush1.bf16.msra.mxu1 %v11360_v0  ;;  %v11444_v0 = vld [vmem:[%s16298_s1 + $0x9a0] ss:$8 sps:$4 sm:$0xff]  }
 0x234   :  { %8520 = vmatpush1.bf16.msra.mxu0 %v11363_v1  ;;  %7747 = vmatprep.subr.bf16.mxu1 %v11368_v2  ;;  %v11447_v1 = vld [vmem:[%s16298_s1 + $0x1ba0] ss:$8 sps:$4 sm:$0xff]   ;;  %v11452_v2 = vld [vmem:[%s16298_s1 + $0x9b4] ss:$8 sps:$4 sm:$0xff]  }
 0x235   :  { %8521 = vmatprep.subr.bf16.mxu0 %v11371_v3  ;;  %v11455_v3 = vld [vmem:[%s16298_s1 + $0x1bb4] ss:$8 sps:$4 sm:$0xff]  }
 0x237   :  { %7748 = vmatpush1.bf16.msra.mxu1 %v11366_v4  ;;  %v11450_v4 = vld [vmem:[%s16298_s1 + $0x9b0] ss:$8 sps:$4 sm:$0xff]  }
 0x238   :  { %8522 = vmatpush1.bf16.msra.mxu0 %v11369_v43  ;;  %7749 = vmatprep.subr.bf16.mxu1 %v11374_v53  ;;  %v11453_v43 = vld [vmem:[%s16298_s1 + $0x1bb0] ss:$8 sps:$4 sm:$0xff]   ;;  %v11458_v53 = vld [vmem:[%s16298_s1 + $0x9c4] ss:$8 sps:$4 sm:$0xff]  }
 0x239   :  { %8523 = vmatprep.subr.bf16.mxu0 %v11377_v54  ;;  %v11461_v54 = vld [vmem:[%s16298_s1 + $0x1bc4] ss:$8 sps:$4 sm:$0xff]  }
 0x23b   :  { %7750 = vmatpush1.bf16.msra.mxu1 %v11372_v8  ;;  %v11456_v8 = vld [vmem:[%s16298_s1 + $0x9c0] ss:$8 sps:$4 sm:$0xff]  }
 0x23c   :  { %8524 = vmatpush1.bf16.msra.mxu0 %v11375_v9  ;;  %7751 = vmatprep.subr.bf16.mxu1 %v11380_v10  ;;  %v11459_v9 = vld [vmem:[%s16298_s1 + $0x1bc0] ss:$8 sps:$4 sm:$0xff]   ;;  %v11464_v10 = vld [vmem:[%s16298_s1 + $0x9d4] ss:$8 sps:$4 sm:$0xff]  }
 0x23d   :  { %8525 = vmatprep.subr.bf16.mxu0 %v11383_v11  ;;  %v11467_v11 = vld [vmem:[%s16298_s1 + $0x1bd4] ss:$8 sps:$4 sm:$0xff]  }
 0x23f   :  { %7752 = vmatpush1.bf16.msra.mxu1 %v11378_v12  ;;  %v11462_v12 = vld [vmem:[%s16298_s1 + $0x9d0] ss:$8 sps:$4 sm:$0xff]  }
 0x240   :  { %8526 = vmatpush1.bf16.msra.mxu0 %v11381_v47  ;;  %7764 = vmatprep.subr.bf16.mxu1 %v11386_v61  ;;  %v11465_v47 = vld [vmem:[%s16298_s1 + $0x1bd0] ss:$8 sps:$4 sm:$0xff]   ;;  %v11470_v61 = vld [vmem:[%s16298_s1 + $0x9e4] ss:$8 sps:$4 sm:$0xff]  }
 0x241   :  { %8538 = vmatprep.subr.bf16.mxu0 %v11389_v62  ;;  %v11473_v62 = vld [vmem:[%s16298_s1 + $0x1be4] ss:$8 sps:$4 sm:$0xff]  }
 0x242   :  { %7754 = vmatmul.mubr.bf16.vlgmr.msra.gmra.mrb[0].mxu1 %v9129_v16  ;;  %v11468_v16 = vld [vmem:[%s16298_s1 + $0x9e0] ss:$8 sps:$4 sm:$0xff]  }
 0x243   :  { %8528 = vmatmul.mubr.bf16.vlgmr.msra.gmra.mrb[0].mxu0 %v9165_v17  ;;  %7765 = vmatpush1.bf16.msra.mxu1 %v11384_v18  ;;  %v11471_v17 = vld [vmem:[%s16298_s1 + $0x1be0] ss:$8 sps:$4 sm:$0xff]   ;;  %v11476_v18 = vld [vmem:[%s16298_s1 + $0x9f4] ss:$8 sps:$4 sm:$0xff]  }
 0x244   :  { %8539 = vmatpush1.bf16.msra.mxu0 %v11387_v19  ;;  %7766 = vmatprep.subr.bf16.mxu1 %v11392_v20  ;;  %v11479_v19 = vld [vmem:[%s16298_s1 + $0x1bf4] ss:$8 sps:$4 sm:$0xff]   ;;  %v11474_v20 = vld [vmem:[%s16298_s1 + $0x9f0] ss:$8 sps:$4 sm:$0xff]  }
 0x245   :  { %8540 = vmatprep.subr.bf16.mxu0 %v11395_v55  ;;  %7796 = vmatprep.mubr.bf16.mxu1 %v9132_v5  ;;  %v11477_v55 = vld [vmem:[%s16298_s1 + $0x1bf0] ss:$8 sps:$4 sm:$0xff]   ;;  %v11482_v5 = vld [vmem:[%s16298_s1 + $0xa04] ss:$8 sps:$4 sm:$0xff]  }
 0x246   :  { %8570 = vmatprep.mubr.bf16.mxu0 %v9168_v6  ;;  %v11485_v6 = vld [vmem:[%s16298_s1 + $0x1c04] ss:$8 sps:$4 sm:$0xff]  }
 0x247   :  { %7767 = vmatpush1.bf16.msra.mxu1 %v11390_v7  ;;  %v14483_v7 = vld [vmem:[%s16299_s0 + $0x50] sm:$0xff] }
 0x248   :  { %8541 = vmatpush1.bf16.msra.mxu0 %v11393_v21  ;;  %7768 = vmatprep.subr.bf16.mxu1 %v11398_v22  ;;  %v14488_v21 = vld [vmem:[%s16299_s0 + $0x170] sm:$0xff]  ;;  %v14493_v22 = vld [vmem:[%s16299_s0 + $0xe0] sm:$0xff] }
 0x249   :  { %8542 = vmatprep.subr.bf16.mxu0 %v11401_v23  ;;  %v14498_v23 = vld [vmem:[%s16299_s0 + $0x200] sm:$0xff] }
 0x24b   :  { %7769 = vmatpush1.bf16.msra.mxu1 %v11396_v26  ;;  %v9131_v26 = vcombine.low %v14263_v63, %v14268_v13  ;;  %v11491_v63 = vld [vmem:[%s16298_s1 + $0x1c14] ss:$8 sps:$4 sm:$0xff]   ;;  %v9134_v13 = vcombine.high %v14483_v7, %v14488_v21 }
 0x24c   :  { %8543 = vmatpush1.bf16.msra.mxu0 %v11399_v27  ;;  %7770 = vmatprep.subr.bf16.mxu1 %v11404_v32  ;;  %v9167_v27 = vcombine.low %v14273_v14, %v14278_v15  ;;  %v11480_v32 = vld [vmem:[%s16298_s1 + $0xa00] ss:$8 sps:$4 sm:$0xff]   ;;  %v9170_v14 = vcombine.high %v14493_v22, %v14498_v23  ;;  %v11486_v15 = vld [vmem:[%s16298_s1 + $0xa10] ss:$8 sps:$4 sm:$0xff]  }
 0x24d   :  { %8544 = vmatprep.subr.bf16.mxu0 %v11407_v33  ;;  %v11483_v33 = vld [vmem:[%s16298_s1 + $0x1c00] ss:$8 sps:$4 sm:$0xff]  }
 0x24f   :  { %7771 = vmatpush1.bf16.msra.mxu1 %v11402_v36  ;;  %v11488_v36 = vld [vmem:[%s16298_s1 + $0xa14] ss:$8 sps:$4 sm:$0xff]  }
 0x250   :  { %8545 = vmatpush1.bf16.msra.mxu0 %v11405_v24  ;;  %7772 = vmatprep.subr.bf16.mxu1 %v11410_v25  ;;  %v11489_v24 = vld [vmem:[%s16298_s1 + $0x1c10] ss:$8 sps:$4 sm:$0xff]   ;;  %v11494_v25 = vld [vmem:[%s16298_s1 + $0xa24] ss:$8 sps:$4 sm:$0xff]  }
 0x251   :  { %8546 = vmatprep.subr.bf16.mxu0 %v11413_v29  ;;  %v11497_v29 = vld [vmem:[%s16298_s1 + $0x1c24] ss:$8 sps:$4 sm:$0xff]  }
 0x253   :  { %7773 = vmatpush1.bf16.msra.mxu1 %v11408_v30  ;;  %v11492_v30 = vld [vmem:[%s16298_s1 + $0xa20] ss:$8 sps:$4 sm:$0xff]  }
 0x254   :  { %8547 = vmatpush1.bf16.msra.mxu0 %v11411_v37  ;;  %7774 = vmatprep.subr.bf16.mxu1 %v11416_v40  ;;  %v11495_v37 = vld [vmem:[%s16298_s1 + $0x1c20] ss:$8 sps:$4 sm:$0xff]   ;;  %v11500_v40 = vld [vmem:[%s16298_s1 + $0xa34] ss:$8 sps:$4 sm:$0xff]  }
 0x255   :  { %8548 = vmatprep.subr.bf16.mxu0 %v11419_v41  ;;  %v11503_v41 = vld [vmem:[%s16298_s1 + $0x1c34] ss:$8 sps:$4 sm:$0xff]  }
 0x257   :  { %7775 = vmatpush1.bf16.msra.mxu1 %v11414_v44  ;;  %v11498_v44 = vld [vmem:[%s16298_s1 + $0xa30] ss:$8 sps:$4 sm:$0xff]  }
 0x258   :  { %8549 = vmatpush1.bf16.msra.mxu0 %v11417_v28  ;;  %7776 = vmatprep.subr.bf16.mxu1 %v11422_v31  ;;  %v11501_v28 = vld [vmem:[%s16298_s1 + $0x1c30] ss:$8 sps:$4 sm:$0xff]   ;;  %v11506_v31 = vld [vmem:[%s16298_s1 + $0xa44] ss:$8 sps:$4 sm:$0xff]  }
 0x259   :  { %8550 = vmatprep.subr.bf16.mxu0 %v11425_v34  ;;  %v11509_v34 = vld [vmem:[%s16298_s1 + $0x1c44] ss:$8 sps:$4 sm:$0xff]  }
 0x25b   :  { %7777 = vmatpush1.bf16.msra.mxu1 %v11420_v48  ;;  %v11504_v48 = vld [vmem:[%s16298_s1 + $0xa40] ss:$8 sps:$4 sm:$0xff]  }
 0x25c   :  { %8551 = vmatpush1.bf16.msra.mxu0 %v11423_v49  ;;  %7778 = vmatprep.subr.bf16.mxu1 %v11428_v50  ;;  %v11507_v49 = vld [vmem:[%s16298_s1 + $0x1c40] ss:$8 sps:$4 sm:$0xff]   ;;  %v11512_v50 = vld [vmem:[%s16298_s1 + $0xa54] ss:$8 sps:$4 sm:$0xff]  }
 0x25d   :  { %8552 = vmatprep.subr.bf16.mxu0 %v11431_v51  ;;  %v11515_v51 = vld [vmem:[%s16298_s1 + $0x1c54] ss:$8 sps:$4 sm:$0xff]  }
 0x25f   :  { %7779 = vmatpush1.bf16.msra.mxu1 %v11426_v52  ;;  %v11510_v52 = vld [vmem:[%s16298_s1 + $0xa50] ss:$8 sps:$4 sm:$0xff]  }
 0x260   :  { %8553 = vmatpush1.bf16.msra.mxu0 %v11429_v38  ;;  %7780 = vmatprep.subr.bf16.mxu1 %v11434_v39  ;;  %v11513_v38 = vld [vmem:[%s16298_s1 + $0x1c50] ss:$8 sps:$4 sm:$0xff]   ;;  %v11518_v39 = vld [vmem:[%s16298_s1 + $0xa64] ss:$8 sps:$4 sm:$0xff]  }
 0x261   :  { %8554 = vmatprep.subr.bf16.mxu0 %v11437_v42  ;;  %v11521_v42 = vld [vmem:[%s16298_s1 + $0x1c64] ss:$8 sps:$4 sm:$0xff]  }
 0x263   :  { %7781 = vmatpush1.bf16.msra.mxu1 %v11432_v56  ;;  %v11516_v56 = vld [vmem:[%s16298_s1 + $0xa60] ss:$8 sps:$4 sm:$0xff]  }
 0x264   :  { %8555 = vmatpush1.bf16.msra.mxu0 %v11435_v57  ;;  %7782 = vmatprep.subr.bf16.mxu1 %v11440_v58  ;;  %v11519_v57 = vld [vmem:[%s16298_s1 + $0x1c60] ss:$8 sps:$4 sm:$0xff]   ;;  %v11524_v58 = vld [vmem:[%s16298_s1 + $0xa74] ss:$8 sps:$4 sm:$0xff]  }
 0x265   :  { %8556 = vmatprep.subr.bf16.mxu0 %v11443_v59  ;;  %v11527_v59 = vld [vmem:[%s16298_s1 + $0x1c74] ss:$8 sps:$4 sm:$0xff]  }
 0x267   :  { %7783 = vmatpush1.bf16.msra.mxu1 %v11438_v60  ;;  %v11522_v60 = vld [vmem:[%s16298_s1 + $0xa70] ss:$8 sps:$4 sm:$0xff]  }
 0x268   :  { %8557 = vmatpush1.bf16.msra.mxu0 %v11441_v35  ;;  %7784 = vmatprep.subr.bf16.mxu1 %v11446_v45  ;;  %v11525_v35 = vld [vmem:[%s16298_s1 + $0x1c70] ss:$8 sps:$4 sm:$0xff]   ;;  %v11530_v45 = vld [vmem:[%s16298_s1 + $0xa84] ss:$8 sps:$4 sm:$0xff]  }
 0x269   :  { %8558 = vmatprep.subr.bf16.mxu0 %v11449_v46  ;;  %v11533_v46 = vld [vmem:[%s16298_s1 + $0x1c84] ss:$8 sps:$4 sm:$0xff]  }
 0x26b   :  { %7785 = vmatpush1.bf16.msra.mxu1 %v11444_v0  ;;  %v11528_v0 = vld [vmem:[%s16298_s1 + $0xa80] ss:$8 sps:$4 sm:$0xff]  }
 0x26c   :  { %8559 = vmatpush1.bf16.msra.mxu0 %v11447_v1  ;;  %7786 = vmatprep.subr.bf16.mxu1 %v11452_v2  ;;  %v11531_v1 = vld [vmem:[%s16298_s1 + $0x1c80] ss:$8 sps:$4 sm:$0xff]   ;;  %v11536_v2 = vld [vmem:[%s16298_s1 + $0xa94] ss:$8 sps:$4 sm:$0xff]  }
 0x26d   :  { %8560 = vmatprep.subr.bf16.mxu0 %v11455_v3  ;;  %v11539_v3 = vld [vmem:[%s16298_s1 + $0x1c94] ss:$8 sps:$4 sm:$0xff]  }
 0x26f   :  { %7787 = vmatpush1.bf16.msra.mxu1 %v11450_v4  ;;  %v11534_v4 = vld [vmem:[%s16298_s1 + $0xa90] ss:$8 sps:$4 sm:$0xff]  }
 0x270   :  { %8561 = vmatpush1.bf16.msra.mxu0 %v11453_v43  ;;  %7788 = vmatprep.subr.bf16.mxu1 %v11458_v53  ;;  %v11537_v43 = vld [vmem:[%s16298_s1 + $0x1c90] ss:$8 sps:$4 sm:$0xff]   ;;  %v11542_v53 = vld [vmem:[%s16298_s1 + $0xaa4] ss:$8 sps:$4 sm:$0xff]  }
 0x271   :  { %8562 = vmatprep.subr.bf16.mxu0 %v11461_v54  ;;  %v11545_v54 = vld [vmem:[%s16298_s1 + $0x1ca4] ss:$8 sps:$4 sm:$0xff]  }
 0x273   :  { %7789 = vmatpush1.bf16.msra.mxu1 %v11456_v8  ;;  %v11540_v8 = vld [vmem:[%s16298_s1 + $0xaa0] ss:$8 sps:$4 sm:$0xff]  }
 0x274   :  { %8563 = vmatpush1.bf16.msra.mxu0 %v11459_v9  ;;  %7790 = vmatprep.subr.bf16.mxu1 %v11464_v10  ;;  %v11543_v9 = vld [vmem:[%s16298_s1 + $0x1ca0] ss:$8 sps:$4 sm:$0xff]   ;;  %v11548_v10 = vld [vmem:[%s16298_s1 + $0xab4] ss:$8 sps:$4 sm:$0xff]  }
 0x275   :  { %8564 = vmatprep.subr.bf16.mxu0 %v11467_v11  ;;  %v11551_v11 = vld [vmem:[%s16298_s1 + $0x1cb4] ss:$8 sps:$4 sm:$0xff]  }
 0x277   :  { %7791 = vmatpush1.bf16.msra.mxu1 %v11462_v12  ;;  %v11546_v12 = vld [vmem:[%s16298_s1 + $0xab0] ss:$8 sps:$4 sm:$0xff]  }
 0x278   :  { %8565 = vmatpush1.bf16.msra.mxu0 %v11465_v47  ;;  %7792 = vmatprep.subr.bf16.mxu1 %v11470_v61  ;;  %v11549_v47 = vld [vmem:[%s16298_s1 + $0x1cb0] ss:$8 sps:$4 sm:$0xff]   ;;  %v11554_v61 = vld [vmem:[%s16298_s1 + $0xac4] ss:$8 sps:$4 sm:$0xff]  }
 0x279   :  { %8566 = vmatprep.subr.bf16.mxu0 %v11473_v62  ;;  %v11557_v62 = vld [vmem:[%s16298_s1 + $0x1cc4] ss:$8 sps:$4 sm:$0xff]  }
 0x27b   :  { %7793 = vmatpush1.bf16.msra.mxu1 %v11468_v16  ;;  %v11552_v16 = vld [vmem:[%s16298_s1 + $0xac0] ss:$8 sps:$4 sm:$0xff]  }
 0x27c   :  { %8567 = vmatpush1.bf16.msra.mxu0 %v11471_v17  ;;  %7794 = vmatprep.subr.bf16.mxu1 %v11476_v18  ;;  %v11555_v17 = vld [vmem:[%s16298_s1 + $0x1cc0] ss:$8 sps:$4 sm:$0xff]   ;;  %v11560_v18 = vld [vmem:[%s16298_s1 + $0xad4] ss:$8 sps:$4 sm:$0xff]  }
 0x27d   :  { %8568 = vmatprep.subr.bf16.mxu0 %v11479_v19  ;;  %v11563_v19 = vld [vmem:[%s16298_s1 + $0x1cd4] ss:$8 sps:$4 sm:$0xff]  }
 0x27f   :  { %7795 = vmatpush1.bf16.msra.mxu1 %v11474_v20  ;;  %v11558_v20 = vld [vmem:[%s16298_s1 + $0xad0] ss:$8 sps:$4 sm:$0xff]  }
 0x280   :  { %8569 = vmatpush1.bf16.msra.mxu0 %v11477_v55  ;;  %7807 = vmatprep.subr.bf16.mxu1 %v11482_v5  ;;  %v11561_v55 = vld [vmem:[%s16298_s1 + $0x1cd0] ss:$8 sps:$4 sm:$0xff]   ;;  %v11566_v5 = vld [vmem:[%s16298_s1 + $0xae4] ss:$8 sps:$4 sm:$0xff]  }
 0x281   :  { %8581 = vmatprep.subr.bf16.mxu0 %v11485_v6  ;;  %v11569_v6 = vld [vmem:[%s16298_s1 + $0x1ce4] ss:$8 sps:$4 sm:$0xff]  }
 0x282   :  { %7797 = vmatmul.mubr.bf16.vlgmr.msra.gmra.mrb[0].mxu1 %v9131_v26  ;;  %v11564_v26 = vld [vmem:[%s16298_s1 + $0xae0] ss:$8 sps:$4 sm:$0xff]  }
 0x283   :  { %8571 = vmatmul.mubr.bf16.vlgmr.msra.gmra.mrb[0].mxu0 %v9167_v27  ;;  %7808 = vmatpush1.bf16.msra.mxu1 %v11480_v32  ;;  %v11567_v27 = vld [vmem:[%s16298_s1 + $0x1ce0] ss:$8 sps:$4 sm:$0xff]   ;;  %v11572_v32 = vld [vmem:[%s16298_s1 + $0xaf4] ss:$8 sps:$4 sm:$0xff]  }
 0x284   :  { %8582 = vmatpush1.bf16.msra.mxu0 %v11483_v33  ;;  %7809 = vmatprep.subr.bf16.mxu1 %v11488_v36  ;;  %v11575_v33 = vld [vmem:[%s16298_s1 + $0x1cf4] ss:$8 sps:$4 sm:$0xff]   ;;  %v11570_v36 = vld [vmem:[%s16298_s1 + $0xaf0] ss:$8 sps:$4 sm:$0xff]  }
 0x285   :  { %8583 = vmatprep.subr.bf16.mxu0 %v11491_v63  ;;  %7839 = vmatprep.mubr.bf16.mxu1 %v9134_v13  ;;  %v11573_v63 = vld [vmem:[%s16298_s1 + $0x1cf0] ss:$8 sps:$4 sm:$0xff]   ;;  %v11578_v13 = vld [vmem:[%s16298_s1 + $0xb04] ss:$8 sps:$4 sm:$0xff]  }
 0x286   :  { %8613 = vmatprep.mubr.bf16.mxu0 %v9170_v14  ;;  %v11581_v14 = vld [vmem:[%s16298_s1 + $0x1d04] ss:$8 sps:$4 sm:$0xff]  }
 0x287   :  { %7810 = vmatpush1.bf16.msra.mxu1 %v11486_v15  ;;  %v14703_v15 = vld [vmem:[%s16299_s0 + $0x58] sm:$0xff] }
 0x288   :  { %8584 = vmatpush1.bf16.msra.mxu0 %v11489_v24  ;;  %7811 = vmatprep.subr.bf16.mxu1 %v11494_v25  ;;  %v9133_v24 = vcombine.low %v14483_v7, %v14488_v21  ;;  %v9169_v25 = vcombine.low %v14493_v22, %v14498_v23  ;;  %v11576_v7 = vld [vmem:[%s16298_s1 + $0xb00] ss:$8 sps:$4 sm:$0xff]   ;;  %v11584_v22 = vld [vmem:[%s16298_s1 + $0xb14] ss:$8 sps:$4 sm:$0xff]  }
 0x289   :  { %8585 = vmatprep.subr.bf16.mxu0 %v11497_v29  ;;  %v14712_v29 = vld [vmem:[%s16299_s0 + $0x178] sm:$0xff]  ;;  %v11579_v21 = vld [vmem:[%s16298_s1 + $0x1d00] ss:$8 sps:$4 sm:$0xff]  }
 0x28a   :  { %v11587_v23 = vld [vmem:[%s16298_s1 + $0x1d14] ss:$8 sps:$4 sm:$0xff]  }
 0x28b   :  { %7812 = vmatpush1.bf16.msra.mxu1 %v11492_v30  ;;  %v14717_v30 = vld [vmem:[%s16299_s0 + $0xe8] sm:$0xff] }
 0x28c   :  { %8586 = vmatpush1.bf16.msra.mxu0 %v11495_v37  ;;  %7813 = vmatprep.subr.bf16.mxu1 %v11500_v40  ;;  %v14722_v37 = vld [vmem:[%s16299_s0 + $0x208] sm:$0xff]  ;;  %v9136_v40 = vcombine.high %v14703_v15, %v14712_v29 }
 0x28d   :  { %8587 = vmatprep.subr.bf16.mxu0 %v11503_v41  ;;  %v9172_v41 = vcombine.high %v14717_v30, %v14722_v37 }
 0x28f   :  { %7814 = vmatpush1.bf16.msra.mxu1 %v11498_v44  ;;  %v11582_v44 = vld [vmem:[%s16298_s1 + $0xb10] ss:$8 sps:$4 sm:$0xff]  }
 0x290   :  { %8588 = vmatpush1.bf16.msra.mxu0 %v11501_v28  ;;  %7815 = vmatprep.subr.bf16.mxu1 %v11506_v31  ;;  %v11585_v28 = vld [vmem:[%s16298_s1 + $0x1d10] ss:$8 sps:$4 sm:$0xff]   ;;  %v11590_v31 = vld [vmem:[%s16298_s1 + $0xb24] ss:$8 sps:$4 sm:$0xff]  }
 0x291   :  { %8589 = vmatprep.subr.bf16.mxu0 %v11509_v34  ;;  %v11593_v34 = vld [vmem:[%s16298_s1 + $0x1d24] ss:$8 sps:$4 sm:$0xff]  }
 0x293   :  { %7816 = vmatpush1.bf16.msra.mxu1 %v11504_v48  ;;  %v11588_v48 = vld [vmem:[%s16298_s1 + $0xb20] ss:$8 sps:$4 sm:$0xff]  }
 0x294   :  { %8590 = vmatpush1.bf16.msra.mxu0 %v11507_v49  ;;  %7817 = vmatprep.subr.bf16.mxu1 %v11512_v50  ;;  %v11591_v49 = vld [vmem:[%s16298_s1 + $0x1d20] ss:$8 sps:$4 sm:$0xff]   ;;  %v11596_v50 = vld [vmem:[%s16298_s1 + $0xb34] ss:$8 sps:$4 sm:$0xff]  }
 0x295   :  { %8591 = vmatprep.subr.bf16.mxu0 %v11515_v51  ;;  %v11599_v51 = vld [vmem:[%s16298_s1 + $0x1d34] ss:$8 sps:$4 sm:$0xff]  }
 0x297   :  { %7818 = vmatpush1.bf16.msra.mxu1 %v11510_v52  ;;  %v11594_v52 = vld [vmem:[%s16298_s1 + $0xb30] ss:$8 sps:$4 sm:$0xff]  }
 0x298   :  { %8592 = vmatpush1.bf16.msra.mxu0 %v11513_v38  ;;  %7819 = vmatprep.subr.bf16.mxu1 %v11518_v39  ;;  %v11597_v38 = vld [vmem:[%s16298_s1 + $0x1d30] ss:$8 sps:$4 sm:$0xff]   ;;  %v11602_v39 = vld [vmem:[%s16298_s1 + $0xb44] ss:$8 sps:$4 sm:$0xff]  }
 0x299   :  { %8593 = vmatprep.subr.bf16.mxu0 %v11521_v42  ;;  %v11605_v42 = vld [vmem:[%s16298_s1 + $0x1d44] ss:$8 sps:$4 sm:$0xff]  }
 0x29b   :  { %7820 = vmatpush1.bf16.msra.mxu1 %v11516_v56  ;;  %v11600_v56 = vld [vmem:[%s16298_s1 + $0xb40] ss:$8 sps:$4 sm:$0xff]  }
 0x29c   :  { %8594 = vmatpush1.bf16.msra.mxu0 %v11519_v57  ;;  %7821 = vmatprep.subr.bf16.mxu1 %v11524_v58  ;;  %v11603_v57 = vld [vmem:[%s16298_s1 + $0x1d40] ss:$8 sps:$4 sm:$0xff]   ;;  %v11608_v58 = vld [vmem:[%s16298_s1 + $0xb54] ss:$8 sps:$4 sm:$0xff]  }
 0x29d   :  { %8595 = vmatprep.subr.bf16.mxu0 %v11527_v59  ;;  %v11611_v59 = vld [vmem:[%s16298_s1 + $0x1d54] ss:$8 sps:$4 sm:$0xff]  }
 0x29f   :  { %7822 = vmatpush1.bf16.msra.mxu1 %v11522_v60  ;;  %v11606_v60 = vld [vmem:[%s16298_s1 + $0xb50] ss:$8 sps:$4 sm:$0xff]  }
 0x2a0   :  { %8596 = vmatpush1.bf16.msra.mxu0 %v11525_v35  ;;  %7823 = vmatprep.subr.bf16.mxu1 %v11530_v45  ;;  %v11609_v35 = vld [vmem:[%s16298_s1 + $0x1d50] ss:$8 sps:$4 sm:$0xff]   ;;  %v11614_v45 = vld [vmem:[%s16298_s1 + $0xb64] ss:$8 sps:$4 sm:$0xff]  }
 0x2a1   :  { %8597 = vmatprep.subr.bf16.mxu0 %v11533_v46  ;;  %v11617_v46 = vld [vmem:[%s16298_s1 + $0x1d64] ss:$8 sps:$4 sm:$0xff]  }
 0x2a3   :  { %7824 = vmatpush1.bf16.msra.mxu1 %v11528_v0  ;;  %v11612_v0 = vld [vmem:[%s16298_s1 + $0xb60] ss:$8 sps:$4 sm:$0xff]  }
 0x2a4   :  { %8598 = vmatpush1.bf16.msra.mxu0 %v11531_v1  ;;  %7825 = vmatprep.subr.bf16.mxu1 %v11536_v2  ;;  %v11615_v1 = vld [vmem:[%s16298_s1 + $0x1d60] ss:$8 sps:$4 sm:$0xff]   ;;  %v11620_v2 = vld [vmem:[%s16298_s1 + $0xb74] ss:$8 sps:$4 sm:$0xff]  }
 0x2a5   :  { %8599 = vmatprep.subr.bf16.mxu0 %v11539_v3  ;;  %v11623_v3 = vld [vmem:[%s16298_s1 + $0x1d74] ss:$8 sps:$4 sm:$0xff]  }
 0x2a7   :  { %7826 = vmatpush1.bf16.msra.mxu1 %v11534_v4  ;;  %v11618_v4 = vld [vmem:[%s16298_s1 + $0xb70] ss:$8 sps:$4 sm:$0xff]  }
 0x2a8   :  { %8600 = vmatpush1.bf16.msra.mxu0 %v11537_v43  ;;  %7827 = vmatprep.subr.bf16.mxu1 %v11542_v53  ;;  %v11621_v43 = vld [vmem:[%s16298_s1 + $0x1d70] ss:$8 sps:$4 sm:$0xff]   ;;  %v11626_v53 = vld [vmem:[%s16298_s1 + $0xb84] ss:$8 sps:$4 sm:$0xff]  }
 0x2a9   :  { %8601 = vmatprep.subr.bf16.mxu0 %v11545_v54  ;;  %v11629_v54 = vld [vmem:[%s16298_s1 + $0x1d84] ss:$8 sps:$4 sm:$0xff]  }
 0x2ab   :  { %7828 = vmatpush1.bf16.msra.mxu1 %v11540_v8  ;;  %v11624_v8 = vld [vmem:[%s16298_s1 + $0xb80] ss:$8 sps:$4 sm:$0xff]  }
 0x2ac   :  { %8602 = vmatpush1.bf16.msra.mxu0 %v11543_v9  ;;  %7829 = vmatprep.subr.bf16.mxu1 %v11548_v10  ;;  %v11627_v9 = vld [vmem:[%s16298_s1 + $0x1d80] ss:$8 sps:$4 sm:$0xff]   ;;  %v11632_v10 = vld [vmem:[%s16298_s1 + $0xb94] ss:$8 sps:$4 sm:$0xff]  }
 0x2ad   :  { %8603 = vmatprep.subr.bf16.mxu0 %v11551_v11  ;;  %v11635_v11 = vld [vmem:[%s16298_s1 + $0x1d94] ss:$8 sps:$4 sm:$0xff]  }
 0x2af   :  { %7830 = vmatpush1.bf16.msra.mxu1 %v11546_v12  ;;  %v11630_v12 = vld [vmem:[%s16298_s1 + $0xb90] ss:$8 sps:$4 sm:$0xff]  }
 0x2b0   :  { %8604 = vmatpush1.bf16.msra.mxu0 %v11549_v47  ;;  %7831 = vmatprep.subr.bf16.mxu1 %v11554_v61  ;;  %v11633_v47 = vld [vmem:[%s16298_s1 + $0x1d90] ss:$8 sps:$4 sm:$0xff]   ;;  %v11638_v61 = vld [vmem:[%s16298_s1 + $0xba4] ss:$8 sps:$4 sm:$0xff]  }
 0x2b1   :  { %8605 = vmatprep.subr.bf16.mxu0 %v11557_v62  ;;  %v11641_v62 = vld [vmem:[%s16298_s1 + $0x1da4] ss:$8 sps:$4 sm:$0xff]  }
 0x2b3   :  { %7832 = vmatpush1.bf16.msra.mxu1 %v11552_v16  ;;  %v11636_v16 = vld [vmem:[%s16298_s1 + $0xba0] ss:$8 sps:$4 sm:$0xff]  }
 0x2b4   :  { %8606 = vmatpush1.bf16.msra.mxu0 %v11555_v17  ;;  %7833 = vmatprep.subr.bf16.mxu1 %v11560_v18  ;;  %v11639_v17 = vld [vmem:[%s16298_s1 + $0x1da0] ss:$8 sps:$4 sm:$0xff]   ;;  %v11644_v18 = vld [vmem:[%s16298_s1 + $0xbb4] ss:$8 sps:$4 sm:$0xff]  }
 0x2b5   :  { %8607 = vmatprep.subr.bf16.mxu0 %v11563_v19  ;;  %v11647_v19 = vld [vmem:[%s16298_s1 + $0x1db4] ss:$8 sps:$4 sm:$0xff]  }
 0x2b7   :  { %7834 = vmatpush1.bf16.msra.mxu1 %v11558_v20  ;;  %v11642_v20 = vld [vmem:[%s16298_s1 + $0xbb0] ss:$8 sps:$4 sm:$0xff]  }
 0x2b8   :  { %8608 = vmatpush1.bf16.msra.mxu0 %v11561_v55  ;;  %7835 = vmatprep.subr.bf16.mxu1 %v11566_v5  ;;  %v11645_v55 = vld [vmem:[%s16298_s1 + $0x1db0] ss:$8 sps:$4 sm:$0xff]   ;;  %v11650_v5 = vld [vmem:[%s16298_s1 + $0xbc4] ss:$8 sps:$4 sm:$0xff]  }
 0x2b9   :  { %8609 = vmatprep.subr.bf16.mxu0 %v11569_v6  ;;  %v11653_v6 = vld [vmem:[%s16298_s1 + $0x1dc4] ss:$8 sps:$4 sm:$0xff]  }
 0x2bb   :  { %7836 = vmatpush1.bf16.msra.mxu1 %v11564_v26  ;;  %v11648_v26 = vld [vmem:[%s16298_s1 + $0xbc0] ss:$8 sps:$4 sm:$0xff]  }
 0x2bc   :  { %8610 = vmatpush1.bf16.msra.mxu0 %v11567_v27  ;;  %7837 = vmatprep.subr.bf16.mxu1 %v11572_v32  ;;  %v11651_v27 = vld [vmem:[%s16298_s1 + $0x1dc0] ss:$8 sps:$4 sm:$0xff]   ;;  %v11656_v32 = vld [vmem:[%s16298_s1 + $0xbd4] ss:$8 sps:$4 sm:$0xff]  }
 0x2bd   :  { %8611 = vmatprep.subr.bf16.mxu0 %v11575_v33  ;;  %v11659_v33 = vld [vmem:[%s16298_s1 + $0x1dd4] ss:$8 sps:$4 sm:$0xff]  }
 0x2bf   :  { %7838 = vmatpush1.bf16.msra.mxu1 %v11570_v36  ;;  %v11654_v36 = vld [vmem:[%s16298_s1 + $0xbd0] ss:$8 sps:$4 sm:$0xff]  }
 0x2c0   :  { %8612 = vmatpush1.bf16.msra.mxu0 %v11573_v63  ;;  %7850 = vmatprep.subr.bf16.mxu1 %v11578_v13  ;;  %v11657_v63 = vld [vmem:[%s16298_s1 + $0x1dd0] ss:$8 sps:$4 sm:$0xff]   ;;  %v11662_v13 = vld [vmem:[%s16298_s1 + $0xbe4] ss:$8 sps:$4 sm:$0xff]  }
 0x2c1   :  { %8624 = vmatprep.subr.bf16.mxu0 %v11581_v14  ;;  %v11665_v14 = vld [vmem:[%s16298_s1 + $0x1de4] ss:$8 sps:$4 sm:$0xff]  }
 0x2c2   :  { %7840 = vmatmul.mubr.bf16.vlgmr.msra.gmra.mrb[0].mxu1 %v9133_v24  ;;  %v11660_v24 = vld [vmem:[%s16298_s1 + $0xbe0] ss:$8 sps:$4 sm:$0xff]  }
 0x2c3   :  { %8614 = vmatmul.mubr.bf16.vlgmr.msra.gmra.mrb[0].mxu0 %v9169_v25  ;;  %7851 = vmatpush1.bf16.msra.mxu1 %v11576_v7  ;;  %v11663_v25 = vld [vmem:[%s16298_s1 + $0x1de0] ss:$8 sps:$4 sm:$0xff]   ;;  %v11668_v7 = vld [vmem:[%s16298_s1 + $0xbf4] ss:$8 sps:$4 sm:$0xff]  }
 0x2c4   :  { %8625 = vmatpush1.bf16.msra.mxu0 %v11579_v21  ;;  %7852 = vmatprep.subr.bf16.mxu1 %v11584_v22  ;;  %v11671_v21 = vld [vmem:[%s16298_s1 + $0x1df4] ss:$8 sps:$4 sm:$0xff]   ;;  %v11666_v22 = vld [vmem:[%s16298_s1 + $0xbf0] ss:$8 sps:$4 sm:$0xff]  }
 0x2c5   :  { %8626 = vmatprep.subr.bf16.mxu0 %v11587_v23  ;;  %7882 = vmatprep.mubr.bf16.mxu1 %v9136_v40  ;;  %v11669_v23 = vld [vmem:[%s16298_s1 + $0x1df0] ss:$8 sps:$4 sm:$0xff]   ;;  %v11674_v40 = vld [vmem:[%s16298_s1 + $0xc04] ss:$8 sps:$4 sm:$0xff]  }
 0x2c6   :  { %8656 = vmatprep.mubr.bf16.mxu0 %v9172_v41  ;;  %v11677_v41 = vld [vmem:[%s16298_s1 + $0x1e04] ss:$8 sps:$4 sm:$0xff]  }
 0x2c7   :  { %7853 = vmatpush1.bf16.msra.mxu1 %v11582_v44  ;;  %v14923_v44 = vld [vmem:[%s16299_s0 + $0x60] sm:$0xff] }
 0x2c8   :  { %8627 = vmatpush1.bf16.msra.mxu0 %v11585_v28  ;;  %7854 = vmatprep.subr.bf16.mxu1 %v11590_v31  ;;  %v9135_v28 = vcombine.low %v14703_v15, %v14712_v29  ;;  %v9171_v31 = vcombine.low %v14717_v30, %v14722_v37  ;;  %v11672_v15 = vld [vmem:[%s16298_s1 + $0xc00] ss:$8 sps:$4 sm:$0xff]   ;;  %v11680_v30 = vld [vmem:[%s16298_s1 + $0xc14] ss:$8 sps:$4 sm:$0xff]  }
 0x2c9   :  { %8628 = vmatprep.subr.bf16.mxu0 %v11593_v34  ;;  %v14932_v34 = vld [vmem:[%s16299_s0 + $0x180] sm:$0xff]  ;;  %v11683_v37 = vld [vmem:[%s16298_s1 + $0x1e14] ss:$8 sps:$4 sm:$0xff]  }
 0x2ca   :  { %v11675_v29 = vld [vmem:[%s16298_s1 + $0x1e00] ss:$8 sps:$4 sm:$0xff]  }
 0x2cb   :  { %7855 = vmatpush1.bf16.msra.mxu1 %v11588_v48  ;;  %v14937_v48 = vld [vmem:[%s16299_s0 + $0xf0] sm:$0xff] }
 0x2cc   :  { %8629 = vmatpush1.bf16.msra.mxu0 %v11591_v49  ;;  %7856 = vmatprep.subr.bf16.mxu1 %v11596_v50  ;;  %v14942_v49 = vld [vmem:[%s16299_s0 + $0x210] sm:$0xff]  ;;  %v9138_v50 = vcombine.high %v14923_v44, %v14932_v34 }
 0x2cd   :  { %8630 = vmatprep.subr.bf16.mxu0 %v11599_v51  ;;  %v9174_v51 = vcombine.high %v14937_v48, %v14942_v49 }
 0x2cf   :  { %7857 = vmatpush1.bf16.msra.mxu1 %v11594_v52  ;;  %v11678_v52 = vld [vmem:[%s16298_s1 + $0xc10] ss:$8 sps:$4 sm:$0xff]  }
 0x2d0   :  { %8631 = vmatpush1.bf16.msra.mxu0 %v11597_v38  ;;  %7858 = vmatprep.subr.bf16.mxu1 %v11602_v39  ;;  %v11681_v38 = vld [vmem:[%s16298_s1 + $0x1e10] ss:$8 sps:$4 sm:$0xff]   ;;  %v11686_v39 = vld [vmem:[%s16298_s1 + $0xc24] ss:$8 sps:$4 sm:$0xff]  }
 0x2d1   :  { %8632 = vmatprep.subr.bf16.mxu0 %v11605_v42  ;;  %v11689_v42 = vld [vmem:[%s16298_s1 + $0x1e24] ss:$8 sps:$4 sm:$0xff]  }
 0x2d3   :  { %7859 = vmatpush1.bf16.msra.mxu1 %v11600_v56  ;;  %v11684_v56 = vld [vmem:[%s16298_s1 + $0xc20] ss:$8 sps:$4 sm:$0xff]  }
 0x2d4   :  { %8633 = vmatpush1.bf16.msra.mxu0 %v11603_v57  ;;  %7860 = vmatprep.subr.bf16.mxu1 %v11608_v58  ;;  %v11687_v57 = vld [vmem:[%s16298_s1 + $0x1e20] ss:$8 sps:$4 sm:$0xff]   ;;  %v11692_v58 = vld [vmem:[%s16298_s1 + $0xc34] ss:$8 sps:$4 sm:$0xff]  }
 0x2d5   :  { %8634 = vmatprep.subr.bf16.mxu0 %v11611_v59  ;;  %v11695_v59 = vld [vmem:[%s16298_s1 + $0x1e34] ss:$8 sps:$4 sm:$0xff]  }
 0x2d7   :  { %7861 = vmatpush1.bf16.msra.mxu1 %v11606_v60  ;;  %v11690_v60 = vld [vmem:[%s16298_s1 + $0xc30] ss:$8 sps:$4 sm:$0xff]  }
 0x2d8   :  { %8635 = vmatpush1.bf16.msra.mxu0 %v11609_v35  ;;  %7862 = vmatprep.subr.bf16.mxu1 %v11614_v45  ;;  %v11693_v35 = vld [vmem:[%s16298_s1 + $0x1e30] ss:$8 sps:$4 sm:$0xff]   ;;  %v11698_v45 = vld [vmem:[%s16298_s1 + $0xc44] ss:$8 sps:$4 sm:$0xff]  }
 0x2d9   :  { %8636 = vmatprep.subr.bf16.mxu0 %v11617_v46  ;;  %v11701_v46 = vld [vmem:[%s16298_s1 + $0x1e44] ss:$8 sps:$4 sm:$0xff]  }
 0x2db   :  { %7863 = vmatpush1.bf16.msra.mxu1 %v11612_v0  ;;  %v11696_v0 = vld [vmem:[%s16298_s1 + $0xc40] ss:$8 sps:$4 sm:$0xff]  }
 0x2dc   :  { %8637 = vmatpush1.bf16.msra.mxu0 %v11615_v1  ;;  %7864 = vmatprep.subr.bf16.mxu1 %v11620_v2  ;;  %v11699_v1 = vld [vmem:[%s16298_s1 + $0x1e40] ss:$8 sps:$4 sm:$0xff]   ;;  %v11704_v2 = vld [vmem:[%s16298_s1 + $0xc54] ss:$8 sps:$4 sm:$0xff]  }
 0x2dd   :  { %8638 = vmatprep.subr.bf16.mxu0 %v11623_v3  ;;  %v11707_v3 = vld [vmem:[%s16298_s1 + $0x1e54] ss:$8 sps:$4 sm:$0xff]  }
 0x2df   :  { %7865 = vmatpush1.bf16.msra.mxu1 %v11618_v4  ;;  %v11702_v4 = vld [vmem:[%s16298_s1 + $0xc50] ss:$8 sps:$4 sm:$0xff]  }
 0x2e0   :  { %8639 = vmatpush1.bf16.msra.mxu0 %v11621_v43  ;;  %7866 = vmatprep.subr.bf16.mxu1 %v11626_v53  ;;  %v11705_v43 = vld [vmem:[%s16298_s1 + $0x1e50] ss:$8 sps:$4 sm:$0xff]   ;;  %v11710_v53 = vld [vmem:[%s16298_s1 + $0xc64] ss:$8 sps:$4 sm:$0xff]  }
 0x2e1   :  { %8640 = vmatprep.subr.bf16.mxu0 %v11629_v54  ;;  %v11713_v54 = vld [vmem:[%s16298_s1 + $0x1e64] ss:$8 sps:$4 sm:$0xff]  }
 0x2e3   :  { %7867 = vmatpush1.bf16.msra.mxu1 %v11624_v8  ;;  %v11708_v8 = vld [vmem:[%s16298_s1 + $0xc60] ss:$8 sps:$4 sm:$0xff]  }
 0x2e4   :  { %8641 = vmatpush1.bf16.msra.mxu0 %v11627_v9  ;;  %7868 = vmatprep.subr.bf16.mxu1 %v11632_v10  ;;  %v11711_v9 = vld [vmem:[%s16298_s1 + $0x1e60] ss:$8 sps:$4 sm:$0xff]   ;;  %v11716_v10 = vld [vmem:[%s16298_s1 + $0xc74] ss:$8 sps:$4 sm:$0xff]  }
 0x2e5   :  { %8642 = vmatprep.subr.bf16.mxu0 %v11635_v11  ;;  %v11719_v11 = vld [vmem:[%s16298_s1 + $0x1e74] ss:$8 sps:$4 sm:$0xff]  }
 0x2e7   :  { %7869 = vmatpush1.bf16.msra.mxu1 %v11630_v12  ;;  %v11714_v12 = vld [vmem:[%s16298_s1 + $0xc70] ss:$8 sps:$4 sm:$0xff]  }
 0x2e8   :  { %8643 = vmatpush1.bf16.msra.mxu0 %v11633_v47  ;;  %7870 = vmatprep.subr.bf16.mxu1 %v11638_v61  ;;  %v11717_v47 = vld [vmem:[%s16298_s1 + $0x1e70] ss:$8 sps:$4 sm:$0xff]   ;;  %v11722_v61 = vld [vmem:[%s16298_s1 + $0xc84] ss:$8 sps:$4 sm:$0xff]  }
 0x2e9   :  { %8644 = vmatprep.subr.bf16.mxu0 %v11641_v62  ;;  %v11725_v62 = vld [vmem:[%s16298_s1 + $0x1e84] ss:$8 sps:$4 sm:$0xff]  }
 0x2eb   :  { %7871 = vmatpush1.bf16.msra.mxu1 %v11636_v16  ;;  %v11720_v16 = vld [vmem:[%s16298_s1 + $0xc80] ss:$8 sps:$4 sm:$0xff]  }
 0x2ec   :  { %8645 = vmatpush1.bf16.msra.mxu0 %v11639_v17  ;;  %7872 = vmatprep.subr.bf16.mxu1 %v11644_v18  ;;  %v11723_v17 = vld [vmem:[%s16298_s1 + $0x1e80] ss:$8 sps:$4 sm:$0xff]   ;;  %v11728_v18 = vld [vmem:[%s16298_s1 + $0xc94] ss:$8 sps:$4 sm:$0xff]  }
 0x2ed   :  { %8646 = vmatprep.subr.bf16.mxu0 %v11647_v19  ;;  %v11731_v19 = vld [vmem:[%s16298_s1 + $0x1e94] ss:$8 sps:$4 sm:$0xff]  }
 0x2ef   :  { %7873 = vmatpush1.bf16.msra.mxu1 %v11642_v20  ;;  %v11726_v20 = vld [vmem:[%s16298_s1 + $0xc90] ss:$8 sps:$4 sm:$0xff]  }
 0x2f0   :  { %8647 = vmatpush1.bf16.msra.mxu0 %v11645_v55  ;;  %7874 = vmatprep.subr.bf16.mxu1 %v11650_v5  ;;  %v11729_v55 = vld [vmem:[%s16298_s1 + $0x1e90] ss:$8 sps:$4 sm:$0xff]   ;;  %v11734_v5 = vld [vmem:[%s16298_s1 + $0xca4] ss:$8 sps:$4 sm:$0xff]  }
 0x2f1   :  { %8648 = vmatprep.subr.bf16.mxu0 %v11653_v6  ;;  %v11737_v6 = vld [vmem:[%s16298_s1 + $0x1ea4] ss:$8 sps:$4 sm:$0xff]  }
 0x2f3   :  { %7875 = vmatpush1.bf16.msra.mxu1 %v11648_v26  ;;  %v11732_v26 = vld [vmem:[%s16298_s1 + $0xca0] ss:$8 sps:$4 sm:$0xff]  }
 0x2f4   :  { %8649 = vmatpush1.bf16.msra.mxu0 %v11651_v27  ;;  %7876 = vmatprep.subr.bf16.mxu1 %v11656_v32  ;;  %v11735_v27 = vld [vmem:[%s16298_s1 + $0x1ea0] ss:$8 sps:$4 sm:$0xff]   ;;  %v11740_v32 = vld [vmem:[%s16298_s1 + $0xcb4] ss:$8 sps:$4 sm:$0xff]  }
 0x2f5   :  { %8650 = vmatprep.subr.bf16.mxu0 %v11659_v33  ;;  %v11743_v33 = vld [vmem:[%s16298_s1 + $0x1eb4] ss:$8 sps:$4 sm:$0xff]  }
 0x2f7   :  { %7877 = vmatpush1.bf16.msra.mxu1 %v11654_v36  ;;  %v11738_v36 = vld [vmem:[%s16298_s1 + $0xcb0] ss:$8 sps:$4 sm:$0xff]  }
 0x2f8   :  { %8651 = vmatpush1.bf16.msra.mxu0 %v11657_v63  ;;  %7878 = vmatprep.subr.bf16.mxu1 %v11662_v13  ;;  %v11741_v63 = vld [vmem:[%s16298_s1 + $0x1eb0] ss:$8 sps:$4 sm:$0xff]   ;;  %v11746_v13 = vld [vmem:[%s16298_s1 + $0xcc4] ss:$8 sps:$4 sm:$0xff]  }
 0x2f9   :  { %8652 = vmatprep.subr.bf16.mxu0 %v11665_v14  ;;  %v11749_v14 = vld [vmem:[%s16298_s1 + $0x1ec4] ss:$8 sps:$4 sm:$0xff]  }
 0x2fb   :  { %7879 = vmatpush1.bf16.msra.mxu1 %v11660_v24  ;;  %v11744_v24 = vld [vmem:[%s16298_s1 + $0xcc0] ss:$8 sps:$4 sm:$0xff]  }
 0x2fc   :  { %8653 = vmatpush1.bf16.msra.mxu0 %v11663_v25  ;;  %7880 = vmatprep.subr.bf16.mxu1 %v11668_v7  ;;  %v11747_v25 = vld [vmem:[%s16298_s1 + $0x1ec0] ss:$8 sps:$4 sm:$0xff]   ;;  %v11752_v7 = vld [vmem:[%s16298_s1 + $0xcd4] ss:$8 sps:$4 sm:$0xff]  }
 0x2fd   :  { %8654 = vmatprep.subr.bf16.mxu0 %v11671_v21  ;;  %v11755_v21 = vld [vmem:[%s16298_s1 + $0x1ed4] ss:$8 sps:$4 sm:$0xff]  }
 0x2ff   :  { %7881 = vmatpush1.bf16.msra.mxu1 %v11666_v22  ;;  %v11750_v22 = vld [vmem:[%s16298_s1 + $0xcd0] ss:$8 sps:$4 sm:$0xff]  }
 0x300   :  { %8655 = vmatpush1.bf16.msra.mxu0 %v11669_v23  ;;  %7893 = vmatprep.subr.bf16.mxu1 %v11674_v40  ;;  %v11753_v23 = vld [vmem:[%s16298_s1 + $0x1ed0] ss:$8 sps:$4 sm:$0xff]   ;;  %v11758_v40 = vld [vmem:[%s16298_s1 + $0xce4] ss:$8 sps:$4 sm:$0xff]  }
 0x301   :  { %8667 = vmatprep.subr.bf16.mxu0 %v11677_v41  ;;  %v11761_v41 = vld [vmem:[%s16298_s1 + $0x1ee4] ss:$8 sps:$4 sm:$0xff]  }
 0x302   :  { %7883 = vmatmul.mubr.bf16.vlgmr.msra.gmra.mrb[0].mxu1 %v9135_v28  ;;  %v11756_v28 = vld [vmem:[%s16298_s1 + $0xce0] ss:$8 sps:$4 sm:$0xff]  }
 0x303   :  { %8657 = vmatmul.mubr.bf16.vlgmr.msra.gmra.mrb[0].mxu0 %v9171_v31  ;;  %7894 = vmatpush1.bf16.msra.mxu1 %v11672_v15  ;;  %v11759_v31 = vld [vmem:[%s16298_s1 + $0x1ee0] ss:$8 sps:$4 sm:$0xff]   ;;  %v11764_v15 = vld [vmem:[%s16298_s1 + $0xcf4] ss:$8 sps:$4 sm:$0xff]  }
 0x304   :  { %8668 = vmatpush1.bf16.msra.mxu0 %v11675_v29  ;;  %7895 = vmatprep.subr.bf16.mxu1 %v11680_v30  ;;  %v11767_v29 = vld [vmem:[%s16298_s1 + $0x1ef4] ss:$8 sps:$4 sm:$0xff]   ;;  %v11762_v30 = vld [vmem:[%s16298_s1 + $0xcf0] ss:$8 sps:$4 sm:$0xff]  }
 0x305   :  { %8669 = vmatprep.subr.bf16.mxu0 %v11683_v37  ;;  %7925 = vmatprep.mubr.bf16.mxu1 %v9138_v50  ;;  %v11765_v37 = vld [vmem:[%s16298_s1 + $0x1ef0] ss:$8 sps:$4 sm:$0xff]   ;;  %v11770_v50 = vld [vmem:[%s16298_s1 + $0xd04] ss:$8 sps:$4 sm:$0xff]  }
 0x306   :  { %8699 = vmatprep.mubr.bf16.mxu0 %v9174_v51  ;;  %v11773_v51 = vld [vmem:[%s16298_s1 + $0x1f04] ss:$8 sps:$4 sm:$0xff]  }
 0x307   :  { %7896 = vmatpush1.bf16.msra.mxu1 %v11678_v52  ;;  %v15143_v52 = vld [vmem:[%s16299_s0 + $0x68] sm:$0xff] }
 0x308   :  { %8670 = vmatpush1.bf16.msra.mxu0 %v11681_v38  ;;  %7897 = vmatprep.subr.bf16.mxu1 %v11686_v39  ;;  %v9137_v38 = vcombine.low %v14923_v44, %v14932_v34  ;;  %v9173_v39 = vcombine.low %v14937_v48, %v14942_v49  ;;  %v11768_v44 = vld [vmem:[%s16298_s1 + $0xd00] ss:$8 sps:$4 sm:$0xff]   ;;  %v11776_v48 = vld [vmem:[%s16298_s1 + $0xd14] ss:$8 sps:$4 sm:$0xff]  }
 0x309   :  { %8671 = vmatprep.subr.bf16.mxu0 %v11689_v42  ;;  %v15152_v42 = vld [vmem:[%s16299_s0 + $0x188] sm:$0xff]  ;;  %v11779_v49 = vld [vmem:[%s16298_s1 + $0x1f14] ss:$8 sps:$4 sm:$0xff]  }
 0x30a   :  { %v11771_v34 = vld [vmem:[%s16298_s1 + $0x1f00] ss:$8 sps:$4 sm:$0xff]  }
 0x30b   :  { %7898 = vmatpush1.bf16.msra.mxu1 %v11684_v56  ;;  %v15157_v56 = vld [vmem:[%s16299_s0 + $0xf8] sm:$0xff] }
 0x30c   :  { %8672 = vmatpush1.bf16.msra.mxu0 %v11687_v57  ;;  %7899 = vmatprep.subr.bf16.mxu1 %v11692_v58  ;;  %v15162_v57 = vld [vmem:[%s16299_s0 + $0x218] sm:$0xff]  ;;  %v9140_v58 = vcombine.high %v15143_v52, %v15152_v42 }
 0x30d   :  { %8673 = vmatprep.subr.bf16.mxu0 %v11695_v59  ;;  %v9176_v59 = vcombine.high %v15157_v56, %v15162_v57 }
 0x30f   :  { %7900 = vmatpush1.bf16.msra.mxu1 %v11690_v60  ;;  %v11774_v60 = vld [vmem:[%s16298_s1 + $0xd10] ss:$8 sps:$4 sm:$0xff]  }
 0x310   :  { %8674 = vmatpush1.bf16.msra.mxu0 %v11693_v35  ;;  %7901 = vmatprep.subr.bf16.mxu1 %v11698_v45  ;;  %v11777_v35 = vld [vmem:[%s16298_s1 + $0x1f10] ss:$8 sps:$4 sm:$0xff]   ;;  %v11782_v45 = vld [vmem:[%s16298_s1 + $0xd24] ss:$8 sps:$4 sm:$0xff]  }
 0x311   :  { %8675 = vmatprep.subr.bf16.mxu0 %v11701_v46  ;;  %v11785_v46 = vld [vmem:[%s16298_s1 + $0x1f24] ss:$8 sps:$4 sm:$0xff]  }
 0x313   :  { %7902 = vmatpush1.bf16.msra.mxu1 %v11696_v0  ;;  %v11780_v0 = vld [vmem:[%s16298_s1 + $0xd20] ss:$8 sps:$4 sm:$0xff]  }
 0x314   :  { %8676 = vmatpush1.bf16.msra.mxu0 %v11699_v1  ;;  %7903 = vmatprep.subr.bf16.mxu1 %v11704_v2  ;;  %v11783_v1 = vld [vmem:[%s16298_s1 + $0x1f20] ss:$8 sps:$4 sm:$0xff]   ;;  %v11788_v2 = vld [vmem:[%s16298_s1 + $0xd34] ss:$8 sps:$4 sm:$0xff]  }
 0x315   :  { %8677 = vmatprep.subr.bf16.mxu0 %v11707_v3  ;;  %v11791_v3 = vld [vmem:[%s16298_s1 + $0x1f34] ss:$8 sps:$4 sm:$0xff]  }
 0x317   :  { %7904 = vmatpush1.bf16.msra.mxu1 %v11702_v4  ;;  %v11786_v4 = vld [vmem:[%s16298_s1 + $0xd30] ss:$8 sps:$4 sm:$0xff]  }
 0x318   :  { %8678 = vmatpush1.bf16.msra.mxu0 %v11705_v43  ;;  %7905 = vmatprep.subr.bf16.mxu1 %v11710_v53  ;;  %v11789_v43 = vld [vmem:[%s16298_s1 + $0x1f30] ss:$8 sps:$4 sm:$0xff]   ;;  %v11794_v53 = vld [vmem:[%s16298_s1 + $0xd44] ss:$8 sps:$4 sm:$0xff]  }
 0x319   :  { %8679 = vmatprep.subr.bf16.mxu0 %v11713_v54  ;;  %v11797_v54 = vld [vmem:[%s16298_s1 + $0x1f44] ss:$8 sps:$4 sm:$0xff]  }
 0x31b   :  { %7906 = vmatpush1.bf16.msra.mxu1 %v11708_v8  ;;  %v11792_v8 = vld [vmem:[%s16298_s1 + $0xd40] ss:$8 sps:$4 sm:$0xff]  }
 0x31c   :  { %8680 = vmatpush1.bf16.msra.mxu0 %v11711_v9  ;;  %7907 = vmatprep.subr.bf16.mxu1 %v11716_v10  ;;  %v11795_v9 = vld [vmem:[%s16298_s1 + $0x1f40] ss:$8 sps:$4 sm:$0xff]   ;;  %v11800_v10 = vld [vmem:[%s16298_s1 + $0xd54] ss:$8 sps:$4 sm:$0xff]  }
 0x31d   :  { %8681 = vmatprep.subr.bf16.mxu0 %v11719_v11  ;;  %v11803_v11 = vld [vmem:[%s16298_s1 + $0x1f54] ss:$8 sps:$4 sm:$0xff]  }
 0x31f   :  { %7908 = vmatpush1.bf16.msra.mxu1 %v11714_v12  ;;  %v11798_v12 = vld [vmem:[%s16298_s1 + $0xd50] ss:$8 sps:$4 sm:$0xff]  }
 0x320   :  { %8682 = vmatpush1.bf16.msra.mxu0 %v11717_v47  ;;  %7909 = vmatprep.subr.bf16.mxu1 %v11722_v61  ;;  %v11801_v47 = vld [vmem:[%s16298_s1 + $0x1f50] ss:$8 sps:$4 sm:$0xff]   ;;  %v11806_v61 = vld [vmem:[%s16298_s1 + $0xd64] ss:$8 sps:$4 sm:$0xff]  }
 0x321   :  { %8683 = vmatprep.subr.bf16.mxu0 %v11725_v62  ;;  %v11809_v62 = vld [vmem:[%s16298_s1 + $0x1f64] ss:$8 sps:$4 sm:$0xff]  }
 0x323   :  { %7910 = vmatpush1.bf16.msra.mxu1 %v11720_v16  ;;  %v11804_v16 = vld [vmem:[%s16298_s1 + $0xd60] ss:$8 sps:$4 sm:$0xff]  }
 0x324   :  { %8684 = vmatpush1.bf16.msra.mxu0 %v11723_v17  ;;  %7911 = vmatprep.subr.bf16.mxu1 %v11728_v18  ;;  %v11807_v17 = vld [vmem:[%s16298_s1 + $0x1f60] ss:$8 sps:$4 sm:$0xff]   ;;  %v11812_v18 = vld [vmem:[%s16298_s1 + $0xd74] ss:$8 sps:$4 sm:$0xff]  }
 0x325   :  { %8685 = vmatprep.subr.bf16.mxu0 %v11731_v19  ;;  %v11815_v19 = vld [vmem:[%s16298_s1 + $0x1f74] ss:$8 sps:$4 sm:$0xff]  }
 0x327   :  { %7912 = vmatpush1.bf16.msra.mxu1 %v11726_v20  ;;  %v11810_v20 = vld [vmem:[%s16298_s1 + $0xd70] ss:$8 sps:$4 sm:$0xff]  }
 0x328   :  { %8686 = vmatpush1.bf16.msra.mxu0 %v11729_v55  ;;  %7913 = vmatprep.subr.bf16.mxu1 %v11734_v5  ;;  %v11813_v55 = vld [vmem:[%s16298_s1 + $0x1f70] ss:$8 sps:$4 sm:$0xff]   ;;  %v11818_v5 = vld [vmem:[%s16298_s1 + $0xd84] ss:$8 sps:$4 sm:$0xff]  }
 0x329   :  { %8687 = vmatprep.subr.bf16.mxu0 %v11737_v6  ;;  %v11821_v6 = vld [vmem:[%s16298_s1 + $0x1f84] ss:$8 sps:$4 sm:$0xff]  }
 0x32b   :  { %7914 = vmatpush1.bf16.msra.mxu1 %v11732_v26  ;;  %v11816_v26 = vld [vmem:[%s16298_s1 + $0xd80] ss:$8 sps:$4 sm:$0xff]  }
 0x32c   :  { %8688 = vmatpush1.bf16.msra.mxu0 %v11735_v27  ;;  %7915 = vmatprep.subr.bf16.mxu1 %v11740_v32  ;;  %v11819_v27 = vld [vmem:[%s16298_s1 + $0x1f80] ss:$8 sps:$4 sm:$0xff]   ;;  %v11824_v32 = vld [vmem:[%s16298_s1 + $0xd94] ss:$8 sps:$4 sm:$0xff]  }
 0x32d   :  { %8689 = vmatprep.subr.bf16.mxu0 %v11743_v33  ;;  %v11827_v33 = vld [vmem:[%s16298_s1 + $0x1f94] ss:$8 sps:$4 sm:$0xff]  }
 0x32f   :  { %7916 = vmatpush1.bf16.msra.mxu1 %v11738_v36  ;;  %v11822_v36 = vld [vmem:[%s16298_s1 + $0xd90] ss:$8 sps:$4 sm:$0xff]  }
 0x330   :  { %8690 = vmatpush1.bf16.msra.mxu0 %v11741_v63  ;;  %7917 = vmatprep.subr.bf16.mxu1 %v11746_v13  ;;  %v11825_v63 = vld [vmem:[%s16298_s1 + $0x1f90] ss:$8 sps:$4 sm:$0xff]   ;;  %v11830_v13 = vld [vmem:[%s16298_s1 + $0xda4] ss:$8 sps:$4 sm:$0xff]  }
 0x331   :  { %8691 = vmatprep.subr.bf16.mxu0 %v11749_v14  ;;  %v11833_v14 = vld [vmem:[%s16298_s1 + $0x1fa4] ss:$8 sps:$4 sm:$0xff]  }
 0x333   :  { %7918 = vmatpush1.bf16.msra.mxu1 %v11744_v24  ;;  %v11828_v24 = vld [vmem:[%s16298_s1 + $0xda0] ss:$8 sps:$4 sm:$0xff]  }
 0x334   :  { %8692 = vmatpush1.bf16.msra.mxu0 %v11747_v25  ;;  %7919 = vmatprep.subr.bf16.mxu1 %v11752_v7  ;;  %v11831_v25 = vld [vmem:[%s16298_s1 + $0x1fa0] ss:$8 sps:$4 sm:$0xff]   ;;  %v11836_v7 = vld [vmem:[%s16298_s1 + $0xdb4] ss:$8 sps:$4 sm:$0xff]  }
 0x335   :  { %8693 = vmatprep.subr.bf16.mxu0 %v11755_v21  ;;  %v11839_v21 = vld [vmem:[%s16298_s1 + $0x1fb4] ss:$8 sps:$4 sm:$0xff]  }
 0x337   :  { %7920 = vmatpush1.bf16.msra.mxu1 %v11750_v22  ;;  %v11834_v22 = vld [vmem:[%s16298_s1 + $0xdb0] ss:$8 sps:$4 sm:$0xff]  }
 0x338   :  { %8694 = vmatpush1.bf16.msra.mxu0 %v11753_v23  ;;  %7921 = vmatprep.subr.bf16.mxu1 %v11758_v40  ;;  %v11837_v23 = vld [vmem:[%s16298_s1 + $0x1fb0] ss:$8 sps:$4 sm:$0xff]   ;;  %v11842_v40 = vld [vmem:[%s16298_s1 + $0xdc4] ss:$8 sps:$4 sm:$0xff]  }
 0x339   :  { %8695 = vmatprep.subr.bf16.mxu0 %v11761_v41  ;;  %v11845_v41 = vld [vmem:[%s16298_s1 + $0x1fc4] ss:$8 sps:$4 sm:$0xff]  }
 0x33b   :  { %7922 = vmatpush1.bf16.msra.mxu1 %v11756_v28  ;;  %v11840_v28 = vld [vmem:[%s16298_s1 + $0xdc0] ss:$8 sps:$4 sm:$0xff]  }
 0x33c   :  { %8696 = vmatpush1.bf16.msra.mxu0 %v11759_v31  ;;  %7923 = vmatprep.subr.bf16.mxu1 %v11764_v15  ;;  %v11843_v31 = vld [vmem:[%s16298_s1 + $0x1fc0] ss:$8 sps:$4 sm:$0xff]   ;;  %v11848_v15 = vld [vmem:[%s16298_s1 + $0xdd4] ss:$8 sps:$4 sm:$0xff]  }
 0x33d   :  { %8697 = vmatprep.subr.bf16.mxu0 %v11767_v29  ;;  %v11851_v29 = vld [vmem:[%s16298_s1 + $0x1fd4] ss:$8 sps:$4 sm:$0xff]  }
 0x33f   :  { %7924 = vmatpush1.bf16.msra.mxu1 %v11762_v30  ;;  %v11846_v30 = vld [vmem:[%s16298_s1 + $0xdd0] ss:$8 sps:$4 sm:$0xff]  }
 0x340   :  { %8698 = vmatpush1.bf16.msra.mxu0 %v11765_v37  ;;  %7936 = vmatprep.subr.bf16.mxu1 %v11770_v50  ;;  %v11849_v37 = vld [vmem:[%s16298_s1 + $0x1fd0] ss:$8 sps:$4 sm:$0xff]   ;;  %v11854_v50 = vld [vmem:[%s16298_s1 + $0xde4] ss:$8 sps:$4 sm:$0xff]  }
 0x341   :  { %8710 = vmatprep.subr.bf16.mxu0 %v11773_v51  ;;  %v11857_v51 = vld [vmem:[%s16298_s1 + $0x1fe4] ss:$8 sps:$4 sm:$0xff]  }
 0x342   :  { %7926 = vmatmul.mubr.bf16.vlgmr.msra.gmra.mrb[0].mxu1 %v9137_v38  ;;  %v11852_v38 = vld [vmem:[%s16298_s1 + $0xde0] ss:$8 sps:$4 sm:$0xff]  }
 0x343   :  { %8700 = vmatmul.mubr.bf16.vlgmr.msra.gmra.mrb[0].mxu0 %v9173_v39  ;;  %7937 = vmatpush1.bf16.msra.mxu1 %v11768_v44  ;;  %v11855_v39 = vld [vmem:[%s16298_s1 + $0x1fe0] ss:$8 sps:$4 sm:$0xff]   ;;  %v11860_v44 = vld [vmem:[%s16298_s1 + $0xdf4] ss:$8 sps:$4 sm:$0xff]  }
 0x344   :  { %8711 = vmatpush1.bf16.msra.mxu0 %v11771_v34  ;;  %7938 = vmatprep.subr.bf16.mxu1 %v11776_v48  ;;  %v11863_v34 = vld [vmem:[%s16298_s1 + $0x1ff4] ss:$8 sps:$4 sm:$0xff]   ;;  %v11858_v48 = vld [vmem:[%s16298_s1 + $0xdf0] ss:$8 sps:$4 sm:$0xff]  }
 0x345   :  { %8712 = vmatprep.subr.bf16.mxu0 %v11779_v49  ;;  %7968 = vmatprep.mubr.bf16.mxu1 %v9140_v58  ;;  %v11861_v49 = vld [vmem:[%s16298_s1 + $0x1ff0] ss:$8 sps:$4 sm:$0xff]   ;;  %v11866_v58 = vld [vmem:[%s16298_s1 + $0xe04] ss:$8 sps:$4 sm:$0xff]  }
 0x346   :  { %8742 = vmatprep.mubr.bf16.mxu0 %v9176_v59  ;;  %v11869_v59 = vld [vmem:[%s16298_s1 + $0x2004] ss:$8 sps:$4 sm:$0xff]  }
 0x347   :  { %7939 = vmatpush1.bf16.msra.mxu1 %v11774_v60  ;;  %v15363_v60 = vld [vmem:[%s16299_s0 + $0x70] sm:$0xff] }
 0x348   :  { %8713 = vmatpush1.bf16.msra.mxu0 %v11777_v35  ;;  %7940 = vmatprep.subr.bf16.mxu1 %v11782_v45  ;;  %v9139_v35 = vcombine.low %v15143_v52, %v15152_v42  ;;  %v9175_v45 = vcombine.low %v15157_v56, %v15162_v57  ;;  %v11864_v52 = vld [vmem:[%s16298_s1 + $0xe00] ss:$8 sps:$4 sm:$0xff]   ;;  %v11872_v56 = vld [vmem:[%s16298_s1 + $0xe14] ss:$8 sps:$4 sm:$0xff]  }
 0x349   :  { %8714 = vmatprep.subr.bf16.mxu0 %v11785_v46  ;;  %v15372_v46 = vld [vmem:[%s16299_s0 + $0x190] sm:$0xff]  ;;  %v11867_v42 = vld [vmem:[%s16298_s1 + $0x2000] ss:$8 sps:$4 sm:$0xff]  }
 0x34a   :  { %v11875_v57 = vld [vmem:[%s16298_s1 + $0x2014] ss:$8 sps:$4 sm:$0xff]  }
 0x34b   :  { %7941 = vmatpush1.bf16.msra.mxu1 %v11780_v0  ;;  %v15377_v0 = vld [vmem:[%s16299_s0 + $0x100] sm:$0xff] }
 0x34c   :  { %8715 = vmatpush1.bf16.msra.mxu0 %v11783_v1  ;;  %7942 = vmatprep.subr.bf16.mxu1 %v11788_v2  ;;  %v15382_v1 = vld [vmem:[%s16299_s0 + $0x220] sm:$0xff]  ;;  %v9142_v2 = vcombine.high %v15363_v60, %v15372_v46 }
 0x34d   :  { %8716 = vmatprep.subr.bf16.mxu0 %v11791_v3  ;;  %v9178_v3 = vcombine.high %v15377_v0, %v15382_v1 }
 0x34f   :  { %7943 = vmatpush1.bf16.msra.mxu1 %v11786_v4  ;;  %v11870_v4 = vld [vmem:[%s16298_s1 + $0xe10] ss:$8 sps:$4 sm:$0xff]  }
 0x350   :  { %8717 = vmatpush1.bf16.msra.mxu0 %v11789_v43  ;;  %7944 = vmatprep.subr.bf16.mxu1 %v11794_v53  ;;  %v11873_v43 = vld [vmem:[%s16298_s1 + $0x2010] ss:$8 sps:$4 sm:$0xff]   ;;  %v11878_v53 = vld [vmem:[%s16298_s1 + $0xe24] ss:$8 sps:$4 sm:$0xff]  }
 0x351   :  { %8718 = vmatprep.subr.bf16.mxu0 %v11797_v54  ;;  %v11881_v54 = vld [vmem:[%s16298_s1 + $0x2024] ss:$8 sps:$4 sm:$0xff]  }
 0x353   :  { %7945 = vmatpush1.bf16.msra.mxu1 %v11792_v8  ;;  %v11876_v8 = vld [vmem:[%s16298_s1 + $0xe20] ss:$8 sps:$4 sm:$0xff]  }
 0x354   :  { %8719 = vmatpush1.bf16.msra.mxu0 %v11795_v9  ;;  %7946 = vmatprep.subr.bf16.mxu1 %v11800_v10  ;;  %v11879_v9 = vld [vmem:[%s16298_s1 + $0x2020] ss:$8 sps:$4 sm:$0xff]   ;;  %v11884_v10 = vld [vmem:[%s16298_s1 + $0xe34] ss:$8 sps:$4 sm:$0xff]  }
 0x355   :  { %8720 = vmatprep.subr.bf16.mxu0 %v11803_v11  ;;  %v11887_v11 = vld [vmem:[%s16298_s1 + $0x2034] ss:$8 sps:$4 sm:$0xff]  }
 0x357   :  { %7947 = vmatpush1.bf16.msra.mxu1 %v11798_v12  ;;  %v11882_v12 = vld [vmem:[%s16298_s1 + $0xe30] ss:$8 sps:$4 sm:$0xff]  }
 0x358   :  { %8721 = vmatpush1.bf16.msra.mxu0 %v11801_v47  ;;  %7948 = vmatprep.subr.bf16.mxu1 %v11806_v61  ;;  %v11885_v47 = vld [vmem:[%s16298_s1 + $0x2030] ss:$8 sps:$4 sm:$0xff]   ;;  %v11890_v61 = vld [vmem:[%s16298_s1 + $0xe44] ss:$8 sps:$4 sm:$0xff]  }
 0x359   :  { %8722 = vmatprep.subr.bf16.mxu0 %v11809_v62  ;;  %v11893_v62 = vld [vmem:[%s16298_s1 + $0x2044] ss:$8 sps:$4 sm:$0xff]  }
 0x35b   :  { %7949 = vmatpush1.bf16.msra.mxu1 %v11804_v16  ;;  %v11888_v16 = vld [vmem:[%s16298_s1 + $0xe40] ss:$8 sps:$4 sm:$0xff]  }
 0x35c   :  { %8723 = vmatpush1.bf16.msra.mxu0 %v11807_v17  ;;  %7950 = vmatprep.subr.bf16.mxu1 %v11812_v18  ;;  %v11891_v17 = vld [vmem:[%s16298_s1 + $0x2040] ss:$8 sps:$4 sm:$0xff]   ;;  %v11896_v18 = vld [vmem:[%s16298_s1 + $0xe54] ss:$8 sps:$4 sm:$0xff]  }
 0x35d   :  { %8724 = vmatprep.subr.bf16.mxu0 %v11815_v19  ;;  %v11899_v19 = vld [vmem:[%s16298_s1 + $0x2054] ss:$8 sps:$4 sm:$0xff]  }
 0x35f   :  { %7951 = vmatpush1.bf16.msra.mxu1 %v11810_v20  ;;  %v11894_v20 = vld [vmem:[%s16298_s1 + $0xe50] ss:$8 sps:$4 sm:$0xff]  }
 0x360   :  { %8725 = vmatpush1.bf16.msra.mxu0 %v11813_v55  ;;  %7952 = vmatprep.subr.bf16.mxu1 %v11818_v5  ;;  %v11897_v55 = vld [vmem:[%s16298_s1 + $0x2050] ss:$8 sps:$4 sm:$0xff]   ;;  %v11902_v5 = vld [vmem:[%s16298_s1 + $0xe64] ss:$8 sps:$4 sm:$0xff]  }
 0x361   :  { %8726 = vmatprep.subr.bf16.mxu0 %v11821_v6  ;;  %v11905_v6 = vld [vmem:[%s16298_s1 + $0x2064] ss:$8 sps:$4 sm:$0xff]  }
 0x363   :  { %7953 = vmatpush1.bf16.msra.mxu1 %v11816_v26  ;;  %v11900_v26 = vld [vmem:[%s16298_s1 + $0xe60] ss:$8 sps:$4 sm:$0xff]  }
 0x364   :  { %8727 = vmatpush1.bf16.msra.mxu0 %v11819_v27  ;;  %7954 = vmatprep.subr.bf16.mxu1 %v11824_v32  ;;  %v11903_v27 = vld [vmem:[%s16298_s1 + $0x2060] ss:$8 sps:$4 sm:$0xff]   ;;  %v11908_v32 = vld [vmem:[%s16298_s1 + $0xe74] ss:$8 sps:$4 sm:$0xff]  }
 0x365   :  { %8728 = vmatprep.subr.bf16.mxu0 %v11827_v33  ;;  %v11911_v33 = vld [vmem:[%s16298_s1 + $0x2074] ss:$8 sps:$4 sm:$0xff]  }
 0x367   :  { %7955 = vmatpush1.bf16.msra.mxu1 %v11822_v36  ;;  %v11906_v36 = vld [vmem:[%s16298_s1 + $0xe70] ss:$8 sps:$4 sm:$0xff]  }
 0x368   :  { %8729 = vmatpush1.bf16.msra.mxu0 %v11825_v63  ;;  %7956 = vmatprep.subr.bf16.mxu1 %v11830_v13  ;;  %v11909_v63 = vld [vmem:[%s16298_s1 + $0x2070] ss:$8 sps:$4 sm:$0xff]   ;;  %v11914_v13 = vld [vmem:[%s16298_s1 + $0xe84] ss:$8 sps:$4 sm:$0xff]  }
 0x369   :  { %8730 = vmatprep.subr.bf16.mxu0 %v11833_v14  ;;  %v11917_v14 = vld [vmem:[%s16298_s1 + $0x2084] ss:$8 sps:$4 sm:$0xff]  }
 0x36b   :  { %7957 = vmatpush1.bf16.msra.mxu1 %v11828_v24  ;;  %v11912_v24 = vld [vmem:[%s16298_s1 + $0xe80] ss:$8 sps:$4 sm:$0xff]  }
 0x36c   :  { %8731 = vmatpush1.bf16.msra.mxu0 %v11831_v25  ;;  %7958 = vmatprep.subr.bf16.mxu1 %v11836_v7  ;;  %v11915_v25 = vld [vmem:[%s16298_s1 + $0x2080] ss:$8 sps:$4 sm:$0xff]   ;;  %v11920_v7 = vld [vmem:[%s16298_s1 + $0xe94] ss:$8 sps:$4 sm:$0xff]  }
 0x36d   :  { %8732 = vmatprep.subr.bf16.mxu0 %v11839_v21  ;;  %v11923_v21 = vld [vmem:[%s16298_s1 + $0x2094] ss:$8 sps:$4 sm:$0xff]  }
 0x36f   :  { %7959 = vmatpush1.bf16.msra.mxu1 %v11834_v22  ;;  %v11918_v22 = vld [vmem:[%s16298_s1 + $0xe90] ss:$8 sps:$4 sm:$0xff]  }
 0x370   :  { %8733 = vmatpush1.bf16.msra.mxu0 %v11837_v23  ;;  %7960 = vmatprep.subr.bf16.mxu1 %v11842_v40  ;;  %v11921_v23 = vld [vmem:[%s16298_s1 + $0x2090] ss:$8 sps:$4 sm:$0xff]   ;;  %v11926_v40 = vld [vmem:[%s16298_s1 + $0xea4] ss:$8 sps:$4 sm:$0xff]  }
 0x371   :  { %8734 = vmatprep.subr.bf16.mxu0 %v11845_v41  ;;  %v11929_v41 = vld [vmem:[%s16298_s1 + $0x20a4] ss:$8 sps:$4 sm:$0xff]  }
 0x373   :  { %7961 = vmatpush1.bf16.msra.mxu1 %v11840_v28  ;;  %v11924_v28 = vld [vmem:[%s16298_s1 + $0xea0] ss:$8 sps:$4 sm:$0xff]  }
 0x374   :  { %8735 = vmatpush1.bf16.msra.mxu0 %v11843_v31  ;;  %7962 = vmatprep.subr.bf16.mxu1 %v11848_v15  ;;  %v11927_v31 = vld [vmem:[%s16298_s1 + $0x20a0] ss:$8 sps:$4 sm:$0xff]   ;;  %v11932_v15 = vld [vmem:[%s16298_s1 + $0xeb4] ss:$8 sps:$4 sm:$0xff]  }
 0x375   :  { %8736 = vmatprep.subr.bf16.mxu0 %v11851_v29  ;;  %v11935_v29 = vld [vmem:[%s16298_s1 + $0x20b4] ss:$8 sps:$4 sm:$0xff]  }
 0x377   :  { %7963 = vmatpush1.bf16.msra.mxu1 %v11846_v30  ;;  %v11930_v30 = vld [vmem:[%s16298_s1 + $0xeb0] ss:$8 sps:$4 sm:$0xff]  }
 0x378   :  { %8737 = vmatpush1.bf16.msra.mxu0 %v11849_v37  ;;  %7964 = vmatprep.subr.bf16.mxu1 %v11854_v50  ;;  %v11933_v37 = vld [vmem:[%s16298_s1 + $0x20b0] ss:$8 sps:$4 sm:$0xff]   ;;  %v11938_v50 = vld [vmem:[%s16298_s1 + $0xec4] ss:$8 sps:$4 sm:$0xff]  }
 0x379   :  { %8738 = vmatprep.subr.bf16.mxu0 %v11857_v51  ;;  %v11941_v51 = vld [vmem:[%s16298_s1 + $0x20c4] ss:$8 sps:$4 sm:$0xff]  }
 0x37b   :  { %7965 = vmatpush1.bf16.msra.mxu1 %v11852_v38  ;;  %v11936_v38 = vld [vmem:[%s16298_s1 + $0xec0] ss:$8 sps:$4 sm:$0xff]  }
 0x37c   :  { %8739 = vmatpush1.bf16.msra.mxu0 %v11855_v39  ;;  %7966 = vmatprep.subr.bf16.mxu1 %v11860_v44  ;;  %v11939_v39 = vld [vmem:[%s16298_s1 + $0x20c0] ss:$8 sps:$4 sm:$0xff]   ;;  %v11944_v44 = vld [vmem:[%s16298_s1 + $0xed4] ss:$8 sps:$4 sm:$0xff]  }
 0x37d   :  { %8740 = vmatprep.subr.bf16.mxu0 %v11863_v34  ;;  %v11947_v34 = vld [vmem:[%s16298_s1 + $0x20d4] ss:$8 sps:$4 sm:$0xff]  }
 0x37f   :  { %7967 = vmatpush1.bf16.msra.mxu1 %v11858_v48  ;;  %v11942_v48 = vld [vmem:[%s16298_s1 + $0xed0] ss:$8 sps:$4 sm:$0xff]  }
 0x380   :  { %8741 = vmatpush1.bf16.msra.mxu0 %v11861_v49  ;;  %7979 = vmatprep.subr.bf16.mxu1 %v11866_v58  ;;  %v11945_v49 = vld [vmem:[%s16298_s1 + $0x20d0] ss:$8 sps:$4 sm:$0xff]   ;;  %v11950_v58 = vld [vmem:[%s16298_s1 + $0xee4] ss:$8 sps:$4 sm:$0xff]  }
 0x381   :  { %8753 = vmatprep.subr.bf16.mxu0 %v11869_v59  ;;  %v11953_v59 = vld [vmem:[%s16298_s1 + $0x20e4] ss:$8 sps:$4 sm:$0xff]  }
 0x382   :  { %7969 = vmatmul.mubr.bf16.vlgmr.msra.gmra.mrb[0].mxu1 %v9139_v35  ;;  %v11948_v35 = vld [vmem:[%s16298_s1 + $0xee0] ss:$8 sps:$4 sm:$0xff]  }
 0x383   :  { %8743 = vmatmul.mubr.bf16.vlgmr.msra.gmra.mrb[0].mxu0 %v9175_v45  ;;  %7980 = vmatpush1.bf16.msra.mxu1 %v11864_v52  ;;  %v11951_v45 = vld [vmem:[%s16298_s1 + $0x20e0] ss:$8 sps:$4 sm:$0xff]   ;;  %v11956_v52 = vld [vmem:[%s16298_s1 + $0xef4] ss:$8 sps:$4 sm:$0xff]  }
 0x384   :  { %8754 = vmatpush1.bf16.msra.mxu0 %v11867_v42  ;;  %7981 = vmatprep.subr.bf16.mxu1 %v11872_v56  ;;  %v11959_v42 = vld [vmem:[%s16298_s1 + $0x20f4] ss:$8 sps:$4 sm:$0xff]   ;;  %v11954_v56 = vld [vmem:[%s16298_s1 + $0xef0] ss:$8 sps:$4 sm:$0xff]  }
 0x385   :  { %8755 = vmatprep.subr.bf16.mxu0 %v11875_v57  ;;  %8011 = vmatprep.mubr.bf16.mxu1 %v9142_v2  ;;  %v11957_v57 = vld [vmem:[%s16298_s1 + $0x20f0] ss:$8 sps:$4 sm:$0xff]   ;;  %v11962_v2 = vld [vmem:[%s16298_s1 + $0xf04] ss:$8 sps:$4 sm:$0xff]  }
 0x386   :  { %8785 = vmatprep.mubr.bf16.mxu0 %v9178_v3  ;;  %v11965_v3 = vld [vmem:[%s16298_s1 + $0x2104] ss:$8 sps:$4 sm:$0xff]  }
 0x387   :  { %7982 = vmatpush1.bf16.msra.mxu1 %v11870_v4  ;;  %v15583_v4 = vld [vmem:[%s16299_s0 + $0x78] sm:$0xff] }
 0x388   :  { %8756 = vmatpush1.bf16.msra.mxu0 %v11873_v43  ;;  %7983 = vmatprep.subr.bf16.mxu1 %v11878_v53  ;;  %v9141_v43 = vcombine.low %v15363_v60, %v15372_v46  ;;  %v9177_v53 = vcombine.low %v15377_v0, %v15382_v1  ;;  %v11960_v60 = vld [vmem:[%s16298_s1 + $0xf00] ss:$8 sps:$4 sm:$0xff]   ;;  %v11968_v0 = vld [vmem:[%s16298_s1 + $0xf14] ss:$8 sps:$4 sm:$0xff]  }
 0x389   :  { %8757 = vmatprep.subr.bf16.mxu0 %v11881_v54  ;;  %v15592_v54 = vld [vmem:[%s16299_s0 + $0x198] sm:$0xff]  ;;  %v11963_v46 = vld [vmem:[%s16298_s1 + $0x2100] ss:$8 sps:$4 sm:$0xff]  }
 0x38a   :  { %v11971_v1 = vld [vmem:[%s16298_s1 + $0x2114] ss:$8 sps:$4 sm:$0xff]  }
 0x38b   :  { %7984 = vmatpush1.bf16.msra.mxu1 %v11876_v8  ;;  %v15597_v8 = vld [vmem:[%s16299_s0 + $0x108] sm:$0xff] }
 0x38c   :  { %8758 = vmatpush1.bf16.msra.mxu0 %v11879_v9  ;;  %7985 = vmatprep.subr.bf16.mxu1 %v11884_v10  ;;  %v15602_v9 = vld [vmem:[%s16299_s0 + $0x228] sm:$0xff]  ;;  %v9144_v10 = vcombine.high %v15583_v4, %v15592_v54 }
 0x38d   :  { %8759 = vmatprep.subr.bf16.mxu0 %v11887_v11  ;;  %v9180_v11 = vcombine.high %v15597_v8, %v15602_v9 }
 0x38f   :  { %7986 = vmatpush1.bf16.msra.mxu1 %v11882_v12  ;;  %v11966_v12 = vld [vmem:[%s16298_s1 + $0xf10] ss:$8 sps:$4 sm:$0xff]  }
 0x390   :  { %8760 = vmatpush1.bf16.msra.mxu0 %v11885_v47  ;;  %7987 = vmatprep.subr.bf16.mxu1 %v11890_v61  ;;  %v11969_v47 = vld [vmem:[%s16298_s1 + $0x2110] ss:$8 sps:$4 sm:$0xff]   ;;  %v11974_v61 = vld [vmem:[%s16298_s1 + $0xf24] ss:$8 sps:$4 sm:$0xff]  }
 0x391   :  { %8761 = vmatprep.subr.bf16.mxu0 %v11893_v62  ;;  %v11977_v62 = vld [vmem:[%s16298_s1 + $0x2124] ss:$8 sps:$4 sm:$0xff]  }
 0x393   :  { %7988 = vmatpush1.bf16.msra.mxu1 %v11888_v16  ;;  %v11972_v16 = vld [vmem:[%s16298_s1 + $0xf20] ss:$8 sps:$4 sm:$0xff]  }
 0x394   :  { %8762 = vmatpush1.bf16.msra.mxu0 %v11891_v17  ;;  %7989 = vmatprep.subr.bf16.mxu1 %v11896_v18  ;;  %v11975_v17 = vld [vmem:[%s16298_s1 + $0x2120] ss:$8 sps:$4 sm:$0xff]   ;;  %v11980_v18 = vld [vmem:[%s16298_s1 + $0xf34] ss:$8 sps:$4 sm:$0xff]  }
 0x395   :  { %8763 = vmatprep.subr.bf16.mxu0 %v11899_v19  ;;  %v11983_v19 = vld [vmem:[%s16298_s1 + $0x2134] ss:$8 sps:$4 sm:$0xff]  }
 0x397   :  { %7990 = vmatpush1.bf16.msra.mxu1 %v11894_v20  ;;  %v11978_v20 = vld [vmem:[%s16298_s1 + $0xf30] ss:$8 sps:$4 sm:$0xff]  }
 0x398   :  { %8764 = vmatpush1.bf16.msra.mxu0 %v11897_v55  ;;  %7991 = vmatprep.subr.bf16.mxu1 %v11902_v5  ;;  %v11981_v55 = vld [vmem:[%s16298_s1 + $0x2130] ss:$8 sps:$4 sm:$0xff]   ;;  %v11986_v5 = vld [vmem:[%s16298_s1 + $0xf44] ss:$8 sps:$4 sm:$0xff]  }
 0x399   :  { %8765 = vmatprep.subr.bf16.mxu0 %v11905_v6  ;;  %v11989_v6 = vld [vmem:[%s16298_s1 + $0x2144] ss:$8 sps:$4 sm:$0xff]  }
 0x39b   :  { %7992 = vmatpush1.bf16.msra.mxu1 %v11900_v26  ;;  %v11984_v26 = vld [vmem:[%s16298_s1 + $0xf40] ss:$8 sps:$4 sm:$0xff]  }
 0x39c   :  { %8766 = vmatpush1.bf16.msra.mxu0 %v11903_v27  ;;  %7993 = vmatprep.subr.bf16.mxu1 %v11908_v32  ;;  %v11987_v27 = vld [vmem:[%s16298_s1 + $0x2140] ss:$8 sps:$4 sm:$0xff]   ;;  %v11992_v32 = vld [vmem:[%s16298_s1 + $0xf54] ss:$8 sps:$4 sm:$0xff]  }
 0x39d   :  { %8767 = vmatprep.subr.bf16.mxu0 %v11911_v33  ;;  %v11995_v33 = vld [vmem:[%s16298_s1 + $0x2154] ss:$8 sps:$4 sm:$0xff]  }
 0x39f   :  { %7994 = vmatpush1.bf16.msra.mxu1 %v11906_v36  ;;  %v11990_v36 = vld [vmem:[%s16298_s1 + $0xf50] ss:$8 sps:$4 sm:$0xff]  }
 0x3a0   :  { %8768 = vmatpush1.bf16.msra.mxu0 %v11909_v63  ;;  %7995 = vmatprep.subr.bf16.mxu1 %v11914_v13  ;;  %v11993_v63 = vld [vmem:[%s16298_s1 + $0x2150] ss:$8 sps:$4 sm:$0xff]   ;;  %v11998_v13 = vld [vmem:[%s16298_s1 + $0xf64] ss:$8 sps:$4 sm:$0xff]  }
 0x3a1   :  { %8769 = vmatprep.subr.bf16.mxu0 %v11917_v14  ;;  %v12001_v14 = vld [vmem:[%s16298_s1 + $0x2164] ss:$8 sps:$4 sm:$0xff]  }
 0x3a3   :  { %7996 = vmatpush1.bf16.msra.mxu1 %v11912_v24  ;;  %v11996_v24 = vld [vmem:[%s16298_s1 + $0xf60] ss:$8 sps:$4 sm:$0xff]  }
 0x3a4   :  { %8770 = vmatpush1.bf16.msra.mxu0 %v11915_v25  ;;  %7997 = vmatprep.subr.bf16.mxu1 %v11920_v7  ;;  %v11999_v25 = vld [vmem:[%s16298_s1 + $0x2160] ss:$8 sps:$4 sm:$0xff]   ;;  %v12004_v7 = vld [vmem:[%s16298_s1 + $0xf74] ss:$8 sps:$4 sm:$0xff]  }
 0x3a5   :  { %8771 = vmatprep.subr.bf16.mxu0 %v11923_v21  ;;  %v12007_v21 = vld [vmem:[%s16298_s1 + $0x2174] ss:$8 sps:$4 sm:$0xff]  }
 0x3a7   :  { %7998 = vmatpush1.bf16.msra.mxu1 %v11918_v22  ;;  %v12002_v22 = vld [vmem:[%s16298_s1 + $0xf70] ss:$8 sps:$4 sm:$0xff]  }
 0x3a8   :  { %8772 = vmatpush1.bf16.msra.mxu0 %v11921_v23  ;;  %7999 = vmatprep.subr.bf16.mxu1 %v11926_v40  ;;  %v12005_v23 = vld [vmem:[%s16298_s1 + $0x2170] ss:$8 sps:$4 sm:$0xff]   ;;  %v12010_v40 = vld [vmem:[%s16298_s1 + $0xf84] ss:$8 sps:$4 sm:$0xff]  }
 0x3a9   :  { %8773 = vmatprep.subr.bf16.mxu0 %v11929_v41  ;;  %v12013_v41 = vld [vmem:[%s16298_s1 + $0x2184] ss:$8 sps:$4 sm:$0xff]  }
 0x3ab   :  { %8000 = vmatpush1.bf16.msra.mxu1 %v11924_v28  ;;  %v12008_v28 = vld [vmem:[%s16298_s1 + $0xf80] ss:$8 sps:$4 sm:$0xff]  }
 0x3ac   :  { %8774 = vmatpush1.bf16.msra.mxu0 %v11927_v31  ;;  %8001 = vmatprep.subr.bf16.mxu1 %v11932_v15  ;;  %v12011_v31 = vld [vmem:[%s16298_s1 + $0x2180] ss:$8 sps:$4 sm:$0xff]   ;;  %v12016_v15 = vld [vmem:[%s16298_s1 + $0xf94] ss:$8 sps:$4 sm:$0xff]  }
 0x3ad   :  { %8775 = vmatprep.subr.bf16.mxu0 %v11935_v29  ;;  %v12019_v29 = vld [vmem:[%s16298_s1 + $0x2194] ss:$8 sps:$4 sm:$0xff]  }
 0x3af   :  { %8002 = vmatpush1.bf16.msra.mxu1 %v11930_v30  ;;  %v12014_v30 = vld [vmem:[%s16298_s1 + $0xf90] ss:$8 sps:$4 sm:$0xff]  }
 0x3b0   :  { %8776 = vmatpush1.bf16.msra.mxu0 %v11933_v37  ;;  %8003 = vmatprep.subr.bf16.mxu1 %v11938_v50  ;;  %v12017_v37 = vld [vmem:[%s16298_s1 + $0x2190] ss:$8 sps:$4 sm:$0xff]   ;;  %v12022_v50 = vld [vmem:[%s16298_s1 + $0xfa4] ss:$8 sps:$4 sm:$0xff]  }
 0x3b1   :  { %8777 = vmatprep.subr.bf16.mxu0 %v11941_v51  ;;  %v12025_v51 = vld [vmem:[%s16298_s1 + $0x21a4] ss:$8 sps:$4 sm:$0xff]  }
 0x3b3   :  { %8004 = vmatpush1.bf16.msra.mxu1 %v11936_v38  ;;  %v12020_v38 = vld [vmem:[%s16298_s1 + $0xfa0] ss:$8 sps:$4 sm:$0xff]  }
 0x3b4   :  { %8778 = vmatpush1.bf16.msra.mxu0 %v11939_v39  ;;  %8005 = vmatprep.subr.bf16.mxu1 %v11944_v44  ;;  %v12023_v39 = vld [vmem:[%s16298_s1 + $0x21a0] ss:$8 sps:$4 sm:$0xff]   ;;  %v12028_v44 = vld [vmem:[%s16298_s1 + $0xfb4] ss:$8 sps:$4 sm:$0xff]  }
 0x3b5   :  { %8779 = vmatprep.subr.bf16.mxu0 %v11947_v34  ;;  %v12031_v34 = vld [vmem:[%s16298_s1 + $0x21b4] ss:$8 sps:$4 sm:$0xff]  }
 0x3b7   :  { %8006 = vmatpush1.bf16.msra.mxu1 %v11942_v48  ;;  %v12026_v48 = vld [vmem:[%s16298_s1 + $0xfb0] ss:$8 sps:$4 sm:$0xff]  }
 0x3b8   :  { %8780 = vmatpush1.bf16.msra.mxu0 %v11945_v49  ;;  %8007 = vmatprep.subr.bf16.mxu1 %v11950_v58  ;;  %v12029_v49 = vld [vmem:[%s16298_s1 + $0x21b0] ss:$8 sps:$4 sm:$0xff]   ;;  %v12034_v58 = vld [vmem:[%s16298_s1 + $0xfc4] ss:$8 sps:$4 sm:$0xff]  }
 0x3b9   :  { %8781 = vmatprep.subr.bf16.mxu0 %v11953_v59  ;;  %v12037_v59 = vld [vmem:[%s16298_s1 + $0x21c4] ss:$8 sps:$4 sm:$0xff]  }
 0x3bb   :  { %8008 = vmatpush1.bf16.msra.mxu1 %v11948_v35  ;;  %v12032_v35 = vld [vmem:[%s16298_s1 + $0xfc0] ss:$8 sps:$4 sm:$0xff]  }
 0x3bc   :  { %8782 = vmatpush1.bf16.msra.mxu0 %v11951_v45  ;;  %8009 = vmatprep.subr.bf16.mxu1 %v11956_v52  ;;  %v12035_v45 = vld [vmem:[%s16298_s1 + $0x21c0] ss:$8 sps:$4 sm:$0xff]   ;;  %v12040_v52 = vld [vmem:[%s16298_s1 + $0xfd4] ss:$8 sps:$4 sm:$0xff]  }
 0x3bd   :  { %8783 = vmatprep.subr.bf16.mxu0 %v11959_v42  ;;  %v12043_v42 = vld [vmem:[%s16298_s1 + $0x21d4] ss:$8 sps:$4 sm:$0xff]  }
 0x3bf   :  { %8010 = vmatpush1.bf16.msra.mxu1 %v11954_v56  ;;  %v12038_v56 = vld [vmem:[%s16298_s1 + $0xfd0] ss:$8 sps:$4 sm:$0xff]  }
 0x3c0   :  { %8784 = vmatpush1.bf16.msra.mxu0 %v11957_v57  ;;  %8022 = vmatprep.subr.bf16.mxu1 %v11962_v2  ;;  %v12041_v57 = vld [vmem:[%s16298_s1 + $0x21d0] ss:$8 sps:$4 sm:$0xff]   ;;  %v12046_v2 = vld [vmem:[%s16298_s1 + $0xfe4] ss:$8 sps:$4 sm:$0xff]  }
 0x3c1   :  { %8796 = vmatprep.subr.bf16.mxu0 %v11965_v3  ;;  %v12049_v3 = vld [vmem:[%s16298_s1 + $0x21e4] ss:$8 sps:$4 sm:$0xff]  }
 0x3c2   :  { %8012 = vmatmul.mubr.bf16.vlgmr.msra.gmra.mrb[0].mxu1 %v9141_v43  ;;  %v12044_v43 = vld [vmem:[%s16298_s1 + $0xfe0] ss:$8 sps:$4 sm:$0xff]  }
 0x3c3   :  { %8786 = vmatmul.mubr.bf16.vlgmr.msra.gmra.mrb[0].mxu0 %v9177_v53  ;;  %8023 = vmatpush1.bf16.msra.mxu1 %v11960_v60  ;;  %v12047_v53 = vld [vmem:[%s16298_s1 + $0x21e0] ss:$8 sps:$4 sm:$0xff]   ;;  %v12052_v60 = vld [vmem:[%s16298_s1 + $0xff4] ss:$8 sps:$4 sm:$0xff]  }
 0x3c4   :  { %8797 = vmatpush1.bf16.msra.mxu0 %v11963_v46  ;;  %8024 = vmatprep.subr.bf16.mxu1 %v11968_v0  ;;  %v12055_v46 = vld [vmem:[%s16298_s1 + $0x21f4] ss:$8 sps:$4 sm:$0xff]   ;;  %v12050_v0 = vld [vmem:[%s16298_s1 + $0xff0] ss:$8 sps:$4 sm:$0xff]  }
 0x3c5   :  { %8798 = vmatprep.subr.bf16.mxu0 %v11971_v1  ;;  %8054 = vmatprep.mubr.bf16.mxu1 %v9144_v10  ;;  %v12053_v1 = vld [vmem:[%s16298_s1 + $0x21f0] ss:$8 sps:$4 sm:$0xff]   ;;  %v12058_v10 = vld [vmem:[%s16298_s1 + $0x1004] ss:$8 sps:$4 sm:$0xff]  }
 0x3c6   :  { %8828 = vmatprep.mubr.bf16.mxu0 %v9180_v11  ;;  %v12061_v11 = vld [vmem:[%s16298_s1 + $0x2204] ss:$8 sps:$4 sm:$0xff]  }
 0x3c7   :  { %8025 = vmatpush1.bf16.msra.mxu1 %v11966_v12  ;;  %v15803_v12 = vld [vmem:[%s16299_s0 + $0x80] sm:$0xff] }
 0x3c8   :  { %8799 = vmatpush1.bf16.msra.mxu0 %v11969_v47  ;;  %8026 = vmatprep.subr.bf16.mxu1 %v11974_v61  ;;  %v9143_v47 = vcombine.low %v15583_v4, %v15592_v54  ;;  %v9179_v61 = vcombine.low %v15597_v8, %v15602_v9  ;;  %v12056_v4 = vld [vmem:[%s16298_s1 + $0x1000] ss:$8 sps:$4 sm:$0xff]   ;;  %v12064_v8 = vld [vmem:[%s16298_s1 + $0x1014] ss:$8 sps:$4 sm:$0xff]  }
 0x3c9   :  { %8800 = vmatprep.subr.bf16.mxu0 %v11977_v62  ;;  %v15812_v62 = vld [vmem:[%s16299_s0 + $0x1a0] sm:$0xff]  ;;  %v12067_v9 = vld [vmem:[%s16298_s1 + $0x2214] ss:$8 sps:$4 sm:$0xff]  }
 0x3ca   :  { %v12059_v54 = vld [vmem:[%s16298_s1 + $0x2200] ss:$8 sps:$4 sm:$0xff]  }
 0x3cb   :  { %8027 = vmatpush1.bf16.msra.mxu1 %v11972_v16  ;;  %v15817_v16 = vld [vmem:[%s16299_s0 + $0x110] sm:$0xff] }
 0x3cc   :  { %8801 = vmatpush1.bf16.msra.mxu0 %v11975_v17  ;;  %8028 = vmatprep.subr.bf16.mxu1 %v11980_v18  ;;  %v15822_v17 = vld [vmem:[%s16299_s0 + $0x230] sm:$0xff]  ;;  %v9146_v18 = vcombine.high %v15803_v12, %v15812_v62 }
 0x3cd   :  { %8802 = vmatprep.subr.bf16.mxu0 %v11983_v19  ;;  %v9182_v19 = vcombine.high %v15817_v16, %v15822_v17 }
 0x3cf   :  { %8029 = vmatpush1.bf16.msra.mxu1 %v11978_v20  ;;  %v12062_v20 = vld [vmem:[%s16298_s1 + $0x1010] ss:$8 sps:$4 sm:$0xff]  }
 0x3d0   :  { %8803 = vmatpush1.bf16.msra.mxu0 %v11981_v55  ;;  %8030 = vmatprep.subr.bf16.mxu1 %v11986_v5  ;;  %v12065_v55 = vld [vmem:[%s16298_s1 + $0x2210] ss:$8 sps:$4 sm:$0xff]   ;;  %v12070_v5 = vld [vmem:[%s16298_s1 + $0x1024] ss:$8 sps:$4 sm:$0xff]  }
 0x3d1   :  { %8804 = vmatprep.subr.bf16.mxu0 %v11989_v6  ;;  %v12073_v6 = vld [vmem:[%s16298_s1 + $0x2224] ss:$8 sps:$4 sm:$0xff]  }
 0x3d3   :  { %8031 = vmatpush1.bf16.msra.mxu1 %v11984_v26  ;;  %v12068_v26 = vld [vmem:[%s16298_s1 + $0x1020] ss:$8 sps:$4 sm:$0xff]  }
 0x3d4   :  { %8805 = vmatpush1.bf16.msra.mxu0 %v11987_v27  ;;  %8032 = vmatprep.subr.bf16.mxu1 %v11992_v32  ;;  %v12071_v27 = vld [vmem:[%s16298_s1 + $0x2220] ss:$8 sps:$4 sm:$0xff]   ;;  %v12076_v32 = vld [vmem:[%s16298_s1 + $0x1034] ss:$8 sps:$4 sm:$0xff]  }
 0x3d5   :  { %8806 = vmatprep.subr.bf16.mxu0 %v11995_v33  ;;  %v12079_v33 = vld [vmem:[%s16298_s1 + $0x2234] ss:$8 sps:$4 sm:$0xff]  }
 0x3d7   :  { %8033 = vmatpush1.bf16.msra.mxu1 %v11990_v36  ;;  %v12074_v36 = vld [vmem:[%s16298_s1 + $0x1030] ss:$8 sps:$4 sm:$0xff]  }
 0x3d8   :  { %8807 = vmatpush1.bf16.msra.mxu0 %v11993_v63  ;;  %8034 = vmatprep.subr.bf16.mxu1 %v11998_v13  ;;  %v12077_v63 = vld [vmem:[%s16298_s1 + $0x2230] ss:$8 sps:$4 sm:$0xff]   ;;  %v12082_v13 = vld [vmem:[%s16298_s1 + $0x1044] ss:$8 sps:$4 sm:$0xff]  }
 0x3d9   :  { %8808 = vmatprep.subr.bf16.mxu0 %v12001_v14  ;;  %v12085_v14 = vld [vmem:[%s16298_s1 + $0x2244] ss:$8 sps:$4 sm:$0xff]  }
 0x3db   :  { %8035 = vmatpush1.bf16.msra.mxu1 %v11996_v24  ;;  %v12080_v24 = vld [vmem:[%s16298_s1 + $0x1040] ss:$8 sps:$4 sm:$0xff]  }
 0x3dc   :  { %8809 = vmatpush1.bf16.msra.mxu0 %v11999_v25  ;;  %8036 = vmatprep.subr.bf16.mxu1 %v12004_v7  ;;  %v12083_v25 = vld [vmem:[%s16298_s1 + $0x2240] ss:$8 sps:$4 sm:$0xff]   ;;  %v12088_v7 = vld [vmem:[%s16298_s1 + $0x1054] ss:$8 sps:$4 sm:$0xff]  }
 0x3dd   :  { %8810 = vmatprep.subr.bf16.mxu0 %v12007_v21  ;;  %v12091_v21 = vld [vmem:[%s16298_s1 + $0x2254] ss:$8 sps:$4 sm:$0xff]  }
 0x3df   :  { %8037 = vmatpush1.bf16.msra.mxu1 %v12002_v22  ;;  %v12086_v22 = vld [vmem:[%s16298_s1 + $0x1050] ss:$8 sps:$4 sm:$0xff]  }
 0x3e0   :  { %8811 = vmatpush1.bf16.msra.mxu0 %v12005_v23  ;;  %8038 = vmatprep.subr.bf16.mxu1 %v12010_v40  ;;  %v12089_v23 = vld [vmem:[%s16298_s1 + $0x2250] ss:$8 sps:$4 sm:$0xff]   ;;  %v12094_v40 = vld [vmem:[%s16298_s1 + $0x1064] ss:$8 sps:$4 sm:$0xff]  }
 0x3e1   :  { %8812 = vmatprep.subr.bf16.mxu0 %v12013_v41  ;;  %v12097_v41 = vld [vmem:[%s16298_s1 + $0x2264] ss:$8 sps:$4 sm:$0xff]  }
 0x3e3   :  { %8039 = vmatpush1.bf16.msra.mxu1 %v12008_v28  ;;  %v12092_v28 = vld [vmem:[%s16298_s1 + $0x1060] ss:$8 sps:$4 sm:$0xff]  }
 0x3e4   :  { %8813 = vmatpush1.bf16.msra.mxu0 %v12011_v31  ;;  %8040 = vmatprep.subr.bf16.mxu1 %v12016_v15  ;;  %v12095_v31 = vld [vmem:[%s16298_s1 + $0x2260] ss:$8 sps:$4 sm:$0xff]   ;;  %v12100_v15 = vld [vmem:[%s16298_s1 + $0x1074] ss:$8 sps:$4 sm:$0xff]  }
 0x3e5   :  { %8814 = vmatprep.subr.bf16.mxu0 %v12019_v29  ;;  %v12103_v29 = vld [vmem:[%s16298_s1 + $0x2274] ss:$8 sps:$4 sm:$0xff]  }
 0x3e7   :  { %8041 = vmatpush1.bf16.msra.mxu1 %v12014_v30  ;;  %v12098_v30 = vld [vmem:[%s16298_s1 + $0x1070] ss:$8 sps:$4 sm:$0xff]  }
 0x3e8   :  { %8815 = vmatpush1.bf16.msra.mxu0 %v12017_v37  ;;  %8042 = vmatprep.subr.bf16.mxu1 %v12022_v50  ;;  %v12101_v37 = vld [vmem:[%s16298_s1 + $0x2270] ss:$8 sps:$4 sm:$0xff]   ;;  %v12106_v50 = vld [vmem:[%s16298_s1 + $0x1084] ss:$8 sps:$4 sm:$0xff]  }
 0x3e9   :  { %8816 = vmatprep.subr.bf16.mxu0 %v12025_v51  ;;  %v12109_v51 = vld [vmem:[%s16298_s1 + $0x2284] ss:$8 sps:$4 sm:$0xff]  }
 0x3eb   :  { %8043 = vmatpush1.bf16.msra.mxu1 %v12020_v38  ;;  %v12104_v38 = vld [vmem:[%s16298_s1 + $0x1080] ss:$8 sps:$4 sm:$0xff]  }
 0x3ec   :  { %8817 = vmatpush1.bf16.msra.mxu0 %v12023_v39  ;;  %8044 = vmatprep.subr.bf16.mxu1 %v12028_v44  ;;  %v12107_v39 = vld [vmem:[%s16298_s1 + $0x2280] ss:$8 sps:$4 sm:$0xff]   ;;  %v12112_v44 = vld [vmem:[%s16298_s1 + $0x1094] ss:$8 sps:$4 sm:$0xff]  }
 0x3ed   :  { %8818 = vmatprep.subr.bf16.mxu0 %v12031_v34  ;;  %v12115_v34 = vld [vmem:[%s16298_s1 + $0x2294] ss:$8 sps:$4 sm:$0xff]  }
 0x3ef   :  { %8045 = vmatpush1.bf16.msra.mxu1 %v12026_v48  ;;  %v12110_v48 = vld [vmem:[%s16298_s1 + $0x1090] ss:$8 sps:$4 sm:$0xff]  }
 0x3f0   :  { %8819 = vmatpush1.bf16.msra.mxu0 %v12029_v49  ;;  %8046 = vmatprep.subr.bf16.mxu1 %v12034_v58  ;;  %v12113_v49 = vld [vmem:[%s16298_s1 + $0x2290] ss:$8 sps:$4 sm:$0xff]   ;;  %v12118_v58 = vld [vmem:[%s16298_s1 + $0x10a4] ss:$8 sps:$4 sm:$0xff]  }
 0x3f1   :  { %8820 = vmatprep.subr.bf16.mxu0 %v12037_v59  ;;  %v12121_v59 = vld [vmem:[%s16298_s1 + $0x22a4] ss:$8 sps:$4 sm:$0xff]  }
 0x3f3   :  { %8047 = vmatpush1.bf16.msra.mxu1 %v12032_v35  ;;  %v12116_v35 = vld [vmem:[%s16298_s1 + $0x10a0] ss:$8 sps:$4 sm:$0xff]  }
 0x3f4   :  { %8821 = vmatpush1.bf16.msra.mxu0 %v12035_v45  ;;  %8048 = vmatprep.subr.bf16.mxu1 %v12040_v52  ;;  %v12119_v45 = vld [vmem:[%s16298_s1 + $0x22a0] ss:$8 sps:$4 sm:$0xff]   ;;  %v12124_v52 = vld [vmem:[%s16298_s1 + $0x10b4] ss:$8 sps:$4 sm:$0xff]  }
 0x3f5   :  { %8822 = vmatprep.subr.bf16.mxu0 %v12043_v42  ;;  %v12127_v42 = vld [vmem:[%s16298_s1 + $0x22b4] ss:$8 sps:$4 sm:$0xff]  }
 0x3f7   :  { %8049 = vmatpush1.bf16.msra.mxu1 %v12038_v56  ;;  %v12122_v56 = vld [vmem:[%s16298_s1 + $0x10b0] ss:$8 sps:$4 sm:$0xff]  }
 0x3f8   :  { %8823 = vmatpush1.bf16.msra.mxu0 %v12041_v57  ;;  %8050 = vmatprep.subr.bf16.mxu1 %v12046_v2  ;;  %v12125_v57 = vld [vmem:[%s16298_s1 + $0x22b0] ss:$8 sps:$4 sm:$0xff]   ;;  %v12130_v2 = vld [vmem:[%s16298_s1 + $0x10c4] ss:$8 sps:$4 sm:$0xff]  }
 0x3f9   :  { %8824 = vmatprep.subr.bf16.mxu0 %v12049_v3  ;;  %v12133_v3 = vld [vmem:[%s16298_s1 + $0x22c4] ss:$8 sps:$4 sm:$0xff]  }
 0x3fb   :  { %8051 = vmatpush1.bf16.msra.mxu1 %v12044_v43  ;;  %v12128_v43 = vld [vmem:[%s16298_s1 + $0x10c0] ss:$8 sps:$4 sm:$0xff]  }
 0x3fc   :  { %8825 = vmatpush1.bf16.msra.mxu0 %v12047_v53  ;;  %8052 = vmatprep.subr.bf16.mxu1 %v12052_v60  ;;  %v12131_v53 = vld [vmem:[%s16298_s1 + $0x22c0] ss:$8 sps:$4 sm:$0xff]   ;;  %v12136_v60 = vld [vmem:[%s16298_s1 + $0x10d4] ss:$8 sps:$4 sm:$0xff]  }
 0x3fd   :  { %8826 = vmatprep.subr.bf16.mxu0 %v12055_v46  ;;  %v12139_v46 = vld [vmem:[%s16298_s1 + $0x22d4] ss:$8 sps:$4 sm:$0xff]  }
 0x3ff   :  { %8053 = vmatpush1.bf16.msra.mxu1 %v12050_v0  ;;  %v12134_v0 = vld [vmem:[%s16298_s1 + $0x10d0] ss:$8 sps:$4 sm:$0xff]  }
 0x400   :  { %8827 = vmatpush1.bf16.msra.mxu0 %v12053_v1  ;;  %8065 = vmatprep.subr.bf16.mxu1 %v12058_v10  ;;  %v12137_v1 = vld [vmem:[%s16298_s1 + $0x22d0] ss:$8 sps:$4 sm:$0xff]   ;;  %v12142_v10 = vld [vmem:[%s16298_s1 + $0x10e4] ss:$8 sps:$4 sm:$0xff]  }
 0x401   :  { %8839 = vmatprep.subr.bf16.mxu0 %v12061_v11  ;;  %v12145_v11 = vld [vmem:[%s16298_s1 + $0x22e4] ss:$8 sps:$4 sm:$0xff]  }
 0x402   :  { %8055 = vmatmul.mubr.bf16.vlgmr.msra.gmra.mrb[0].mxu1 %v9143_v47  ;;  %v12140_v47 = vld [vmem:[%s16298_s1 + $0x10e0] ss:$8 sps:$4 sm:$0xff]  }
 0x403   :  { %8829 = vmatmul.mubr.bf16.vlgmr.msra.gmra.mrb[0].mxu0 %v9179_v61  ;;  %8066 = vmatpush1.bf16.msra.mxu1 %v12056_v4  ;;  %v12143_v61 = vld [vmem:[%s16298_s1 + $0x22e0] ss:$8 sps:$4 sm:$0xff]   ;;  %v12148_v4 = vld [vmem:[%s16298_s1 + $0x10f4] ss:$8 sps:$4 sm:$0xff]  }
 0x404   :  { %8840 = vmatpush1.bf16.msra.mxu0 %v12059_v54  ;;  %8067 = vmatprep.subr.bf16.mxu1 %v12064_v8  ;;  %v12151_v54 = vld [vmem:[%s16298_s1 + $0x22f4] ss:$8 sps:$4 sm:$0xff]   ;;  %v12146_v8 = vld [vmem:[%s16298_s1 + $0x10f0] ss:$8 sps:$4 sm:$0xff]  }
 0x405   :  { %8841 = vmatprep.subr.bf16.mxu0 %v12067_v9  ;;  %8097 = vmatprep.mubr.bf16.mxu1 %v9146_v18  ;;  %v12149_v9 = vld [vmem:[%s16298_s1 + $0x22f0] ss:$8 sps:$4 sm:$0xff]   ;;  %v12154_v18 = vld [vmem:[%s16298_s1 + $0x1104] ss:$8 sps:$4 sm:$0xff]  }
 0x406   :  { %8871 = vmatprep.mubr.bf16.mxu0 %v9182_v19  ;;  %v12157_v19 = vld [vmem:[%s16298_s1 + $0x2304] ss:$8 sps:$4 sm:$0xff]  }
 0x407   :  { %8068 = vmatpush1.bf16.msra.mxu1 %v12062_v20  ;;  %v16023_v20 = vld [vmem:[%s16299_s0 + $0x88] sm:$0xff] }
 0x408   :  { %8842 = vmatpush1.bf16.msra.mxu0 %v12065_v55  ;;  %8069 = vmatprep.subr.bf16.mxu1 %v12070_v5  ;;  %v9145_v55 = vcombine.low %v15803_v12, %v15812_v62  ;;  %v9181_v5 = vcombine.low %v15817_v16, %v15822_v17  ;;  %v12152_v12 = vld [vmem:[%s16298_s1 + $0x1100] ss:$8 sps:$4 sm:$0xff]   ;;  %v12160_v16 = vld [vmem:[%s16298_s1 + $0x1114] ss:$8 sps:$4 sm:$0xff]  }
 0x409   :  { %8843 = vmatprep.subr.bf16.mxu0 %v12073_v6  ;;  %v16032_v6 = vld [vmem:[%s16299_s0 + $0x1a8] sm:$0xff]  ;;  %v12163_v17 = vld [vmem:[%s16298_s1 + $0x2314] ss:$8 sps:$4 sm:$0xff]  }
 0x40a   :  { %v12155_v62 = vld [vmem:[%s16298_s1 + $0x2300] ss:$8 sps:$4 sm:$0xff]  }
 0x40b   :  { %8070 = vmatpush1.bf16.msra.mxu1 %v12068_v26  ;;  %v16037_v26 = vld [vmem:[%s16299_s0 + $0x118] sm:$0xff] }
 0x40c   :  { %8844 = vmatpush1.bf16.msra.mxu0 %v12071_v27  ;;  %8071 = vmatprep.subr.bf16.mxu1 %v12076_v32  ;;  %v16042_v27 = vld [vmem:[%s16299_s0 + $0x238] sm:$0xff]  ;;  %v9148_v32 = vcombine.high %v16023_v20, %v16032_v6 }
 0x40d   :  { %8845 = vmatprep.subr.bf16.mxu0 %v12079_v33  ;;  %v9184_v33 = vcombine.high %v16037_v26, %v16042_v27 }
 0x40f   :  { %8072 = vmatpush1.bf16.msra.mxu1 %v12074_v36  ;;  %v12158_v36 = vld [vmem:[%s16298_s1 + $0x1110] ss:$8 sps:$4 sm:$0xff]  }
 0x410   :  { %8846 = vmatpush1.bf16.msra.mxu0 %v12077_v63  ;;  %8073 = vmatprep.subr.bf16.mxu1 %v12082_v13  ;;  %v12161_v63 = vld [vmem:[%s16298_s1 + $0x2310] ss:$8 sps:$4 sm:$0xff]   ;;  %v12166_v13 = vld [vmem:[%s16298_s1 + $0x1124] ss:$8 sps:$4 sm:$0xff]  }
 0x411   :  { %8847 = vmatprep.subr.bf16.mxu0 %v12085_v14  ;;  %v12169_v14 = vld [vmem:[%s16298_s1 + $0x2324] ss:$8 sps:$4 sm:$0xff]  }
 0x413   :  { %8074 = vmatpush1.bf16.msra.mxu1 %v12080_v24  ;;  %v12164_v24 = vld [vmem:[%s16298_s1 + $0x1120] ss:$8 sps:$4 sm:$0xff]  }
 0x414   :  { %8848 = vmatpush1.bf16.msra.mxu0 %v12083_v25  ;;  %8075 = vmatprep.subr.bf16.mxu1 %v12088_v7  ;;  %v12167_v25 = vld [vmem:[%s16298_s1 + $0x2320] ss:$8 sps:$4 sm:$0xff]   ;;  %v12172_v7 = vld [vmem:[%s16298_s1 + $0x1134] ss:$8 sps:$4 sm:$0xff]  }
 0x415   :  { %8849 = vmatprep.subr.bf16.mxu0 %v12091_v21  ;;  %v12175_v21 = vld [vmem:[%s16298_s1 + $0x2334] ss:$8 sps:$4 sm:$0xff]  }
 0x417   :  { %8076 = vmatpush1.bf16.msra.mxu1 %v12086_v22  ;;  %v12170_v22 = vld [vmem:[%s16298_s1 + $0x1130] ss:$8 sps:$4 sm:$0xff]  }
 0x418   :  { %8850 = vmatpush1.bf16.msra.mxu0 %v12089_v23  ;;  %8077 = vmatprep.subr.bf16.mxu1 %v12094_v40  ;;  %v12173_v23 = vld [vmem:[%s16298_s1 + $0x2330] ss:$8 sps:$4 sm:$0xff]   ;;  %v12178_v40 = vld [vmem:[%s16298_s1 + $0x1144] ss:$8 sps:$4 sm:$0xff]  }
 0x419   :  { %8851 = vmatprep.subr.bf16.mxu0 %v12097_v41  ;;  %v12181_v41 = vld [vmem:[%s16298_s1 + $0x2344] ss:$8 sps:$4 sm:$0xff]  }
 0x41b   :  { %8078 = vmatpush1.bf16.msra.mxu1 %v12092_v28  ;;  %v12176_v28 = vld [vmem:[%s16298_s1 + $0x1140] ss:$8 sps:$4 sm:$0xff]  }
 0x41c   :  { %8852 = vmatpush1.bf16.msra.mxu0 %v12095_v31  ;;  %8079 = vmatprep.subr.bf16.mxu1 %v12100_v15  ;;  %v12179_v31 = vld [vmem:[%s16298_s1 + $0x2340] ss:$8 sps:$4 sm:$0xff]   ;;  %v12184_v15 = vld [vmem:[%s16298_s1 + $0x1154] ss:$8 sps:$4 sm:$0xff]  }
 0x41d   :  { %8853 = vmatprep.subr.bf16.mxu0 %v12103_v29  ;;  %v12187_v29 = vld [vmem:[%s16298_s1 + $0x2354] ss:$8 sps:$4 sm:$0xff]  }
 0x41f   :  { %8080 = vmatpush1.bf16.msra.mxu1 %v12098_v30  ;;  %v12182_v30 = vld [vmem:[%s16298_s1 + $0x1150] ss:$8 sps:$4 sm:$0xff]  }
 0x420   :  { %8854 = vmatpush1.bf16.msra.mxu0 %v12101_v37  ;;  %8081 = vmatprep.subr.bf16.mxu1 %v12106_v50  ;;  %v12185_v37 = vld [vmem:[%s16298_s1 + $0x2350] ss:$8 sps:$4 sm:$0xff]   ;;  %v12190_v50 = vld [vmem:[%s16298_s1 + $0x1164] ss:$8 sps:$4 sm:$0xff]  }
 0x421   :  { %8855 = vmatprep.subr.bf16.mxu0 %v12109_v51  ;;  %v12193_v51 = vld [vmem:[%s16298_s1 + $0x2364] ss:$8 sps:$4 sm:$0xff]  }
 0x423   :  { %8082 = vmatpush1.bf16.msra.mxu1 %v12104_v38  ;;  %v12188_v38 = vld [vmem:[%s16298_s1 + $0x1160] ss:$8 sps:$4 sm:$0xff]  }
 0x424   :  { %8856 = vmatpush1.bf16.msra.mxu0 %v12107_v39  ;;  %8083 = vmatprep.subr.bf16.mxu1 %v12112_v44  ;;  %v12191_v39 = vld [vmem:[%s16298_s1 + $0x2360] ss:$8 sps:$4 sm:$0xff]   ;;  %v12196_v44 = vld [vmem:[%s16298_s1 + $0x1174] ss:$8 sps:$4 sm:$0xff]  }
 0x425   :  { %8857 = vmatprep.subr.bf16.mxu0 %v12115_v34  ;;  %v12199_v34 = vld [vmem:[%s16298_s1 + $0x2374] ss:$8 sps:$4 sm:$0xff]  }
 0x427   :  { %8084 = vmatpush1.bf16.msra.mxu1 %v12110_v48  ;;  %v12194_v48 = vld [vmem:[%s16298_s1 + $0x1170] ss:$8 sps:$4 sm:$0xff]  }
 0x428   :  { %8858 = vmatpush1.bf16.msra.mxu0 %v12113_v49  ;;  %8085 = vmatprep.subr.bf16.mxu1 %v12118_v58  ;;  %v12197_v49 = vld [vmem:[%s16298_s1 + $0x2370] ss:$8 sps:$4 sm:$0xff]   ;;  %v12202_v58 = vld [vmem:[%s16298_s1 + $0x1184] ss:$8 sps:$4 sm:$0xff]  }
 0x429   :  { %8859 = vmatprep.subr.bf16.mxu0 %v12121_v59  ;;  %v12205_v59 = vld [vmem:[%s16298_s1 + $0x2384] ss:$8 sps:$4 sm:$0xff]  }
 0x42b   :  { %8086 = vmatpush1.bf16.msra.mxu1 %v12116_v35  ;;  %v12200_v35 = vld [vmem:[%s16298_s1 + $0x1180] ss:$8 sps:$4 sm:$0xff]  }
 0x42c   :  { %8860 = vmatpush1.bf16.msra.mxu0 %v12119_v45  ;;  %8087 = vmatprep.subr.bf16.mxu1 %v12124_v52  ;;  %v12203_v45 = vld [vmem:[%s16298_s1 + $0x2380] ss:$8 sps:$4 sm:$0xff]   ;;  %v12208_v52 = vld [vmem:[%s16298_s1 + $0x1194] ss:$8 sps:$4 sm:$0xff]  }
 0x42d   :  { %8861 = vmatprep.subr.bf16.mxu0 %v12127_v42  ;;  %v12211_v42 = vld [vmem:[%s16298_s1 + $0x2394] ss:$8 sps:$4 sm:$0xff]  }
 0x42f   :  { %8088 = vmatpush1.bf16.msra.mxu1 %v12122_v56  ;;  %v12206_v56 = vld [vmem:[%s16298_s1 + $0x1190] ss:$8 sps:$4 sm:$0xff]  }
 0x430   :  { %8862 = vmatpush1.bf16.msra.mxu0 %v12125_v57  ;;  %8089 = vmatprep.subr.bf16.mxu1 %v12130_v2  ;;  %v12209_v57 = vld [vmem:[%s16298_s1 + $0x2390] ss:$8 sps:$4 sm:$0xff]   ;;  %v12214_v2 = vld [vmem:[%s16298_s1 + $0x11a4] ss:$8 sps:$4 sm:$0xff]  }
 0x431   :  { %8863 = vmatprep.subr.bf16.mxu0 %v12133_v3  ;;  %v12217_v3 = vld [vmem:[%s16298_s1 + $0x23a4] ss:$8 sps:$4 sm:$0xff]  }
 0x433   :  { %8090 = vmatpush1.bf16.msra.mxu1 %v12128_v43  ;;  %v12212_v43 = vld [vmem:[%s16298_s1 + $0x11a0] ss:$8 sps:$4 sm:$0xff]  }
 0x434   :  { %8864 = vmatpush1.bf16.msra.mxu0 %v12131_v53  ;;  %8091 = vmatprep.subr.bf16.mxu1 %v12136_v60  ;;  %v12215_v53 = vld [vmem:[%s16298_s1 + $0x23a0] ss:$8 sps:$4 sm:$0xff]   ;;  %v12220_v60 = vld [vmem:[%s16298_s1 + $0x11b4] ss:$8 sps:$4 sm:$0xff]  }
 0x435   :  { %8865 = vmatprep.subr.bf16.mxu0 %v12139_v46  ;;  %v12223_v46 = vld [vmem:[%s16298_s1 + $0x23b4] ss:$8 sps:$4 sm:$0xff]  }
 0x437   :  { %8092 = vmatpush1.bf16.msra.mxu1 %v12134_v0  ;;  %v12218_v0 = vld [vmem:[%s16298_s1 + $0x11b0] ss:$8 sps:$4 sm:$0xff]  }
 0x438   :  { %8866 = vmatpush1.bf16.msra.mxu0 %v12137_v1  ;;  %8093 = vmatprep.subr.bf16.mxu1 %v12142_v10  ;;  %v12221_v1 = vld [vmem:[%s16298_s1 + $0x23b0] ss:$8 sps:$4 sm:$0xff]   ;;  %v12226_v10 = vld [vmem:[%s16298_s1 + $0x11c4] ss:$8 sps:$4 sm:$0xff]  }
 0x439   :  { %8867 = vmatprep.subr.bf16.mxu0 %v12145_v11  ;;  %v12229_v11 = vld [vmem:[%s16298_s1 + $0x23c4] ss:$8 sps:$4 sm:$0xff]  }
 0x43b   :  { %8094 = vmatpush1.bf16.msra.mxu1 %v12140_v47  ;;  %v12224_v47 = vld [vmem:[%s16298_s1 + $0x11c0] ss:$8 sps:$4 sm:$0xff]  }
 0x43c   :  { %8868 = vmatpush1.bf16.msra.mxu0 %v12143_v61  ;;  %8095 = vmatprep.subr.bf16.mxu1 %v12148_v4  ;;  %v12227_v61 = vld [vmem:[%s16298_s1 + $0x23c0] ss:$8 sps:$4 sm:$0xff]   ;;  %v12232_v4 = vld [vmem:[%s16298_s1 + $0x11d4] ss:$8 sps:$4 sm:$0xff]  }
 0x43d   :  { %8869 = vmatprep.subr.bf16.mxu0 %v12151_v54  ;;  %v12235_v54 = vld [vmem:[%s16298_s1 + $0x23d4] ss:$8 sps:$4 sm:$0xff]  }
 0x43f   :  { %8096 = vmatpush1.bf16.msra.mxu1 %v12146_v8  ;;  %v12230_v8 = vld [vmem:[%s16298_s1 + $0x11d0] ss:$8 sps:$4 sm:$0xff]  }
 0x440   :  { %8870 = vmatpush1.bf16.msra.mxu0 %v12149_v9  ;;  %8108 = vmatprep.subr.bf16.mxu1 %v12154_v18  ;;  %v12233_v9 = vld [vmem:[%s16298_s1 + $0x23d0] ss:$8 sps:$4 sm:$0xff]   ;;  %v12238_v18 = vld [vmem:[%s16298_s1 + $0x11e4] ss:$8 sps:$4 sm:$0xff]  }
 0x441   :  { %8882 = vmatprep.subr.bf16.mxu0 %v12157_v19  ;;  %v12241_v19 = vld [vmem:[%s16298_s1 + $0x23e4] ss:$8 sps:$4 sm:$0xff]  }
 0x442   :  { %8098 = vmatmul.mubr.bf16.vlgmr.msra.gmra.mrb[0].mxu1 %v9145_v55  ;;  %v12236_v55 = vld [vmem:[%s16298_s1 + $0x11e0] ss:$8 sps:$4 sm:$0xff]  }
 0x443   :  { %8872 = vmatmul.mubr.bf16.vlgmr.msra.gmra.mrb[0].mxu0 %v9181_v5  ;;  %8109 = vmatpush1.bf16.msra.mxu1 %v12152_v12  ;;  %v12239_v5 = vld [vmem:[%s16298_s1 + $0x23e0] ss:$8 sps:$4 sm:$0xff]   ;;  %v12244_v12 = vld [vmem:[%s16298_s1 + $0x11f4] ss:$8 sps:$4 sm:$0xff]  }
 0x444   :  { %8883 = vmatpush1.bf16.msra.mxu0 %v12155_v62  ;;  %8110 = vmatprep.subr.bf16.mxu1 %v12160_v16  ;;  %v12247_v62 = vld [vmem:[%s16298_s1 + $0x23f4] ss:$8 sps:$4 sm:$0xff]   ;;  %v12242_v16 = vld [vmem:[%s16298_s1 + $0x11f0] ss:$8 sps:$4 sm:$0xff]  }
 0x445   :  { %8884 = vmatprep.subr.bf16.mxu0 %v12163_v17  ;;  %8140 = vmatprep.mubr.bf16.mxu1 %v9148_v32  ;;  %v12245_v17 = vld [vmem:[%s16298_s1 + $0x23f0] ss:$8 sps:$4 sm:$0xff]   ;;  %v12248_v32 = vld [vmem:[%s16300_s3 + $0x40] sm:$0xff]  }
 0x446   :  { %8914 = vmatprep.mubr.bf16.mxu0 %v9184_v33  ;;  %v9147_v33 = vcombine.low %v16023_v20, %v16032_v6  ;;  %v12251_v20 = vld [vmem:[%s16300_s3 + $0x8] sm:$0xff]   ;;  %v12252_v6 = vld [vmem:[%s16300_s3 + $0x50] sm:$0xff]  }
 0x447   :  { %8111 = vmatpush1.bf16.msra.mxu1 %v12158_v36  ;;  %v9183_v36 = vcombine.low %v16037_v26, %v16042_v27  ;;  %v12253_v26 = vld [vmem:[%s16300_s3 + $0x10] sm:$0xff]   ;;  %v12254_v27 = vld [vmem:[%s16300_s3 + $0x58] sm:$0xff]  }
 0x448   :  { %8885 = vmatpush1.bf16.msra.mxu0 %v12161_v63  ;;  %8112 = vmatprep.subr.bf16.mxu1 %v12166_v13  ;;  %v12249_v63 = vld [vmem:[%s16300_s3] sm:$0xff]   ;;  %v12250_v13 = vld [vmem:[%s16300_s3 + $0x48] sm:$0xff]  }
 0x449   :  { %8886 = vmatprep.subr.bf16.mxu0 %v12169_v14  ;;  %v12255_v14 = vld [vmem:[%s16300_s3 + $0x18] sm:$0xff]  }
 0x44b   :  { %8113 = vmatpush1.bf16.msra.mxu1 %v12164_v24  ;;  %v12256_v24 = vld [vmem:[%s16300_s3 + $0x60] sm:$0xff]  }
 0x44c   :  { %8887 = vmatpush1.bf16.msra.mxu0 %v12167_v25  ;;  %8114 = vmatprep.subr.bf16.mxu1 %v12172_v7  ;;  %v12257_v25 = vld [vmem:[%s16300_s3 + $0x20] sm:$0xff]   ;;  %v12258_v7 = vld [vmem:[%s16300_s3 + $0x68] sm:$0xff]  }
 0x44d   :  { %8888 = vmatprep.subr.bf16.mxu0 %v12175_v21  ;;  %v12259_v21 = vld [vmem:[%s16300_s3 + $0x28] sm:$0xff]  }
 0x44f   :  { %8115 = vmatpush1.bf16.msra.mxu1 %v12170_v22  ;;  %v12260_v22 = vld [vmem:[%s16300_s3 + $0x70] sm:$0xff]  }
 0x450   :  { %8889 = vmatpush1.bf16.msra.mxu0 %v12173_v23  ;;  %8116 = vmatprep.subr.bf16.mxu1 %v12178_v40  ;;  %v12261_v23 = vld [vmem:[%s16300_s3 + $0x30] sm:$0xff]   ;;  %v12262_v40 = vld [vmem:[%s16300_s3 + $0x78] sm:$0xff]  }
 0x451   :  { %8890 = vmatprep.subr.bf16.mxu0 %v12181_v41  ;;  %v12263_v41 = vld [vmem:[%s16300_s3 + $0x38] sm:$0xff]  }
 0x453   :  { %8117 = vmatpush1.bf16.msra.mxu1 %v12176_v28  ;;  %v1247_v28 = vlaneseq }
 0x454   :  { %8891 = vmatpush1.bf16.msra.mxu0 %v12179_v31  ;;  %8118 = vmatprep.subr.bf16.mxu1 %v12184_v15 }
 0x455   :  { %8892 = vmatprep.subr.bf16.mxu0 %v12187_v29  ;;  %v1248_v31 = vshrl.u32 %v1247_v28, 7  ;;  %v1245_v29 = vld [vmem:[%s16301_s2] sm:$0x3] }
 0x457   :  { %8119 = vmatpush1.bf16.msra.mxu1 %v12182_v30  ;;  %v1249_v15 = vsub.s32 0, %v1248_v31  ;;  %v1253_v30 = vsub.s32 1, %v1248_v31 }
 0x458   :  { %8893 = vmatpush1.bf16.msra.mxu0 %v12185_v37  ;;  %8120 = vmatprep.subr.bf16.mxu1 %v12190_v50 }
 0x459   :  { %8894 = vmatprep.subr.bf16.mxu0 %v12193_v51  ;;  %v1250_v37 = vrot.slane %v1245_v29, %v1249_v15  ;;  %v1254_v50 = vrot.slane %v1245_v29, %v1253_v30 }
 0x45b   :  { %8121 = vmatpush1.bf16.msra.mxu1 %v12188_v38 }
 0x45c   :  { %8895 = vmatpush1.bf16.msra.mxu0 %v12191_v39  ;;  %8122 = vmatprep.subr.bf16.mxu1 %v12196_v44 }
 0x45d   :  { %8896 = vmatprep.subr.bf16.mxu0 %v12199_v34 }
 0x45f   :  { %8123 = vmatpush1.bf16.msra.mxu1 %v12194_v48 }
 0x460   :  { %8897 = vmatpush1.bf16.msra.mxu0 %v12197_v49  ;;  %8124 = vmatprep.subr.bf16.mxu1 %v12202_v58 }
 0x461   :  { %8898 = vmatprep.subr.bf16.mxu0 %v12205_v59 }
 0x463   :  { %8125 = vmatpush1.bf16.msra.mxu1 %v12200_v35 }
 0x464   :  { %8899 = vmatpush1.bf16.msra.mxu0 %v12203_v45  ;;  %8126 = vmatprep.subr.bf16.mxu1 %v12208_v52 }
 0x465   :  { %8900 = vmatprep.subr.bf16.mxu0 %v12211_v42 }
 0x467   :  { %8127 = vmatpush1.bf16.msra.mxu1 %v12206_v56 }
 0x468   :  { %8901 = vmatpush1.bf16.msra.mxu0 %v12209_v57  ;;  %8128 = vmatprep.subr.bf16.mxu1 %v12214_v2 }
 0x469   :  { %8902 = vmatprep.subr.bf16.mxu0 %v12217_v3 }
 0x46b   :  { %8129 = vmatpush1.bf16.msra.mxu1 %v12212_v43 }
 0x46c   :  { %8903 = vmatpush1.bf16.msra.mxu0 %v12215_v53  ;;  %8130 = vmatprep.subr.bf16.mxu1 %v12220_v60 }
 0x46d   :  { %8904 = vmatprep.subr.bf16.mxu0 %v12223_v46 }
 0x46f   :  { %8131 = vmatpush1.bf16.msra.mxu1 %v12218_v0 }
 0x470   :  { %8905 = vmatpush1.bf16.msra.mxu0 %v12221_v1  ;;  %8132 = vmatprep.subr.bf16.mxu1 %v12226_v10  ;;  %v10337_v10 = vld [vmem:[%s16302_s4] ss:$0 sm:$0xff] }
 0x471   :  { %8906 = vmatprep.subr.bf16.mxu0 %v12229_v11 }
 0x473   :  { %8133 = vmatpush1.bf16.msra.mxu1 %v12224_v47 }
 0x474   :  { %8907 = vmatpush1.bf16.msra.mxu0 %v12227_v61  ;;  %8134 = vmatprep.subr.bf16.mxu1 %v12232_v4 }
 0x475   :  { %8908 = vmatprep.subr.bf16.mxu0 %v12235_v54 }
 0x477   :  { %8135 = vmatpush1.bf16.msra.mxu1 %v12230_v8 }
 0x478   :  { %8909 = vmatpush1.bf16.msra.mxu0 %v12233_v9  ;;  %8136 = vmatprep.subr.bf16.mxu1 %v12238_v18 }
 0x479   :  { %8910 = vmatprep.subr.bf16.mxu0 %v12241_v19 }
 0x47b   :  { %8137 = vmatpush1.bf16.msra.mxu1 %v12236_v55 }
 0x47c   :  { %8911 = vmatpush1.bf16.msra.mxu0 %v12239_v5  ;;  %8138 = vmatprep.subr.bf16.mxu1 %v12244_v12 }
 0x47d   :  { %8912 = vmatprep.subr.bf16.mxu0 %v12247_v62 }
 0x47f   :  { %8139 = vmatpush1.bf16.msra.mxu1 %v12242_v16 }
 0x480   :  { %8913 = vmatpush1.bf16.msra.mxu0 %v12245_v17  ;;  %10354 = vmatprep.subr.bf16.mxu1 %v12248_v32 }
 0x482   :  { %8141 = vmatmul.mubr.bf16.vlgmr.msra.gmra.mrb[0].mxu1 %v9147_v33 }
 0x483   :  { %8915 = vmatmul.mubr.bf16.vlgmr.msra.gmra.mrb[0].mxu0 %v9183_v36  ;;  %10355 = vmatpush3.bf16.msra.mxu1 %v12249_v63 }
 0x484   :  { %10356 = vmatprep.subr.bf16.mxu1 %v12250_v13 }
 0x487   :  { %10357 = vmatpush3.bf16.msra.mxu1 %v12251_v20 }
 0x488   :  { %10358 = vmatprep.subr.bf16.mxu1 %v12252_v6 }
 0x48b   :  { %10359 = vmatpush3.bf16.msra.mxu1 %v12253_v26 }
 0x48c   :  { %10360 = vmatprep.subr.bf16.mxu1 %v12254_v27 }
 0x48f   :  { %10361 = vmatpush3.bf16.msra.mxu1 %v12255_v14 }
 0x490   :  { %10362 = vmatprep.subr.bf16.mxu1 %v12256_v24 }
 0x493   :  { %10363 = vmatpush3.bf16.msra.mxu1 %v12257_v25 }
 0x494   :  { %10364 = vmatprep.subr.bf16.mxu1 %v12258_v7 }
 0x497   :  { %10365 = vmatpush3.bf16.msra.mxu1 %v12259_v21 }
 0x498   :  { %10366 = vmatprep.subr.bf16.mxu1 %v12260_v22 }
 0x49b   :  { %10367 = vmatpush3.bf16.msra.mxu1 %v12261_v23 }
 0x49c   :  { %10368 = vmatprep.subr.bf16.mxu1 %v12262_v40 }
 0x49f   :  { %10369 = vmatpush3.bf16.msra.mxu1 %v12263_v41 }
 0x555   :  { %v8142_v51 = vpop.f32.mrb[0].mxu1 }
 0x556   :  { %v8916_v38 = vpop.f32.mrb[0].mxu0  ;;  %v10376_v39 = vadd.f32 %v8142_v51, %v1250_v37  ;;  %v8144_v44 = vpop.f32.mrb[1].mxu1 }
 0x557   :  { %v8918_v34 = vpop.f32.mrb[1].mxu0  ;;  %v10378_v48 = vadd.f32 %v8144_v44, %v1254_v50  ;;  %v8146_v49 = vpop.f32.mrb[2].mxu1 }
 0x558   :  { %v8920_v58 = vpop.f32.mrb[2].mxu0  ;;  %v10377_v59 = vadd.f32 %v10376_v39, %v8916_v38  ;;  %v10380_v35 = vadd.f32 %v8146_v49, %v1250_v37  ;;  %v8148_v45 = vpop.f32.mrb[3].mxu1 }
 0x559   :  { %v8922_v52 = vpop.f32.mrb[3].mxu0  ;;  %v10379_v42 = vadd.f32 %v10378_v48, %v8918_v34  ;;  %v10382_v56 = vadd.f32 %v8148_v45, %v1254_v50 }
 0x55a   :  { %v10381_v57 = vadd.f32 %v10380_v35, %v8920_v58  ;;  %v8925_v3 = vmax.f32 %v10377_v59, 0.0 }
 0x55b   :  { %v10383_v2 = vadd.f32 %v10382_v56, %v8922_v52  ;;  %v8926_v53 = vmax.f32 %v10379_v42, 0.0 }
 0x55c   :  { %v8927_v43 = vmax.f32 %v10381_v57, 0.0 }
 0x55d   :  { %v8928_v60 = vmax.f32 %v10383_v2, 0.0 }
 0x55e   :  { %v8929_v46 = vpack.c.bf16 %v8927_v43, %v8925_v3 }
 0x55f   :  { %v8930_v0 = vpack.c.bf16 %v8928_v60, %v8926_v53 }
 0x561   :  { %9098 = vmatprep.mubr.bf16.mxu1 %v8930_v0 }
 0x562   :  { %9099 = vmatmul.mubr.bf16.vlgmr.msra.gmra.mrb[4].mxu1 %v8929_v46 }
 0x635   :  { %v10370_v1 = vpop.f32.mrb[4].mxu1 }
 0x636   :  { %v10371_v11 = vpop.f32.mrb[5].mxu1 }
 0x637   :  { %v10372_v47 = vadd.f32 %v10371_v11, %v10370_v1  ;;  %v10373_v61 = vpop.f32.mrb[6].mxu1 }
 0x638   :  { %v10374_v4 = vpop.f32.mrb[7].mxu1 }
 0x639   :  { %v9101_v54 = vadd.f32 %v10372_v47, %v10337_v10  ;;  %v10375_v8 = vadd.f32 %v10374_v4, %v10373_v61 }
 0x63b   :  { %9107 = vst [vmem:[%s16303_s5] sm:$0xff] %v9101_v54  ;;  %v9104_v9 = vadd.f32 %v10375_v8, %v10337_v10 }
 0x63d   :  { %9108 = vst [vmem:[%s16303_s5 + $0x8] sm:$0xff] %v9104_v9 }

</bundles_post_ra>
